<compile_context>
chip_gen: v7x
topology: tpu7x:2x2x1
jax: 0.10.0
libtpu: 0.0.40
codegen_flags: <defaults>
</compile_context>

<pallas_src>
import jax
import jax.numpy as jnp
from jax import lax
from jax.experimental import pallas as pl
from jax.experimental.pallas import tpu as pltpu


# ---------------------------------------------------------------------------
# In-kernel helpers.
# ---------------------------------------------------------------------------

def _zero_border(buf):
    """Zero the 1-pixel spatial border of a padded (H+2, W+2, C) VMEM buffer."""
    Hp, Wp, C = buf.shape
    zrow = jnp.zeros((1, Wp, C), jnp.float32)
    buf[0:1, :, :] = zrow
    buf[Hp - 1:Hp, :, :] = zrow
    zcol = jnp.zeros((Hp, 1, C), jnp.float32)
    buf[:, 0:1, :] = zcol
    buf[:, Wp - 1:Wp, :] = zcol


def _conv3x3_from_padded(src_ref, w_ref, b_ref, H, W, relu):
    """3x3 'same' conv reading 9 shifted windows from a padded VMEM ref.

    Per-tap accumulating MXU matmuls (H*W, Cin) @ (Cin, Cout) with a single
    f32 accumulator; bias pre-added; optional fused ReLU.  Returns (H*W, Cout).
    """
    Cin = src_ref.shape[-1]
    Cout = w_ref.shape[-1]
    acc = jnp.zeros((H * W, Cout), jnp.float32) + b_ref[...]
    for kh in range(3):
        for kw in range(3):
            win = src_ref[kh:kh + H, kw:kw + W, :].reshape(H * W, Cin)
            acc = acc + jnp.dot(win, w_ref[kh, kw],
                                preferred_element_type=jnp.float32)
    if relu:
        acc = jnp.maximum(acc, 0.0)
    return acc


# ---------------------------------------------------------------------------
# Fused forward kernel: one image per grid step.
# ---------------------------------------------------------------------------

def _cnn_inverse_kernel(x_ref, w1, b1, w2, b2, w3, b3, w4, b4, w5, b5,
                        o_ref, p1, p3, p4):
    Hp, Wp = x_ref.shape[1], x_ref.shape[2]
    H, W = Hp - 2, Wp - 2
    Hh, Wh = H // 2, W // 2

    # Borders of the padded activation buffers ARE the conv zero-padding.
    # Interiors are fully overwritten each step, so only borders need zeroing.
    _zero_border(p1)
    _zero_border(p3)
    _zero_border(p4)

    # ---- conv1: 1 -> 32.  Cin == 1, so each tap is a rank-1 update done on
    # the VPU as a broadcast multiply (no 9-lane patch matrix, no K=1 MXU).
    C1 = w1.shape[-1]
    acc = jnp.zeros((H * W, C1), jnp.float32) + b1[...]
    for kh in range(3):
        for kw in range(3):
            win = x_ref[0, kh:kh + H, kw:kw + W, :].reshape(H * W, 1)
            acc = acc + win * w1[kh, kw]                  # (H*W,1) * (1,C1)
    p1[1:H + 1, 1:W + 1, :] = jnp.maximum(acc, 0.0).reshape(H, W, C1)

    # ---- conv2: 32 -> 64 (per-tap MXU) + ReLU.
    a = _conv3x3_from_padded(p1, w2, b2, H, W, relu=True)     # (H*W, 64)
    C2 = a.shape[-1]

    # ---- 2x2 / stride-2 max pool.  Rows: free leading-dim reshape + max.
    # Columns: Wh small pairwise maxima + one concat.
    a = a.reshape(H, W, C2)
    r = jnp.max(a.reshape(Hh, 2, W, C2), axis=1)               # (Hh, W, C2)
    pooled = jnp.concatenate(
        [jnp.maximum(r[:, 2 * j:2 * j + 1, :], r[:, 2 * j + 1:2 * j + 2, :])
         for j in range(Wh)], axis=1)                          # (Hh, Wh, C2)
    p3[1:Hh + 1, 1:Wh + 1, :] = pooled

    # ---- conv3: 64 -> 64 + ReLU (half resolution).
    a = _conv3x3_from_padded(p3, w3, b3, Hh, Wh, relu=True)    # (Hh*Wh, 64)
    C3 = a.shape[-1]
    a = a.reshape(Hh, Wh, C3)

    # ---- nearest-neighbour 2x upsample.  Rows: concat on a leading dim +
    # free reshape.  Columns: duplicate each of the Wh column slices.
    rows2 = jnp.concatenate([a[:, None], a[:, None]], axis=1).reshape(H, Wh, C3)
    cols = []
    for j in range(Wh):
        c = rows2[:, j:j + 1, :]
        cols.append(c)
        cols.append(c)
    up = jnp.concatenate(cols, axis=1)                         # (H, W, C3)
    p4[1:H + 1, 1:W + 1, :] = up

    # ---- conv4: 64 -> 32 + ReLU.  Output reuses p1 (same padded shape,
    # border is still zero from the initial zeroing).
    a = _conv3x3_from_padded(p4, w4, b4, H, W, relu=True)      # (H*W, 32)
    p1[1:H + 1, 1:W + 1, :] = a.reshape(H, W, a.shape[-1])

    # ---- conv5: 32 -> 1, then sigmoid (exp on the EUP, exact divide).
    a = _conv3x3_from_padded(p1, w5, b5, H, W, relu=False)     # (H*W, 1)
    out = 1.0 / (1.0 + jnp.exp(-a))
    o_ref[0] = out.reshape(H, W, 1).astype(o_ref.dtype)


# ---------------------------------------------------------------------------
# Wrapper.
# ---------------------------------------------------------------------------

def cnn_inverse_classifier_forward(x_nchw, p):
    """Fused Pallas forward.  Input/output are NCHW (PyTorch convention)."""
    N, C, H, W = x_nchw.shape
    assert C == 1 and H % 2 == 0 and W % 16 == 0, (N, C, H, W)

    c_enc = p["w1"].shape[-1]          # 32
    c_mid = p["w2"].shape[-1]          # 64
    assert p["w4"].shape[-1] == c_enc and p["w3"].shape[-1] == c_mid

    # C == 1: NCHW -> NHWC is a free reshape.  Pad spatially once in the
    # wrapper so conv1 reads its 9 shifted windows directly from the input.
    x = x_nchw.reshape(N, H, W, 1).astype(jnp.float32)
    xp = jnp.pad(x, ((0, 0), (1, 1), (1, 1), (0, 0)))

    def brow(b):                       # (Cout,) -> (1, Cout)
        return b.reshape(1, -1).astype(jnp.float32)

    weight_args = (
        p["w1"], brow(p["b1"]),
        p["w2"], brow(p["b2"]),
        p["w3"], brow(p["b3"]),
        p["w4"], brow(p["b4"]),
        p["w5"], brow(p["b5"]),
    )

    def full_spec(a):
        # Full-array, grid-invariant block: fetched once, reused every step.
        zero = (0,) * a.ndim
        return pl.BlockSpec(a.shape, lambda n, _z=zero: _z)

    in_specs = ([pl.BlockSpec((1, H + 2, W + 2, 1), lambda n: (n, 0, 0, 0))]
                + [full_spec(a) for a in weight_args])
    out_spec = pl.BlockSpec((1, H, W, 1), lambda n: (n, 0, 0, 0))

    out = pl.pallas_call(
        _cnn_inverse_kernel,
        out_shape=jax.ShapeDtypeStruct((N, H, W, 1), x_nchw.dtype),
        grid_spec=pltpu.PrefetchScalarGridSpec(
            num_scalar_prefetch=0,
            grid=(N,),
            in_specs=in_specs,
            out_specs=out_spec,
            scratch_shapes=[
                pltpu.VMEM((H + 2, W + 2, c_enc), jnp.float32),            # conv1/conv4 out
                pltpu.VMEM((H // 2 + 2, W // 2 + 2, c_mid), jnp.float32),  # pooled
                pltpu.VMEM((H + 2, W + 2, c_mid), jnp.float32),            # upsampled
            ],
        ),
        compiler_params=pltpu.CompilerParams(
            dimension_semantics=("parallel",)),
    )(xp, *weight_args)

    # C == 1: NHWC -> NCHW is again a free reshape.
    return out.reshape(N, 1, H, W)


# ---------------------------------------------------------------------------
# Params + pure-JAX reference + self-test.
# ---------------------------------------------------------------------------

def init_params(key):
    """Deterministic conv params (PyTorch-like uniform(-1/sqrt(fan_in), ...))."""

    def conv_init(k, cin, cout):
        kw_key, kb_key = jax.random.split(k)
        bound = 1.0 / jnp.sqrt(cin * 9.0)
        w = jax.random.uniform(kw_key, (3, 3, cin, cout), jnp.float32, -bound, bound)
        b = jax.random.uniform(kb_key, (cout,), jnp.float32, -bound, bound)
        return w, b

    keys = jax.random.split(key, 5)
    params = {}
    params["w1"], params["b1"] = conv_init(keys[0], 1, 32)     # encoder
    params["w2"], params["b2"] = conv_init(keys[1], 32, 64)
    params["w3"], params["b3"] = conv_init(keys[2], 64, 64)    # middle
    params["w4"], params["b4"] = conv_init(keys[3], 64, 32)    # decoder
    params["w5"], params["b5"] = conv_init(keys[4], 32, 1)
    return params


def reference_forward(x_nchw, p):
    """Pure-JAX reference matching the PyTorch module semantics."""

    def conv(x, w, b):
        return (
            lax.conv_general_dilated(
                x, w, (1, 1), "SAME", dimension_numbers=("NHWC", "HWIO", "NHWC")
            )
            + b
        )

    x = jnp.transpose(x_nchw, (0, 2, 3, 1))
    x = jax.nn.relu(conv(x, p["w1"], p["b1"]))
    x = jax.nn.relu(conv(x, p["w2"], p["b2"]))
    x = lax.reduce_window(x, -jnp.inf, lax.max, (1, 2, 2, 1), (1, 2, 2, 1), "VALID")
    x = jax.nn.relu(conv(x, p["w3"], p["b3"]))
    x = jnp.repeat(jnp.repeat(x, 2, axis=1), 2, axis=2)
    x = jax.nn.relu(conv(x, p["w4"], p["b4"]))
    x = jax.nn.sigmoid(conv(x, p["w5"], p["b5"]))
    return jnp.transpose(x, (0, 3, 1, 2))


if __name__ == "__main__":
    key = jax.random.PRNGKey(0)
    pkey, xkey = jax.random.split(key)
    params = init_params(pkey)

    # PyTorch module expects NCHW with 1 input channel.
    x = jax.random.normal(xkey, (2, 1, 16, 16), jnp.float32)

    out = jax.block_until_ready(cnn_inverse_classifier_forward(x, params))
    ref = jax.block_until_ready(reference_forward(x, params))

    assert out.shape == (2, 1, 16, 16), out.shape
    assert bool(jnp.allclose(out, ref, atol=1e-4, rtol=1e-4)), "mismatch vs reference"

    print("KERNEL_OK")
</pallas_src>

<mosaic_0001>
module attributes {stable_mosaic.version = 11 : i64} {
  func.func @_cnn_inverse_kernel(%arg0: i32, %arg1: memref<1x18x18x1xf32, #tpu.memory_space<vmem>>, %arg2: memref<3x3x1x32xf32, #tpu.memory_space<vmem>>, %arg3: memref<1x32xf32, #tpu.memory_space<vmem>>, %arg4: memref<3x3x32x64xf32, #tpu.memory_space<vmem>>, %arg5: memref<1x64xf32, #tpu.memory_space<vmem>>, %arg6: memref<3x3x64x64xf32, #tpu.memory_space<vmem>>, %arg7: memref<1x64xf32, #tpu.memory_space<vmem>>, %arg8: memref<3x3x64x32xf32, #tpu.memory_space<vmem>>, %arg9: memref<1x32xf32, #tpu.memory_space<vmem>>, %arg10: memref<3x3x32x1xf32, #tpu.memory_space<vmem>>, %arg11: memref<1x1xf32, #tpu.memory_space<vmem>>, %arg12: memref<1x16x16x1xf32, #tpu.memory_space<vmem>>, %arg13: memref<18x18x32xf32, #tpu.memory_space<vmem>>, %arg14: memref<10x10x64xf32, #tpu.memory_space<vmem>>, %arg15: memref<18x18x64xf32, #tpu.memory_space<vmem>>) attributes {dimension_semantics = [#tpu.dimension_semantics<parallel>], iteration_bounds = array<i64: 2>, scalar_prefetch = 0 : i64, scratch_operands = 3 : i64, tpu.core_type = #tpu.core_type<tc>, window_params = [{transform_indices = @transform_0, window_bounds = array<i64: 1, 18, 18, 1>}, {pipeline_mode = #tpu.pipeline_mode<synchronous>, transform_indices = @transform_1, window_bounds = array<i64: 3, 3, 1, 32>}, {pipeline_mode = #tpu.pipeline_mode<synchronous>, transform_indices = @transform_2, window_bounds = array<i64: 1, 32>}, {pipeline_mode = #tpu.pipeline_mode<synchronous>, transform_indices = @transform_3, window_bounds = array<i64: 3, 3, 32, 64>}, {pipeline_mode = #tpu.pipeline_mode<synchronous>, transform_indices = @transform_4, window_bounds = array<i64: 1, 64>}, {pipeline_mode = #tpu.pipeline_mode<synchronous>, transform_indices = @transform_5, window_bounds = array<i64: 3, 3, 64, 64>}, {pipeline_mode = #tpu.pipeline_mode<synchronous>, transform_indices = @transform_6, window_bounds = array<i64: 1, 64>}, {pipeline_mode = #tpu.pipeline_mode<synchronous>, transform_indices = @transform_7, window_bounds = array<i64: 3, 3, 64, 32>}, {pipeline_mode = #tpu.pipeline_mode<synchronous>, transform_indices = @transform_8, window_bounds = array<i64: 1, 32>}, {pipeline_mode = #tpu.pipeline_mode<synchronous>, transform_indices = @transform_9, window_bounds = array<i64: 3, 3, 32, 1>}, {pipeline_mode = #tpu.pipeline_mode<synchronous>, transform_indices = @transform_10, window_bounds = array<i64: 1, 1>}, {transform_indices = @transform_11, window_bounds = array<i64: 1, 16, 16, 1>}]} {
    %cst = arith.constant 0.000000e+00 : f32
    %0 = vector.broadcast %cst : f32 to vector<1x18x32xf32>
    %c0 = arith.constant 0 : index
    %c0_0 = arith.constant 0 : index
    %c0_1 = arith.constant 0 : index
    %1 = vector.load %arg13[%c0, %c0_0, %c0_1] : memref<18x18x32xf32, #tpu.memory_space<vmem>>, vector<1x18x32xf32>
    tpu.vector_store %arg13[%c0, %c0_0, %c0_1], %0 {strides = array<i32>} : memref<18x18x32xf32, #tpu.memory_space<vmem>>, vector<1x18x32xf32>,
    %c17 = arith.constant 17 : index
    %c0_2 = arith.constant 0 : index
    %c0_3 = arith.constant 0 : index
    %2 = vector.load %arg13[%c17, %c0_2, %c0_3] : memref<18x18x32xf32, #tpu.memory_space<vmem>>, vector<1x18x32xf32>
    tpu.vector_store %arg13[%c17, %c0_2, %c0_3], %0 {strides = array<i32>} : memref<18x18x32xf32, #tpu.memory_space<vmem>>, vector<1x18x32xf32>,
    %cst_4 = arith.constant 0.000000e+00 : f32
    %3 = vector.broadcast %cst_4 : f32 to vector<18x1x32xf32>
    %c0_5 = arith.constant 0 : index
    %c0_6 = arith.constant 0 : index
    %c0_7 = arith.constant 0 : index
    %4 = vector.load %arg13[%c0_5, %c0_6, %c0_7] : memref<18x18x32xf32, #tpu.memory_space<vmem>>, vector<18x1x32xf32>
    tpu.vector_store %arg13[%c0_5, %c0_6, %c0_7], %3 {strides = array<i32>} : memref<18x18x32xf32, #tpu.memory_space<vmem>>, vector<18x1x32xf32>,
    %c0_8 = arith.constant 0 : index
    %c17_9 = arith.constant 17 : index
    %c0_10 = arith.constant 0 : index
    %5 = vector.load %arg13[%c0_8, %c17_9, %c0_10] : memref<18x18x32xf32, #tpu.memory_space<vmem>>, vector<18x1x32xf32>
    tpu.vector_store %arg13[%c0_8, %c17_9, %c0_10], %3 {strides = array<i32>} : memref<18x18x32xf32, #tpu.memory_space<vmem>>, vector<18x1x32xf32>,
    %cst_11 = arith.constant 0.000000e+00 : f32
    %6 = vector.broadcast %cst_11 : f32 to vector<1x10x64xf32>
    %c0_12 = arith.constant 0 : index
    %c0_13 = arith.constant 0 : index
    %c0_14 = arith.constant 0 : index
    %7 = vector.load %arg14[%c0_12, %c0_13, %c0_14] : memref<10x10x64xf32, #tpu.memory_space<vmem>>, vector<1x10x64xf32>
    tpu.vector_store %arg14[%c0_12, %c0_13, %c0_14], %6 {strides = array<i32>} : memref<10x10x64xf32, #tpu.memory_space<vmem>>, vector<1x10x64xf32>,
    %c9 = arith.constant 9 : index
    %c0_15 = arith.constant 0 : index
    %c0_16 = arith.constant 0 : index
    %8 = vector.load %arg14[%c9, %c0_15, %c0_16] : memref<10x10x64xf32, #tpu.memory_space<vmem>>, vector<1x10x64xf32>
    tpu.vector_store %arg14[%c9, %c0_15, %c0_16], %6 {strides = array<i32>} : memref<10x10x64xf32, #tpu.memory_space<vmem>>, vector<1x10x64xf32>,
    %cst_17 = arith.constant 0.000000e+00 : f32
    %9 = vector.broadcast %cst_17 : f32 to vector<10x1x64xf32>
    %c0_18 = arith.constant 0 : index
    %c0_19 = arith.constant 0 : index
    %c0_20 = arith.constant 0 : index
    %10 = vector.load %arg14[%c0_18, %c0_19, %c0_20] : memref<10x10x64xf32, #tpu.memory_space<vmem>>, vector<10x1x64xf32>
    tpu.vector_store %arg14[%c0_18, %c0_19, %c0_20], %9 {strides = array<i32>} : memref<10x10x64xf32, #tpu.memory_space<vmem>>, vector<10x1x64xf32>,
    %c0_21 = arith.constant 0 : index
    %c9_22 = arith.constant 9 : index
    %c0_23 = arith.constant 0 : index
    %11 = vector.load %arg14[%c0_21, %c9_22, %c0_23] : memref<10x10x64xf32, #tpu.memory_space<vmem>>, vector<10x1x64xf32>
    tpu.vector_store %arg14[%c0_21, %c9_22, %c0_23], %9 {strides = array<i32>} : memref<10x10x64xf32, #tpu.memory_space<vmem>>, vector<10x1x64xf32>,
    %cst_24 = arith.constant 0.000000e+00 : f32
    %12 = vector.broadcast %cst_24 : f32 to vector<1x18x64xf32>
    %c0_25 = arith.constant 0 : index
    %c0_26 = arith.constant 0 : index
    %c0_27 = arith.constant 0 : index
    %13 = vector.load %arg15[%c0_25, %c0_26, %c0_27] : memref<18x18x64xf32, #tpu.memory_space<vmem>>, vector<1x18x64xf32>
    tpu.vector_store %arg15[%c0_25, %c0_26, %c0_27], %12 {strides = array<i32>} : memref<18x18x64xf32, #tpu.memory_space<vmem>>, vector<1x18x64xf32>,
    %c17_28 = arith.constant 17 : index
    %c0_29 = arith.constant 0 : index
    %c0_30 = arith.constant 0 : index
    %14 = vector.load %arg15[%c17_28, %c0_29, %c0_30] : memref<18x18x64xf32, #tpu.memory_space<vmem>>, vector<1x18x64xf32>
    tpu.vector_store %arg15[%c17_28, %c0_29, %c0_30], %12 {strides = array<i32>} : memref<18x18x64xf32, #tpu.memory_space<vmem>>, vector<1x18x64xf32>,
    %cst_31 = arith.constant 0.000000e+00 : f32
    %15 = vector.broadcast %cst_31 : f32 to vector<18x1x64xf32>
    %c0_32 = arith.constant 0 : index
    %c0_33 = arith.constant 0 : index
    %c0_34 = arith.constant 0 : index
    %16 = vector.load %arg15[%c0_32, %c0_33, %c0_34] : memref<18x18x64xf32, #tpu.memory_space<vmem>>, vector<18x1x64xf32>
    tpu.vector_store %arg15[%c0_32, %c0_33, %c0_34], %15 {strides = array<i32>} : memref<18x18x64xf32, #tpu.memory_space<vmem>>, vector<18x1x64xf32>,
    %c0_35 = arith.constant 0 : index
    %c17_36 = arith.constant 17 : index
    %c0_37 = arith.constant 0 : index
    %17 = vector.load %arg15[%c0_35, %c17_36, %c0_37] : memref<18x18x64xf32, #tpu.memory_space<vmem>>, vector<18x1x64xf32>
    tpu.vector_store %arg15[%c0_35, %c17_36, %c0_37], %15 {strides = array<i32>} : memref<18x18x64xf32, #tpu.memory_space<vmem>>, vector<18x1x64xf32>,
    %cst_38 = arith.constant 0.000000e+00 : f32
    %18 = vector.broadcast %cst_38 : f32 to vector<256x32xf32>
    %c0_39 = arith.constant 0 : index
    %c0_40 = arith.constant 0 : index
    %19 = vector.load %arg3[%c0_39, %c0_40] : memref<1x32xf32, #tpu.memory_space<vmem>>, vector<1x32xf32>
    %20 = vector.broadcast %19 : vector<1x32xf32> to vector<256x32xf32>
    %21 = arith.addf %18, %20 : vector<256x32xf32>
    %c0_41 = arith.constant 0 : index
    %c0_42 = arith.constant 0 : index
    %c0_43 = arith.constant 0 : index
    %c0_44 = arith.constant 0 : index
    %22 = vector.load %arg1[%c0_41, %c0_42, %c0_43, %c0_44] : memref<1x18x18x1xf32, #tpu.memory_space<vmem>>, vector<1x16x16x1xf32>
    %23 = vector.shape_cast %22 : vector<1x16x16x1xf32> to vector<16x16x1xf32>
    %24 = vector.shape_cast %23 : vector<16x16x1xf32> to vector<256x1xf32>
    %c0_45 = arith.constant 0 : index
    %c0_46 = arith.constant 0 : index
    %c0_47 = arith.constant 0 : index
    %c0_48 = arith.constant 0 : index
    %25 = vector.load %arg2[%c0_45, %c0_46, %c0_47, %c0_48] : memref<3x3x1x32xf32, #tpu.memory_space<vmem>>, vector<1x1x1x32xf32>
    %26 = vector.shape_cast %25 : vector<1x1x1x32xf32> to vector<1x32xf32>
    %27 = vector.broadcast %24 : vector<256x1xf32> to vector<256x32xf32>
    %28 = vector.broadcast %26 : vector<1x32xf32> to vector<256x32xf32>
    %29 = arith.mulf %27, %28 : vector<256x32xf32>
    %30 = arith.addf %21, %29 : vector<256x32xf32>
    %c0_49 = arith.constant 0 : index
    %c0_50 = arith.constant 0 : index
    %c1 = arith.constant 1 : index
    %c0_51 = arith.constant 0 : index
    %31 = vector.load %arg1[%c0_49, %c0_50, %c1, %c0_51] : memref<1x18x18x1xf32, #tpu.memory_space<vmem>>, vector<1x16x16x1xf32>
    %32 = vector.shape_cast %31 : vector<1x16x16x1xf32> to vector<16x16x1xf32>
    %33 = vector.shape_cast %32 : vector<16x16x1xf32> to vector<256x1xf32>
    %c0_52 = arith.constant 0 : index
    %c1_53 = arith.constant 1 : index
    %c0_54 = arith.constant 0 : index
    %c0_55 = arith.constant 0 : index
    %34 = vector.load %arg2[%c0_52, %c1_53, %c0_54, %c0_55] : memref<3x3x1x32xf32, #tpu.memory_space<vmem>>, vector<1x1x1x32xf32>
    %35 = vector.shape_cast %34 : vector<1x1x1x32xf32> to vector<1x32xf32>
    %36 = vector.broadcast %33 : vector<256x1xf32> to vector<256x32xf32>
    %37 = vector.broadcast %35 : vector<1x32xf32> to vector<256x32xf32>
    %38 = arith.mulf %36, %37 : vector<256x32xf32>
    %39 = arith.addf %30, %38 : vector<256x32xf32>
    %c0_56 = arith.constant 0 : index
    %c0_57 = arith.constant 0 : index
    %c2 = arith.constant 2 : index
    %c0_58 = arith.constant 0 : index
    %40 = vector.load %arg1[%c0_56, %c0_57, %c2, %c0_58] : memref<1x18x18x1xf32, #tpu.memory_space<vmem>>, vector<1x16x16x1xf32>
    %41 = vector.shape_cast %40 : vector<1x16x16x1xf32> to vector<16x16x1xf32>
    %42 = vector.shape_cast %41 : vector<16x16x1xf32> to vector<256x1xf32>
    %c0_59 = arith.constant 0 : index
    %c2_60 = arith.constant 2 : index
    %c0_61 = arith.constant 0 : index
    %c0_62 = arith.constant 0 : index
    %43 = vector.load %arg2[%c0_59, %c2_60, %c0_61, %c0_62] : memref<3x3x1x32xf32, #tpu.memory_space<vmem>>, vector<1x1x1x32xf32>
    %44 = vector.shape_cast %43 : vector<1x1x1x32xf32> to vector<1x32xf32>
    %45 = vector.broadcast %42 : vector<256x1xf32> to vector<256x32xf32>
    %46 = vector.broadcast %44 : vector<1x32xf32> to vector<256x32xf32>
    %47 = arith.mulf %45, %46 : vector<256x32xf32>
    %48 = arith.addf %39, %47 : vector<256x32xf32>
    %c0_63 = arith.constant 0 : index
    %c1_64 = arith.constant 1 : index
    %c0_65 = arith.constant 0 : index
    %c0_66 = arith.constant 0 : index
    %49 = vector.load %arg1[%c0_63, %c1_64, %c0_65, %c0_66] : memref<1x18x18x1xf32, #tpu.memory_space<vmem>>, vector<1x16x16x1xf32>
    %50 = vector.shape_cast %49 : vector<1x16x16x1xf32> to vector<16x16x1xf32>
    %51 = vector.shape_cast %50 : vector<16x16x1xf32> to vector<256x1xf32>
    %c1_67 = arith.constant 1 : index
    %c0_68 = arith.constant 0 : index
    %c0_69 = arith.constant 0 : index
    %c0_70 = arith.constant 0 : index
    %52 = vector.load %arg2[%c1_67, %c0_68, %c0_69, %c0_70] : memref<3x3x1x32xf32, #tpu.memory_space<vmem>>, vector<1x1x1x32xf32>
    %53 = vector.shape_cast %52 : vector<1x1x1x32xf32> to vector<1x32xf32>
    %54 = vector.broadcast %51 : vector<256x1xf32> to vector<256x32xf32>
    %55 = vector.broadcast %53 : vector<1x32xf32> to vector<256x32xf32>
    %56 = arith.mulf %54, %55 : vector<256x32xf32>
    %57 = arith.addf %48, %56 : vector<256x32xf32>
    %c0_71 = arith.constant 0 : index
    %c1_72 = arith.constant 1 : index
    %c1_73 = arith.constant 1 : index
    %c0_74 = arith.constant 0 : index
    %58 = vector.load %arg1[%c0_71, %c1_72, %c1_73, %c0_74] : memref<1x18x18x1xf32, #tpu.memory_space<vmem>>, vector<1x16x16x1xf32>
    %59 = vector.shape_cast %58 : vector<1x16x16x1xf32> to vector<16x16x1xf32>
    %60 = vector.shape_cast %59 : vector<16x16x1xf32> to vector<256x1xf32>
    %c1_75 = arith.constant 1 : index
    %c1_76 = arith.constant 1 : index
    %c0_77 = arith.constant 0 : index
    %c0_78 = arith.constant 0 : index
    %61 = vector.load %arg2[%c1_75, %c1_76, %c0_77, %c0_78] : memref<3x3x1x32xf32, #tpu.memory_space<vmem>>, vector<1x1x1x32xf32>
    %62 = vector.shape_cast %61 : vector<1x1x1x32xf32> to vector<1x32xf32>
    %63 = vector.broadcast %60 : vector<256x1xf32> to vector<256x32xf32>
    %64 = vector.broadcast %62 : vector<1x32xf32> to vector<256x32xf32>
    %65 = arith.mulf %63, %64 : vector<256x32xf32>
    %66 = arith.addf %57, %65 : vector<256x32xf32>
    %c0_79 = arith.constant 0 : index
    %c1_80 = arith.constant 1 : index
    %c2_81 = arith.constant 2 : index
    %c0_82 = arith.constant 0 : index
    %67 = vector.load %arg1[%c0_79, %c1_80, %c2_81, %c0_82] : memref<1x18x18x1xf32, #tpu.memory_space<vmem>>, vector<1x16x16x1xf32>
    %68 = vector.shape_cast %67 : vector<1x16x16x1xf32> to vector<16x16x1xf32>
    %69 = vector.shape_cast %68 : vector<16x16x1xf32> to vector<256x1xf32>
    %c1_83 = arith.constant 1 : index
    %c2_84 = arith.constant 2 : index
    %c0_85 = arith.constant 0 : index
    %c0_86 = arith.constant 0 : index
    %70 = vector.load %arg2[%c1_83, %c2_84, %c0_85, %c0_86] : memref<3x3x1x32xf32, #tpu.memory_space<vmem>>, vector<1x1x1x32xf32>
    %71 = vector.shape_cast %70 : vector<1x1x1x32xf32> to vector<1x32xf32>
    %72 = vector.broadcast %69 : vector<256x1xf32> to vector<256x32xf32>
    %73 = vector.broadcast %71 : vector<1x32xf32> to vector<256x32xf32>
    %74 = arith.mulf %72, %73 : vector<256x32xf32>
    %75 = arith.addf %66, %74 : vector<256x32xf32>
    %c0_87 = arith.constant 0 : index
    %c2_88 = arith.constant 2 : index
    %c0_89 = arith.constant 0 : index
    %c0_90 = arith.constant 0 : index
    %76 = vector.load %arg1[%c0_87, %c2_88, %c0_89, %c0_90] : memref<1x18x18x1xf32, #tpu.memory_space<vmem>>, vector<1x16x16x1xf32>
    %77 = vector.shape_cast %76 : vector<1x16x16x1xf32> to vector<16x16x1xf32>
    %78 = vector.shape_cast %77 : vector<16x16x1xf32> to vector<256x1xf32>
    %c2_91 = arith.constant 2 : index
    %c0_92 = arith.constant 0 : index
    %c0_93 = arith.constant 0 : index
    %c0_94 = arith.constant 0 : index
    %79 = vector.load %arg2[%c2_91, %c0_92, %c0_93, %c0_94] : memref<3x3x1x32xf32, #tpu.memory_space<vmem>>, vector<1x1x1x32xf32>
    %80 = vector.shape_cast %79 : vector<1x1x1x32xf32> to vector<1x32xf32>
    %81 = vector.broadcast %78 : vector<256x1xf32> to vector<256x32xf32>
    %82 = vector.broadcast %80 : vector<1x32xf32> to vector<256x32xf32>
    %83 = arith.mulf %81, %82 : vector<256x32xf32>
    %84 = arith.addf %75, %83 : vector<256x32xf32>
    %c0_95 = arith.constant 0 : index
    %c2_96 = arith.constant 2 : index
    %c1_97 = arith.constant 1 : index
    %c0_98 = arith.constant 0 : index
    %85 = vector.load %arg1[%c0_95, %c2_96, %c1_97, %c0_98] : memref<1x18x18x1xf32, #tpu.memory_space<vmem>>, vector<1x16x16x1xf32>
    %86 = vector.shape_cast %85 : vector<1x16x16x1xf32> to vector<16x16x1xf32>
    %87 = vector.shape_cast %86 : vector<16x16x1xf32> to vector<256x1xf32>
    %c2_99 = arith.constant 2 : index
    %c1_100 = arith.constant 1 : index
    %c0_101 = arith.constant 0 : index
    %c0_102 = arith.constant 0 : index
    %88 = vector.load %arg2[%c2_99, %c1_100, %c0_101, %c0_102] : memref<3x3x1x32xf32, #tpu.memory_space<vmem>>, vector<1x1x1x32xf32>
    %89 = vector.shape_cast %88 : vector<1x1x1x32xf32> to vector<1x32xf32>
    %90 = vector.broadcast %87 : vector<256x1xf32> to vector<256x32xf32>
    %91 = vector.broadcast %89 : vector<1x32xf32> to vector<256x32xf32>
    %92 = arith.mulf %90, %91 : vector<256x32xf32>
    %93 = arith.addf %84, %92 : vector<256x32xf32>
    %c0_103 = arith.constant 0 : index
    %c2_104 = arith.constant 2 : index
    %c2_105 = arith.constant 2 : index
    %c0_106 = arith.constant 0 : index
    %94 = vector.load %arg1[%c0_103, %c2_104, %c2_105, %c0_106] : memref<1x18x18x1xf32, #tpu.memory_space<vmem>>, vector<1x16x16x1xf32>
    %95 = vector.shape_cast %94 : vector<1x16x16x1xf32> to vector<16x16x1xf32>
    %96 = vector.shape_cast %95 : vector<16x16x1xf32> to vector<256x1xf32>
    %c2_107 = arith.constant 2 : index
    %c2_108 = arith.constant 2 : index
    %c0_109 = arith.constant 0 : index
    %c0_110 = arith.constant 0 : index
    %97 = vector.load %arg2[%c2_107, %c2_108, %c0_109, %c0_110] : memref<3x3x1x32xf32, #tpu.memory_space<vmem>>, vector<1x1x1x32xf32>
    %98 = vector.shape_cast %97 : vector<1x1x1x32xf32> to vector<1x32xf32>
    %99 = vector.broadcast %96 : vector<256x1xf32> to vector<256x32xf32>
    %100 = vector.broadcast %98 : vector<1x32xf32> to vector<256x32xf32>
    %101 = arith.mulf %99, %100 : vector<256x32xf32>
    %102 = arith.addf %93, %101 : vector<256x32xf32>
    %cst_111 = arith.constant 0.000000e+00 : f32
    %103 = vector.broadcast %cst_111 : f32 to vector<256x32xf32>
    %104 = arith.maximumf %102, %103 : vector<256x32xf32>
    %105 = vector.shape_cast %104 : vector<256x32xf32> to vector<16x16x32xf32>
    %c1_112 = arith.constant 1 : index
    %c1_113 = arith.constant 1 : index
    %c0_114 = arith.constant 0 : index
    %106 = vector.load %arg13[%c1_112, %c1_113, %c0_114] : memref<18x18x32xf32, #tpu.memory_space<vmem>>, vector<16x16x32xf32>
    tpu.vector_store %arg13[%c1_112, %c1_113, %c0_114], %105 {strides = array<i32>} : memref<18x18x32xf32, #tpu.memory_space<vmem>>, vector<16x16x32xf32>,
    %cst_115 = arith.constant 0.000000e+00 : f32
    %107 = vector.broadcast %cst_115 : f32 to vector<256x64xf32>
    %c0_116 = arith.constant 0 : index
    %c0_117 = arith.constant 0 : index
    %108 = vector.load %arg5[%c0_116, %c0_117] : memref<1x64xf32, #tpu.memory_space<vmem>>, vector<1x64xf32>
    %109 = vector.broadcast %108 : vector<1x64xf32> to vector<256x64xf32>
    %110 = arith.addf %107, %109 : vector<256x64xf32>
    %c0_118 = arith.constant 0 : index
    %c0_119 = arith.constant 0 : index
    %c0_120 = arith.constant 0 : index
    %111 = vector.load %arg13[%c0_118, %c0_119, %c0_120] : memref<18x18x32xf32, #tpu.memory_space<vmem>>, vector<16x16x32xf32>
    %112 = vector.shape_cast %111 : vector<16x16x32xf32> to vector<256x32xf32>
    %c0_121 = arith.constant 0 : index
    %c0_122 = arith.constant 0 : index
    %c0_123 = arith.constant 0 : index
    %c0_124 = arith.constant 0 : index
    %113 = vector.load %arg4[%c0_121, %c0_122, %c0_123, %c0_124] : memref<3x3x32x64xf32, #tpu.memory_space<vmem>>, vector<1x1x32x64xf32>
    %114 = vector.shape_cast %113 : vector<1x1x32x64xf32> to vector<32x64xf32>
    %cst_125 = arith.constant dense<0.000000e+00> : vector<256x64xf32>
    %115 = tpu.matmul %112, %114, %cst_125 {dimension_numbers = #tpu.dot_dimension_numbers<[1], [0], [0], [1], [0, 0, 1, 1], [], []>} : vector<256x32xf32>, vector<32x64xf32>, vector<256x64xf32> -> vector<256x64xf32>
    %116 = arith.addf %110, %115 : vector<256x64xf32>
    %c0_126 = arith.constant 0 : index
    %c1_127 = arith.constant 1 : index
    %c0_128 = arith.constant 0 : index
    %117 = vector.load %arg13[%c0_126, %c1_127, %c0_128] : memref<18x18x32xf32, #tpu.memory_space<vmem>>, vector<16x16x32xf32>
    %118 = vector.shape_cast %117 : vector<16x16x32xf32> to vector<256x32xf32>
    %c0_129 = arith.constant 0 : index
    %c1_130 = arith.constant 1 : index
    %c0_131 = arith.constant 0 : index
    %c0_132 = arith.constant 0 : index
    %119 = vector.load %arg4[%c0_129, %c1_130, %c0_131, %c0_132] : memref<3x3x32x64xf32, #tpu.memory_space<vmem>>, vector<1x1x32x64xf32>
    %120 = vector.shape_cast %119 : vector<1x1x32x64xf32> to vector<32x64xf32>
    %cst_133 = arith.constant dense<0.000000e+00> : vector<256x64xf32>
    %121 = tpu.matmul %118, %120, %cst_133 {dimension_numbers = #tpu.dot_dimension_numbers<[1], [0], [0], [1], [0, 0, 1, 1], [], []>} : vector<256x32xf32>, vector<32x64xf32>, vector<256x64xf32> -> vector<256x64xf32>
    %122 = arith.addf %116, %121 : vector<256x64xf32>
    %c0_134 = arith.constant 0 : index
    %c2_135 = arith.constant 2 : index
    %c0_136 = arith.constant 0 : index
    %123 = vector.load %arg13[%c0_134, %c2_135, %c0_136] : memref<18x18x32xf32, #tpu.memory_space<vmem>>, vector<16x16x32xf32>
    %124 = vector.shape_cast %123 : vector<16x16x32xf32> to vector<256x32xf32>
    %c0_137 = arith.constant 0 : index
    %c2_138 = arith.constant 2 : index
    %c0_139 = arith.constant 0 : index
    %c0_140 = arith.constant 0 : index
    %125 = vector.load %arg4[%c0_137, %c2_138, %c0_139, %c0_140] : memref<3x3x32x64xf32, #tpu.memory_space<vmem>>, vector<1x1x32x64xf32>
    %126 = vector.shape_cast %125 : vector<1x1x32x64xf32> to vector<32x64xf32>
    %cst_141 = arith.constant dense<0.000000e+00> : vector<256x64xf32>
    %127 = tpu.matmul %124, %126, %cst_141 {dimension_numbers = #tpu.dot_dimension_numbers<[1], [0], [0], [1], [0, 0, 1, 1], [], []>} : vector<256x32xf32>, vector<32x64xf32>, vector<256x64xf32> -> vector<256x64xf32>
    %128 = arith.addf %122, %127 : vector<256x64xf32>
    %c1_142 = arith.constant 1 : index
    %c0_143 = arith.constant 0 : index
    %c0_144 = arith.constant 0 : index
    %129 = vector.load %arg13[%c1_142, %c0_143, %c0_144] : memref<18x18x32xf32, #tpu.memory_space<vmem>>, vector<16x16x32xf32>
    %130 = vector.shape_cast %129 : vector<16x16x32xf32> to vector<256x32xf32>
    %c1_145 = arith.constant 1 : index
    %c0_146 = arith.constant 0 : index
    %c0_147 = arith.constant 0 : index
    %c0_148 = arith.constant 0 : index
    %131 = vector.load %arg4[%c1_145, %c0_146, %c0_147, %c0_148] : memref<3x3x32x64xf32, #tpu.memory_space<vmem>>, vector<1x1x32x64xf32>
    %132 = vector.shape_cast %131 : vector<1x1x32x64xf32> to vector<32x64xf32>
    %cst_149 = arith.constant dense<0.000000e+00> : vector<256x64xf32>
    %133 = tpu.matmul %130, %132, %cst_149 {dimension_numbers = #tpu.dot_dimension_numbers<[1], [0], [0], [1], [0, 0, 1, 1], [], []>} : vector<256x32xf32>, vector<32x64xf32>, vector<256x64xf32> -> vector<256x64xf32>
    %134 = arith.addf %128, %133 : vector<256x64xf32>
    %c1_150 = arith.constant 1 : index
    %c1_151 = arith.constant 1 : index
    %c0_152 = arith.constant 0 : index
    %135 = vector.load %arg13[%c1_150, %c1_151, %c0_152] : memref<18x18x32xf32, #tpu.memory_space<vmem>>, vector<16x16x32xf32>
    %136 = vector.shape_cast %135 : vector<16x16x32xf32> to vector<256x32xf32>
    %c1_153 = arith.constant 1 : index
    %c1_154 = arith.constant 1 : index
    %c0_155 = arith.constant 0 : index
    %c0_156 = arith.constant 0 : index
    %137 = vector.load %arg4[%c1_153, %c1_154, %c0_155, %c0_156] : memref<3x3x32x64xf32, #tpu.memory_space<vmem>>, vector<1x1x32x64xf32>
    %138 = vector.shape_cast %137 : vector<1x1x32x64xf32> to vector<32x64xf32>
    %cst_157 = arith.constant dense<0.000000e+00> : vector<256x64xf32>
    %139 = tpu.matmul %136, %138, %cst_157 {dimension_numbers = #tpu.dot_dimension_numbers<[1], [0], [0], [1], [0, 0, 1, 1], [], []>} : vector<256x32xf32>, vector<32x64xf32>, vector<256x64xf32> -> vector<256x64xf32>
    %140 = arith.addf %134, %139 : vector<256x64xf32>
    %c1_158 = arith.constant 1 : index
    %c2_159 = arith.constant 2 : index
    %c0_160 = arith.constant 0 : index
    %141 = vector.load %arg13[%c1_158, %c2_159, %c0_160] : memref<18x18x32xf32, #tpu.memory_space<vmem>>, vector<16x16x32xf32>
    %142 = vector.shape_cast %141 : vector<16x16x32xf32> to vector<256x32xf32>
    %c1_161 = arith.constant 1 : index
    %c2_162 = arith.constant 2 : index
    %c0_163 = arith.constant 0 : index
    %c0_164 = arith.constant 0 : index
    %143 = vector.load %arg4[%c1_161, %c2_162, %c0_163, %c0_164] : memref<3x3x32x64xf32, #tpu.memory_space<vmem>>, vector<1x1x32x64xf32>
    %144 = vector.shape_cast %143 : vector<1x1x32x64xf32> to vector<32x64xf32>
    %cst_165 = arith.constant dense<0.000000e+00> : vector<256x64xf32>
    %145 = tpu.matmul %142, %144, %cst_165 {dimension_numbers = #tpu.dot_dimension_numbers<[1], [0], [0], [1], [0, 0, 1, 1], [], []>} : vector<256x32xf32>, vector<32x64xf32>, vector<256x64xf32> -> vector<256x64xf32>
    %146 = arith.addf %140, %145 : vector<256x64xf32>
    %c2_166 = arith.constant 2 : index
    %c0_167 = arith.constant 0 : index
    %c0_168 = arith.constant 0 : index
    %147 = vector.load %arg13[%c2_166, %c0_167, %c0_168] : memref<18x18x32xf32, #tpu.memory_space<vmem>>, vector<16x16x32xf32>
    %148 = vector.shape_cast %147 : vector<16x16x32xf32> to vector<256x32xf32>
    %c2_169 = arith.constant 2 : index
    %c0_170 = arith.constant 0 : index
    %c0_171 = arith.constant 0 : index
    %c0_172 = arith.constant 0 : index
    %149 = vector.load %arg4[%c2_169, %c0_170, %c0_171, %c0_172] : memref<3x3x32x64xf32, #tpu.memory_space<vmem>>, vector<1x1x32x64xf32>
    %150 = vector.shape_cast %149 : vector<1x1x32x64xf32> to vector<32x64xf32>
    %cst_173 = arith.constant dense<0.000000e+00> : vector<256x64xf32>
    %151 = tpu.matmul %148, %150, %cst_173 {dimension_numbers = #tpu.dot_dimension_numbers<[1], [0], [0], [1], [0, 0, 1, 1], [], []>} : vector<256x32xf32>, vector<32x64xf32>, vector<256x64xf32> -> vector<256x64xf32>
    %152 = arith.addf %146, %151 : vector<256x64xf32>
    %c2_174 = arith.constant 2 : index
    %c1_175 = arith.constant 1 : index
    %c0_176 = arith.constant 0 : index
    %153 = vector.load %arg13[%c2_174, %c1_175, %c0_176] : memref<18x18x32xf32, #tpu.memory_space<vmem>>, vector<16x16x32xf32>
    %154 = vector.shape_cast %153 : vector<16x16x32xf32> to vector<256x32xf32>
    %c2_177 = arith.constant 2 : index
    %c1_178 = arith.constant 1 : index
    %c0_179 = arith.constant 0 : index
    %c0_180 = arith.constant 0 : index
    %155 = vector.load %arg4[%c2_177, %c1_178, %c0_179, %c0_180] : memref<3x3x32x64xf32, #tpu.memory_space<vmem>>, vector<1x1x32x64xf32>
    %156 = vector.shape_cast %155 : vector<1x1x32x64xf32> to vector<32x64xf32>
    %cst_181 = arith.constant dense<0.000000e+00> : vector<256x64xf32>
    %157 = tpu.matmul %154, %156, %cst_181 {dimension_numbers = #tpu.dot_dimension_numbers<[1], [0], [0], [1], [0, 0, 1, 1], [], []>} : vector<256x32xf32>, vector<32x64xf32>, vector<256x64xf32> -> vector<256x64xf32>
    %158 = arith.addf %152, %157 : vector<256x64xf32>
    %c2_182 = arith.constant 2 : index
    %c2_183 = arith.constant 2 : index
    %c0_184 = arith.constant 0 : index
    %159 = vector.load %arg13[%c2_182, %c2_183, %c0_184] : memref<18x18x32xf32, #tpu.memory_space<vmem>>, vector<16x16x32xf32>
    %160 = vector.shape_cast %159 : vector<16x16x32xf32> to vector<256x32xf32>
    %c2_185 = arith.constant 2 : index
    %c2_186 = arith.constant 2 : index
    %c0_187 = arith.constant 0 : index
    %c0_188 = arith.constant 0 : index
    %161 = vector.load %arg4[%c2_185, %c2_186, %c0_187, %c0_188] : memref<3x3x32x64xf32, #tpu.memory_space<vmem>>, vector<1x1x32x64xf32>
    %162 = vector.shape_cast %161 : vector<1x1x32x64xf32> to vector<32x64xf32>
    %cst_189 = arith.constant dense<0.000000e+00> : vector<256x64xf32>
    %163 = tpu.matmul %160, %162, %cst_189 {dimension_numbers = #tpu.dot_dimension_numbers<[1], [0], [0], [1], [0, 0, 1, 1], [], []>} : vector<256x32xf32>, vector<32x64xf32>, vector<256x64xf32> -> vector<256x64xf32>
    %164 = arith.addf %158, %163 : vector<256x64xf32>
    %cst_190 = arith.constant 0.000000e+00 : f32
    %165 = vector.broadcast %cst_190 : f32 to vector<256x64xf32>
    %166 = arith.maximumf %164, %165 : vector<256x64xf32>
    %167 = vector.shape_cast %166 : vector<256x64xf32> to vector<16x16x64xf32>
    %168 = vector.shape_cast %167 : vector<16x16x64xf32> to vector<8x2x16x64xf32>
    %cst_191 = arith.constant dense<0xFF800000> : vector<8x16x64xf32>
    %169 = vector.multi_reduction <maximumf>, %168, %cst_191 [1] : vector<8x2x16x64xf32> to vector<8x16x64xf32>
    %170 = vector.extract_strided_slice %169 {offsets = [0, 0, 0], sizes = [8, 1, 64], strides = [1, 1, 1]} : vector<8x16x64xf32> to vector<8x1x64xf32>
    %171 = vector.extract_strided_slice %169 {offsets = [0, 1, 0], sizes = [8, 1, 64], strides = [1, 1, 1]} : vector<8x16x64xf32> to vector<8x1x64xf32>
    %172 = arith.maximumf %170, %171 : vector<8x1x64xf32>
    %173 = vector.extract_strided_slice %169 {offsets = [0, 2, 0], sizes = [8, 1, 64], strides = [1, 1, 1]} : vector<8x16x64xf32> to vector<8x1x64xf32>
    %174 = vector.extract_strided_slice %169 {offsets = [0, 3, 0], sizes = [8, 1, 64], strides = [1, 1, 1]} : vector<8x16x64xf32> to vector<8x1x64xf32>
    %175 = arith.maximumf %173, %174 : vector<8x1x64xf32>
    %176 = vector.extract_strided_slice %169 {offsets = [0, 4, 0], sizes = [8, 1, 64], strides = [1, 1, 1]} : vector<8x16x64xf32> to vector<8x1x64xf32>
    %177 = vector.extract_strided_slice %169 {offsets = [0, 5, 0], sizes = [8, 1, 64], strides = [1, 1, 1]} : vector<8x16x64xf32> to vector<8x1x64xf32>
    %178 = arith.maximumf %176, %177 : vector<8x1x64xf32>
    %179 = vector.extract_strided_slice %169 {offsets = [0, 6, 0], sizes = [8, 1, 64], strides = [1, 1, 1]} : vector<8x16x64xf32> to vector<8x1x64xf32>
    %180 = vector.extract_strided_slice %169 {offsets = [0, 7, 0], sizes = [8, 1, 64], strides = [1, 1, 1]} : vector<8x16x64xf32> to vector<8x1x64xf32>
    %181 = arith.maximumf %179, %180 : vector<8x1x64xf32>
    %182 = vector.extract_strided_slice %169 {offsets = [0, 8, 0], sizes = [8, 1, 64], strides = [1, 1, 1]} : vector<8x16x64xf32> to vector<8x1x64xf32>
    %183 = vector.extract_strided_slice %169 {offsets = [0, 9, 0], sizes = [8, 1, 64], strides = [1, 1, 1]} : vector<8x16x64xf32> to vector<8x1x64xf32>
    %184 = arith.maximumf %182, %183 : vector<8x1x64xf32>
    %185 = vector.extract_strided_slice %169 {offsets = [0, 10, 0], sizes = [8, 1, 64], strides = [1, 1, 1]} : vector<8x16x64xf32> to vector<8x1x64xf32>
    %186 = vector.extract_strided_slice %169 {offsets = [0, 11, 0], sizes = [8, 1, 64], strides = [1, 1, 1]} : vector<8x16x64xf32> to vector<8x1x64xf32>
    %187 = arith.maximumf %185, %186 : vector<8x1x64xf32>
    %188 = vector.extract_strided_slice %169 {offsets = [0, 12, 0], sizes = [8, 1, 64], strides = [1, 1, 1]} : vector<8x16x64xf32> to vector<8x1x64xf32>
    %189 = vector.extract_strided_slice %169 {offsets = [0, 13, 0], sizes = [8, 1, 64], strides = [1, 1, 1]} : vector<8x16x64xf32> to vector<8x1x64xf32>
    %190 = arith.maximumf %188, %189 : vector<8x1x64xf32>
    %191 = vector.extract_strided_slice %169 {offsets = [0, 14, 0], sizes = [8, 1, 64], strides = [1, 1, 1]} : vector<8x16x64xf32> to vector<8x1x64xf32>
    %192 = vector.extract_strided_slice %169 {offsets = [0, 15, 0], sizes = [8, 1, 64], strides = [1, 1, 1]} : vector<8x16x64xf32> to vector<8x1x64xf32>
    %193 = arith.maximumf %191, %192 : vector<8x1x64xf32>
    %194 = tpu.concatenate %172, %175, %178, %181, %184, %187, %190, %193 in 1 : vector<8x1x64xf32>, vector<8x1x64xf32>, vector<8x1x64xf32>, vector<8x1x64xf32>, vector<8x1x64xf32>, vector<8x1x64xf32>, vector<8x1x64xf32>, vector<8x1x64xf32> -> vector<8x8x64xf32>
    %c1_192 = arith.constant 1 : index
    %c1_193 = arith.constant 1 : index
    %c0_194 = arith.constant 0 : index
    %195 = vector.load %arg14[%c1_192, %c1_193, %c0_194] : memref<10x10x64xf32, #tpu.memory_space<vmem>>, vector<8x8x64xf32>
    tpu.vector_store %arg14[%c1_192, %c1_193, %c0_194], %194 {strides = array<i32>} : memref<10x10x64xf32, #tpu.memory_space<vmem>>, vector<8x8x64xf32>,
    %cst_195 = arith.constant 0.000000e+00 : f32
    %196 = vector.broadcast %cst_195 : f32 to vector<64x64xf32>
    %c0_196 = arith.constant 0 : index
    %c0_197 = arith.constant 0 : index
    %197 = vector.load %arg7[%c0_196, %c0_197] : memref<1x64xf32, #tpu.memory_space<vmem>>, vector<1x64xf32>
    %198 = vector.broadcast %197 : vector<1x64xf32> to vector<64x64xf32>
    %199 = arith.addf %196, %198 : vector<64x64xf32>
    %c0_198 = arith.constant 0 : index
    %c0_199 = arith.constant 0 : index
    %c0_200 = arith.constant 0 : index
    %200 = vector.load %arg14[%c0_198, %c0_199, %c0_200] : memref<10x10x64xf32, #tpu.memory_space<vmem>>, vector<8x8x64xf32>
    %201 = vector.shape_cast %200 : vector<8x8x64xf32> to vector<64x64xf32>
    %c0_201 = arith.constant 0 : index
    %c0_202 = arith.constant 0 : index
    %c0_203 = arith.constant 0 : index
    %c0_204 = arith.constant 0 : index
    %202 = vector.load %arg6[%c0_201, %c0_202, %c0_203, %c0_204] : memref<3x3x64x64xf32, #tpu.memory_space<vmem>>, vector<1x1x64x64xf32>
    %203 = vector.shape_cast %202 : vector<1x1x64x64xf32> to vector<64x64xf32>
    %cst_205 = arith.constant dense<0.000000e+00> : vector<64x64xf32>
    %204 = tpu.matmul %201, %203, %cst_205 {dimension_numbers = #tpu.dot_dimension_numbers<[1], [0], [0], [1], [0, 0, 1, 1], [], []>} : vector<64x64xf32>, vector<64x64xf32>, vector<64x64xf32> -> vector<64x64xf32>
    %205 = arith.addf %199, %204 : vector<64x64xf32>
    %c0_206 = arith.constant 0 : index
    %c1_207 = arith.constant 1 : index
    %c0_208 = arith.constant 0 : index
    %206 = vector.load %arg14[%c0_206, %c1_207, %c0_208] : memref<10x10x64xf32, #tpu.memory_space<vmem>>, vector<8x8x64xf32>
    %207 = vector.shape_cast %206 : vector<8x8x64xf32> to vector<64x64xf32>
    %c0_209 = arith.constant 0 : index
    %c1_210 = arith.constant 1 : index
    %c0_211 = arith.constant 0 : index
    %c0_212 = arith.constant 0 : index
    %208 = vector.load %arg6[%c0_209, %c1_210, %c0_211, %c0_212] : memref<3x3x64x64xf32, #tpu.memory_space<vmem>>, vector<1x1x64x64xf32>
    %209 = vector.shape_cast %208 : vector<1x1x64x64xf32> to vector<64x64xf32>
    %cst_213 = arith.constant dense<0.000000e+00> : vector<64x64xf32>
    %210 = tpu.matmul %207, %209, %cst_213 {dimension_numbers = #tpu.dot_dimension_numbers<[1], [0], [0], [1], [0, 0, 1, 1], [], []>} : vector<64x64xf32>, vector<64x64xf32>, vector<64x64xf32> -> vector<64x64xf32>
    %211 = arith.addf %205, %210 : vector<64x64xf32>
    %c0_214 = arith.constant 0 : index
    %c2_215 = arith.constant 2 : index
    %c0_216 = arith.constant 0 : index
    %212 = vector.load %arg14[%c0_214, %c2_215, %c0_216] : memref<10x10x64xf32, #tpu.memory_space<vmem>>, vector<8x8x64xf32>
    %213 = vector.shape_cast %212 : vector<8x8x64xf32> to vector<64x64xf32>
    %c0_217 = arith.constant 0 : index
    %c2_218 = arith.constant 2 : index
    %c0_219 = arith.constant 0 : index
    %c0_220 = arith.constant 0 : index
    %214 = vector.load %arg6[%c0_217, %c2_218, %c0_219, %c0_220] : memref<3x3x64x64xf32, #tpu.memory_space<vmem>>, vector<1x1x64x64xf32>
    %215 = vector.shape_cast %214 : vector<1x1x64x64xf32> to vector<64x64xf32>
    %cst_221 = arith.constant dense<0.000000e+00> : vector<64x64xf32>
    %216 = tpu.matmul %213, %215, %cst_221 {dimension_numbers = #tpu.dot_dimension_numbers<[1], [0], [0], [1], [0, 0, 1, 1], [], []>} : vector<64x64xf32>, vector<64x64xf32>, vector<64x64xf32> -> vector<64x64xf32>
    %217 = arith.addf %211, %216 : vector<64x64xf32>
    %c1_222 = arith.constant 1 : index
    %c0_223 = arith.constant 0 : index
    %c0_224 = arith.constant 0 : index
    %218 = vector.load %arg14[%c1_222, %c0_223, %c0_224] : memref<10x10x64xf32, #tpu.memory_space<vmem>>, vector<8x8x64xf32>
    %219 = vector.shape_cast %218 : vector<8x8x64xf32> to vector<64x64xf32>
    %c1_225 = arith.constant 1 : index
    %c0_226 = arith.constant 0 : index
    %c0_227 = arith.constant 0 : index
    %c0_228 = arith.constant 0 : index
    %220 = vector.load %arg6[%c1_225, %c0_226, %c0_227, %c0_228] : memref<3x3x64x64xf32, #tpu.memory_space<vmem>>, vector<1x1x64x64xf32>
    %221 = vector.shape_cast %220 : vector<1x1x64x64xf32> to vector<64x64xf32>
    %cst_229 = arith.constant dense<0.000000e+00> : vector<64x64xf32>
    %222 = tpu.matmul %219, %221, %cst_229 {dimension_numbers = #tpu.dot_dimension_numbers<[1], [0], [0], [1], [0, 0, 1, 1], [], []>} : vector<64x64xf32>, vector<64x64xf32>, vector<64x64xf32> -> vector<64x64xf32>
    %223 = arith.addf %217, %222 : vector<64x64xf32>
    %c1_230 = arith.constant 1 : index
    %c1_231 = arith.constant 1 : index
    %c0_232 = arith.constant 0 : index
    %224 = vector.load %arg14[%c1_230, %c1_231, %c0_232] : memref<10x10x64xf32, #tpu.memory_space<vmem>>, vector<8x8x64xf32>
    %225 = vector.shape_cast %224 : vector<8x8x64xf32> to vector<64x64xf32>
    %c1_233 = arith.constant 1 : index
    %c1_234 = arith.constant 1 : index
    %c0_235 = arith.constant 0 : index
    %c0_236 = arith.constant 0 : index
    %226 = vector.load %arg6[%c1_233, %c1_234, %c0_235, %c0_236] : memref<3x3x64x64xf32, #tpu.memory_space<vmem>>, vector<1x1x64x64xf32>
    %227 = vector.shape_cast %226 : vector<1x1x64x64xf32> to vector<64x64xf32>
    %cst_237 = arith.constant dense<0.000000e+00> : vector<64x64xf32>
    %228 = tpu.matmul %225, %227, %cst_237 {dimension_numbers = #tpu.dot_dimension_numbers<[1], [0], [0], [1], [0, 0, 1, 1], [], []>} : vector<64x64xf32>, vector<64x64xf32>, vector<64x64xf32> -> vector<64x64xf32>
    %229 = arith.addf %223, %228 : vector<64x64xf32>
    %c1_238 = arith.constant 1 : index
    %c2_239 = arith.constant 2 : index
    %c0_240 = arith.constant 0 : index
    %230 = vector.load %arg14[%c1_238, %c2_239, %c0_240] : memref<10x10x64xf32, #tpu.memory_space<vmem>>, vector<8x8x64xf32>
    %231 = vector.shape_cast %230 : vector<8x8x64xf32> to vector<64x64xf32>
    %c1_241 = arith.constant 1 : index
    %c2_242 = arith.constant 2 : index
    %c0_243 = arith.constant 0 : index
    %c0_244 = arith.constant 0 : index
    %232 = vector.load %arg6[%c1_241, %c2_242, %c0_243, %c0_244] : memref<3x3x64x64xf32, #tpu.memory_space<vmem>>, vector<1x1x64x64xf32>
    %233 = vector.shape_cast %232 : vector<1x1x64x64xf32> to vector<64x64xf32>
    %cst_245 = arith.constant dense<0.000000e+00> : vector<64x64xf32>
    %234 = tpu.matmul %231, %233, %cst_245 {dimension_numbers = #tpu.dot_dimension_numbers<[1], [0], [0], [1], [0, 0, 1, 1], [], []>} : vector<64x64xf32>, vector<64x64xf32>, vector<64x64xf32> -> vector<64x64xf32>
    %235 = arith.addf %229, %234 : vector<64x64xf32>
    %c2_246 = arith.constant 2 : index
    %c0_247 = arith.constant 0 : index
    %c0_248 = arith.constant 0 : index
    %236 = vector.load %arg14[%c2_246, %c0_247, %c0_248] : memref<10x10x64xf32, #tpu.memory_space<vmem>>, vector<8x8x64xf32>
    %237 = vector.shape_cast %236 : vector<8x8x64xf32> to vector<64x64xf32>
    %c2_249 = arith.constant 2 : index
    %c0_250 = arith.constant 0 : index
    %c0_251 = arith.constant 0 : index
    %c0_252 = arith.constant 0 : index
    %238 = vector.load %arg6[%c2_249, %c0_250, %c0_251, %c0_252] : memref<3x3x64x64xf32, #tpu.memory_space<vmem>>, vector<1x1x64x64xf32>
    %239 = vector.shape_cast %238 : vector<1x1x64x64xf32> to vector<64x64xf32>
    %cst_253 = arith.constant dense<0.000000e+00> : vector<64x64xf32>
    %240 = tpu.matmul %237, %239, %cst_253 {dimension_numbers = #tpu.dot_dimension_numbers<[1], [0], [0], [1], [0, 0, 1, 1], [], []>} : vector<64x64xf32>, vector<64x64xf32>, vector<64x64xf32> -> vector<64x64xf32>
    %241 = arith.addf %235, %240 : vector<64x64xf32>
    %c2_254 = arith.constant 2 : index
    %c1_255 = arith.constant 1 : index
    %c0_256 = arith.constant 0 : index
    %242 = vector.load %arg14[%c2_254, %c1_255, %c0_256] : memref<10x10x64xf32, #tpu.memory_space<vmem>>, vector<8x8x64xf32>
    %243 = vector.shape_cast %242 : vector<8x8x64xf32> to vector<64x64xf32>
    %c2_257 = arith.constant 2 : index
    %c1_258 = arith.constant 1 : index
    %c0_259 = arith.constant 0 : index
    %c0_260 = arith.constant 0 : index
    %244 = vector.load %arg6[%c2_257, %c1_258, %c0_259, %c0_260] : memref<3x3x64x64xf32, #tpu.memory_space<vmem>>, vector<1x1x64x64xf32>
    %245 = vector.shape_cast %244 : vector<1x1x64x64xf32> to vector<64x64xf32>
    %cst_261 = arith.constant dense<0.000000e+00> : vector<64x64xf32>
    %246 = tpu.matmul %243, %245, %cst_261 {dimension_numbers = #tpu.dot_dimension_numbers<[1], [0], [0], [1], [0, 0, 1, 1], [], []>} : vector<64x64xf32>, vector<64x64xf32>, vector<64x64xf32> -> vector<64x64xf32>
    %247 = arith.addf %241, %246 : vector<64x64xf32>
    %c2_262 = arith.constant 2 : index
    %c2_263 = arith.constant 2 : index
    %c0_264 = arith.constant 0 : index
    %248 = vector.load %arg14[%c2_262, %c2_263, %c0_264] : memref<10x10x64xf32, #tpu.memory_space<vmem>>, vector<8x8x64xf32>
    %249 = vector.shape_cast %248 : vector<8x8x64xf32> to vector<64x64xf32>
    %c2_265 = arith.constant 2 : index
    %c2_266 = arith.constant 2 : index
    %c0_267 = arith.constant 0 : index
    %c0_268 = arith.constant 0 : index
    %250 = vector.load %arg6[%c2_265, %c2_266, %c0_267, %c0_268] : memref<3x3x64x64xf32, #tpu.memory_space<vmem>>, vector<1x1x64x64xf32>
    %251 = vector.shape_cast %250 : vector<1x1x64x64xf32> to vector<64x64xf32>
    %cst_269 = arith.constant dense<0.000000e+00> : vector<64x64xf32>
    %252 = tpu.matmul %249, %251, %cst_269 {dimension_numbers = #tpu.dot_dimension_numbers<[1], [0], [0], [1], [0, 0, 1, 1], [], []>} : vector<64x64xf32>, vector<64x64xf32>, vector<64x64xf32> -> vector<64x64xf32>
    %253 = arith.addf %247, %252 : vector<64x64xf32>
    %cst_270 = arith.constant 0.000000e+00 : f32
    %254 = vector.broadcast %cst_270 : f32 to vector<64x64xf32>
    %255 = arith.maximumf %253, %254 : vector<64x64xf32>
    %256 = vector.shape_cast %255 : vector<64x64xf32> to vector<8x8x64xf32>
    %257 = vector.shape_cast %256 : vector<8x8x64xf32> to vector<8x1x8x64xf32>
    %258 = vector.shape_cast %256 : vector<8x8x64xf32> to vector<8x1x8x64xf32>
    %259 = tpu.concatenate %257, %258 in 1 : vector<8x1x8x64xf32>, vector<8x1x8x64xf32> -> vector<8x2x8x64xf32>
    %260 = vector.shape_cast %259 : vector<8x2x8x64xf32> to vector<16x8x64xf32>
    %261 = vector.extract_strided_slice %260 {offsets = [0, 0, 0], sizes = [16, 1, 64], strides = [1, 1, 1]} : vector<16x8x64xf32> to vector<16x1x64xf32>
    %262 = vector.extract_strided_slice %260 {offsets = [0, 1, 0], sizes = [16, 1, 64], strides = [1, 1, 1]} : vector<16x8x64xf32> to vector<16x1x64xf32>
    %263 = vector.extract_strided_slice %260 {offsets = [0, 2, 0], sizes = [16, 1, 64], strides = [1, 1, 1]} : vector<16x8x64xf32> to vector<16x1x64xf32>
    %264 = vector.extract_strided_slice %260 {offsets = [0, 3, 0], sizes = [16, 1, 64], strides = [1, 1, 1]} : vector<16x8x64xf32> to vector<16x1x64xf32>
    %265 = vector.extract_strided_slice %260 {offsets = [0, 4, 0], sizes = [16, 1, 64], strides = [1, 1, 1]} : vector<16x8x64xf32> to vector<16x1x64xf32>
    %266 = vector.extract_strided_slice %260 {offsets = [0, 5, 0], sizes = [16, 1, 64], strides = [1, 1, 1]} : vector<16x8x64xf32> to vector<16x1x64xf32>
    %267 = vector.extract_strided_slice %260 {offsets = [0, 6, 0], sizes = [16, 1, 64], strides = [1, 1, 1]} : vector<16x8x64xf32> to vector<16x1x64xf32>
    %268 = vector.extract_strided_slice %260 {offsets = [0, 7, 0], sizes = [16, 1, 64], strides = [1, 1, 1]} : vector<16x8x64xf32> to vector<16x1x64xf32>
    %269 = tpu.concatenate %261, %261, %262, %262, %263, %263, %264, %264, %265, %265, %266, %266, %267, %267, %268, %268 in 1 : vector<16x1x64xf32>, vector<16x1x64xf32>, vector<16x1x64xf32>, vector<16x1x64xf32>, vector<16x1x64xf32>, vector<16x1x64xf32>, vector<16x1x64xf32>, vector<16x1x64xf32>, vector<16x1x64xf32>, vector<16x1x64xf32>, vector<16x1x64xf32>, vector<16x1x64xf32>, vector<16x1x64xf32>, vector<16x1x64xf32>, vector<16x1x64xf32>, vector<16x1x64xf32> -> vector<16x16x64xf32>
    %c1_271 = arith.constant 1 : index
    %c1_272 = arith.constant 1 : index
    %c0_273 = arith.constant 0 : index
    %270 = vector.load %arg15[%c1_271, %c1_272, %c0_273] : memref<18x18x64xf32, #tpu.memory_space<vmem>>, vector<16x16x64xf32>
    tpu.vector_store %arg15[%c1_271, %c1_272, %c0_273], %269 {strides = array<i32>} : memref<18x18x64xf32, #tpu.memory_space<vmem>>, vector<16x16x64xf32>,
    %cst_274 = arith.constant 0.000000e+00 : f32
    %271 = vector.broadcast %cst_274 : f32 to vector<256x32xf32>
    %c0_275 = arith.constant 0 : index
    %c0_276 = arith.constant 0 : index
    %272 = vector.load %arg9[%c0_275, %c0_276] : memref<1x32xf32, #tpu.memory_space<vmem>>, vector<1x32xf32>
    %273 = vector.broadcast %272 : vector<1x32xf32> to vector<256x32xf32>
    %274 = arith.addf %271, %273 : vector<256x32xf32>
    %c0_277 = arith.constant 0 : index
    %c0_278 = arith.constant 0 : index
    %c0_279 = arith.constant 0 : index
    %275 = vector.load %arg15[%c0_277, %c0_278, %c0_279] : memref<18x18x64xf32, #tpu.memory_space<vmem>>, vector<16x16x64xf32>
    %276 = vector.shape_cast %275 : vector<16x16x64xf32> to vector<256x64xf32>
    %c0_280 = arith.constant 0 : index
    %c0_281 = arith.constant 0 : index
    %c0_282 = arith.constant 0 : index
    %c0_283 = arith.constant 0 : index
    %277 = vector.load %arg8[%c0_280, %c0_281, %c0_282, %c0_283] : memref<3x3x64x32xf32, #tpu.memory_space<vmem>>, vector<1x1x64x32xf32>
    %278 = vector.shape_cast %277 : vector<1x1x64x32xf32> to vector<64x32xf32>
    %cst_284 = arith.constant dense<0.000000e+00> : vector<256x32xf32>
    %279 = tpu.matmul %276, %278, %cst_284 {dimension_numbers = #tpu.dot_dimension_numbers<[1], [0], [0], [1], [0, 0, 1, 1], [], []>} : vector<256x64xf32>, vector<64x32xf32>, vector<256x32xf32> -> vector<256x32xf32>
    %280 = arith.addf %274, %279 : vector<256x32xf32>
    %c0_285 = arith.constant 0 : index
    %c1_286 = arith.constant 1 : index
    %c0_287 = arith.constant 0 : index
    %281 = vector.load %arg15[%c0_285, %c1_286, %c0_287] : memref<18x18x64xf32, #tpu.memory_space<vmem>>, vector<16x16x64xf32>
    %282 = vector.shape_cast %281 : vector<16x16x64xf32> to vector<256x64xf32>
    %c0_288 = arith.constant 0 : index
    %c1_289 = arith.constant 1 : index
    %c0_290 = arith.constant 0 : index
    %c0_291 = arith.constant 0 : index
    %283 = vector.load %arg8[%c0_288, %c1_289, %c0_290, %c0_291] : memref<3x3x64x32xf32, #tpu.memory_space<vmem>>, vector<1x1x64x32xf32>
    %284 = vector.shape_cast %283 : vector<1x1x64x32xf32> to vector<64x32xf32>
    %cst_292 = arith.constant dense<0.000000e+00> : vector<256x32xf32>
    %285 = tpu.matmul %282, %284, %cst_292 {dimension_numbers = #tpu.dot_dimension_numbers<[1], [0], [0], [1], [0, 0, 1, 1], [], []>} : vector<256x64xf32>, vector<64x32xf32>, vector<256x32xf32> -> vector<256x32xf32>
    %286 = arith.addf %280, %285 : vector<256x32xf32>
    %c0_293 = arith.constant 0 : index
    %c2_294 = arith.constant 2 : index
    %c0_295 = arith.constant 0 : index
    %287 = vector.load %arg15[%c0_293, %c2_294, %c0_295] : memref<18x18x64xf32, #tpu.memory_space<vmem>>, vector<16x16x64xf32>
    %288 = vector.shape_cast %287 : vector<16x16x64xf32> to vector<256x64xf32>
    %c0_296 = arith.constant 0 : index
    %c2_297 = arith.constant 2 : index
    %c0_298 = arith.constant 0 : index
    %c0_299 = arith.constant 0 : index
    %289 = vector.load %arg8[%c0_296, %c2_297, %c0_298, %c0_299] : memref<3x3x64x32xf32, #tpu.memory_space<vmem>>, vector<1x1x64x32xf32>
    %290 = vector.shape_cast %289 : vector<1x1x64x32xf32> to vector<64x32xf32>
    %cst_300 = arith.constant dense<0.000000e+00> : vector<256x32xf32>
    %291 = tpu.matmul %288, %290, %cst_300 {dimension_numbers = #tpu.dot_dimension_numbers<[1], [0], [0], [1], [0, 0, 1, 1], [], []>} : vector<256x64xf32>, vector<64x32xf32>, vector<256x32xf32> -> vector<256x32xf32>
    %292 = arith.addf %286, %291 : vector<256x32xf32>
    %c1_301 = arith.constant 1 : index
    %c0_302 = arith.constant 0 : index
    %c0_303 = arith.constant 0 : index
    %293 = vector.load %arg15[%c1_301, %c0_302, %c0_303] : memref<18x18x64xf32, #tpu.memory_space<vmem>>, vector<16x16x64xf32>
    %294 = vector.shape_cast %293 : vector<16x16x64xf32> to vector<256x64xf32>
    %c1_304 = arith.constant 1 : index
    %c0_305 = arith.constant 0 : index
    %c0_306 = arith.constant 0 : index
    %c0_307 = arith.constant 0 : index
    %295 = vector.load %arg8[%c1_304, %c0_305, %c0_306, %c0_307] : memref<3x3x64x32xf32, #tpu.memory_space<vmem>>, vector<1x1x64x32xf32>
    %296 = vector.shape_cast %295 : vector<1x1x64x32xf32> to vector<64x32xf32>
    %cst_308 = arith.constant dense<0.000000e+00> : vector<256x32xf32>
    %297 = tpu.matmul %294, %296, %cst_308 {dimension_numbers = #tpu.dot_dimension_numbers<[1], [0], [0], [1], [0, 0, 1, 1], [], []>} : vector<256x64xf32>, vector<64x32xf32>, vector<256x32xf32> -> vector<256x32xf32>
    %298 = arith.addf %292, %297 : vector<256x32xf32>
    %c1_309 = arith.constant 1 : index
    %c1_310 = arith.constant 1 : index
    %c0_311 = arith.constant 0 : index
    %299 = vector.load %arg15[%c1_309, %c1_310, %c0_311] : memref<18x18x64xf32, #tpu.memory_space<vmem>>, vector<16x16x64xf32>
    %300 = vector.shape_cast %299 : vector<16x16x64xf32> to vector<256x64xf32>
    %c1_312 = arith.constant 1 : index
    %c1_313 = arith.constant 1 : index
    %c0_314 = arith.constant 0 : index
    %c0_315 = arith.constant 0 : index
    %301 = vector.load %arg8[%c1_312, %c1_313, %c0_314, %c0_315] : memref<3x3x64x32xf32, #tpu.memory_space<vmem>>, vector<1x1x64x32xf32>
    %302 = vector.shape_cast %301 : vector<1x1x64x32xf32> to vector<64x32xf32>
    %cst_316 = arith.constant dense<0.000000e+00> : vector<256x32xf32>
    %303 = tpu.matmul %300, %302, %cst_316 {dimension_numbers = #tpu.dot_dimension_numbers<[1], [0], [0], [1], [0, 0, 1, 1], [], []>} : vector<256x64xf32>, vector<64x32xf32>, vector<256x32xf32> -> vector<256x32xf32>
    %304 = arith.addf %298, %303 : vector<256x32xf32>
    %c1_317 = arith.constant 1 : index
    %c2_318 = arith.constant 2 : index
    %c0_319 = arith.constant 0 : index
    %305 = vector.load %arg15[%c1_317, %c2_318, %c0_319] : memref<18x18x64xf32, #tpu.memory_space<vmem>>, vector<16x16x64xf32>
    %306 = vector.shape_cast %305 : vector<16x16x64xf32> to vector<256x64xf32>
    %c1_320 = arith.constant 1 : index
    %c2_321 = arith.constant 2 : index
    %c0_322 = arith.constant 0 : index
    %c0_323 = arith.constant 0 : index
    %307 = vector.load %arg8[%c1_320, %c2_321, %c0_322, %c0_323] : memref<3x3x64x32xf32, #tpu.memory_space<vmem>>, vector<1x1x64x32xf32>
    %308 = vector.shape_cast %307 : vector<1x1x64x32xf32> to vector<64x32xf32>
    %cst_324 = arith.constant dense<0.000000e+00> : vector<256x32xf32>
    %309 = tpu.matmul %306, %308, %cst_324 {dimension_numbers = #tpu.dot_dimension_numbers<[1], [0], [0], [1], [0, 0, 1, 1], [], []>} : vector<256x64xf32>, vector<64x32xf32>, vector<256x32xf32> -> vector<256x32xf32>
    %310 = arith.addf %304, %309 : vector<256x32xf32>
    %c2_325 = arith.constant 2 : index
    %c0_326 = arith.constant 0 : index
    %c0_327 = arith.constant 0 : index
    %311 = vector.load %arg15[%c2_325, %c0_326, %c0_327] : memref<18x18x64xf32, #tpu.memory_space<vmem>>, vector<16x16x64xf32>
    %312 = vector.shape_cast %311 : vector<16x16x64xf32> to vector<256x64xf32>
    %c2_328 = arith.constant 2 : index
    %c0_329 = arith.constant 0 : index
    %c0_330 = arith.constant 0 : index
    %c0_331 = arith.constant 0 : index
    %313 = vector.load %arg8[%c2_328, %c0_329, %c0_330, %c0_331] : memref<3x3x64x32xf32, #tpu.memory_space<vmem>>, vector<1x1x64x32xf32>
    %314 = vector.shape_cast %313 : vector<1x1x64x32xf32> to vector<64x32xf32>
    %cst_332 = arith.constant dense<0.000000e+00> : vector<256x32xf32>
    %315 = tpu.matmul %312, %314, %cst_332 {dimension_numbers = #tpu.dot_dimension_numbers<[1], [0], [0], [1], [0, 0, 1, 1], [], []>} : vector<256x64xf32>, vector<64x32xf32>, vector<256x32xf32> -> vector<256x32xf32>
    %316 = arith.addf %310, %315 : vector<256x32xf32>
    %c2_333 = arith.constant 2 : index
    %c1_334 = arith.constant 1 : index
    %c0_335 = arith.constant 0 : index
    %317 = vector.load %arg15[%c2_333, %c1_334, %c0_335] : memref<18x18x64xf32, #tpu.memory_space<vmem>>, vector<16x16x64xf32>
    %318 = vector.shape_cast %317 : vector<16x16x64xf32> to vector<256x64xf32>
    %c2_336 = arith.constant 2 : index
    %c1_337 = arith.constant 1 : index
    %c0_338 = arith.constant 0 : index
    %c0_339 = arith.constant 0 : index
    %319 = vector.load %arg8[%c2_336, %c1_337, %c0_338, %c0_339] : memref<3x3x64x32xf32, #tpu.memory_space<vmem>>, vector<1x1x64x32xf32>
    %320 = vector.shape_cast %319 : vector<1x1x64x32xf32> to vector<64x32xf32>
    %cst_340 = arith.constant dense<0.000000e+00> : vector<256x32xf32>
    %321 = tpu.matmul %318, %320, %cst_340 {dimension_numbers = #tpu.dot_dimension_numbers<[1], [0], [0], [1], [0, 0, 1, 1], [], []>} : vector<256x64xf32>, vector<64x32xf32>, vector<256x32xf32> -> vector<256x32xf32>
    %322 = arith.addf %316, %321 : vector<256x32xf32>
    %c2_341 = arith.constant 2 : index
    %c2_342 = arith.constant 2 : index
    %c0_343 = arith.constant 0 : index
    %323 = vector.load %arg15[%c2_341, %c2_342, %c0_343] : memref<18x18x64xf32, #tpu.memory_space<vmem>>, vector<16x16x64xf32>
    %324 = vector.shape_cast %323 : vector<16x16x64xf32> to vector<256x64xf32>
    %c2_344 = arith.constant 2 : index
    %c2_345 = arith.constant 2 : index
    %c0_346 = arith.constant 0 : index
    %c0_347 = arith.constant 0 : index
    %325 = vector.load %arg8[%c2_344, %c2_345, %c0_346, %c0_347] : memref<3x3x64x32xf32, #tpu.memory_space<vmem>>, vector<1x1x64x32xf32>
    %326 = vector.shape_cast %325 : vector<1x1x64x32xf32> to vector<64x32xf32>
    %cst_348 = arith.constant dense<0.000000e+00> : vector<256x32xf32>
    %327 = tpu.matmul %324, %326, %cst_348 {dimension_numbers = #tpu.dot_dimension_numbers<[1], [0], [0], [1], [0, 0, 1, 1], [], []>} : vector<256x64xf32>, vector<64x32xf32>, vector<256x32xf32> -> vector<256x32xf32>
    %328 = arith.addf %322, %327 : vector<256x32xf32>
    %cst_349 = arith.constant 0.000000e+00 : f32
    %329 = vector.broadcast %cst_349 : f32 to vector<256x32xf32>
    %330 = arith.maximumf %328, %329 : vector<256x32xf32>
    %331 = vector.shape_cast %330 : vector<256x32xf32> to vector<16x16x32xf32>
    %c1_350 = arith.constant 1 : index
    %c1_351 = arith.constant 1 : index
    %c0_352 = arith.constant 0 : index
    %332 = vector.load %arg13[%c1_350, %c1_351, %c0_352] : memref<18x18x32xf32, #tpu.memory_space<vmem>>, vector<16x16x32xf32>
    tpu.vector_store %arg13[%c1_350, %c1_351, %c0_352], %331 {strides = array<i32>} : memref<18x18x32xf32, #tpu.memory_space<vmem>>, vector<16x16x32xf32>,
    %cst_353 = arith.constant 0.000000e+00 : f32
    %333 = vector.broadcast %cst_353 : f32 to vector<256x1xf32>
    %c0_354 = arith.constant 0 : index
    %c0_355 = arith.constant 0 : index
    %334 = vector.load %arg11[%c0_354, %c0_355] : memref<1x1xf32, #tpu.memory_space<vmem>>, vector<1x1xf32>
    %335 = vector.broadcast %334 : vector<1x1xf32> to vector<256x1xf32>
    %336 = arith.addf %333, %335 : vector<256x1xf32>
    %c0_356 = arith.constant 0 : index
    %c0_357 = arith.constant 0 : index
    %c0_358 = arith.constant 0 : index
    %337 = vector.load %arg13[%c0_356, %c0_357, %c0_358] : memref<18x18x32xf32, #tpu.memory_space<vmem>>, vector<16x16x32xf32>
    %338 = vector.shape_cast %337 : vector<16x16x32xf32> to vector<256x32xf32>
    %c0_359 = arith.constant 0 : index
    %c0_360 = arith.constant 0 : index
    %c0_361 = arith.constant 0 : index
    %c0_362 = arith.constant 0 : index
    %339 = vector.load %arg10[%c0_359, %c0_360, %c0_361, %c0_362] : memref<3x3x32x1xf32, #tpu.memory_space<vmem>>, vector<1x1x32x1xf32>
    %340 = vector.shape_cast %339 : vector<1x1x32x1xf32> to vector<32x1xf32>
    %cst_363 = arith.constant dense<0.000000e+00> : vector<256x1xf32>
    %341 = tpu.matmul %338, %340, %cst_363 {dimension_numbers = #tpu.dot_dimension_numbers<[1], [0], [0], [1], [0, 0, 1, 1], [], []>} : vector<256x32xf32>, vector<32x1xf32>, vector<256x1xf32> -> vector<256x1xf32>
    %342 = arith.addf %336, %341 : vector<256x1xf32>
    %c0_364 = arith.constant 0 : index
    %c1_365 = arith.constant 1 : index
    %c0_366 = arith.constant 0 : index
    %343 = vector.load %arg13[%c0_364, %c1_365, %c0_366] : memref<18x18x32xf32, #tpu.memory_space<vmem>>, vector<16x16x32xf32>
    %344 = vector.shape_cast %343 : vector<16x16x32xf32> to vector<256x32xf32>
    %c0_367 = arith.constant 0 : index
    %c1_368 = arith.constant 1 : index
    %c0_369 = arith.constant 0 : index
    %c0_370 = arith.constant 0 : index
    %345 = vector.load %arg10[%c0_367, %c1_368, %c0_369, %c0_370] : memref<3x3x32x1xf32, #tpu.memory_space<vmem>>, vector<1x1x32x1xf32>
    %346 = vector.shape_cast %345 : vector<1x1x32x1xf32> to vector<32x1xf32>
    %cst_371 = arith.constant dense<0.000000e+00> : vector<256x1xf32>
    %347 = tpu.matmul %344, %346, %cst_371 {dimension_numbers = #tpu.dot_dimension_numbers<[1], [0], [0], [1], [0, 0, 1, 1], [], []>} : vector<256x32xf32>, vector<32x1xf32>, vector<256x1xf32> -> vector<256x1xf32>
    %348 = arith.addf %342, %347 : vector<256x1xf32>
    %c0_372 = arith.constant 0 : index
    %c2_373 = arith.constant 2 : index
    %c0_374 = arith.constant 0 : index
    %349 = vector.load %arg13[%c0_372, %c2_373, %c0_374] : memref<18x18x32xf32, #tpu.memory_space<vmem>>, vector<16x16x32xf32>
    %350 = vector.shape_cast %349 : vector<16x16x32xf32> to vector<256x32xf32>
    %c0_375 = arith.constant 0 : index
    %c2_376 = arith.constant 2 : index
    %c0_377 = arith.constant 0 : index
    %c0_378 = arith.constant 0 : index
    %351 = vector.load %arg10[%c0_375, %c2_376, %c0_377, %c0_378] : memref<3x3x32x1xf32, #tpu.memory_space<vmem>>, vector<1x1x32x1xf32>
    %352 = vector.shape_cast %351 : vector<1x1x32x1xf32> to vector<32x1xf32>
    %cst_379 = arith.constant dense<0.000000e+00> : vector<256x1xf32>
    %353 = tpu.matmul %350, %352, %cst_379 {dimension_numbers = #tpu.dot_dimension_numbers<[1], [0], [0], [1], [0, 0, 1, 1], [], []>} : vector<256x32xf32>, vector<32x1xf32>, vector<256x1xf32> -> vector<256x1xf32>
    %354 = arith.addf %348, %353 : vector<256x1xf32>
    %c1_380 = arith.constant 1 : index
    %c0_381 = arith.constant 0 : index
    %c0_382 = arith.constant 0 : index
    %355 = vector.load %arg13[%c1_380, %c0_381, %c0_382] : memref<18x18x32xf32, #tpu.memory_space<vmem>>, vector<16x16x32xf32>
    %356 = vector.shape_cast %355 : vector<16x16x32xf32> to vector<256x32xf32>
    %c1_383 = arith.constant 1 : index
    %c0_384 = arith.constant 0 : index
    %c0_385 = arith.constant 0 : index
    %c0_386 = arith.constant 0 : index
    %357 = vector.load %arg10[%c1_383, %c0_384, %c0_385, %c0_386] : memref<3x3x32x1xf32, #tpu.memory_space<vmem>>, vector<1x1x32x1xf32>
    %358 = vector.shape_cast %357 : vector<1x1x32x1xf32> to vector<32x1xf32>
    %cst_387 = arith.constant dense<0.000000e+00> : vector<256x1xf32>
    %359 = tpu.matmul %356, %358, %cst_387 {dimension_numbers = #tpu.dot_dimension_numbers<[1], [0], [0], [1], [0, 0, 1, 1], [], []>} : vector<256x32xf32>, vector<32x1xf32>, vector<256x1xf32> -> vector<256x1xf32>
    %360 = arith.addf %354, %359 : vector<256x1xf32>
    %c1_388 = arith.constant 1 : index
    %c1_389 = arith.constant 1 : index
    %c0_390 = arith.constant 0 : index
    %361 = vector.load %arg13[%c1_388, %c1_389, %c0_390] : memref<18x18x32xf32, #tpu.memory_space<vmem>>, vector<16x16x32xf32>
    %362 = vector.shape_cast %361 : vector<16x16x32xf32> to vector<256x32xf32>
    %c1_391 = arith.constant 1 : index
    %c1_392 = arith.constant 1 : index
    %c0_393 = arith.constant 0 : index
    %c0_394 = arith.constant 0 : index
    %363 = vector.load %arg10[%c1_391, %c1_392, %c0_393, %c0_394] : memref<3x3x32x1xf32, #tpu.memory_space<vmem>>, vector<1x1x32x1xf32>
    %364 = vector.shape_cast %363 : vector<1x1x32x1xf32> to vector<32x1xf32>
    %cst_395 = arith.constant dense<0.000000e+00> : vector<256x1xf32>
    %365 = tpu.matmul %362, %364, %cst_395 {dimension_numbers = #tpu.dot_dimension_numbers<[1], [0], [0], [1], [0, 0, 1, 1], [], []>} : vector<256x32xf32>, vector<32x1xf32>, vector<256x1xf32> -> vector<256x1xf32>
    %366 = arith.addf %360, %365 : vector<256x1xf32>
    %c1_396 = arith.constant 1 : index
    %c2_397 = arith.constant 2 : index
    %c0_398 = arith.constant 0 : index
    %367 = vector.load %arg13[%c1_396, %c2_397, %c0_398] : memref<18x18x32xf32, #tpu.memory_space<vmem>>, vector<16x16x32xf32>
    %368 = vector.shape_cast %367 : vector<16x16x32xf32> to vector<256x32xf32>
    %c1_399 = arith.constant 1 : index
    %c2_400 = arith.constant 2 : index
    %c0_401 = arith.constant 0 : index
    %c0_402 = arith.constant 0 : index
    %369 = vector.load %arg10[%c1_399, %c2_400, %c0_401, %c0_402] : memref<3x3x32x1xf32, #tpu.memory_space<vmem>>, vector<1x1x32x1xf32>
    %370 = vector.shape_cast %369 : vector<1x1x32x1xf32> to vector<32x1xf32>
    %cst_403 = arith.constant dense<0.000000e+00> : vector<256x1xf32>
    %371 = tpu.matmul %368, %370, %cst_403 {dimension_numbers = #tpu.dot_dimension_numbers<[1], [0], [0], [1], [0, 0, 1, 1], [], []>} : vector<256x32xf32>, vector<32x1xf32>, vector<256x1xf32> -> vector<256x1xf32>
    %372 = arith.addf %366, %371 : vector<256x1xf32>
    %c2_404 = arith.constant 2 : index
    %c0_405 = arith.constant 0 : index
    %c0_406 = arith.constant 0 : index
    %373 = vector.load %arg13[%c2_404, %c0_405, %c0_406] : memref<18x18x32xf32, #tpu.memory_space<vmem>>, vector<16x16x32xf32>
    %374 = vector.shape_cast %373 : vector<16x16x32xf32> to vector<256x32xf32>
    %c2_407 = arith.constant 2 : index
    %c0_408 = arith.constant 0 : index
    %c0_409 = arith.constant 0 : index
    %c0_410 = arith.constant 0 : index
    %375 = vector.load %arg10[%c2_407, %c0_408, %c0_409, %c0_410] : memref<3x3x32x1xf32, #tpu.memory_space<vmem>>, vector<1x1x32x1xf32>
    %376 = vector.shape_cast %375 : vector<1x1x32x1xf32> to vector<32x1xf32>
    %cst_411 = arith.constant dense<0.000000e+00> : vector<256x1xf32>
    %377 = tpu.matmul %374, %376, %cst_411 {dimension_numbers = #tpu.dot_dimension_numbers<[1], [0], [0], [1], [0, 0, 1, 1], [], []>} : vector<256x32xf32>, vector<32x1xf32>, vector<256x1xf32> -> vector<256x1xf32>
    %378 = arith.addf %372, %377 : vector<256x1xf32>
    %c2_412 = arith.constant 2 : index
    %c1_413 = arith.constant 1 : index
    %c0_414 = arith.constant 0 : index
    %379 = vector.load %arg13[%c2_412, %c1_413, %c0_414] : memref<18x18x32xf32, #tpu.memory_space<vmem>>, vector<16x16x32xf32>
    %380 = vector.shape_cast %379 : vector<16x16x32xf32> to vector<256x32xf32>
    %c2_415 = arith.constant 2 : index
    %c1_416 = arith.constant 1 : index
    %c0_417 = arith.constant 0 : index
    %c0_418 = arith.constant 0 : index
    %381 = vector.load %arg10[%c2_415, %c1_416, %c0_417, %c0_418] : memref<3x3x32x1xf32, #tpu.memory_space<vmem>>, vector<1x1x32x1xf32>
    %382 = vector.shape_cast %381 : vector<1x1x32x1xf32> to vector<32x1xf32>
    %cst_419 = arith.constant dense<0.000000e+00> : vector<256x1xf32>
    %383 = tpu.matmul %380, %382, %cst_419 {dimension_numbers = #tpu.dot_dimension_numbers<[1], [0], [0], [1], [0, 0, 1, 1], [], []>} : vector<256x32xf32>, vector<32x1xf32>, vector<256x1xf32> -> vector<256x1xf32>
    %384 = arith.addf %378, %383 : vector<256x1xf32>
    %c2_420 = arith.constant 2 : index
    %c2_421 = arith.constant 2 : index
    %c0_422 = arith.constant 0 : index
    %385 = vector.load %arg13[%c2_420, %c2_421, %c0_422] : memref<18x18x32xf32, #tpu.memory_space<vmem>>, vector<16x16x32xf32>
    %386 = vector.shape_cast %385 : vector<16x16x32xf32> to vector<256x32xf32>
    %c2_423 = arith.constant 2 : index
    %c2_424 = arith.constant 2 : index
    %c0_425 = arith.constant 0 : index
    %c0_426 = arith.constant 0 : index
    %387 = vector.load %arg10[%c2_423, %c2_424, %c0_425, %c0_426] : memref<3x3x32x1xf32, #tpu.memory_space<vmem>>, vector<1x1x32x1xf32>
    %388 = vector.shape_cast %387 : vector<1x1x32x1xf32> to vector<32x1xf32>
    %cst_427 = arith.constant dense<0.000000e+00> : vector<256x1xf32>
    %389 = tpu.matmul %386, %388, %cst_427 {dimension_numbers = #tpu.dot_dimension_numbers<[1], [0], [0], [1], [0, 0, 1, 1], [], []>} : vector<256x32xf32>, vector<32x1xf32>, vector<256x1xf32> -> vector<256x1xf32>
    %390 = arith.addf %384, %389 : vector<256x1xf32>
    %cst_428 = arith.constant 0.000000e+00 : f32
    %391 = vector.broadcast %cst_428 : f32 to vector<256x1xf32>
    %392 = arith.subf %391, %390 : vector<256x1xf32>
    %393 = math.exp %392 : vector<256x1xf32>
    %cst_429 = arith.constant 1.000000e+00 : f32
    %394 = vector.broadcast %cst_429 : f32 to vector<256x1xf32>
    %395 = arith.addf %394, %393 : vector<256x1xf32>
    %cst_430 = arith.constant 1.000000e+00 : f32
    %396 = vector.broadcast %cst_430 : f32 to vector<256x1xf32>
    %397 = arith.divf %396, %395 : vector<256x1xf32>
    %398 = vector.shape_cast %397 : vector<256x1xf32> to vector<16x16x1xf32>
    %c0_431 = arith.constant 0 : index
    %c0_432 = arith.constant 0 : index
    %c0_433 = arith.constant 0 : index
    %c0_434 = arith.constant 0 : index
    %399 = vector.load %arg12[%c0_431, %c0_432, %c0_433, %c0_434] : memref<1x16x16x1xf32, #tpu.memory_space<vmem>>, vector<1x16x16x1xf32>
    %400 = vector.shape_cast %399 : vector<1x16x16x1xf32> to vector<16x16x1xf32>
    %401 = vector.shape_cast %398 : vector<16x16x1xf32> to vector<1x16x16x1xf32>
    tpu.vector_store %arg12[%c0_431, %c0_432, %c0_433, %c0_434], %401 {strides = array<i32>} : memref<1x16x16x1xf32, #tpu.memory_space<vmem>>, vector<1x16x16x1xf32>,
    return
  }
  func.func @transform_0(%arg0: i32) -> (i32, i32, i32, i32) {
    %c0_i32 = arith.constant 0 : i32
    %c0_i32_0 = arith.constant 0 : i32
    %c0_i32_1 = arith.constant 0 : i32
    %c0_i32_2 = arith.constant 0 : i32
    return %arg0, %c0_i32, %c0_i32_0, %c0_i32_1 : i32, i32, i32, i32
  }
  func.func @transform_1(%arg0: i32) -> (i32, i32, i32, i32) {
    %c0_i32 = arith.constant 0 : i32
    %c0_i32_0 = arith.constant 0 : i32
    %c0_i32_1 = arith.constant 0 : i32
    %c0_i32_2 = arith.constant 0 : i32
    %c0_i32_3 = arith.constant 0 : i32
    return %c0_i32, %c0_i32_0, %c0_i32_1, %c0_i32_2 : i32, i32, i32, i32
  }
  func.func @transform_2(%arg0: i32) -> (i32, i32) {
    %c0_i32 = arith.constant 0 : i32
    %c0_i32_0 = arith.constant 0 : i32
    %c0_i32_1 = arith.constant 0 : i32
    return %c0_i32, %c0_i32_0 : i32, i32
  }
  func.func @transform_3(%arg0: i32) -> (i32, i32, i32, i32) {
    %c0_i32 = arith.constant 0 : i32
    %c0_i32_0 = arith.constant 0 : i32
    %c0_i32_1 = arith.constant 0 : i32
    %c0_i32_2 = arith.constant 0 : i32
    %c0_i32_3 = arith.constant 0 : i32
    return %c0_i32, %c0_i32_0, %c0_i32_1, %c0_i32_2 : i32, i32, i32, i32
  }
  func.func @transform_4(%arg0: i32) -> (i32, i32) {
    %c0_i32 = arith.constant 0 : i32
    %c0_i32_0 = arith.constant 0 : i32
    %c0_i32_1 = arith.constant 0 : i32
    return %c0_i32, %c0_i32_0 : i32, i32
  }
  func.func @transform_5(%arg0: i32) -> (i32, i32, i32, i32) {
    %c0_i32 = arith.constant 0 : i32
    %c0_i32_0 = arith.constant 0 : i32
    %c0_i32_1 = arith.constant 0 : i32
    %c0_i32_2 = arith.constant 0 : i32
    %c0_i32_3 = arith.constant 0 : i32
    return %c0_i32, %c0_i32_0, %c0_i32_1, %c0_i32_2 : i32, i32, i32, i32
  }
  func.func @transform_6(%arg0: i32) -> (i32, i32) {
    %c0_i32 = arith.constant 0 : i32
    %c0_i32_0 = arith.constant 0 : i32
    %c0_i32_1 = arith.constant 0 : i32
    return %c0_i32, %c0_i32_0 : i32, i32
  }
  func.func @transform_7(%arg0: i32) -> (i32, i32, i32, i32) {
    %c0_i32 = arith.constant 0 : i32
    %c0_i32_0 = arith.constant 0 : i32
    %c0_i32_1 = arith.constant 0 : i32
    %c0_i32_2 = arith.constant 0 : i32
    %c0_i32_3 = arith.constant 0 : i32
    return %c0_i32, %c0_i32_0, %c0_i32_1, %c0_i32_2 : i32, i32, i32, i32
  }
  func.func @transform_8(%arg0: i32) -> (i32, i32) {
    %c0_i32 = arith.constant 0 : i32
    %c0_i32_0 = arith.constant 0 : i32
    %c0_i32_1 = arith.constant 0 : i32
    return %c0_i32, %c0_i32_0 : i32, i32
  }
  func.func @transform_9(%arg0: i32) -> (i32, i32, i32, i32) {
    %c0_i32 = arith.constant 0 : i32
    %c0_i32_0 = arith.constant 0 : i32
    %c0_i32_1 = arith.constant 0 : i32
    %c0_i32_2 = arith.constant 0 : i32
    %c0_i32_3 = arith.constant 0 : i32
    return %c0_i32, %c0_i32_0, %c0_i32_1, %c0_i32_2 : i32, i32, i32, i32
  }
  func.func @transform_10(%arg0: i32) -> (i32, i32) {
    %c0_i32 = arith.constant 0 : i32
    %c0_i32_0 = arith.constant 0 : i32
    %c0_i32_1 = arith.constant 0 : i32
    return %c0_i32, %c0_i32_0 : i32, i32
  }
  func.func @transform_11(%arg0: i32) -> (i32, i32, i32, i32) {
    %c0_i32 = arith.constant 0 : i32
    %c0_i32_0 = arith.constant 0 : i32
    %c0_i32_1 = arith.constant 0 : i32
    %c0_i32_2 = arith.constant 0 : i32
    return %arg0, %c0_i32, %c0_i32_0, %c0_i32_1 : i32, i32, i32, i32
  }
}

</mosaic_0001>

<bundles_post_ra>
// kernel: tpu_custom_call.1
= control target key start
LH: loop header
LB: loop body
LE: loop exit
PB: predicated region body
PF: predicated region fallthrough
CT: control target
= control target key end

     0   :  { %s21853_s19 = smov 0   ;;  %s27447_s0 = inlined_call_operand.vmem [shape: f32[2,18,18,1], index: 0, kind: input, shape index: {}]   ;;  %s27448_s1 = inlined_call_operand.vmem [shape: f32[3,3,1,32], index: 1, kind: input, shape index: {}]   ;;  %s27449_s2 = inlined_call_operand.vmem [shape: f32[1,32], index: 2, kind: input, shape index: {}]   ;;  %s27450_s3 = inlined_call_operand.vmem [shape: f32[3,3,32,64], index: 3, kind: input, shape index: {}]   ;;  %s27451_s4 = inlined_call_operand.vmem [shape: f32[1,64], index: 4, kind: input, shape index: {}]   ;;  %s27452_s5 = inlined_call_operand.vmem [shape: f32[3,3,64,64], index: 5, kind: input, shape index: {}]   ;;  %s27453_s6 = inlined_call_operand.vmem [shape: f32[1,64], index: 6, kind: input, shape index: {}]   ;;  %s27454_s7 = inlined_call_operand.vmem [shape: f32[3,3,64,32], index: 7, kind: input, shape index: {}]   ;;  %s27455_s8 = inlined_call_operand.vmem [shape: f32[1,32], index: 8, kind: input, shape index: {}]   ;;  %s27456_s9 = inlined_call_operand.vmem [shape: f32[3,3,32,1], index: 9, kind: input, shape index: {}]   ;;  %s27457_s10 = inlined_call_operand.<no memory space> [shape: f32[1,1], index: 10, kind: input, shape index: {}]   ;;  %s27458_s11 = inlined_call_operand.vmem [shape: f32[2,16,16,1], index: 11, kind: output, shape index: {}]  }
   0x1   :  { %v16_v0 = vstv %s27457_s10 }
   0x2   :  { %17 = vst [vmem:[#allocation5] sm:$0x1] %v16_v0 }
   0x3 LB: > { %s15900_s20 = sadd.s32 4294967295, %s21786_s19   ;;  %p15904_p0 = scmp.ge.s32.totalorder %s21786_s19, 1  ;;  %s21786_s19 = sphi %s21853_s19, %s23_s19  }
   0x4   : > { %p339_p1 = scmp.lt.s32.totalorder %s21786_s19, 3 }
   0x6   : > { %p340_p2 = pnand %p15904_p0, %p339_p1 }
   0x8   : > { %343 = sbr.rel (%p340_p2) target bundleno = 3143 (0xc47), region = 64 }
   0xf   : > { %p379_p3 = scmp.lt.s32.totalorder %s15900_s20, 1  ;;  %v21788_v1 = vmov 0   ;;  %vm389_vm0 = vcmask 261120   ;;  %v2996_v28 = vld [vmem:[%s27450_s3] sm:$0xff]  ;;  %v2997_v29 = vld [vmem:[%s27450_s3 + $0x8] sm:$0xff]  ;;  %v27459_v31 = vmov 0.0  }
  0x10   : > { %21625 = vset.pattern.permute.xlu1 %v21788_v1  ;;  %21624 = vset.pattern.permute.xlu0 %v21788_v1  ;;  %v20241_v30 = vpack.c.bf16 %v2997_v29, %v2996_v28  ;;  %390 = vst.msk [vmem:[#allocation2] sm:$0xff] %vm389_vm0, %v27459_v31  ;;  %vm398_vm1 = vcmask 253952   ;;  %391 = vst.msk [vmem:[#allocation2 + $0x8] sm:$0xff] %vm389_vm0, %v27459_v31  ;;  %v2998_v32 = vld [vmem:[%s27450_s3 + $0x10] sm:$0xff]  ;;  %v2999_v33 = vld [vmem:[%s27450_s3 + $0x18] sm:$0xff]  ;;  %vm392_vm2 = vcmask 254976  }
  0x11   : > { %s27860_s20 = smov (!%p379_p3, %s15900_s20), 1  ;;  %395 = vst.msk [vmem:[#allocation2 + $0x198] sm:$0xff] %vm389_vm0, %v27459_v31  ;;  %396 = vst.msk [vmem:[#allocation2 + $0x1a0] sm:$0xff] %vm389_vm0, %v27459_v31  ;;  %v20245_v34 = vpack.c.bf16 %v2999_v33, %v2998_v32  ;;  %v16223_v37 = vld [vmem:[%s27450_s3 + $0x60] sm:$0xff]  ;;  %v16224_v38 = vld [vmem:[%s27450_s3 + $0x68] sm:$0xff]  ;;  %vm435_vm3 = vcmask 523264  }
  0x12   : > { %s21613_s10 = smul.u32 432, %s27860_s20  ;;  %399 = vst.msk [vmem:[#allocation2] sm:$0x1] %vm398_vm1, %v27459_v31  ;;  %400 = vst.msk [vmem:[#allocation2 + $0x18] sm:$0x1] %vm398_vm1, %v27459_v31  ;;  %20242 = vmatprep.subr.bf16.mxu1 %v20241_v30  ;;  %v22021_v40 = vpack.c.bf16 %v16224_v38, %v16223_v37  ;;  %v16225_v41 = vld [vmem:[%s27450_s3 + $0x70] sm:$0xff] }
  0x13   : > { %401 = vst.msk [vmem:[#allocation2 + $0x30] sm:$0x1] %vm398_vm1, %v27459_v31  ;;  %402 = vst.msk [vmem:[#allocation2 + $0x48] sm:$0x1] %vm398_vm1, %v27459_v31  ;;  %20244 = vmatpush3.bf16.msra.mxu1 %v20241_v30  ;;  %v16226_v42 = vld [vmem:[%s27450_s3 + $0x78] sm:$0xff]  ;;  %vm442_vm4 = vcmask 516096  }
  0x14   : > { %s21867_s23 = scalar_lea.vmem %s27447_s0, %s21613_s10  ;;  %403 = vst.msk [vmem:[#allocation2 + $0x60] sm:$0x1] %vm398_vm1, %v27459_v31  ;;  %404 = vst.msk [vmem:[#allocation2 + $0x78] sm:$0x1] %vm398_vm1, %v27459_v31  ;;  %20246 = vmatprep.subr.bf16.mxu1 %v20245_v34  ;;  %20266 = vmatprep.subr.bf16.mxu0 %v22021_v40  ;;  %v22035_v43 = vpack.c.bf16 %v16226_v42, %v16225_v41  ;;  %v22147_v29 = vld [vmem:[%s27448_s1] ss:$0 sm:$0xff] }
  0x15   : > { %v777_v2 = vld [vmem:[%s21867_s23 + $0x1] sm:$0xff]  ;;  %v778_v4 = vld [vmem:[%s21867_s23 + $0x9] sm:$0xff]  ;;  %v516_v7 = vld [vmem:[%s21867_s23 + $0x18] sm:$0xff]  ;;  %405 = vst.msk [vmem:[#allocation2 + $0x90] sm:$0x1] %vm398_vm1, %v27459_v31  ;;  %20268 = vmatpush3.bf16.msra.mxu0 %v22021_v40  ;;  %vm437_vm5 = vcmask 517120  }
  0x16   : > { %v514_v3 = vld [vmem:[%s21867_s23] sm:$0xff]  ;;  %813 = vperm.xlu1 %21625, %v777_v2   ;;  %v515_v5 = vld [vmem:[%s21867_s23 + $0x8] sm:$0xff]  ;;  %v518_v13 = vld [vmem:[%s21867_s23 + $0x30] sm:$0xff]  ;;  %406 = vst.msk [vmem:[#allocation2 + $0xa8] sm:$0x1] %vm398_vm1, %v27459_v31  ;;  %20270 = vmatprep.subr.bf16.mxu0 %v22035_v43  ;;  %vm6746_vm6 = vcmask 1040384  }
  0x17   : > { %549 = vperm.xlu0 %21624, %v514_v3   ;;  %v1041_v6 = vld [vmem:[%s21867_s23 + $0x2] sm:$0xff]  ;;  %v1042_v8 = vld [vmem:[%s21867_s23 + $0xa] sm:$0xff]  ;;  %v779_v10 = vld [vmem:[%s21867_s23 + $0x19] sm:$0xff]  ;;  %407 = vst.msk [vmem:[#allocation2 + $0xc0] sm:$0x1] %vm398_vm1, %v27459_v31  ;;  %20248 = vmatpush3.bf16.msra.mxu1 %v20245_v34  ;;  %vm6755_vm7 = vcmask 1041408  }
  0x18   : > { %v517_v9 = vld [vmem:[%s21867_s23 + $0x20] sm:$0xff]  ;;  %v519_v14 = vld [vmem:[%s21867_s23 + $0x38] sm:$0xff]  ;;  %v520_v19 = vld [vmem:[%s21867_s23 + $0x48] sm:$0xff]  ;;  %408 = vst.msk [vmem:[#allocation2 + $0xd8] sm:$0x1] %vm398_vm1, %v27459_v31  ;;  %vm6764_vm8 = vcmask 1042432  }
  0x19   : > { %v780_v11 = vld [vmem:[%s21867_s23 + $0x21] sm:$0xff]  ;;  %v781_v16 = vld [vmem:[%s21867_s23 + $0x31] sm:$0xff]  ;;  %v782_v17 = vld [vmem:[%s21867_s23 + $0x39] sm:$0xff]  ;;  %409 = vst.msk [vmem:[#allocation2 + $0xf0] sm:$0x1] %vm398_vm1, %v27459_v31  ;;  %20272 = vmatpush3.bf16.msra.mxu0 %v22035_v43  ;;  %vm6773_vm9 = vcmask 1043456  }
  0x1a   : > { %818 = vperm.xlu1 %21625, %v778_v4   ;;  %v1043_v12 = vld [vmem:[%s21867_s23 + $0x1a] sm:$0xff]  ;;  %v1044_v15 = vld [vmem:[%s21867_s23 + $0x22] sm:$0xff]  ;;  %v1045_v18 = vld [vmem:[%s21867_s23 + $0x32] sm:$0xff]  ;;  %410 = vst.msk [vmem:[#allocation2 + $0x108] sm:$0x1] %vm398_vm1, %v27459_v31  ;;  %vm6782_vm10 = vcmask 1044480  }
  0x1b   : > { %554 = vperm.xlu0 %21624, %v515_v5   ;;  %v21888_v20 = vld [vmem:[%s21867_s23 + $0x3a] sm:$0xff]  ;;  %v21891_v21 = vld [vmem:[%s21867_s23 + $0x50] sm:$0xff]  ;;  %v21915_v26 = vld [vmem:[%s21867_s23 + $0x68] sm:$0xff]  ;;  %411 = vst.msk [vmem:[#allocation2 + $0x120] sm:$0x1] %vm398_vm1, %v27459_v31  ;;  %vm6791_vm11 = vcmask 1045504  }
  0x1c   : > { %v21896_v22 = vld [vmem:[%s21867_s23 + $0x49] sm:$0xff]  ;;  %v21900_v23 = vld [vmem:[%s21867_s23 + $0x51] sm:$0xff]  ;;  %v21909_v25 = vld [vmem:[%s21867_s23 + $0x60] sm:$0xff]  ;;  %412 = vst.msk [vmem:[#allocation2 + $0x138] sm:$0x1] %vm398_vm1, %v27459_v31  ;;  %vm6800_vm12 = vcmask 1046528  }
  0x1d   : > { %v21906_v24 = vld [vmem:[%s21867_s23 + $0x4a] sm:$0xff]  ;;  %v21919_v27 = vld [vmem:[%s21867_s23 + $0x52] sm:$0xff]  ;;  %413 = vst.msk [vmem:[#allocation2 + $0x150] sm:$0x1] %vm398_vm1, %v27459_v31  ;;  %414 = vst.msk [vmem:[#allocation2 + $0x168] sm:$0x1] %vm398_vm1, %v27459_v31 }
  0x1e   : > { %1077 = vperm.xlu1 %21625, %v1041_v6   ;;  %415 = vst.msk [vmem:[#allocation2 + $0x180] sm:$0x1] %vm398_vm1, %v27459_v31  ;;  %418 = vst.msk [vmem:[#allocation2 + $0x29] sm:$0x1] %vm398_vm1, %v27459_v31  ;;  %v785_v35 = vld [vmem:[%s21867_s23 + $0x61] sm:$0xff]  ;;  %v786_v44 = vld [vmem:[%s21867_s23 + $0x69] sm:$0xff] }
  0x1f   : > { %559 = vperm.xlu0 %21624, %v516_v7   ;;  %419 = vst.msk [vmem:[#allocation2 + $0x41] sm:$0x1] %vm398_vm1, %v27459_v31  ;;  %420 = vst.msk [vmem:[#allocation2 + $0x59] sm:$0x1] %vm398_vm1, %v27459_v31  ;;  %v2964_v36 = vld [vmem:[#allocation2] sm:$0xff]  ;;  %v2965_v39 = vld [vmem:[#allocation2 + $0x8] sm:$0xff] }
  0x20   : > { %421 = vst.msk [vmem:[#allocation2 + $0x71] sm:$0x1] %vm398_vm1, %v27459_v31  ;;  %422 = vst.msk [vmem:[#allocation2 + $0x89] sm:$0x1] %vm398_vm1, %v27459_v31  ;;  %18413 = vmatprep.mubr.msk.f32.mxu1 %vm389_vm0, %v2964_v36  ;;  %v1049_v45 = vld [vmem:[%s21867_s23 + $0x62] sm:$0xff]  ;;  %v524_v46 = vld [vmem:[%s21867_s23 + $0x78] sm:$0xff] }
  0x21   : > { %423 = vst.msk [vmem:[#allocation2 + $0xa1] sm:$0x1] %vm398_vm1, %v27459_v31  ;;  %424 = vst.msk [vmem:[#allocation2 + $0xb9] sm:$0x1] %vm398_vm1, %v27459_v31  ;;  %18414 = vmatmul.mubr.msk.f32.vlgmr.msra.gmra.mrb[0].mxu1 %vm389_vm0, %v2965_v39  ;;  %v525_v47 = vld [vmem:[%s21867_s23 + $0x80] sm:$0xff]  ;;  %v1050_v48 = vld [vmem:[%s21867_s23 + $0x6a] sm:$0xff] }
  0x22   : > { %1082 = vperm.xlu1 %21625, %v1042_v8   ;;  %425 = vst.msk [vmem:[#allocation2 + $0xd1] sm:$0x1] %vm398_vm1, %v27459_v31  ;;  %426 = vst.msk [vmem:[#allocation2 + $0xe9] sm:$0x1] %vm398_vm1, %v27459_v31  ;;  %v787_v53 = vld [vmem:[%s21867_s23 + $0x79] sm:$0xff]  ;;  %v788_v58 = vld [vmem:[%s21867_s23 + $0x81] sm:$0xff] }
  0x23   : > { %564 = vperm.xlu0 %21624, %v517_v9   ;;  %427 = vst.msk [vmem:[#allocation2 + $0x101] sm:$0x1] %vm398_vm1, %v27459_v31  ;;  %428 = vst.msk [vmem:[#allocation2 + $0x119] sm:$0x1] %vm398_vm1, %v27459_v31  ;;  %v1051_v63 = vld [vmem:[%s21867_s23 + $0x7a] sm:$0xff]  ;;  %v526_v0 = vld [vmem:[%s21867_s23 + $0x90] sm:$0xff] }
  0x24   : > { %429 = vst.msk [vmem:[#allocation2 + $0x131] sm:$0x1] %vm398_vm1, %v27459_v31  ;;  %430 = vst.msk [vmem:[#allocation2 + $0x149] sm:$0x1] %vm398_vm1, %v27459_v31  ;;  %v22088_v5 = vld [vmem:[%s21867_s23 + $0x98] sm:$0xff]  ;;  %v1052_v8 = vld [vmem:[%s21867_s23 + $0x82] sm:$0xff] }
  0x25   : > { %431 = vst.msk [vmem:[#allocation2 + $0x161] sm:$0x1] %vm398_vm1, %v27459_v31  ;;  %432 = vst.msk [vmem:[#allocation2 + $0x179] sm:$0x1] %vm398_vm1, %v27459_v31  ;;  %v22150_v30 = vld [vmem:[%s21867_s23 + $0xb0] sm:$0xff]  ;;  %v22168_v37 = vld [vmem:[%s21867_s23 + $0x9a] sm:$0xff] }
  0x26   : > { %1342 = vperm.xlu1 %21625, %v516_v7   ;;  %433 = vst.msk [vmem:[#allocation2 + $0x191] sm:$0x1] %vm398_vm1, %v27459_v31  ;;  %416 = vst.msk [vmem:[#allocation2 + $0x198] sm:$0x1] %vm398_vm1, %v27459_v31  ;;  %v22165_v36 = vld [vmem:[%s27449_s2] ss:$0 sm:$0xff] }
  0x27   : > { %823 = vperm.xlu0 %21624, %v779_v10   ;;  %27623 = vst [vmem:[#allocation6_spill] sm:$0xff] %v22021_v40  ;;  %27624 = vst [vmem:[#allocation7_spill] sm:$0xff] %v22035_v43  ;;  %v22173_v38 = vld [vmem:[%s27448_s1 + $0x2] ss:$0 sm:$0xff]  ;;  %s17252_s21 = sshll.u32 %s27860_s20, 8  ;;  %vm15812_vm13 = vcmask 7168  }
  0x28   : > { %s27360_s25 = scalar_lea.vmem %s27458_s11, %s17252_s21 }
  0x2a   : > { %1347 = vperm.xlu1 %21625, %v517_v9  }
  0x2b   : > { %828 = vperm.xlu0 %21624, %v780_v11  }
  0x2e   : > { %1087 = vperm.xlu1 %21625, %v1043_v12  }
  0x2f   : > { %569 = vperm.xlu0 %21624, %v518_v13  }
  0x32   : > { %574 = vperm.xlu1 %21625, %v519_v14  }
  0x33   : > { %1606 = vperm.xlu0 %21624, %v779_v10  }
  0x36   : > { %1611 = vperm.xlu1 %21625, %v780_v11  }
  0x37   : > { %1092 = vperm.xlu0 %21624, %v1044_v15  }
  0x3a   : > { %1352 = vperm.xlu1 %21625, %v518_v13  }
  0x3b   : > { %833 = vperm.xlu0 %21624, %v781_v16  }
  0x3e   : > { %838 = vperm.xlu1 %21625, %v782_v17  }
  0x3f   : > { %1870 = vperm.xlu0 %21624, %v1043_v12  }
  0x42   : > { %1875 = vperm.xlu1 %21625, %v1044_v15  }
  0x43   : > { %1357 = vperm.xlu0 %21624, %v519_v14  }
  0x46   : > { %1097 = vperm.xlu1 %21625, %v1045_v18  }
  0x47   : > { %579 = vperm.xlu0 %21624, %v520_v19  }
  0x4a   : > { %2135 = vperm.xlu1 %21625, %v518_v13   ;;  %v22105_v13 = vld [vmem:[%s21867_s23 + $0x91] sm:$0xff] }
  0x4b   : > { %1616 = vperm.xlu0 %21624, %v781_v16  }
  0x4e   : > { %1102 = vperm.xlu1 %21625, %v21888_v20  }
  0x4f   : > { %584 = vperm.xlu0 %21624, %v21891_v21  }
  0x52   : > { %2140 = vperm.xlu1 %21625, %v519_v14  }
  0x53   : > { %1621 = vperm.xlu0 %21624, %v782_v17  }
  0x56   : > { %1362 = vperm.xlu1 %21625, %v520_v19  }
  0x57   : > { %843 = vperm.xlu0 %21624, %v21896_v22  }
  0x5a   : > { %2399 = vperm.xlu1 %21625, %v781_v16  }
  0x5b   : > { %1880 = vperm.xlu0 %21624, %v1045_v18  }
  0x5e   : > { %1367 = vperm.xlu1 %21625, %v21891_v21  }
  0x5f   : > { %848 = vperm.xlu0 %21624, %v21900_v23  }
  0x62   : > { %2404 = vperm.xlu1 %21625, %v782_v17  }
  0x63   : > { %1885 = vperm.xlu0 %21624, %v21888_v20  }
  0x66   : > { %1107 = vperm.xlu1 %21625, %v21906_v24  }
  0x67   : > { %589 = vperm.xlu0 %21624, %v21909_v25  }
  0x6a   : > { %2145 = vperm.xlu1 %21625, %v520_v19  }
  0x6b   : > { %1626 = vperm.xlu0 %21624, %v21896_v22  }
  0x6e   : > { %594 = vperm.xlu1 %21625, %v21915_v26  }
  0x6f   : > { %2663 = vperm.xlu0 %21624, %v1045_v18   ;;  %v22117_v18 = vld [vmem:[%s21867_s23 + $0x99] sm:$0xff] }
  0x72   : > { %1631 = vperm.xlu1 %21625, %v21900_v23  }
  0x73   : > { %1112 = vperm.xlu0 %21624, %v21919_v27  }
  0x76   : > { %2668 = vperm.xlu1 %21625, %v21888_v20  }
  0x77   : > { %2150 = vperm.xlu0 %21624, %v21891_v21  }
  0x7a   : > { %1372 = vperm.xlu1 %21625, %v21909_v25  }
  0x7b   : > { %853 = vperm.xlu0 %21624, %v785_v35  }
  0x7e   : > { %2409 = vperm.xlu1 %21625, %v21896_v22  }
  0x7f   : > { %1890 = vperm.xlu0 %21624, %v21906_v24  }
  0x82   : > { %1377 = vperm.xlu1 %21625, %v21915_v26  }
  0x83   : > { %858 = vperm.xlu0 %21624, %v786_v44  }
  0x86   : > { %2414 = vperm.xlu1 %21625, %v21900_v23   ;;  %v22128_v23 = vld [vmem:[%s21867_s23 + $0x92] sm:$0xff] }
  0x87   : > { %1895 = vperm.xlu0 %21624, %v21919_v27  }
  0x8a   : > { %1117 = vperm.xlu1 %21625, %v1049_v45  }
  0x8b   : > { %599 = vperm.xlu0 %21624, %v524_v46  }
  0x8e   : > { %2155 = vperm.xlu1 %21625, %v21909_v25  }
  0x8f   : > { %1636 = vperm.xlu0 %21624, %v785_v35  }
  0x92   : > { %604 = vperm.xlu1 %21625, %v525_v47  }
  0x93   : > { %2673 = vperm.xlu0 %21624, %v21906_v24   ;;  %v22131_v24 = vld [vmem:[%s21867_s23 + $0xa8] sm:$0xff] }
  0x95   : > { %v22049_v49 = vpop.permute.xlu1 %813 }
  0x96   : > { %v22051_v50 = vpop.permute.xlu0 %549  ;;  %1641 = vperm.xlu1 %21625, %v786_v44  }
  0x97   : > { %1122 = vperm.xlu0 %21624, %v1050_v48   ;;  %v713_v34 = vmul.f32 %v22147_v29, %v22051_v50 }
  0x99   : > { %v22053_v51 = vpop.permute.xlu1 %818 }
  0x9a   : > { %v22055_v52 = vpop.permute.xlu0 %554  ;;  %2678 = vperm.xlu1 %21625, %v21919_v27  }
  0x9b   : > { %2160 = vperm.xlu0 %21624, %v21915_v26  }
  0x9d   : > { %v22060_v54 = vpop.permute.xlu1 %1077 }
  0x9e   : > { %v22062_v55 = vpop.permute.xlu0 %559  ;;  %1382 = vperm.xlu1 %21625, %v524_v46  }
  0x9f   : > { %863 = vperm.xlu0 %21624, %v787_v53  }
  0xa1   : > { %v22064_v56 = vpop.permute.xlu1 %1082 }
  0xa2   : > { %v22066_v57 = vpop.permute.xlu0 %564  ;;  %2419 = vperm.xlu1 %21625, %v785_v35   ;;  %v22160_v35 = vld [vmem:[%s27448_s1 + $0x1] ss:$0 sm:$0xff] }
  0xa3   : > { %1900 = vperm.xlu0 %21624, %v1049_v45   ;;  %v977_v42 = vmul.f32 %v22160_v35, %v22049_v49 }
  0xa5   : > { %v22069_v59 = vpop.permute.xlu1 %1342 }
  0xa6   : > { %v22071_v60 = vpop.permute.xlu0 %823  ;;  %1387 = vperm.xlu1 %21625, %v525_v47  }
  0xa7   : > { %868 = vperm.xlu0 %21624, %v788_v58  }
  0xa9   : > { %v22073_v61 = vpop.permute.xlu1 %1347 }
  0xaa   : > { %v22075_v62 = vpop.permute.xlu0 %828  ;;  %2424 = vperm.xlu1 %21625, %v786_v44   ;;  %v745_v44 = vadd.f32 %v22165_v36, %v713_v34 }
  0xab   : > { %1905 = vperm.xlu0 %21624, %v1050_v48  }
  0xad   : > { %v22079_v1 = vpop.permute.xlu1 %1087 }
  0xae   : > { %v22081_v2 = vpop.permute.xlu0 %569  ;;  %1127 = vperm.xlu1 %21625, %v1051_v63  }
  0xaf   : > { %609 = vperm.xlu0 %21624, %v526_v0  }
  0xb1   : > { %v22083_v3 = vpop.permute.xlu1 %574 }
  0xb2   : > { %v22085_v4 = vpop.permute.xlu0 %1606  ;;  %2165 = vperm.xlu1 %21625, %v524_v46   ;;  %v1241_v46 = vmul.f32 %v22173_v38, %v22060_v54  ;;  %v22206_v54 = vld [vmem:[%s27448_s1 + $0x5] ss:$0 sm:$0xff] }
  0xb3   : > { %1646 = vperm.xlu0 %21624, %v787_v53  }
  0xb5   : > { %v22090_v6 = vpop.permute.xlu1 %1611 }
  0xb6   : > { %v22092_v7 = vpop.permute.xlu0 %1092  ;;  %614 = vperm.xlu1 %21625, %v22088_v5  }
  0xb7   : > { %2683 = vperm.xlu0 %21624, %v1049_v45   ;;  %v22187_v45 = vld [vmem:[%s27448_s1 + $0x3] ss:$0 sm:$0xff] }
  0xb9   : > { %v22096_v9 = vpop.permute.xlu1 %1352 }
  0xba   : > { %v22098_v10 = vpop.permute.xlu0 %833  ;;  %1651 = vperm.xlu1 %21625, %v788_v58  }
  0xbb   : > { %1132 = vperm.xlu0 %21624, %v1052_v8  }
  0xbd   : > { %v22100_v11 = vpop.permute.xlu1 %838 }
  0xbe   : > { %v22102_v12 = vpop.permute.xlu0 %1870  ;;  %2688 = vperm.xlu1 %21625, %v1050_v48   ;;  %v22196_v48 = vld [vmem:[%s27448_s1 + $0x4] ss:$0 sm:$0xff] }
  0xbf   : > { %2170 = vperm.xlu0 %21624, %v525_v47   ;;  %v714_v47 = vmul.f32 %v22147_v29, %v22055_v52  ;;  %v22209_v52 = vld [vmem:[%s21867_s23 + $0xa9] sm:$0xff] }
  0xc1   : > { %v22107_v14 = vpop.permute.xlu1 %1875  ;;  %v746_v34 = vadd.f32 %v22165_v36, %v714_v47  ;;  %v22234_v47 = vld [vmem:[%s27448_s1 + $0x7] ss:$0 sm:$0xff] }
  0xc2   : > { %v22109_v15 = vpop.permute.xlu0 %1357  ;;  %1392 = vperm.xlu1 %21625, %v526_v0  }
  0xc3   : > { %873 = vperm.xlu0 %21624, %v22105_v13  }
  0xc5   : > { %v22112_v16 = vpop.permute.xlu1 %1097 }
  0xc6   : > { %v22114_v17 = vpop.permute.xlu0 %579  ;;  %2429 = vperm.xlu1 %21625, %v787_v53   ;;  %v1009_v53 = vadd.f32 %v977_v42, %v745_v44  ;;  %v2034_v44 = vmul.f32 %v22206_v54, %v22102_v12 }
  0xc7   : > { %1910 = vperm.xlu0 %21624, %v1051_v63  }
  0xc9   : > { %v2136_v19 = vpop.permute.xlu1 %2135 }
  0xca   : > { %v22119_v20 = vpop.permute.xlu0 %1616  ;;  %1397 = vperm.xlu1 %21625, %v22088_v5  }
  0xcb   : > { %878 = vperm.xlu0 %21624, %v22117_v18  }
  0xcd   : > { %v22123_v21 = vpop.permute.xlu1 %1102 }
  0xce   : > { %v22125_v22 = vpop.permute.xlu0 %584  ;;  %2434 = vperm.xlu1 %21625, %v788_v58   ;;  %v1506_v58 = vmul.f32 %v22187_v45, %v22069_v59  ;;  %v22217_v59 = vld [vmem:[%s27448_s1 + $0x6] ss:$0 sm:$0xff] }
  0xcf   : > { %1915 = vperm.xlu0 %21624, %v1052_v8  }
  0xd1   : > { %v22133_v25 = vpop.permute.xlu1 %2140 }
  0xd2   : > { %v22135_v26 = vpop.permute.xlu0 %1621  ;;  %1137 = vperm.xlu1 %21625, %v22128_v23  }
  0xd3   : > { %619 = vperm.xlu0 %21624, %v22131_v24  }
  0xd5   : > { %v22139_v27 = vpop.permute.xlu1 %1362 }
  0xd6   : > { %v22141_v28 = vpop.permute.xlu0 %843  ;;  %2175 = vperm.xlu1 %21625, %v526_v0   ;;  %v1770_v0 = vmul.f32 %v22196_v48, %v22085_v4  ;;  %v978_v4 = vmul.f32 %v22160_v35, %v22053_v51 }
  0xd7   : > { %1656 = vperm.xlu0 %21624, %v22105_v13  }
  0xd8   : > { %v1010_v12 = vadd.f32 %v978_v4, %v746_v34 }
  0xd9   : > { %v2400_v32 = vpop.permute.xlu1 %2399 }
  0xda   : > { %v22152_v33 = vpop.permute.xlu0 %1880  ;;  %624 = vperm.xlu1 %21625, %v22150_v30   ;;  %v2563_v40 = vmul.f32 %v22234_v47, %v2400_v32 }
  0xdb   : > { %2693 = vperm.xlu0 %21624, %v1051_v63   ;;  %v1273_v63 = vadd.f32 %v1241_v46, %v1009_v53  ;;  %v1242_v46 = vmul.f32 %v22173_v38, %v22064_v56 }
  0xdd   : > { %v22175_v39 = vpop.permute.xlu1 %1367  ;;  %v1538_v42 = vadd.f32 %v1506_v58, %v1273_v63  ;;  %v2299_v58 = vmul.f32 %v22217_v59, %v2136_v19  ;;  %v1507_v63 = vmul.f32 %v22187_v45, %v22073_v61  ;;  %v1274_v56 = vadd.f32 %v1242_v46, %v1010_v12  ;;  %v22249_v19 = vld [vmem:[%s27448_s1 + $0x8] ss:$0 sm:$0xff] }
  0xde   : > { %v22177_v41 = vpop.permute.xlu0 %848  ;;  %1661 = vperm.xlu1 %21625, %v22117_v18   ;;  %v1771_v61 = vmul.f32 %v22196_v48, %v22090_v6  ;;  %v2300_v6 = vmul.f32 %v22217_v59, %v22133_v25 }
  0xdf   : > { %1142 = vperm.xlu0 %21624, %v22168_v37   ;;  %v1802_v53 = vadd.f32 %v1770_v0, %v1538_v42  ;;  %v22252_v0 = vld [vmem:[%s21867_s23 + $0xb1] sm:$0xff]  ;;  %v1539_v42 = vadd.f32 %v1507_v63, %v1274_v56 }
  0xe1   : > { %v2405_v49 = vpop.permute.xlu1 %2404  ;;  %v2066_v51 = vadd.f32 %v2034_v44, %v1802_v53  ;;  %v1803_v53 = vadd.f32 %v1771_v61, %v1539_v42 }
  0xe2   : > { %v22198_v50 = vpop.permute.xlu0 %1885  ;;  %2698 = vperm.xlu1 %21625, %v1052_v8  }
  0xe3   : > { %2180 = vperm.xlu0 %21624, %v22088_v5   ;;  %v2331_v34 = vadd.f32 %v2299_v58, %v2066_v51 }
  0xe5   : > { %v22219_v8 = vpop.permute.xlu1 %1107  ;;  %v2595_v4 = vadd.f32 %v2563_v40, %v2331_v34  ;;  %v22273_v40 = vld [vmem:[%s21867_s23 + $0xaa] sm:$0xff]  ;;  %v22276_v34 = vld [vmem:[%s21867_s23 + $0xc0] sm:$0xff] }
  0xe6   : > { %v22221_v5 = vpop.permute.xlu0 %589  ;;  %1402 = vperm.xlu1 %21625, %v22131_v24  }
  0xe7   : > { %883 = vperm.xlu0 %21624, %v22209_v52  }
  0xe9   : > { %v22239_v31 = vpop.permute.xlu1 %2145 }
  0xea   : > { %v22241_v43 = vpop.permute.xlu0 %1626  ;;  %2439 = vperm.xlu1 %21625, %v22105_v13   ;;  %v2035_v13 = vmul.f32 %v22206_v54, %v22107_v14  ;;  %v2564_v14 = vmul.f32 %v22234_v47, %v2405_v49 }
  0xeb   : > { %1920 = vperm.xlu0 %21624, %v22128_v23  }
  0xec   : > { %v2067_v51 = vadd.f32 %v2035_v13, %v1803_v53 }
  0xed   : > { %v22256_v44 = vpop.permute.xlu1 %594 }
  0xee   : > { %v2664_v32 = vpop.permute.xlu0 %2663  ;;  %1407 = vperm.xlu1 %21625, %v22150_v30   ;;  %v2332_v61 = vadd.f32 %v2300_v6, %v2067_v51  ;;  %v22291_v6 = vld [vmem:[%s21867_s23 + $0xc8] sm:$0xff] }
  0xef   : > { %v2827_v46 = vmul.f32 %v22249_v19, %v2664_v32  ;;  %888 = vperm.xlu0 %21624, %v22252_v0  }
  0xf0   : > { %v2596_v32 = vadd.f32 %v2564_v14, %v2332_v61  ;;  %v22301_v14 = vld [vmem:[%s21867_s23 + $0xb2] sm:$0xff] }
  0xf1   : > { %v2859_v58 = vadd.f32 %v2827_v46, %v2595_v4  ;;  %v22265_v12 = vpop.permute.xlu1 %1631 }
  0xf2   : > { %v22267_v63 = vpop.permute.xlu0 %1112  ;;  %2444 = vperm.xlu1 %21625, %v22117_v18  }
  0xf3   : > { %v2891_v56 = vmax.f32 %v2859_v58, 0.0  ;;  %1925 = vperm.xlu0 %21624, %v22168_v37  }
  0xf5   : > { %2924 = vst.msk [vmem:[#allocation2 + $0x19] sm:$0xff] %vm389_vm0, %v2891_v56  ;;  %v2669_v25 = vpop.permute.xlu1 %2668 }
  0xf6   : > { %v22279_v42 = vpop.permute.xlu0 %2150  ;;  %v2828_v13 = vmul.f32 %v22249_v19, %v2669_v25  ;;  %1147 = vperm.xlu1 %21625, %v22273_v40   ;;  %v979_v25 = vmul.f32 %v22160_v35, %v22071_v60  ;;  %v1508_v60 = vmul.f32 %v22187_v45, %v22096_v9 }
  0xf7   : > { %629 = vperm.xlu0 %21624, %v22276_v34  }
  0xf8   : > { %v2860_v18 = vadd.f32 %v2828_v13, %v2596_v32  ;;  %v1243_v13 = vmul.f32 %v22173_v38, %v22079_v1 }
  0xf9   : > { %v22284_v49 = vpop.permute.xlu1 %1372 }
  0xfa   : > { %v22286_v4 = vpop.permute.xlu0 %853  ;;  %v2892_v46 = vmax.f32 %v2860_v18, 0.0  ;;  %2185 = vperm.xlu1 %21625, %v22131_v24   ;;  %v715_v24 = vmul.f32 %v22147_v29, %v22062_v55 }
  0xfb   : > { %1666 = vperm.xlu0 %21624, %v22209_v52  }
  0xfc   : > { %v2966_v53 = vld [vmem:[#allocation2 + $0x18] sm:$0xff]  ;;  %2925 = vst.msk [vmem:[#allocation2 + $0x21] sm:$0xff] %vm389_vm0, %v2892_v46 }
  0xfd   : > { %18416 = vmatprep.mubr.msk.f32.mxu1 %vm389_vm0, %v2966_v53  ;;  %18581 = vmatprep.mubr.msk.f32.mxu0 %vm389_vm0, %v2966_v53  ;;  %v2410_v58 = vpop.permute.xlu1 %2409  ;;  %v716_v53 = vmul.f32 %v22147_v29, %v22066_v57 }
  0xfe   : > { %v22296_v51 = vpop.permute.xlu0 %1890  ;;  %634 = vperm.xlu1 %21625, %v22291_v6  }
  0xff   : > { %2703 = vperm.xlu0 %21624, %v22128_v23   ;;  %v747_v23 = vadd.f32 %v22165_v36, %v715_v24  ;;  %v22327_v24 = vld [vmem:[%s21867_s23 + $0xc1] sm:$0xff]  ;;  %v748_v57 = vadd.f32 %v22165_v36, %v716_v53  ;;  %v22356_v53 = vld [vmem:[%s21867_s23 + $0xc9] sm:$0xff] }
 0x101   : > { %v22305_v56 = vpop.permute.xlu1 %1377  ;;  %v1011_v46 = vadd.f32 %v979_v25, %v747_v23 }
 0x102   : > { %v22307_v61 = vpop.permute.xlu0 %858  ;;  %1671 = vperm.xlu1 %21625, %v22252_v0  }
 0x103   : > { %27625 = vst [vmem:[#allocation8_spill] sm:$0xff] %v22307_v61  ;;  %1152 = vperm.xlu0 %21624, %v22301_v14   ;;  %v2967_v32 = vld [vmem:[#allocation2 + $0x20] sm:$0xff]  ;;  %v1275_v1 = vadd.f32 %v1243_v13, %v1011_v46  ;;  %v980_v61 = vmul.f32 %v22160_v35, %v22075_v62  ;;  %v2301_v62 = vmul.f32 %v22217_v59, %v22239_v31 }
 0x104   : > { %18417 = vmatmul.mubr.msk.f32.gmra.mrb[2].mxu1 %vm389_vm0, %v2967_v32  ;;  %18582 = vmatmul.mubr.msk.f32.vlgmr.msra.gmra.mrb[0].mxu0 %vm389_vm0, %v2967_v32  ;;  %v1772_v32 = vmul.f32 %v22196_v48, %v22119_v20  ;;  %v1244_v20 = vmul.f32 %v22173_v38, %v22092_v7  ;;  %v1509_v46 = vmul.f32 %v22187_v45, %v22109_v15 }
 0x105   : > { %v2415_v55 = vpop.permute.xlu1 %2414  ;;  %v1540_v9 = vadd.f32 %v1508_v60, %v1275_v1  ;;  %v1012_v13 = vadd.f32 %v980_v61, %v748_v57  ;;  %v1773_v31 = vmul.f32 %v22196_v48, %v22135_v26  ;;  %v2302_v26 = vmul.f32 %v22217_v59, %v22279_v42 }
 0x106   : > { %v22318_v18 = vpop.permute.xlu0 %1895  ;;  %2708 = vperm.xlu1 %21625, %v22168_v37  }
 0x107   : > { %2190 = vperm.xlu0 %21624, %v22150_v30   ;;  %v2036_v30 = vmul.f32 %v22206_v54, %v22152_v33  ;;  %v1804_v37 = vadd.f32 %v1772_v32, %v1540_v9  ;;  %v1276_v7 = vadd.f32 %v1244_v20, %v1012_v13 }
 0x109   : > { %v22333_v25 = vpop.permute.xlu1 %1117  ;;  %v2068_v1 = vadd.f32 %v2036_v30, %v1804_v37  ;;  %v1541_v32 = vadd.f32 %v1509_v46, %v1276_v7  ;;  %v2037_v30 = vmul.f32 %v22206_v54, %v22198_v50  ;;  %v2566_v50 = vmul.f32 %v22234_v47, %v2415_v55 }
 0x10a   : > { %v22335_v23 = vpop.permute.xlu0 %599  ;;  %1412 = vperm.xlu1 %21625, %v22276_v34  }
 0x10b   : > { %27626 = vst [vmem:[#allocation9_spill] sm:$0xff] %v22335_v23  ;;  %893 = vperm.xlu0 %21624, %v22327_v24   ;;  %v2565_v23 = vmul.f32 %v22234_v47, %v2410_v58  ;;  %v2333_v61 = vadd.f32 %v2301_v62, %v2068_v1  ;;  %v1805_v57 = vadd.f32 %v1773_v31, %v1541_v32  ;;  %v22380_v1 = vld [vmem:[%s21867_s23 + $0xd8] sm:$0xff] }
 0x10d   : > { %v22348_v60 = vpop.permute.xlu1 %2155  ;;  %v2597_v58 = vadd.f32 %v2565_v23, %v2333_v61  ;;  %v2069_v13 = vadd.f32 %v2037_v30, %v1805_v57  ;;  %v22377_v23 = vld [vmem:[%s21867_s23 + $0xc2] sm:$0xff] }
 0x10e   : > { %v22350_v33 = vpop.permute.xlu0 %1636  ;;  %2449 = vperm.xlu1 %21625, %v22209_v52  }
 0x10f   : > { %1930 = vperm.xlu0 %21624, %v22273_v40   ;;  %v2334_v7 = vadd.f32 %v2302_v26, %v2069_v13 }
 0x111   : > { %v22360_v15 = vpop.permute.xlu1 %604  ;;  %v2598_v61 = vadd.f32 %v2566_v50, %v2334_v7 }
 0x112   : > { %v2674_v9 = vpop.permute.xlu0 %2673  ;;  %1417 = vperm.xlu1 %21625, %v22291_v6  }
 0x113   : > { %v2829_v52 = vmul.f32 %v22249_v19, %v2674_v9  ;;  %898 = vperm.xlu0 %21624, %v22356_v53  }
 0x115   : > { %v2861_v20 = vadd.f32 %v2829_v52, %v2597_v58  ;;  %v22369_v37 = vpop.permute.xlu1 %1641  ;;  %v22395_v52 = vld [vmem:[%s21867_s23 + $0xe0] sm:$0xff] }
 0x116   : > { %v22371_v62 = vpop.permute.xlu0 %1122  ;;  %2454 = vperm.xlu1 %21625, %v22252_v0  }
 0x117   : > { %v2893_v46 = vmax.f32 %v2861_v20, 0.0  ;;  %1935 = vperm.xlu0 %21624, %v22301_v14   ;;  %v22405_v20 = vld [vmem:[%s21867_s23 + $0xca] sm:$0xff] }
 0x119   : > { %2926 = vst.msk [vmem:[#allocation2 + $0x31] sm:$0xff] %vm389_vm0, %v2893_v46  ;;  %v2679_v42 = vpop.permute.xlu1 %2678  ;;  %v981_v46 = vmul.f32 %v22160_v35, %v22098_v10  ;;  %v1510_v10 = vmul.f32 %v22187_v45, %v22139_v27 }
 0x11a   : > { %v22383_v31 = vpop.permute.xlu0 %2160  ;;  %v2830_v32 = vmul.f32 %v22249_v19, %v2679_v42  ;;  %1157 = vperm.xlu1 %21625, %v22377_v23   ;;  %v1245_v42 = vmul.f32 %v22173_v38, %v22112_v16 }
 0x11b   : > { %639 = vperm.xlu0 %21624, %v22380_v1  }
 0x11c   : > { %v2862_v0 = vadd.f32 %v2830_v32, %v2598_v61 }
 0x11d   : > { %v22388_v55 = vpop.permute.xlu1 %1382 }
 0x11e   : > { %v22390_v9 = vpop.permute.xlu0 %863  ;;  %v2894_v30 = vmax.f32 %v2862_v0, 0.0  ;;  %2195 = vperm.xlu1 %21625, %v22276_v34   ;;  %v717_v34 = vmul.f32 %v22147_v29, %v22081_v2  ;;  %v718_v0 = vmul.f32 %v22147_v29, %v22083_v3 }
 0x11f   : > { %1676 = vperm.xlu0 %21624, %v22327_v24  }
 0x120   : > { %v2968_v58 = vld [vmem:[#allocation2 + $0x30] sm:$0xff]  ;;  %2927 = vst.msk [vmem:[#allocation2 + $0x39] sm:$0xff] %vm389_vm0, %v2894_v30  ;;  %v22431_v30 = vld [vmem:[%s21867_s23 + $0xd9] sm:$0xff]  ;;  %v750_v3 = vadd.f32 %v22165_v36, %v718_v0  ;;  %v22460_v0 = vld [vmem:[%s21867_s23 + $0xe1] sm:$0xff] }
 0x121   : > { %18419 = vmatprep.mubr.msk.f32.mxu1 %vm389_vm0, %v2968_v58  ;;  %18584 = vmatprep.mubr.msk.f32.mxu0 %vm389_vm0, %v2968_v58  ;;  %v2420_v57 = vpop.permute.xlu1 %2419  ;;  %v1774_v58 = vmul.f32 %v22196_v48, %v22241_v43  ;;  %v1246_v43 = vmul.f32 %v22173_v38, %v22123_v21 }
 0x122   : > { %v22400_v26 = vpop.permute.xlu0 %1900  ;;  %644 = vperm.xlu1 %21625, %v22395_v52  }
 0x123   : > { %2713 = vperm.xlu0 %21624, %v22273_v40   ;;  %v749_v40 = vadd.f32 %v22165_v36, %v717_v34  ;;  %v982_v34 = vmul.f32 %v22160_v35, %v22100_v11  ;;  %v2303_v11 = vmul.f32 %v22217_v59, %v22348_v60  ;;  %v1775_v60 = vmul.f32 %v22196_v48, %v22265_v12 }
 0x124   : > { %v2304_v12 = vmul.f32 %v22217_v59, %v22383_v31 }
 0x125   : > { %v22409_v13 = vpop.permute.xlu1 %1387  ;;  %v1013_v32 = vadd.f32 %v981_v46, %v749_v40  ;;  %v1014_v40 = vadd.f32 %v982_v34, %v750_v3 }
 0x126   : > { %v22411_v50 = vpop.permute.xlu0 %868  ;;  %1681 = vperm.xlu1 %21625, %v22356_v53  }
 0x127   : > { %1162 = vperm.xlu0 %21624, %v22405_v20   ;;  %v2969_v7 = vld [vmem:[#allocation2 + $0x38] sm:$0xff]  ;;  %v1277_v16 = vadd.f32 %v1245_v42, %v1013_v32  ;;  %v1511_v42 = vmul.f32 %v22187_v45, %v22175_v39  ;;  %v1278_v21 = vadd.f32 %v1246_v43, %v1014_v40 }
 0x128   : > { %18420 = vmatmul.mubr.msk.f32.gmra.mrb[4].mxu1 %vm389_vm0, %v2969_v7  ;;  %18585 = vmatmul.mubr.msk.f32.gmra.mrb[2].mxu0 %vm389_vm0, %v2969_v7 }
 0x129   : > { %v2425_v2 = vpop.permute.xlu1 %2424  ;;  %v1542_v27 = vadd.f32 %v1510_v10, %v1277_v16  ;;  %v2567_v16 = vmul.f32 %v22234_v47, %v2420_v57  ;;  %v1543_v34 = vadd.f32 %v1511_v42, %v1278_v21 }
 0x12a   : > { %v22422_v61 = vpop.permute.xlu0 %1905  ;;  %2718 = vperm.xlu1 %21625, %v22301_v14   ;;  %v2568_v42 = vmul.f32 %v22234_v47, %v2425_v2 }
 0x12b   : > { %2200 = vperm.xlu0 %21624, %v22291_v6   ;;  %v2038_v6 = vmul.f32 %v22206_v54, %v22296_v51  ;;  %v1806_v14 = vadd.f32 %v1774_v58, %v1542_v27  ;;  %v1807_v3 = vadd.f32 %v1775_v60, %v1543_v34 }
 0x12d   : > { %v22437_v46 = vpop.permute.xlu1 %1127  ;;  %v2070_v10 = vadd.f32 %v2038_v6, %v1806_v14  ;;  %v2039_v6 = vmul.f32 %v22206_v54, %v22318_v18 }
 0x12e   : > { %v22439_v7 = vpop.permute.xlu0 %609  ;;  %1422 = vperm.xlu1 %21625, %v22380_v1  }
 0x12f   : > { %903 = vperm.xlu0 %21624, %v22431_v30   ;;  %v2335_v58 = vadd.f32 %v2303_v11, %v2070_v10  ;;  %v2071_v40 = vadd.f32 %v2039_v6, %v1807_v3  ;;  %v22481_v10 = vld [vmem:[%s21867_s23 + $0xda] sm:$0xff] }
 0x131   : > { %v22452_v32 = vpop.permute.xlu1 %2165  ;;  %v2599_v57 = vadd.f32 %v2567_v16, %v2335_v58  ;;  %v2336_v16 = vadd.f32 %v2304_v12, %v2071_v40 }
 0x132   : > { %v22454_v51 = vpop.permute.xlu0 %1646  ;;  %2459 = vperm.xlu1 %21625, %v22327_v24  }
 0x133   : > { %1940 = vperm.xlu0 %21624, %v22377_v23   ;;  %v2600_v60 = vadd.f32 %v2568_v42, %v2336_v16  ;;  %v22516_v42 = vld [vmem:[%s21867_s23 + $0xf0] sm:$0xff] }
 0x135   : > { %v22464_v39 = vpop.permute.xlu1 %614 }
 0x136   : > { %v2684_v27 = vpop.permute.xlu0 %2683  ;;  %1427 = vperm.xlu1 %21625, %v22395_v52  }
 0x137   : > { %v2831_v24 = vmul.f32 %v22249_v19, %v2684_v27  ;;  %908 = vperm.xlu0 %21624, %v22460_v0  }
 0x139   : > { %v2863_v43 = vadd.f32 %v2831_v24, %v2599_v57  ;;  %v22473_v14 = vpop.permute.xlu1 %1651  ;;  %v22496_v57 = vld [vmem:[%s21867_s23 + $0xe2] sm:$0xff] }
 0x13a   : > { %v22475_v11 = vpop.permute.xlu0 %1132  ;;  %2464 = vperm.xlu1 %21625, %v22356_v53  }
 0x13b   : > { %v2895_v18 = vmax.f32 %v2863_v43, 0.0  ;;  %1945 = vperm.xlu0 %21624, %v22405_v20   ;;  %v983_v43 = vmul.f32 %v22160_v35, %v22141_v28 }
 0x13d   : > { %2928 = vst.msk [vmem:[#allocation2 + $0x49] sm:$0xff] %vm389_vm0, %v2895_v18  ;;  %v2689_v31 = vpop.permute.xlu1 %2688 }
 0x13e   : > { %v22484_v21 = vpop.permute.xlu0 %2170  ;;  %v2832_v58 = vmul.f32 %v22249_v19, %v2689_v31  ;;  %1686 = vperm.xlu1 %21625, %v22431_v30  }
 0x13f   : > { %1167 = vperm.xlu0 %21624, %v22481_v10  }
 0x140   : > { %v2864_v2 = vadd.f32 %v2832_v58, %v2600_v60  ;;  %v22532_v60 = vld [vmem:[%s21867_s23 + $0xf8] sm:$0xff]  ;;  %v1776_v58 = vmul.f32 %v22196_v48, %v22350_v33  ;;  %v1248_v33 = vmul.f32 %v22173_v38, %v22267_v63 }
 0x141   : > { %v22489_v53 = vpop.permute.xlu1 %1392 }
 0x142   : > { %v22491_v34 = vpop.permute.xlu0 %873  ;;  %v2896_v27 = vmax.f32 %v2864_v2, 0.0  ;;  %2723 = vperm.xlu1 %21625, %v22377_v23   ;;  %v719_v23 = vmul.f32 %v22147_v29, %v22114_v17  ;;  %v1247_v17 = vmul.f32 %v22173_v38, %v22219_v8  ;;  %v984_v2 = vmul.f32 %v22160_v35, %v22177_v41 }
 0x143   : > { %2205 = vperm.xlu0 %21624, %v22380_v1   ;;  %v2305_v41 = vmul.f32 %v22217_v59, %v22452_v32  ;;  %v1777_v32 = vmul.f32 %v22196_v48, %v22369_v37  ;;  %v2306_v37 = vmul.f32 %v22217_v59, %v22484_v21 }
 0x144   : > { %v2970_v6 = vld [vmem:[#allocation2 + $0x48] sm:$0xff]  ;;  %2929 = vst.msk [vmem:[#allocation2 + $0x51] sm:$0xff] %vm389_vm0, %v2896_v27  ;;  %v751_v18 = vadd.f32 %v22165_v36, %v719_v23  ;;  %v2040_v23 = vmul.f32 %v22206_v54, %v22400_v26 }
 0x145   : > { %18422 = vmatprep.mubr.msk.f32.mxu1 %vm389_vm0, %v2970_v6  ;;  %18587 = vmatprep.mubr.msk.f32.mxu0 %vm389_vm0, %v2970_v6  ;;  %v2430_v24 = vpop.permute.xlu1 %2429 }
 0x146   : > { %v22501_v3 = vpop.permute.xlu0 %1910  ;;  %1691 = vperm.xlu1 %21625, %v22460_v0   ;;  %v1015_v28 = vadd.f32 %v983_v43, %v751_v18  ;;  %v1513_v18 = vmul.f32 %v22187_v45, %v22305_v56 }
 0x147   : > { %1172 = vperm.xlu0 %21624, %v22496_v57  }
 0x148   : > { %v1279_v8 = vadd.f32 %v1247_v17, %v1015_v28 }
 0x149   : > { %v22507_v1 = vpop.permute.xlu1 %1397 }
 0x14a   : > { %v22509_v12 = vpop.permute.xlu0 %878  ;;  %2728 = vperm.xlu1 %21625, %v22405_v20   ;;  %v1512_v20 = vmul.f32 %v22187_v45, %v22284_v49 }
 0x14b   : > { %2210 = vperm.xlu0 %21624, %v22395_v52   ;;  %v2971_v40 = vld [vmem:[#allocation2 + $0x50] sm:$0xff]  ;;  %v720_v52 = vmul.f32 %v22147_v29, %v22125_v22 }
 0x14c   : > { %18423 = vmatmul.mubr.msk.f32.gmra.mrb[6].mxu1 %vm389_vm0, %v2971_v40  ;;  %18588 = vmatmul.mubr.msk.f32.gmra.mrb[4].mxu0 %vm389_vm0, %v2971_v40  ;;  %v1544_v49 = vadd.f32 %v1512_v20, %v1279_v8  ;;  %v22561_v20 = vld [vmem:[%s21867_s23 + $0xf1] sm:$0xff] }
 0x14d   : > { %v2435_v16 = vpop.permute.xlu1 %2434  ;;  %v752_v22 = vadd.f32 %v22165_v36, %v720_v52 }
 0x14e   : > { %v22523_v31 = vpop.permute.xlu0 %1915  ;;  %1950 = vperm.xlu1 %21625, %v22481_v10   ;;  %v1808_v43 = vadd.f32 %v1776_v58, %v1544_v49 }
 0x14f   : > { %1432 = vperm.xlu0 %21624, %v22516_v42   ;;  %v1016_v40 = vadd.f32 %v984_v2, %v752_v22  ;;  %v2041_v2 = vmul.f32 %v22206_v54, %v22422_v61 }
 0x150   : > { %v2072_v28 = vadd.f32 %v2040_v23, %v1808_v43 }
 0x151   : > { %v22538_v27 = vpop.permute.xlu1 %1137  ;;  %v1280_v63 = vadd.f32 %v1248_v33, %v1016_v40 }
 0x152   : > { %v22540_v6 = vpop.permute.xlu0 %619  ;;  %1437 = vperm.xlu1 %21625, %v22532_v60   ;;  %v2337_v52 = vadd.f32 %v2305_v41, %v2072_v28  ;;  %v2570_v41 = vmul.f32 %v22234_v47, %v2435_v16  ;;  %v22591_v16 = vld [vmem:[%s21867_s23 + $0xf2] sm:$0xff] }
 0x153   : > { %27627 = vst [vmem:[#allocation10_spill] sm:$0xff] %v22540_v6  ;;  %2469 = vperm.xlu0 %21624, %v22431_v30   ;;  %v2569_v30 = vmul.f32 %v22234_v47, %v2430_v24  ;;  %v1545_v56 = vadd.f32 %v1513_v18, %v1280_v63 }
 0x155   : > { %v22553_v17 = vpop.permute.xlu1 %2175  ;;  %v2601_v49 = vadd.f32 %v2569_v30, %v2337_v52  ;;  %v1809_v23 = vadd.f32 %v1777_v32, %v1545_v56 }
 0x156   : > { %v22555_v26 = vpop.permute.xlu0 %1656  ;;  %2474 = vperm.xlu1 %21625, %v22460_v0   ;;  %v22573_v0 = vld [vmem:[%s21867_s23 + $0xf9] sm:$0xff] }
 0x157   : > { %1955 = vperm.xlu0 %21624, %v22496_v57   ;;  %v2073_v61 = vadd.f32 %v2041_v2, %v1809_v23  ;;  %v22600_v2 = vld [vmem:[%s21867_s23 + $0xfa] sm:$0xff]  ;;  %v721_v23 = vmul.f32 %v22147_v29, %v22221_v5  ;;  %v1249_v5 = vmul.f32 %v22173_v38, %v22333_v25  ;;  %v722_v25 = vmul.f32 %v22147_v29, %v22256_v44 }
 0x159   : > { %v22565_v8 = vpop.permute.xlu1 %624  ;;  %v2338_v18 = vadd.f32 %v2306_v37, %v2073_v61  ;;  %v985_v61 = vmul.f32 %v22160_v35, %v22286_v4  ;;  %v754_v44 = vadd.f32 %v22165_v36, %v722_v25 }
 0x15a   : > { %27628 = vst [vmem:[#allocation11_spill] sm:$0xff] %v22565_v8  ;;  %v2694_v58 = vpop.permute.xlu0 %2693  ;;  %2215 = vperm.xlu1 %21625, %v22516_v42   ;;  %v2042_v8 = vmul.f32 %v22206_v54, %v22501_v3  ;;  %v1515_v3 = vmul.f32 %v22187_v45, %v22409_v13 }
 0x15b   : > { %v2833_v24 = vmul.f32 %v22249_v19, %v2694_v58  ;;  %1696 = vperm.xlu0 %21624, %v22561_v20   ;;  %v2602_v30 = vadd.f32 %v2570_v41, %v2338_v18  ;;  %v753_v18 = vadd.f32 %v22165_v36, %v721_v23  ;;  %v1778_v23 = vmul.f32 %v22196_v48, %v22454_v51 }
 0x15c   : > { %v1250_v51 = vmul.f32 %v22173_v38, %v22371_v62 }
 0x15d   : > { %v2865_v22 = vadd.f32 %v2833_v24, %v2601_v49  ;;  %v22577_v33 = vpop.permute.xlu1 %1661  ;;  %v22610_v24 = vld [vmem:[%s21867_s23 + $0x108] sm:$0xff] }
 0x15e   : > { %v22579_v43 = vpop.permute.xlu0 %1142  ;;  %1701 = vperm.xlu1 %21625, %v22573_v0  }
 0x15f   : > { %v2897_v40 = vmax.f32 %v2865_v22, 0.0  ;;  %2733 = vperm.xlu0 %21624, %v22481_v10  }
 0x161   : > { %2930 = vst.msk [vmem:[#allocation2 + $0x61] sm:$0xff] %vm389_vm0, %v2897_v40  ;;  %v2699_v28 = vpop.permute.xlu1 %2698  ;;  %v22623_v40 = vld [vmem:[%s21867_s23 + $0x110] sm:$0xff] }
 0x162   : > { %v22585_v21 = vpop.permute.xlu0 %2180  ;;  %v2834_v63 = vmul.f32 %v22249_v19, %v2699_v28  ;;  %2738 = vperm.xlu1 %21625, %v22496_v57  }
 0x163   : > { %2220 = vperm.xlu0 %21624, %v22532_v60  }
 0x164   : > { %v2866_v32 = vadd.f32 %v2834_v63, %v2602_v30  ;;  %v1017_v30 = vadd.f32 %v985_v61, %v753_v18  ;;  %v1514_v63 = vmul.f32 %v22187_v45, %v22388_v55  ;;  %v27631_v61 = vld [vmem:[#allocation8_spill] sm:$0xff] }
 0x165   : > { %v22593_v52 = vpop.permute.xlu1 %1402  ;;  %v986_v55 = vmul.f32 %v22160_v35, %v27631_v61 }
 0x166   : > { %v22595_v10 = vpop.permute.xlu0 %883  ;;  %v2898_v56 = vmax.f32 %v2866_v32, 0.0  ;;  %2479 = vperm.xlu1 %21625, %v22561_v20   ;;  %v22639_v32 = vld [vmem:[%s21867_s23 + $0x111] sm:$0xff] }
 0x167   : > { %27629 = vst [vmem:[#allocation12_spill] sm:$0xff] %v22595_v10  ;;  %1960 = vperm.xlu0 %21624, %v22591_v16  }
 0x168   : > { %v2972_v58 = vld [vmem:[#allocation2 + $0x60] sm:$0xff]  ;;  %2931 = vst.msk [vmem:[#allocation2 + $0x69] sm:$0xff] %vm389_vm0, %v2898_v56  ;;  %v22642_v56 = vld [vmem:[%s21867_s23 + $0x109] sm:$0xff] }
 0x169   : > { %18425 = vmatprep.mubr.msk.f32.mxu1 %vm389_vm0, %v2972_v58  ;;  %18590 = vmatprep.mubr.msk.f32.mxu0 %vm389_vm0, %v2972_v58  ;;  %v2440_v57 = vpop.permute.xlu1 %2439  ;;  %v1281_v58 = vadd.f32 %v1249_v5, %v1017_v30  ;;  %v22660_v5 = vld [vmem:[%s21867_s23 + $0x112] sm:$0xff]  ;;  %v22663_v30 = vld [vmem:[%s21867_s23 + $0x10a] sm:$0xff] }
 0x16a   : > { %v22605_v49 = vpop.permute.xlu0 %1920  ;;  %2484 = vperm.xlu1 %21625, %v22573_v0   ;;  %v2571_v10 = vmul.f32 %v22234_v47, %v2440_v57 }
 0x16b   : > { %1965 = vperm.xlu0 %21624, %v22600_v2  }
 0x16d   : > { %v22614_v37 = vpop.permute.xlu1 %1407 }
 0x16e   : > { %v22616_v22 = vpop.permute.xlu0 %888  ;;  %2743 = vperm.xlu1 %21625, %v22591_v16  }
 0x16f   : > { %27630 = vst [vmem:[#allocation13_spill] sm:$0xff] %v22616_v22  ;;  %2225 = vperm.xlu0 %21624, %v22610_v24   ;;  %v2973_v41 = vld [vmem:[#allocation2 + $0x68] sm:$0xff]  ;;  %v1546_v22 = vadd.f32 %v1514_v63, %v1281_v58  ;;  %v2307_v63 = vmul.f32 %v22217_v59, %v22553_v17  ;;  %v1018_v58 = vadd.f32 %v986_v55, %v754_v44 }
 0x170   : > { %18426 = vmatmul.mubr.msk.f32.gmra.mrb[8].mxu1 %vm389_vm0, %v2973_v41  ;;  %18591 = vmatmul.mubr.msk.f32.gmra.mrb[6].mxu0 %vm389_vm0, %v2973_v41  ;;  %v2043_v44 = vmul.f32 %v22206_v54, %v22523_v31 }
 0x171   : > { %v2445_v28 = vpop.permute.xlu1 %2444  ;;  %v1810_v61 = vadd.f32 %v1778_v23, %v1546_v22  ;;  %v1282_v62 = vadd.f32 %v1250_v51, %v1018_v58  ;;  %v1779_v22 = vmul.f32 %v22196_v48, %v22473_v14  ;;  %v2308_v51 = vmul.f32 %v22217_v59, %v22585_v21 }
 0x172   : > { %v22630_v4 = vpop.permute.xlu0 %1925  ;;  %2748 = vperm.xlu1 %21625, %v22600_v2  }
 0x173   : > { %2230 = vperm.xlu0 %21624, %v22623_v40   ;;  %v2074_v25 = vadd.f32 %v2042_v8, %v1810_v61  ;;  %v1547_v23 = vadd.f32 %v1515_v3, %v1282_v62  ;;  %v2572_v3 = vmul.f32 %v22234_v47, %v2445_v28  ;;  %v16262_v62 = vld [vmem:[%s27450_s3 + $0x98] sm:$0xff] }
 0x175   : > { %v22648_v41 = vpop.permute.xlu1 %1147  ;;  %v2339_v17 = vadd.f32 %v2307_v63, %v2074_v25  ;;  %v1811_v57 = vadd.f32 %v1779_v22, %v1547_v23 }
 0x176   : > { %27632 = vst [vmem:[#allocation8_spill] sm:$0xff] %v22648_v41  ;;  %v22650_v18 = vpop.permute.xlu0 %629  ;;  %2494 = vperm.xlu1 %21625, %v22639_v32  }
 0x177   : > { %27633 = vst [vmem:[#allocation14_spill] sm:$0xff] %v22650_v18  ;;  %2489 = vperm.xlu0 %21624, %v22642_v56   ;;  %v2603_v6 = vadd.f32 %v2571_v10, %v2339_v17  ;;  %v2075_v58 = vadd.f32 %v2043_v44, %v1811_v57 }
 0x179   : > { %v22669_v18 = vpop.permute.xlu1 %2185  ;;  %v2340_v21 = vadd.f32 %v2308_v51, %v2075_v58  ;;  %v27634_v51 = vld [vmem:[#allocation9_spill] sm:$0xff] }
 0x17a   : > { %v22671_v41 = vpop.permute.xlu0 %1666  ;;  %2758 = vperm.xlu1 %21625, %v22660_v5  }
 0x17b   : > { %2753 = vperm.xlu0 %21624, %v22663_v30   ;;  %v2604_v28 = vadd.f32 %v2572_v3, %v2340_v21  ;;  %v987_v3 = vmul.f32 %v22160_v35, %v22390_v9 }
 0x17d   : > { %v22678_v55 = vpop.permute.xlu1 %634 }
 0x17e   : > { %v2704_v13 = vpop.permute.xlu0 %2703  ;;  %654 = vperm.xlu1 %21625, %v22532_v60   ;;  %v16260_v60 = vld [vmem:[%s27450_s3 + $0x88] sm:$0xff] }
 0x17f   : > { %v2835_v8 = vmul.f32 %v22249_v19, %v2704_v13  ;;  %649 = vperm.xlu0 %21624, %v22516_v42   ;;  %v16259_v42 = vld [vmem:[%s27450_s3 + $0x80] sm:$0xff] }
 0x181   : > { %v2867_v14 = vadd.f32 %v2835_v8, %v2603_v6  ;;  %v22687_v61 = vpop.permute.xlu1 %1671  ;;  %v20273_v6 = vpack.c.bf16 %v16260_v60, %v16259_v42  ;;  %v22736_v42 = vld [vmem:[%s21867_s23 + $0x120] sm:$0xff]  ;;  %v1251_v60 = vmul.f32 %v22173_v38, %v22437_v46 }
 0x182   : > { %v22689_v63 = vpop.permute.xlu0 %1152  ;;  %918 = vperm.xlu1 %21625, %v22573_v0  }
 0x183   : > { %v2899_v31 = vmax.f32 %v2867_v14, 0.0  ;;  %913 = vperm.xlu0 %21624, %v22561_v20   ;;  %20274 = vmatprep.subr.bf16.mxu0 %v20273_v6  ;;  %v16261_v20 = vld [vmem:[%s27450_s3 + $0x90] sm:$0xff] }
 0x184   : > { %20276 = vmatpush3.bf16.msra.mxu0 %v20273_v6  ;;  %v20277_v22 = vpack.c.bf16 %v16262_v62, %v16261_v20  ;;  %v988_v20 = vmul.f32 %v22160_v35, %v22411_v50  ;;  %v2309_v35 = vmul.f32 %v22217_v59, %v22669_v18 }
 0x185   : > { %2932 = vst.msk [vmem:[#allocation2 + $0x79] sm:$0xff] %vm389_vm0, %v2899_v31  ;;  %v2709_v10 = vpop.permute.xlu1 %2708 }
 0x186   : > { %v22701_v25 = vpop.permute.xlu0 %2190  ;;  %v2836_v0 = vmul.f32 %v22249_v19, %v2709_v10  ;;  %1177 = vperm.xlu1 %21625, %v22591_v16   ;;  %20278 = vmatprep.subr.bf16.mxu0 %v20277_v22  ;;  %v724_v10 = vmul.f32 %v22147_v29, %v22360_v15  ;;  %v1252_v15 = vmul.f32 %v22173_v38, %v22475_v11  ;;  %v22781_v38 = vld [vmem:[%s21867_s23 + $0x121] sm:$0xff] }
 0x187   : > { %659 = vperm.xlu0 %21624, %v22610_v24   ;;  %v1781_v11 = vmul.f32 %v22196_v48, %v22577_v33 }
 0x188   : > { %v2868_v17 = vadd.f32 %v2836_v0, %v2604_v28  ;;  %20280 = vmatpush3.bf16.msra.mxu0 %v20277_v22  ;;  %v22752_v28 = vld [vmem:[%s21867_s23 + $0x128] sm:$0xff]  ;;  %v1780_v0 = vmul.f32 %v22196_v48, %v22555_v26  ;;  %v2310_v48 = vmul.f32 %v22217_v59, %v22701_v25 }
 0x189   : > { %v22712_v23 = vpop.permute.xlu1 %1412 }
 0x18a   : > { %v22714_v13 = vpop.permute.xlu0 %893  ;;  %v2900_v44 = vmax.f32 %v2868_v17, 0.0  ;;  %1182 = vperm.xlu1 %21625, %v22600_v2   ;;  %v723_v2 = vmul.f32 %v22147_v29, %v27634_v51  ;;  %v2044_v17 = vmul.f32 %v22206_v54, %v22605_v49  ;;  %v756_v29 = vadd.f32 %v22165_v36, %v724_v10 }
 0x18b   : > { %664 = vperm.xlu0 %21624, %v22623_v40  }
 0x18c   : > { %v2974_v16 = vld [vmem:[#allocation2 + $0x78] sm:$0xff]  ;;  %2933 = vst.msk [vmem:[#allocation2 + $0x81] sm:$0xff] %vm389_vm0, %v2900_v44  ;;  %v1020_v50 = vadd.f32 %v988_v20, %v756_v29  ;;  %v1517_v44 = vmul.f32 %v22187_v45, %v22507_v1  ;;  %v22811_v20 = vld [vmem:[%s21867_s23 + $0x122] sm:$0xff] }
 0x18d   : > { %18428 = vmatprep.mubr.msk.f32.mxu1 %vm389_vm0, %v2974_v16  ;;  %18593 = vmatprep.mubr.msk.f32.mxu0 %vm389_vm0, %v2974_v16  ;;  %v2450_v8 = vpop.permute.xlu1 %2449 }
 0x18e   : > { %v22721_v57 = vpop.permute.xlu0 %1930  ;;  %1442 = vperm.xlu1 %21625, %v22610_v24   ;;  %v755_v24 = vadd.f32 %v22165_v36, %v723_v2  ;;  %v1284_v36 = vadd.f32 %v1252_v15, %v1020_v50 }
 0x18f   : > { %923 = vperm.xlu0 %21624, %v22642_v56  }
 0x190   : > { %v1019_v9 = vadd.f32 %v987_v3, %v755_v24  ;;  %v2045_v3 = vmul.f32 %v22206_v54, %v22630_v4 }
 0x191   : > { %v22727_v14 = vpop.permute.xlu1 %1417 }
 0x192   : > { %v22729_v58 = vpop.permute.xlu0 %898  ;;  %1447 = vperm.xlu1 %21625, %v22623_v40   ;;  %v1516_v40 = vmul.f32 %v22187_v45, %v22489_v53  ;;  %v1283_v46 = vadd.f32 %v1251_v60, %v1019_v9  ;;  %v1549_v45 = vadd.f32 %v1517_v44, %v1284_v36  ;;  %v22847_v44 = vld [vmem:[%s21867_s23 + $0x140] sm:$0xff] }
 0x193   : > { %928 = vperm.xlu0 %21624, %v22639_v32   ;;  %v2975_v31 = vld [vmem:[#allocation2 + $0x80] sm:$0xff] }
 0x194   : > { %18429 = vmatmul.mubr.msk.f32.gmra.mrb[10].mxu1 %vm389_vm0, %v2975_v31  ;;  %18594 = vmatmul.mubr.msk.f32.gmra.mrb[8].mxu0 %vm389_vm0, %v2975_v31  ;;  %v1548_v53 = vadd.f32 %v1516_v40, %v1283_v46  ;;  %v1813_v24 = vadd.f32 %v1781_v11, %v1549_v45  ;;  %v22858_v36 = vld [vmem:[%s27448_s1 + $0x2] ss:$0 sm:$0xff]  ;;  %v22869_v45 = vld [vmem:[%s27448_s1 + $0x3] ss:$0 sm:$0xff] }
 0x195   : > { %v2455_v6 = vpop.permute.xlu1 %2454 }
 0x196   : > { %v22743_v21 = vpop.permute.xlu0 %1935  ;;  %1187 = vperm.xlu1 %21625, %v22663_v30   ;;  %v1812_v26 = vadd.f32 %v1780_v0, %v1548_v53  ;;  %v2077_v54 = vadd.f32 %v2045_v3, %v1813_v24  ;;  %v2574_v4 = vmul.f32 %v22234_v47, %v2455_v6 }
 0x197   : > { %669 = vperm.xlu0 %21624, %v22736_v42  }
 0x198   : > { %v2076_v51 = vadd.f32 %v2044_v17, %v1812_v26  ;;  %v2342_v10 = vadd.f32 %v2310_v48, %v2077_v54  ;;  %v22893_v54 = vld [vmem:[%s27448_s1 + $0x5] ss:$0 sm:$0xff] }
 0x199   : > { %v22758_v62 = vpop.permute.xlu1 %1157 }
 0x19a   : > { %v22760_v22 = vpop.permute.xlu0 %639  ;;  %674 = vperm.xlu1 %21625, %v22752_v28   ;;  %v2341_v18 = vadd.f32 %v2309_v35, %v2076_v51  ;;  %v2606_v25 = vadd.f32 %v2574_v4, %v2342_v10  ;;  %v22837_v35 = vld [vmem:[%s27448_s1 + $0x1] ss:$0 sm:$0xff]  ;;  %v22852_v51 = vld [vmem:[%s27449_s2] ss:$0 sm:$0xff]  ;;  %v2046_v4 = vmul.f32 %v22893_v54, %v22721_v57 }
 0x19b   : > { %1706 = vperm.xlu0 %21624, %v22642_v56   ;;  %v2573_v56 = vmul.f32 %v22234_v47, %v2450_v8  ;;  %v22814_v47 = vld [vmem:[%s21867_s23 + $0x138] sm:$0xff]  ;;  %v989_v50 = vmul.f32 %v22837_v35, %v22491_v34  ;;  %v1253_v34 = vmul.f32 %v22858_v36, %v22538_v27 }
 0x19d   : > { %v22773_v16 = vpop.permute.xlu1 %2195  ;;  %v2605_v31 = vadd.f32 %v2573_v56, %v2341_v18 }
 0x19e   : > { %v22775_v49 = vpop.permute.xlu0 %1676  ;;  %1711 = vperm.xlu1 %21625, %v22639_v32   ;;  %v22793_v32 = vld [vmem:[%s21867_s23 + $0x129] sm:$0xff] }
 0x19f   : > { %1192 = vperm.xlu0 %21624, %v22660_v5  }
 0x1a1   : > { %v22785_v1 = vpop.permute.xlu1 %644 }
 0x1a2   : > { %v2714_v2 = vpop.permute.xlu0 %2713  ;;  %1452 = vperm.xlu1 %21625, %v22736_v42  }
 0x1a3   : > { %v2837_v8 = vmul.f32 %v22249_v19, %v2714_v2  ;;  %933 = vperm.xlu0 %21624, %v22781_v38   ;;  %v1518_v2 = vmul.f32 %v22869_v45, %v22593_v52  ;;  %v990_v52 = vmul.f32 %v22837_v35, %v22509_v12  ;;  %v1254_v12 = vmul.f32 %v22858_v36, %v22579_v43 }
 0x1a5   : > { %v2869_v33 = vadd.f32 %v2837_v8, %v2605_v31  ;;  %v22797_v60 = vpop.permute.xlu1 %1681  ;;  %v22880_v8 = vld [vmem:[%s27448_s1 + $0x4] ss:$0 sm:$0xff] }
 0x1a6   : > { %v22799_v9 = vpop.permute.xlu0 %1162  ;;  %938 = vperm.xlu1 %21625, %v22793_v32   ;;  %v1782_v24 = vmul.f32 %v22880_v8, %v22671_v41 }
 0x1a7   : > { %v2901_v40 = vmax.f32 %v2869_v33, 0.0  ;;  %1970 = vperm.xlu0 %21624, %v22663_v30  }
 0x1a9   : > { %2934 = vst.msk [vmem:[#allocation2 + $0x91] sm:$0xff] %vm389_vm0, %v2901_v40  ;;  %v2719_v46 = vpop.permute.xlu1 %2718  ;;  %v22903_v40 = vld [vmem:[%s21867_s23 + $0x139] sm:$0xff] }
 0x1aa   : > { %v22805_v59 = vpop.permute.xlu0 %2200  ;;  %v2838_v0 = vmul.f32 %v22249_v19, %v2719_v46  ;;  %1975 = vperm.xlu1 %21625, %v22660_v5   ;;  %v22825_v5 = vld [vmem:[%s27448_s1] ss:$0 sm:$0xff]  ;;  %v22908_v46 = vld [vmem:[%s27448_s1 + $0x6] ss:$0 sm:$0xff] }
 0x1ab   : > { %1457 = vperm.xlu0 %21624, %v22752_v28   ;;  %v725_v29 = vmul.f32 %v22825_v5, %v22439_v7  ;;  %v22844_v7 = vld [vmem:[%s21867_s23 + $0x12a] sm:$0xff]  ;;  %v726_v27 = vmul.f32 %v22825_v5, %v22464_v39  ;;  %v2311_v57 = vmul.f32 %v22908_v46, %v22773_v16 }
 0x1ac   : > { %v2870_v6 = vadd.f32 %v2838_v0, %v2606_v25 }
 0x1ad   : > { %v22816_v53 = vpop.permute.xlu1 %1422  ;;  %v757_v56 = vadd.f32 %v22852_v51, %v725_v29  ;;  %v758_v41 = vadd.f32 %v22852_v51, %v726_v27 }
 0x1ae   : > { %v22818_v30 = vpop.permute.xlu0 %903  ;;  %v2902_v17 = vmax.f32 %v2870_v6, 0.0  ;;  %1197 = vperm.xlu1 %21625, %v22811_v20  }
 0x1af   : > { %679 = vperm.xlu0 %21624, %v22814_v47   ;;  %v1021_v18 = vadd.f32 %v989_v50, %v757_v56  ;;  %v1022_v25 = vadd.f32 %v990_v52, %v758_v41 }
 0x1b0   : > { %v2976_v19 = vld [vmem:[#allocation2 + $0x90] sm:$0xff]  ;;  %2935 = vst.msk [vmem:[#allocation2 + $0x99] sm:$0xff] %vm389_vm0, %v2902_v17  ;;  %v22921_v17 = vld [vmem:[%s27448_s1 + $0x7] ss:$0 sm:$0xff] }
 0x1b1   : > { %18431 = vmatprep.mubr.msk.f32.mxu1 %vm389_vm0, %v2976_v19  ;;  %18596 = vmatprep.mubr.msk.f32.mxu0 %vm389_vm0, %v2976_v19  ;;  %v2460_v15 = vpop.permute.xlu1 %2459  ;;  %v1285_v31 = vadd.f32 %v1253_v34, %v1021_v18  ;;  %v1286_v16 = vadd.f32 %v1254_v12, %v1022_v25  ;;  %v2047_v18 = vmul.f32 %v22893_v54, %v22743_v21  ;;  %v22957_v25 = vld [vmem:[%s21867_s23 + $0x13a] sm:$0xff] }
 0x1b2   : > { %v22832_v26 = vpop.permute.xlu0 %1940  ;;  %2235 = vperm.xlu1 %21625, %v22736_v42   ;;  %v2575_v19 = vmul.f32 %v22921_v17, %v2460_v15  ;;  %v22935_v15 = vld [vmem:[%s27448_s1 + $0x8] ss:$0 sm:$0xff] }
 0x1b3   : > { %1716 = vperm.xlu0 %21624, %v22781_v38   ;;  %v1550_v33 = vadd.f32 %v1518_v2, %v1285_v31  ;;  %v2312_v31 = vmul.f32 %v22908_v46, %v22805_v59 }
 0x1b5   : > { %v22862_v42 = vpop.permute.xlu1 %1427  ;;  %v1814_v10 = vadd.f32 %v1782_v24, %v1550_v33 }
 0x1b6   : > { %v22864_v11 = vpop.permute.xlu0 %908  ;;  %1202 = vperm.xlu1 %21625, %v22844_v7  }
 0x1b7   : > { %684 = vperm.xlu0 %21624, %v22847_v44   ;;  %v2977_v3 = vld [vmem:[#allocation2 + $0x98] sm:$0xff]  ;;  %v2078_v43 = vadd.f32 %v2046_v4, %v1814_v10 }
 0x1b8   : > { %18432 = vmatmul.mubr.msk.f32.gmra.mrb[12].mxu1 %vm389_vm0, %v2977_v3  ;;  %18597 = vmatmul.mubr.msk.f32.gmra.mrb[10].mxu0 %vm389_vm0, %v2977_v3 }
 0x1b9   : > { %v2465_v48 = vpop.permute.xlu1 %2464  ;;  %v2343_v29 = vadd.f32 %v2311_v57, %v2078_v43 }
 0x1ba   : > { %v22888_v39 = vpop.permute.xlu0 %1945  ;;  %2240 = vperm.xlu1 %21625, %v22752_v28   ;;  %v1519_v28 = vmul.f32 %v22869_v45, %v22614_v37  ;;  %v1783_v37 = vmul.f32 %v22880_v8, %v22687_v61  ;;  %v22941_v61 = vld [vmem:[%s21867_s23 + $0x141] sm:$0xff]  ;;  %v2576_v4 = vmul.f32 %v22921_v17, %v2465_v48  ;;  %v22960_v48 = vld [vmem:[%s21867_s23 + $0x150] sm:$0xff] }
 0x1bb   : > { %1721 = vperm.xlu0 %21624, %v22793_v32   ;;  %v2607_v2 = vadd.f32 %v2575_v19, %v2343_v29  ;;  %v27636_v29 = vld [vmem:[#allocation12_spill] sm:$0xff] }
 0x1bc   : > { %v1551_v50 = vadd.f32 %v1519_v28, %v1286_v16  ;;  %v27635_v28 = vld [vmem:[#allocation10_spill] sm:$0xff] }
 0x1bd   : > { %v22914_v0 = vpop.permute.xlu1 %1686  ;;  %v727_v43 = vmul.f32 %v22825_v5, %v27635_v28  ;;  %v22992_v28 = vld [vmem:[%s21867_s23 + $0x158] sm:$0xff] }
 0x1be   : > { %v22916_v6 = vpop.permute.xlu0 %1167  ;;  %1462 = vperm.xlu1 %21625, %v22814_v47   ;;  %v1815_v3 = vadd.f32 %v1783_v37, %v1551_v50  ;;  %v991_v50 = vmul.f32 %v22837_v35, %v27636_v29 }
 0x1bf   : > { %943 = vperm.xlu0 %21624, %v22903_v40  }
 0x1c0   : > { %v2079_v33 = vadd.f32 %v2047_v18, %v1815_v3  ;;  %v27638_v3 = vld [vmem:[#allocation8_spill] sm:$0xff] }
 0x1c1   : > { %v2724_v56 = vpop.permute.xlu1 %2723 }
 0x1c2   : > { %v22928_v34 = vpop.permute.xlu0 %2205  ;;  %v2839_v27 = vmul.f32 %v22935_v15, %v2724_v56  ;;  %2499 = vperm.xlu1 %21625, %v22781_v38   ;;  %v2344_v38 = vadd.f32 %v2312_v31, %v2079_v33  ;;  %v1255_v31 = vmul.f32 %v22858_v36, %v27638_v3  ;;  %v2049_v3 = vmul.f32 %v22893_v54, %v22888_v39 }
 0x1c3   : > { %1980 = vperm.xlu0 %21624, %v22811_v20   ;;  %v993_v39 = vmul.f32 %v22837_v35, %v22714_v13  ;;  %v1257_v13 = vmul.f32 %v22858_v36, %v22758_v62 }
 0x1c4   : > { %v2871_v24 = vadd.f32 %v2839_v27, %v2607_v2  ;;  %v2608_v10 = vadd.f32 %v2576_v4, %v2344_v38  ;;  %v759_v27 = vadd.f32 %v22852_v51, %v727_v43 }
 0x1c5   : > { %v22945_v21 = vpop.permute.xlu1 %1691 }
 0x1c6   : > { %v22947_v52 = vpop.permute.xlu0 %1172  ;;  %v2903_v41 = vmax.f32 %v2871_v24, 0.0  ;;  %1467 = vperm.xlu1 %21625, %v22847_v44   ;;  %v27639_v24 = vld [vmem:[#allocation13_spill] sm:$0xff]  ;;  %v1023_v38 = vadd.f32 %v991_v50, %v759_v27 }
 0x1c7   : > { %948 = vperm.xlu0 %21624, %v22941_v61   ;;  %v992_v33 = vmul.f32 %v22837_v35, %v27639_v24 }
 0x1c8   : > { %2936 = vst.msk [vmem:[#allocation2 + $0xa9] sm:$0xff] %vm389_vm0, %v2903_v41  ;;  %v1287_v43 = vadd.f32 %v1255_v31, %v1023_v38 }
 0x1c9   : > { %v2729_v12 = vpop.permute.xlu1 %2728 }
 0x1ca   : > { %v2211_v59 = vpop.permute.xlu0 %2210  ;;  %v2840_v57 = vmul.f32 %v22935_v15, %v2729_v12  ;;  %2504 = vperm.xlu1 %21625, %v22793_v32   ;;  %v27637_v32 = vld [vmem:[#allocation11_spill] sm:$0xff]  ;;  %v1520_v12 = vmul.f32 %v22869_v45, %v22712_v23  ;;  %v1521_v23 = vmul.f32 %v22869_v45, %v22727_v14  ;;  %v2313_v14 = vmul.f32 %v22908_v46, %v22928_v34 }
 0x1cb   : > { %1985 = vperm.xlu0 %21624, %v22844_v7   ;;  %v728_v18 = vmul.f32 %v22825_v5, %v27637_v32  ;;  %v2048_v32 = vmul.f32 %v22893_v54, %v22832_v26 }
 0x1cc   : > { %v2872_v19 = vadd.f32 %v2840_v57, %v2608_v10  ;;  %v1256_v57 = vmul.f32 %v22858_v36, %v22689_v63 }
 0x1cd   : > { %v22964_v16 = vpop.permute.xlu1 %1950  ;;  %v760_v10 = vadd.f32 %v22852_v51, %v728_v18  ;;  %v1785_v18 = vmul.f32 %v22880_v8, %v22797_v60 }
 0x1ce   : > { %v22966_v37 = vpop.permute.xlu0 %1432  ;;  %v2904_v56 = vmax.f32 %v2872_v19, 0.0  ;;  %1207 = vperm.xlu1 %21625, %v22957_v25   ;;  %v1784_v19 = vmul.f32 %v22880_v8, %v22775_v49 }
 0x1cf   : > { %689 = vperm.xlu0 %21624, %v22960_v48   ;;  %v2978_v2 = vld [vmem:[#allocation2 + $0xa8] sm:$0xff]  ;;  %v1024_v29 = vadd.f32 %v992_v33, %v760_v10  ;;  %v2314_v10 = vmul.f32 %v22908_v46, %v2211_v59  ;;  %v730_v59 = vmul.f32 %v22825_v5, %v22678_v55 }
 0x1d0   : > { %2937 = vst.msk [vmem:[#allocation2 + $0xb1] sm:$0xff] %vm389_vm0, %v2904_v56  ;;  %18434 = vmatprep.mubr.msk.f32.mxu1 %vm389_vm0, %v2978_v2  ;;  %18599 = vmatprep.mubr.msk.f32.mxu0 %vm389_vm0, %v2978_v2  ;;  %v1552_v56 = vadd.f32 %v1520_v12, %v1287_v43  ;;  %v23007_v2 = vld [vmem:[%s21867_s23 + $0x142] sm:$0xff] }
 0x1d1   : > { %v22982_v4 = vpop.permute.xlu1 %1437  ;;  %v1288_v63 = vadd.f32 %v1256_v57, %v1024_v29  ;;  %v27640_v33 = vld [vmem:[#allocation14_spill] sm:$0xff]  ;;  %v762_v62 = vadd.f32 %v22852_v51, %v730_v59 }
 0x1d2   : > { %v2470_v41 = vpop.permute.xlu0 %2469  ;;  %2245 = vperm.xlu1 %21625, %v22814_v47   ;;  %v1816_v27 = vadd.f32 %v1784_v19, %v1552_v56  ;;  %v729_v34 = vmul.f32 %v22825_v5, %v27640_v33  ;;  %v1523_v33 = vmul.f32 %v22869_v45, %v22862_v42  ;;  %v1787_v42 = vmul.f32 %v22880_v8, %v22945_v21 }
 0x1d3   : > { %1726 = vperm.xlu0 %21624, %v22903_v40   ;;  %v1553_v26 = vadd.f32 %v1521_v23, %v1288_v63  ;;  %v2577_v60 = vmul.f32 %v22921_v17, %v2470_v41 }
 0x1d4   : > { %v2080_v24 = vadd.f32 %v2048_v32, %v1816_v27  ;;  %v761_v56 = vadd.f32 %v22852_v51, %v729_v34  ;;  %v23035_v32 = vld [vmem:[%s21867_s23 + $0x151] sm:$0xff] }
 0x1d5   : > { %v2475_v50 = vpop.permute.xlu1 %2474  ;;  %v1817_v38 = vadd.f32 %v1785_v18, %v1553_v26 }
 0x1d6   : > { %v22998_v47 = vpop.permute.xlu0 %1955  ;;  %694 = vperm.xlu1 %21625, %v22992_v28   ;;  %v2345_v12 = vadd.f32 %v2313_v14, %v2080_v24  ;;  %v2578_v29 = vmul.f32 %v22921_v17, %v2475_v50  ;;  %v994_v50 = vmul.f32 %v22837_v35, %v22729_v58  ;;  %v1786_v58 = vmul.f32 %v22880_v8, %v22914_v0 }
 0x1d7   : > { %2763 = vperm.xlu0 %21624, %v22811_v20   ;;  %v2979_v49 = vld [vmem:[#allocation2 + $0xb0] sm:$0xff]  ;;  %v2081_v57 = vadd.f32 %v2049_v3, %v1817_v38  ;;  %v1258_v3 = vmul.f32 %v22858_v36, %v22799_v9  ;;  %v2050_v9 = vmul.f32 %v22893_v54, %v22964_v16  ;;  %v732_v0 = vmul.f32 %v22825_v5, %v22785_v1 }
 0x1d8   : > { %18435 = vmatmul.mubr.msk.f32.gmra.mrb[14].mxu1 %vm389_vm0, %v2979_v49  ;;  %18600 = vmatmul.mubr.msk.f32.gmra.mrb[12].mxu0 %vm389_vm0, %v2979_v49  ;;  %v2609_v41 = vadd.f32 %v2577_v60, %v2345_v12  ;;  %v1025_v49 = vadd.f32 %v993_v39, %v761_v56  ;;  %v1026_v60 = vadd.f32 %v994_v50, %v762_v62 }
 0x1d9   : > { %v2216_v20 = vpop.permute.xlu1 %2215  ;;  %v2346_v63 = vadd.f32 %v2314_v10, %v2081_v57  ;;  %v731_v12 = vmul.f32 %v22825_v5, %v22760_v22  ;;  %v995_v22 = vmul.f32 %v22837_v35, %v22818_v30  ;;  %v2051_v1 = vmul.f32 %v22893_v54, %v22998_v47 }
 0x1da   : > { %v23015_v31 = vpop.permute.xlu0 %1696  ;;  %1731 = vperm.xlu1 %21625, %v22941_v61   ;;  %v1289_v24 = vadd.f32 %v1257_v13, %v1025_v49  ;;  %v1290_v57 = vadd.f32 %v1258_v3, %v1026_v60  ;;  %v2315_v16 = vmul.f32 %v22908_v46, %v2216_v20  ;;  %v764_v30 = vadd.f32 %v22852_v51, %v732_v0 }
 0x1db   : > { %1212 = vperm.xlu0 %21624, %v23007_v2   ;;  %v2610_v14 = vadd.f32 %v2578_v29, %v2346_v63  ;;  %v996_v29 = vmul.f32 %v22837_v35, %v22864_v11  ;;  %v763_v21 = vadd.f32 %v22852_v51, %v731_v12  ;;  %v1259_v20 = vmul.f32 %v22858_v36, %v22916_v6 }
 0x1dc   : > { %v1260_v47 = vmul.f32 %v22858_v36, %v22947_v52  ;;  %v1525_v6 = vmul.f32 %v22869_v45, %v22982_v4  ;;  %v23101_v4 = vld [vmem:[%s21867_s23 + $0x168] sm:$0xff]  ;;  %v1788_v60 = vmul.f32 %v22880_v8, %v23015_v31 }
 0x1dd   : > { %v23025_v43 = vpop.permute.xlu1 %1701 }
 0x1de   : > { %v2734_v19 = vpop.permute.xlu0 %2733  ;;  %2768 = vperm.xlu1 %21625, %v22844_v7  }
 0x1df   : > { %v2841_v23 = vmul.f32 %v22935_v15, %v2734_v19  ;;  %2250 = vperm.xlu0 %21624, %v22847_v44   ;;  %v1522_v44 = vmul.f32 %v22869_v45, %v22816_v53  ;;  %v23065_v19 = vld [vmem:[%s21867_s23 + $0x159] sm:$0xff] }
 0x1e1   : > { %v2873_v18 = vadd.f32 %v2841_v23, %v2609_v41  ;;  %v2739_v27 = vpop.permute.xlu1 %2738  ;;  %v1554_v10 = vadd.f32 %v1522_v44, %v1289_v24  ;;  %v1524_v44 = vmul.f32 %v22869_v45, %v22966_v37  ;;  %v1789_v37 = vmul.f32 %v22880_v8, %v23025_v43 }
 0x1e2   : > { %v2221_v7 = vpop.permute.xlu0 %2220  ;;  %v2842_v55 = vmul.f32 %v22935_v15, %v2739_v27  ;;  %1472 = vperm.xlu1 %21625, %v22960_v48   ;;  %v1028_v27 = vadd.f32 %v996_v29, %v764_v30  ;;  %v23120_v30 = vld [vmem:[%s21867_s23 + $0x170] sm:$0xff] }
 0x1e3   : > { %v2905_v26 = vmax.f32 %v2873_v18, 0.0  ;;  %953 = vperm.xlu0 %21624, %v23035_v32   ;;  %v1818_v41 = vadd.f32 %v1786_v58, %v1554_v10  ;;  %v1027_v18 = vadd.f32 %v995_v22, %v763_v21  ;;  %v2316_v50 = vmul.f32 %v22908_v46, %v2221_v7 }
 0x1e4   : > { %v2874_v53 = vadd.f32 %v2842_v55, %v2610_v14  ;;  %v1292_v24 = vadd.f32 %v1260_v47, %v1028_v27  ;;  %v23128_v27 = vld [vmem:[%s21867_s23 + $0x15a] sm:$0xff] }
 0x1e5   : > { %2938 = vst.msk [vmem:[#allocation2 + $0xc1] sm:$0xff] %vm389_vm0, %v2905_v26  ;;  %v2480_v34 = vpop.permute.xlu1 %2479  ;;  %v2082_v59 = vadd.f32 %v2050_v9, %v1818_v41  ;;  %v1291_v3 = vadd.f32 %v1259_v20, %v1027_v18 }
 0x1e6   : > { %v1961_v38 = vpop.permute.xlu0 %1960  ;;  %v2906_v39 = vmax.f32 %v2874_v53, 0.0  ;;  %2509 = vperm.xlu1 %21625, %v22903_v40   ;;  %v1555_v40 = vadd.f32 %v1523_v33, %v1290_v57  ;;  %v2579_v13 = vmul.f32 %v22921_v17, %v2480_v34  ;;  %v23098_v53 = vld [vmem:[%s21867_s23 + $0x152] sm:$0xff]  ;;  %v1557_v12 = vadd.f32 %v1525_v6, %v1292_v24 }
 0x1e7   : > { %1990 = vperm.xlu0 %21624, %v22957_v25   ;;  %v2347_v49 = vadd.f32 %v2315_v16, %v2082_v59 }
 0x1e8   : > { %2939 = vst.msk [vmem:[#allocation2 + $0xc9] sm:$0xff] %vm389_vm0, %v2906_v39  ;;  %v1819_v11 = vadd.f32 %v1787_v42, %v1555_v40  ;;  %v2052_v39 = vmul.f32 %v22893_v54, %v1961_v38  ;;  %v1821_v31 = vadd.f32 %v1789_v37, %v1557_v12 }
 0x1e9   : > { %v2485_v23 = vpop.permute.xlu1 %2484  ;;  %v2611_v55 = vadd.f32 %v2579_v13, %v2347_v49 }
 0x1ea   : > { %v1966_v56 = vpop.permute.xlu0 %1965  ;;  %1477 = vperm.xlu1 %21625, %v22992_v28   ;;  %v2083_v14 = vadd.f32 %v2051_v1, %v1819_v11  ;;  %v2580_v62 = vmul.f32 %v22921_v17, %v2485_v23 }
 0x1eb   : > { %958 = vperm.xlu0 %21624, %v23065_v19   ;;  %v2053_v10 = vmul.f32 %v22893_v54, %v1966_v56 }
 0x1ec   : > { %v2980_v63 = vld [vmem:[#allocation2 + $0xc0] sm:$0xff]  ;;  %v2348_v33 = vadd.f32 %v2316_v50, %v2083_v14 }
 0x1ed   : > { %18437 = vmatprep.mubr.msk.f32.mxu1 %vm389_vm0, %v2980_v63  ;;  %18602 = vmatprep.mubr.msk.f32.mxu0 %vm389_vm0, %v2980_v63  ;;  %v2744_v52 = vpop.permute.xlu1 %2743  ;;  %v2085_v29 = vadd.f32 %v2053_v10, %v1821_v31 }
 0x1ee   : > { %v2226_v26 = vpop.permute.xlu0 %2225  ;;  %v2843_v7 = vmul.f32 %v22935_v15, %v2744_v52  ;;  %2514 = vperm.xlu1 %21625, %v22941_v61   ;;  %v1556_v61 = vadd.f32 %v1524_v44, %v1291_v3  ;;  %v2612_v0 = vadd.f32 %v2580_v62, %v2348_v33  ;;  %v23149_v3 = vld [vmem:[%s21867_s23 + $0x169] sm:$0xff] }
 0x1ef   : > { %1995 = vperm.xlu0 %21624, %v23007_v2   ;;  %v2981_v58 = vld [vmem:[#allocation2 + $0xc8] sm:$0xff]  ;;  %v2317_v16 = vmul.f32 %v22908_v46, %v2226_v26 }
 0x1f0   : > { %v2875_v34 = vadd.f32 %v2843_v7, %v2611_v55  ;;  %18438 = vmatmul.mubr.msk.f32.gmra.mrb[16].mxu1 %vm389_vm0, %v2981_v58  ;;  %18603 = vmatmul.mubr.msk.f32.gmra.mrb[14].mxu0 %vm389_vm0, %v2981_v58  ;;  %v1820_v41 = vadd.f32 %v1788_v60, %v1556_v61  ;;  %v4524_v61 = vld [vmem:[#allocation2 + $0x21] sm:$0xff] }
 0x1f1   : > { %v2749_v9 = vpop.permute.xlu1 %2748 }
 0x1f2   : > { %v2231_v43 = vpop.permute.xlu0 %2230  ;;  %v2907_v57 = vmax.f32 %v2875_v34, 0.0  ;;  %v2844_v42 = vmul.f32 %v22935_v15, %v2749_v9  ;;  %1217 = vperm.xlu1 %21625, %v23098_v53   ;;  %v2084_v23 = vadd.f32 %v2052_v39, %v1820_v41  ;;  %v23168_v34 = vld [vmem:[%s21867_s23 + $0x171] sm:$0xff]  ;;  %v4526_v9 = vld [vmem:[#allocation2 + $0x39] sm:$0xff]  ;;  %v4529_v41 = vld [vmem:[#allocation2 + $0x61] sm:$0xff] }
 0x1f3   : > { %699 = vperm.xlu0 %21624, %v23101_v4   ;;  %v2318_v22 = vmul.f32 %v22908_v46, %v2231_v43 }
 0x1f4   : > { %2940 = vst.msk [vmem:[#allocation2 + $0xd9] sm:$0xff] %vm389_vm0, %v2907_v57  ;;  %v2876_v40 = vadd.f32 %v2844_v42, %v2612_v0  ;;  %v2349_v20 = vadd.f32 %v2317_v16, %v2084_v23  ;;  %v4527_v0 = vld [vmem:[#allocation2 + $0x49] sm:$0xff]  ;;  %v4528_v42 = vld [vmem:[#allocation2 + $0x51] sm:$0xff]  ;;  %v23200_v23 = vld [vmem:[#allocation2 + $0x79] sm:$0xff] }
 0x1f5   : > { %v2495_v38 = vpop.permute.xlu1 %2494  ;;  %v2350_v13 = vadd.f32 %v2318_v22, %v2085_v29  ;;  %v23186_v57 = vld [vmem:[%s21867_s23 + $0x16a] sm:$0xff] }
 0x1f6   : > { %v2490_v1 = vpop.permute.xlu0 %2489  ;;  %v2908_v56 = vmax.f32 %v2876_v40, 0.0  ;;  %v2582_v21 = vmul.f32 %v22921_v17, %v2495_v38  ;;  %2255 = vperm.xlu1 %21625, %v22960_v48   ;;  %v4530_v16 = vld [vmem:[#allocation2 + $0x69] sm:$0xff] }
 0x1f7   : > { %v2581_v59 = vmul.f32 %v22921_v17, %v2490_v1  ;;  %1736 = vperm.xlu0 %21624, %v23035_v32  }
 0x1f8   : > { %2941 = vst.msk [vmem:[#allocation2 + $0xe1] sm:$0xff] %vm389_vm0, %v2908_v56  ;;  %v2614_v11 = vadd.f32 %v2582_v21, %v2350_v13  ;;  %v23206_v21 = vld [vmem:[%s21867_s23 + $0x172] sm:$0xff]  ;;  %v23209_v13 = vld [vmem:[#allocation2 + $0x81] sm:$0xff] }
 0x1f9   : > { %v2759_v47 = vpop.permute.xlu1 %2758  ;;  %v2613_v18 = vadd.f32 %v2581_v59, %v2349_v20 }
 0x1fa   : > { %v2754_v63 = vpop.permute.xlu0 %2753  ;;  %v2846_v49 = vmul.f32 %v22935_v15, %v2759_v47  ;;  %704 = vperm.xlu1 %21625, %v23120_v30  }
 0x1fb   : > { %v2845_v50 = vmul.f32 %v22935_v15, %v2754_v63  ;;  %2773 = vperm.xlu0 %21624, %v22957_v25   ;;  %v2982_v48 = vld [vmem:[#allocation2 + $0xd8] sm:$0xff] }
 0x1fc   : > { %v2878_v44 = vadd.f32 %v2846_v49, %v2614_v11  ;;  %18440 = vmatprep.mubr.msk.f32.mxu1 %vm389_vm0, %v2982_v48  ;;  %18605 = vmatprep.mubr.msk.f32.mxu0 %vm389_vm0, %v2982_v48  ;;  %v23221_v49 = vld [vmem:[#allocation2 + $0x91] sm:$0xff] }
 0x1fd   : > { %v2877_v6 = vadd.f32 %v2845_v50, %v2613_v18  ;;  %v23132_v14 = vpop.permute.xlu1 %654 }
 0x1fe   : > { %v23134_v52 = vpop.permute.xlu0 %649  ;;  %v2910_v26 = vmax.f32 %v2878_v44, 0.0  ;;  %1741 = vperm.xlu1 %21625, %v23065_v19   ;;  %v23225_v44 = vld [vmem:[#allocation2 + $0x99] sm:$0xff] }
 0x1ff   : > { %v2909_v55 = vmax.f32 %v2877_v6, 0.0  ;;  %1222 = vperm.xlu0 %21624, %v23128_v27   ;;  %v2983_v25 = vld [vmem:[#allocation2 + $0xe0] sm:$0xff] }
 0x200   : > { %2943 = vst.msk [vmem:[#allocation2 + $0xf9] sm:$0xff] %vm389_vm0, %v2910_v26  ;;  %18441 = vmatmul.mubr.msk.f32.gmra.mrb[18].mxu1 %vm389_vm0, %v2983_v25  ;;  %18606 = vmatmul.mubr.msk.f32.gmra.mrb[16].mxu0 %vm389_vm0, %v2983_v25 }
 0x201   : > { %2942 = vst.msk [vmem:[#allocation2 + $0xf1] sm:$0xff] %vm389_vm0, %v2909_v55  ;;  %v23142_v62 = vpop.permute.xlu1 %918 }
 0x202   : > { %v23144_v7 = vpop.permute.xlu0 %913  ;;  %2778 = vperm.xlu1 %21625, %v23007_v2   ;;  %v23163_v2 = vld [vmem:[#allocation2 + $0x19] sm:$0xff] }
 0x203   : > { %2260 = vperm.xlu0 %21624, %v22992_v28  }
 0x205   : > { %v23151_v24 = vpop.permute.xlu1 %1177 }
 0x206   : > { %v660_v37 = vpop.permute.xlu0 %659  ;;  %1482 = vperm.xlu1 %21625, %v23101_v4  }
 0x207   : > { %963 = vperm.xlu0 %21624, %v23149_v3   ;;  %v735_v40 = vmul.f32 %v22825_v5, %v660_v37 }
 0x208   : > { %v2984_v58 = vld [vmem:[#allocation2 + $0xf0] sm:$0xff]  ;;  %v2985_v60 = vld [vmem:[#allocation2 + $0xf8] sm:$0xff] }
 0x209   : > { %18443 = vmatprep.mubr.msk.f32.mxu1 %vm389_vm0, %v2984_v58  ;;  %18608 = vmatprep.mubr.msk.f32.mxu0 %vm389_vm0, %v2984_v58  ;;  %v23157_v33 = vpop.permute.xlu1 %1182  ;;  %v767_v20 = vadd.f32 %v22852_v51, %v735_v40  ;;  %v16296_v40 = vld [vmem:[%s27450_s3 + $0xa8] sm:$0xff] }
 0x20a   : > { %18444 = vmatmul.mubr.msk.f32.gmra.mrb[20].mxu1 %vm389_vm0, %v2985_v60  ;;  %18609 = vmatmul.mubr.msk.f32.gmra.mrb[18].mxu0 %vm389_vm0, %v2985_v60  ;;  %v665_v28 = vpop.permute.xlu0 %664 }
 0x20b   : > { %2519 = vperm.xlu1 %21625, %v23035_v32   ;;  %2000 = vperm.xlu0 %21624, %v23098_v53   ;;  %v23175_v32 = vld [vmem:[#allocation2 + $0x31] sm:$0xff] }
 0x20c   : > { %18637 = vmatprep.mubr.msk.f32.mxu0 %vm389_vm0, %v23163_v2 }
 0x20d   : > { %v23170_v12 = vpop.permute.xlu1 %1442 }
 0x20e   : > { %18638 = vmatmul.mubr.msk.f32.vlgmr.msra.gmra.mrb[0].mxu0 %vm389_vm0, %v4524_v61  ;;  %v924_v10 = vpop.permute.xlu0 %923  ;;  %v15944_v61 = vld [vmem:[%s21867_s23 + $0x180] sm:$0xff] }
 0x20f   : > { %1487 = vperm.xlu1 %21625, %v23120_v30   ;;  %968 = vperm.xlu0 %21624, %v23168_v34   ;;  %v999_v56 = vmul.f32 %v22837_v35, %v924_v10 }
 0x210   : > { %18640 = vmatprep.mubr.msk.f32.mxu0 %vm389_vm0, %v23175_v32 }
 0x211   : > { %v23179_v43 = vpop.permute.xlu1 %1447  ;;  %v1031_v50 = vadd.f32 %v999_v56, %v767_v20  ;;  %v23268_v20 = vld [vmem:[#allocation2 + $0xd9] sm:$0xff] }
 0x212   : > { %18641 = vmatmul.mubr.msk.f32.gmra.mrb[2].mxu0 %vm389_vm0, %v4526_v9  ;;  %v929_v39 = vpop.permute.xlu0 %928 }
 0x213   : > { %2524 = vperm.xlu1 %21625, %v23065_v19   ;;  %2005 = vperm.xlu0 %21624, %v23128_v27   ;;  %v736_v19 = vmul.f32 %v22825_v5, %v665_v28  ;;  %v1000_v1 = vmul.f32 %v22837_v35, %v929_v39  ;;  %v23235_v28 = vld [vmem:[#allocation2 + $0xa9] sm:$0xff]  ;;  %v23240_v39 = vld [vmem:[#allocation2 + $0xb1] sm:$0xff] }
 0x214   : > { %18643 = vmatprep.mubr.msk.f32.mxu0 %vm389_vm0, %v4527_v0 }
 0x215   : > { %v1188_v31 = vpop.permute.xlu1 %1187  ;;  %v768_v59 = vadd.f32 %v22852_v51, %v736_v19  ;;  %v23254_v19 = vld [vmem:[#allocation2 + $0xc9] sm:$0xff] }
 0x216   : > { %18644 = vmatmul.mubr.msk.f32.gmra.mrb[4].mxu0 %vm389_vm0, %v4528_v42  ;;  %v670_v22 = vpop.permute.xlu0 %669  ;;  %v1263_v11 = vmul.f32 %v22858_v36, %v1188_v31  ;;  %v23249_v31 = vld [vmem:[#allocation2 + $0xc1] sm:$0xff] }
 0x217   : > { %1746 = vperm.xlu1 %21625, %v23149_v3   ;;  %1227 = vperm.xlu0 %21624, %v23186_v57   ;;  %v1032_v63 = vadd.f32 %v1000_v1, %v768_v59 }
 0x218   : > { %18646 = vmatprep.mubr.msk.f32.mxu0 %vm389_vm0, %v4529_v41  ;;  %v1295_v6 = vadd.f32 %v1263_v11, %v1031_v50  ;;  %v15978_v50 = vld [vmem:[%s21867_s23 + $0x181] sm:$0xff] }
 0x219   : > { %v675_v29 = vpop.permute.xlu1 %674 }
 0x21a   : > { %18647 = vmatmul.mubr.msk.f32.gmra.mrb[6].mxu0 %vm389_vm0, %v4530_v16  ;;  %v23195_v38 = vpop.permute.xlu0 %1706  ;;  %v738_v37 = vmul.f32 %v22825_v5, %v675_v29  ;;  %v16295_v16 = vld [vmem:[%s27450_s3 + $0xa0] sm:$0xff] }
 0x21b   : > { %2783 = vperm.xlu1 %21625, %v23098_v53   ;;  %2265 = vperm.xlu0 %21624, %v23101_v4   ;;  %v737_v53 = vmul.f32 %v22825_v5, %v670_v22  ;;  %v15945_v22 = vld [vmem:[%s21867_s23 + $0x188] sm:$0xff]  ;;  %v20281_v56 = vpack.c.bf16 %v16296_v40, %v16295_v16 }
 0x21c   : > { %18649 = vmatprep.mubr.msk.f32.mxu0 %vm389_vm0, %v23200_v23 }
 0x21d   : > { %v23214_v4 = vpop.permute.xlu1 %1711  ;;  %v769_v26 = vadd.f32 %v22852_v51, %v737_v53  ;;  %20282 = vmatprep.subr.bf16.mxu0 %v20281_v56  ;;  %v23272_v53 = vld [vmem:[#allocation2 + $0xe1] sm:$0xff] }
 0x21e   : > { %18650 = vmatmul.mubr.msk.f32.gmra.mrb[8].mxu0 %vm389_vm0, %v23209_v13  ;;  %v1193_v47 = vpop.permute.xlu0 %1192 }
 0x21f   : > { %v1264_v18 = vmul.f32 %v22858_v36, %v1193_v47  ;;  %1751 = vperm.xlu1 %21625, %v23168_v34   ;;  %1232 = vperm.xlu0 %21624, %v23206_v21  }
 0x220   : > { %18652 = vmatprep.mubr.msk.f32.mxu0 %vm389_vm0, %v23221_v49  ;;  %20284 = vmatpush3.bf16.msra.mxu0 %v20281_v56 }
 0x221   : > { %v1296_v48 = vadd.f32 %v1264_v18, %v1032_v63  ;;  %v1453_v55 = vpop.permute.xlu1 %1452 }
 0x222   : > { %18653 = vmatmul.mubr.msk.f32.gmra.mrb[10].mxu0 %vm389_vm0, %v23225_v44  ;;  %v934_v25 = vpop.permute.xlu0 %933  ;;  %v1528_v58 = vmul.f32 %v22869_v45, %v1453_v55 }
 0x223   : > { %v1001_v60 = vmul.f32 %v22837_v35, %v934_v25  ;;  %2788 = vperm.xlu1 %21625, %v23128_v27   ;;  %2270 = vperm.xlu0 %21624, %v23120_v30   ;;  %v770_v27 = vadd.f32 %v22852_v51, %v738_v37 }
 0x224   : > { %18655 = vmatprep.mubr.msk.f32.mxu0 %vm389_vm0, %v23235_v28  ;;  %v1560_v10 = vadd.f32 %v1528_v58, %v1295_v6  ;;  %v23284_v6 = vld [vmem:[#allocation2 + $0xf9] sm:$0xff] }
 0x225   : > { %v1033_v9 = vadd.f32 %v1001_v60, %v769_v26  ;;  %v939_v0 = vpop.permute.xlu1 %938  ;;  %27642 = vst [vmem:[#allocation10_spill] sm:$0xff] %v23284_v6 }
 0x226   : > { %18656 = vmatmul.mubr.msk.f32.gmra.mrb[12].mxu0 %vm389_vm0, %v23240_v39  ;;  %v23244_v42 = vpop.permute.xlu0 %1970  ;;  %v1002_v30 = vmul.f32 %v22837_v35, %v939_v0 }
 0x227   : > { %2010 = vperm.xlu1 %21625, %v23186_v57   ;;  %1492 = vperm.xlu0 %21624, %v15944_v61  }
 0x228   : > { %18658 = vmatprep.mubr.msk.f32.mxu0 %vm389_vm0, %v23249_v31  ;;  %v1034_v41 = vadd.f32 %v1002_v30, %v770_v27 }
 0x229   : > { %v23262_v29 = vpop.permute.xlu1 %1975 }
 0x22a   : > { %18659 = vmatmul.mubr.msk.f32.gmra.mrb[14].mxu0 %vm389_vm0, %v23254_v19  ;;  %v1458_v1 = vpop.permute.xlu0 %1457 }
 0x22b   : > { %v1529_v59 = vmul.f32 %v22869_v45, %v1458_v1  ;;  %1497 = vperm.xlu1 %21625, %v15945_v22   ;;  %2529 = vperm.xlu0 %21624, %v23149_v3   ;;  %v23279_v3 = vld [vmem:[#allocation2 + $0xf1] sm:$0xff] }
 0x22c   : > { %18661 = vmatprep.mubr.msk.f32.mxu0 %vm389_vm0, %v23268_v20  ;;  %27641 = vst [vmem:[#allocation9_spill] sm:$0xff] %v23279_v3 }
 0x22d   : > { %v1561_v11 = vadd.f32 %v1529_v59, %v1296_v48  ;;  %v1198_v47 = vpop.permute.xlu1 %1197 }
 0x22e   : > { %18662 = vmatmul.mubr.msk.f32.gmra.mrb[16].mxu0 %vm389_vm0, %v23272_v53  ;;  %v680_v63 = vpop.permute.xlu0 %679  ;;  %v1265_v18 = vmul.f32 %v22858_v36, %v1198_v47  ;;  %v16013_v47 = vld [vmem:[%s21867_s23 + $0x18a] sm:$0xff] }
 0x22f   : > { %2534 = vperm.xlu1 %21625, %v23168_v34   ;;  %2015 = vperm.xlu0 %21624, %v23206_v21   ;;  %v15979_v34 = vld [vmem:[%s21867_s23 + $0x189] sm:$0xff]  ;;  %v739_v16 = vmul.f32 %v22825_v5, %v680_v63 }
 0x230   : > { %18664 = vmatprep.mubr.msk.f32.mxu0 %vm389_vm0, %v23279_v3  ;;  %v1297_v48 = vadd.f32 %v1265_v18, %v1033_v9 }
 0x231   : > { %v23286_v26 = vpop.permute.xlu1 %2235 }
 0x232   : > { %18665 = vmatmul.mubr.msk.f32.gmra.mrb[18].mxu0 %vm389_vm0, %v23284_v6  ;;  %v1717_v55 = vpop.permute.xlu0 %1716 }
 0x233   : > { %v1792_v25 = vmul.f32 %v22880_v8, %v1717_v55  ;;  %2275 = vperm.xlu1 %21625, %v15944_v61   ;;  %1756 = vperm.xlu0 %21624, %v15978_v50   ;;  %v16046_v55 = vld [vmem:[%s21867_s23 + $0x198] sm:$0xff] }
 0x235   : > { %v23292_v37 = vadd.f32 %v1792_v25, %v1560_v10  ;;  %v1203_v58 = vpop.permute.xlu1 %1202  ;;  %v16012_v10 = vld [vmem:[%s21867_s23 + $0x182] sm:$0xff]  ;;  %v733_v25 = vmul.f32 %v22825_v5, %v23134_v52 }
 0x236   : > { %v685_v60 = vpop.permute.xlu0 %684  ;;  %v1266_v9 = vmul.f32 %v22858_v36, %v1203_v58  ;;  %v997_v58 = vmul.f32 %v22837_v35, %v23144_v7  ;;  %v1261_v7 = vmul.f32 %v22858_v36, %v23151_v24  ;;  %v16081_v24 = vld [vmem:[%s21867_s23 + $0x1a1] sm:$0xff] }
 0x237   : > { %1761 = vperm.xlu1 %21625, %v15979_v34   ;;  %2793 = vperm.xlu0 %21624, %v23186_v57   ;;  %v771_v57 = vadd.f32 %v22852_v51, %v739_v16 }
 0x238   : > { %v1298_v0 = vadd.f32 %v1266_v9, %v1034_v41 }
 0x239   : > { %v23296_v27 = vpop.permute.xlu1 %2240 }
 0x23a   : > { %v1722_v30 = vpop.permute.xlu0 %1721 }
 0x23b   : > { %v1793_v61 = vmul.f32 %v22880_v8, %v1722_v30  ;;  %2798 = vperm.xlu1 %21625, %v23206_v21   ;;  %2280 = vperm.xlu0 %21624, %v15945_v22  }
 0x23d   : > { %v23302_v40 = vadd.f32 %v1793_v61, %v1561_v11  ;;  %v1463_v1 = vpop.permute.xlu1 %1462  ;;  %v740_v11 = vmul.f32 %v22825_v5, %v685_v60  ;;  %v16047_v61 = vld [vmem:[%s21867_s23 + $0x1a0] sm:$0xff] }
 0x23e   : > { %v944_v56 = vpop.permute.xlu0 %943  ;;  %v1530_v41 = vmul.f32 %v22869_v45, %v1463_v1  ;;  %v765_v1 = vadd.f32 %v22852_v51, %v733_v25 }
 0x23f   : > { %v1003_v59 = vmul.f32 %v22837_v35, %v944_v56  ;;  %2539 = vperm.xlu1 %21625, %v15978_v50   ;;  %2020 = vperm.xlu0 %21624, %v16012_v10   ;;  %v16297_v50 = vld [vmem:[%s27450_s3 + $0xb0] sm:$0xff] }
 0x240   : > { %v23308_v63 = vadd.f32 %v1530_v41, %v1297_v48  ;;  %v16298_v48 = vld [vmem:[%s27450_s3 + $0xb8] sm:$0xff] }
 0x241   : > { %v1035_v18 = vadd.f32 %v1003_v59, %v771_v57  ;;  %v2500_v21 = vpop.permute.xlu1 %2499  ;;  %v20285_v30 = vpack.c.bf16 %v16298_v48, %v16297_v50  ;;  %v1790_v50 = vmul.f32 %v22880_v8, %v23195_v38  ;;  %v998_v48 = vmul.f32 %v22837_v35, %v23142_v62  ;;  %v16115_v38 = vld [vmem:[%s21867_s23 + $0x1a2] sm:$0xff] }
 0x242   : > { %v23310_v22 = vpop.permute.xlu0 %1980 }
 0x243   : > { %2544 = vperm.xlu1 %21625, %v15979_v34   ;;  %2025 = vperm.xlu0 %21624, %v16013_v47   ;;  %v772_v34 = vadd.f32 %v22852_v51, %v740_v11  ;;  %v1526_v11 = vmul.f32 %v22869_v45, %v23170_v12 }
 0x244   : > { %20286 = vmatprep.subr.bf16.mxu0 %v20285_v30 }
 0x245   : > { %v1468_v9 = vpop.permute.xlu1 %1467  ;;  %20288 = vmatpush3.bf16.msra.mxu0 %v20285_v30  ;;  %v16114_v30 = vld [vmem:[%s21867_s23 + $0x19a] sm:$0xff] }
 0x246   : > { %v949_v60 = vpop.permute.xlu0 %948  ;;  %v1531_v16 = vmul.f32 %v22869_v45, %v1468_v9 }
 0x247   : > { %v1004_v52 = vmul.f32 %v22837_v35, %v949_v60  ;;  %2803 = vperm.xlu1 %21625, %v16012_v10   ;;  %2285 = vperm.xlu0 %21624, %v16046_v55   ;;  %v1029_v10 = vadd.f32 %v997_v58, %v765_v1  ;;  %v734_v55 = vmul.f32 %v22825_v5, %v23132_v14 }
 0x248   : > { %v23331_v56 = vadd.f32 %v1531_v16, %v1298_v0  ;;  %v16080_v0 = vld [vmem:[%s21867_s23 + $0x199] sm:$0xff]  ;;  %v1262_v14 = vmul.f32 %v22858_v36, %v23157_v33  ;;  %v2319_v35 = vmul.f32 %v22908_v46, %v23286_v26  ;;  %v16152_v26 = vld [vmem:[%s27450_s3 + $0x28] sm:$0xff] }
 0x249   : > { %v23333_v57 = vadd.f32 %v1004_v52, %v772_v34  ;;  %v23335_v41 = vpop.permute.xlu1 %2504  ;;  %v1293_v25 = vadd.f32 %v1261_v7, %v1029_v10  ;;  %v766_v5 = vadd.f32 %v22852_v51, %v734_v55  ;;  %v2583_v51 = vmul.f32 %v22921_v17, %v2500_v21  ;;  %v16151_v33 = vld [vmem:[%s27450_s3 + $0x20] sm:$0xff] }
 0x24a   : > { %v23337_v59 = vpop.permute.xlu0 %1985 }
 0x24b   : > { %2808 = vperm.xlu1 %21625, %v16013_v47   ;;  %2290 = vperm.xlu0 %21624, %v16047_v61   ;;  %v1558_v12 = vadd.f32 %v1526_v11, %v1293_v25  ;;  %v2054_v47 = vmul.f32 %v22893_v54, %v23244_v42  ;;  %v1030_v16 = vadd.f32 %v998_v48, %v766_v5 }
 0x24c   : > { %v1527_v42 = vmul.f32 %v22869_v45, %v23179_v43  ;;  %v1791_v45 = vmul.f32 %v22880_v8, %v23214_v4  ;;  %v20249_v43 = vpack.c.bf16 %v16152_v26, %v16151_v33  ;;  %v2055_v11 = vmul.f32 %v22893_v54, %v23262_v29  ;;  %v23428_v26 = vld [vmem:[%s27448_s1 + $0x3] ss:$0 sm:$0xff] }
 0x24d   : > { %v1208_v58 = vpop.permute.xlu1 %1207  ;;  %v1822_v34 = vadd.f32 %v1790_v50, %v1558_v12  ;;  %v16154_v50 = vld [vmem:[%s27450_s3 + $0x38] sm:$0xff]  ;;  %v2320_v48 = vmul.f32 %v22908_v46, %v23296_v27  ;;  %v2584_v5 = vmul.f32 %v22921_v17, %v23335_v41 }
 0x24e   : > { %v23349_v9 = vpop.permute.xlu0 %689  ;;  %v1267_v60 = vmul.f32 %v22858_v36, %v1208_v58  ;;  %20250 = vmatprep.subr.bf16.mxu1 %v20249_v43 }
 0x24f   : > { %2554 = vperm.xlu1 %21625, %v16081_v24   ;;  %2549 = vperm.xlu0 %21624, %v16080_v0   ;;  %v2086_v1 = vadd.f32 %v2054_v47, %v1822_v34  ;;  %v27643_v0 = vmov 0.0  }
 0x250   : > { %v23361_v62 = vadd.f32 %v1267_v60, %v1035_v18  ;;  %v1294_v18 = vadd.f32 %v1262_v14, %v1030_v16  ;;  %393 = vst.msk [vmem:[#allocation2 + $0x10] sm:$0x3] %vm392_vm2, %v27643_v0  ;;  %397 = vst.msk [vmem:[#allocation2 + $0x1a8] sm:$0x3] %vm392_vm2, %v27643_v0  ;;  %20252 = vmatpush3.bf16.msra.mxu1 %v20249_v43 }
 0x251   : > { %v23365_v52 = vpop.permute.xlu1 %2245  ;;  %v2351_v7 = vadd.f32 %v2319_v35, %v2086_v1  ;;  %417 = vst.msk [vmem:[#allocation2 + $0x11] sm:$0x1] %vm398_vm1, %v27643_v0  ;;  %434 = vst.msk [vmem:[#allocation2 + $0x1a9] sm:$0x1] %vm398_vm1, %v27643_v0 }
 0x252   : > { %v1727_v61 = vpop.permute.xlu0 %1726  ;;  %v1559_v10 = vadd.f32 %v1527_v42, %v1294_v18 }
 0x253   : > { %v1794_v36 = vmul.f32 %v22880_v8, %v1727_v61  ;;  %2818 = vperm.xlu1 %21625, %v16115_v38   ;;  %2813 = vperm.xlu0 %21624, %v16114_v30   ;;  %v2615_v25 = vadd.f32 %v2583_v51, %v2351_v7  ;;  %v23403_v30 = vld [vmem:[%s27448_s1 + $0x2] ss:$0 sm:$0xff] }
 0x254   : > { %v1823_v54 = vadd.f32 %v1791_v45, %v1559_v10 }
 0x255   : > { %v23378_v21 = vadd.f32 %v1794_v36, %v23308_v63  ;;  %v695_v55 = vpop.permute.xlu1 %694  ;;  %v16153_v63 = vld [vmem:[%s27450_s3 + $0x30] sm:$0xff] }
 0x256   : > { %v2764_v24 = vpop.permute.xlu0 %2763  ;;  %v20253_v29 = vpack.c.bf16 %v16154_v50, %v16153_v63  ;;  %v2087_v12 = vadd.f32 %v2055_v11, %v1823_v54  ;;  %v16331_v11 = vld [vmem:[%s27450_s3 + $0xc0] sm:$0xff] }
 0x257   : > { %v2847_v4 = vmul.f32 %v22935_v15, %v2764_v24  ;;  %v16332_v24 = vld [vmem:[%s27450_s3 + $0xc8] sm:$0xff] }
 0x258   : > { %20254 = vmatprep.subr.bf16.mxu1 %v20253_v29  ;;  %v2352_v46 = vadd.f32 %v2320_v48, %v2087_v12 }
 0x259   : > { %v2879_v58 = vadd.f32 %v2847_v4, %v2615_v25  ;;  %v1732_v47 = vpop.permute.xlu1 %1731  ;;  %20256 = vmatpush3.bf16.msra.mxu1 %v20253_v29 }
 0x25a   : > { %v1213_v60 = vpop.permute.xlu0 %1212  ;;  %v1795_v38 = vmul.f32 %v22880_v8, %v1732_v47  ;;  %v2616_v16 = vadd.f32 %v2584_v5, %v2352_v46  ;;  %v23414_v8 = vld [vmem:[%s27448_s1] ss:$0 sm:$0xff]  ;;  %v23481_v46 = vld [vmem:[%s27448_s1 + $0x5] ss:$0 sm:$0xff] }
 0x25b   : > { %v2911_v14 = vmax.f32 %v2879_v58, 0.0  ;;  %v1268_v34 = vmul.f32 %v23403_v30, %v1213_v60  ;;  %v741_v42 = vmul.f32 %v23414_v8, %v23349_v9  ;;  %v742_v63 = vmul.f32 %v23414_v8, %v695_v55 }
 0x25c   : > { %v23408_v27 = vadd.f32 %v1795_v38, %v23331_v56  ;;  %v23422_v56 = vld [vmem:[%s27449_s2] ss:$0 sm:$0xff] }
 0x25d   : > { %2944 = vst.msk [vmem:[#allocation2 + $0x109] sm:$0xff] %vm389_vm0, %v2911_v14  ;;  %v1300_v35 = vadd.f32 %v1268_v34, %v23333_v57  ;;  %v2769_v17 = vpop.permute.xlu1 %2768  ;;  %v773_v57 = vadd.f32 %v23422_v56, %v741_v42  ;;  %v774_v29 = vadd.f32 %v23422_v56, %v742_v63 }
 0x25e   : > { %v2251_v41 = vpop.permute.xlu0 %2250  ;;  %v2848_v61 = vmul.f32 %v22935_v15, %v2769_v17  ;;  %v23434_v15 = vld [vmem:[%s27448_s1 + $0x1] ss:$0 sm:$0xff] }
 0x260   : > { %v2880_v1 = vadd.f32 %v2848_v61, %v2616_v16  ;;  %v23489_v16 = vld [vmem:[%s27448_s1 + $0x6] ss:$0 sm:$0xff] }
 0x261   : > { %v1473_v51 = vpop.permute.xlu1 %1472  ;;  %v2321_v42 = vmul.f32 %v23489_v16, %v23365_v52  ;;  %v2057_v52 = vmul.f32 %v23481_v46, %v23337_v59 }
 0x262   : > { %v954_v36 = vpop.permute.xlu0 %953  ;;  %v2912_v33 = vmax.f32 %v2880_v1, 0.0  ;;  %v1532_v9 = vmul.f32 %v23428_v26, %v1473_v51 }
 0x263   : > { %v1005_v18 = vmul.f32 %v23434_v15, %v954_v36 }
 0x264   : > { %v23437_v45 = vld [vmem:[#allocation2 + $0x108] sm:$0xff]  ;;  %2945 = vst.msk [vmem:[#allocation2 + $0x111] sm:$0xff] %vm389_vm0, %v2912_v33  ;;  %v23443_v7 = vadd.f32 %v1532_v9, %v23361_v62  ;;  %v23457_v62 = vpack.c.bf16 %v16332_v24, %v16331_v11  ;;  %v2322_v24 = vmul.f32 %v23489_v16, %v2251_v41 }
 0x265   : > { %27644 = vst [vmem:[#allocation12_spill] sm:$0xff] %v23437_v45  ;;  %v23439_v43 = vld [vmem:[#allocation2 + $0x109] sm:$0xff]  ;;  %v1037_v10 = vadd.f32 %v1005_v18, %v773_v57  ;;  %18446 = vmatprep.mubr.msk.f32.mxu1 %vm389_vm0, %v23437_v45  ;;  %v2510_v25 = vpop.permute.xlu1 %2509  ;;  %v23511_v11 = vld [vmem:[%s27448_s1 + $0x8] ss:$0 sm:$0xff] }
 0x266   : > { %27645 = vst [vmem:[#allocation11_spill] sm:$0xff] %v23439_v43  ;;  %18667 = vmatprep.mubr.msk.f32.mxu0 %vm389_vm0, %v23439_v43  ;;  %v23455_v4 = vpop.permute.xlu0 %1990  ;;  %20290 = vmatprep.subr.bf16.mxu0 %v23457_v62 }
 0x269   : > { %v1478_v50 = vpop.permute.xlu1 %1477 }
 0x26a   : > { %v959_v54 = vpop.permute.xlu0 %958  ;;  %v1533_v48 = vmul.f32 %v23428_v26, %v1478_v50 }
 0x26b   : > { %v1006_v58 = vmul.f32 %v23434_v15, %v959_v54  ;;  %v23464_v12 = vld [vmem:[#allocation2 + $0x110] sm:$0xff]  ;;  %v2089_v54 = vadd.f32 %v2057_v52, %v23302_v40 }
 0x26c   : > { %27646 = vst [vmem:[#allocation8_spill] sm:$0xff] %v23464_v12  ;;  %v23466_v47 = vld [vmem:[#allocation2 + $0x111] sm:$0xff]  ;;  %v23468_v60 = vadd.f32 %v1533_v48, %v1300_v35  ;;  %18447 = vmatmul.mubr.msk.f32.gmra.mrb[22].mxu1 %vm389_vm0, %v23464_v12  ;;  %v2056_v35 = vmul.f32 %v23481_v46, %v23310_v22  ;;  %v23501_v22 = vld [vmem:[%s27448_s1 + $0x7] ss:$0 sm:$0xff] }
 0x26d   : > { %27647 = vst [vmem:[#allocation13_spill] sm:$0xff] %v23466_v47  ;;  %v1038_v5 = vadd.f32 %v1006_v58, %v774_v29  ;;  %18668 = vmatmul.mubr.msk.f32.gmra.mrb[20].mxu0 %vm389_vm0, %v23466_v47  ;;  %v2515_v55 = vpop.permute.xlu1 %2514  ;;  %v2585_v57 = vmul.f32 %v23501_v22, %v2510_v25  ;;  %v2354_v58 = vadd.f32 %v2322_v24, %v2089_v54 }
 0x26e   : > { %v23474_v14 = vpop.permute.xlu0 %1995  ;;  %v2088_v36 = vadd.f32 %v2056_v35, %v23292_v37  ;;  %v2586_v29 = vmul.f32 %v23501_v22, %v2515_v55 }
 0x270   : > { %v2353_v33 = vadd.f32 %v2321_v42, %v2088_v36  ;;  %v2618_v42 = vadd.f32 %v2586_v29, %v2354_v58  ;;  %v2058_v29 = vmul.f32 %v23481_v46, %v23455_v4 }
 0x271   : > { %v1218_v38 = vpop.permute.xlu1 %1217 }
 0x272   : > { %v23476_v34 = vpop.permute.xlu0 %699  ;;  %v1269_v17 = vmul.f32 %v23403_v30, %v1218_v38  ;;  %v2090_v4 = vadd.f32 %v2058_v29, %v23378_v21 }
 0x274   : > { %v23493_v61 = vadd.f32 %v1269_v17, %v1037_v10  ;;  %v2617_v10 = vadd.f32 %v2585_v57, %v2353_v33 }
 0x275   : > { %v2256_v1 = vpop.permute.xlu1 %2255 }
 0x276   : > { %v23495_v51 = vpop.permute.xlu0 %1736 }
 0x279   : > { %v23504_v9 = vpop.permute.xlu1 %704 }
 0x27a   : > { %v2774_v18 = vpop.permute.xlu0 %2773 }
 0x27b   : > { %v2849_v37 = vmul.f32 %v23511_v11, %v2774_v18 }
 0x27d   : > { %v2881_v63 = vadd.f32 %v2849_v37, %v2617_v10  ;;  %v23515_v50 = vpop.permute.xlu1 %1741 }
 0x27e   : > { %v1223_v25 = vpop.permute.xlu0 %1222 }
 0x27f   : > { %v2913_v48 = vmax.f32 %v2881_v63, 0.0  ;;  %v1270_v59 = vmul.f32 %v23403_v30, %v1223_v25 }
 0x281   : > { %2946 = vst.msk [vmem:[#allocation2 + $0x121] sm:$0xff] %vm389_vm0, %v2913_v48  ;;  %v23521_v38 = vadd.f32 %v1270_v59, %v1038_v5  ;;  %v2779_v35 = vpop.permute.xlu1 %2778  ;;  %v16187_v48 = vld [vmem:[%s27450_s3 + $0x40] sm:$0xff]  ;;  %v16188_v59 = vld [vmem:[%s27450_s3 + $0x48] sm:$0xff] }
 0x282   : > { %v2261_v17 = vpop.permute.xlu0 %2260  ;;  %v2850_v41 = vmul.f32 %v23511_v11, %v2779_v35  ;;  %v23557_v58 = vpack.c.bf16 %v16188_v59, %v16187_v48  ;;  %v2323_v35 = vmul.f32 %v23489_v16, %v2256_v1 }
 0x283   : > { %v2324_v1 = vmul.f32 %v23489_v16, %v2261_v17 }
 0x284   : > { %v2882_v36 = vadd.f32 %v2850_v41, %v2618_v42  ;;  %20258 = vmatprep.subr.bf16.mxu1 %v23557_v58 }
 0x285   : > { %v23524_v57 = vpop.permute.xlu1 %1482 }
 0x286   : > { %v23526_v33 = vpop.permute.xlu0 %963  ;;  %v2914_v40 = vmax.f32 %v2882_v36, 0.0 }
 0x288   : > { %v23528_v55 = vld [vmem:[#allocation2 + $0x120] sm:$0xff]  ;;  %2947 = vst.msk [vmem:[#allocation2 + $0x129] sm:$0xff] %vm389_vm0, %v2914_v40  ;;  %v2355_v40 = vadd.f32 %v2323_v35, %v2090_v4 }
 0x289   : > { %27648 = vst [vmem:[#allocation14_spill] sm:$0xff] %v23528_v55  ;;  %v23530_v18 = vld [vmem:[#allocation2 + $0x121] sm:$0xff]  ;;  %18449 = vmatprep.mubr.msk.f32.mxu1 %vm389_vm0, %v23528_v55  ;;  %v2059_v55 = vmul.f32 %v23481_v46, %v23474_v14 }
 0x28a   : > { %27649 = vst [vmem:[#allocation15_spill] sm:$0xff] %v23530_v18  ;;  %18670 = vmatprep.mubr.msk.f32.mxu0 %vm389_vm0, %v23530_v18  ;;  %v2520_v5 = vpop.permute.xlu1 %2519  ;;  %v2001_v52 = vpop.permute.xlu0 %2000 }
 0x28b   : > { %v2587_v36 = vmul.f32 %v23501_v22, %v2520_v5  ;;  %v2091_v21 = vadd.f32 %v2059_v55, %v23408_v27  ;;  %v23595_v55 = vld [vmem:[%s27448_s1 + $0x4] ss:$0 sm:$0xff] }
 0x28d   : > { %v2619_v48 = vadd.f32 %v2587_v36, %v2355_v40  ;;  %v2356_v35 = vadd.f32 %v2324_v1, %v2091_v21 }
 0x28e   : > { %v23537_v10 = vpop.permute.xlu1 %1487  ;;  %v23539_v37 = vpop.permute.xlu0 %968 }
 0x28f   : > { %v23541_v24 = vld [vmem:[#allocation2 + $0x128] sm:$0xff] }
 0x290   : > { %27650 = vst [vmem:[#allocation16_spill] sm:$0xff] %v23541_v24  ;;  %v23543_v63 = vld [vmem:[#allocation2 + $0x129] sm:$0xff]  ;;  %18450 = vmatmul.mubr.msk.f32.gmra.mrb[24].mxu1 %vm389_vm0, %v23541_v24 }
 0x291   : > { %27651 = vst [vmem:[#allocation17_spill] sm:$0xff] %v23543_v63  ;;  %18671 = vmatmul.mubr.msk.f32.gmra.mrb[22].mxu0 %vm389_vm0, %v23543_v63 }
 0x292   : > { %v2525_v25 = vpop.permute.xlu1 %2524  ;;  %v2006_v54 = vpop.permute.xlu0 %2005 }
 0x293   : > { %v2588_v5 = vmul.f32 %v23501_v22, %v2525_v25  ;;  %v1796_v25 = vmul.f32 %v23595_v55, %v23495_v51 }
 0x295   : > { %v2620_v36 = vadd.f32 %v2588_v5, %v2356_v35  ;;  %v2060_v5 = vmul.f32 %v23481_v46, %v2001_v52 }
 0x296   : > { %v23560_v42 = vpop.permute.xlu1 %1746  ;;  %v23562_v41 = vpop.permute.xlu0 %1227 }
 0x29a   : > { %v2784_v0 = vpop.permute.xlu1 %2783  ;;  %v2266_v24 = vpop.permute.xlu0 %2265 }
 0x29b   : > { %v2851_v59 = vmul.f32 %v23511_v11, %v2784_v0 }
 0x29d   : > { %v2883_v12 = vadd.f32 %v2851_v59, %v2619_v48 }
 0x29e   : > { %v23571_v45 = vpop.permute.xlu1 %1751  ;;  %v23573_v63 = vpop.permute.xlu0 %1232 }
 0x29f   : > { %v2915_v29 = vmax.f32 %v2883_v12, 0.0 }
 0x2a1   : > { %2948 = vst.msk [vmem:[#allocation2 + $0x139] sm:$0xff] %vm389_vm0, %v2915_v29 }
 0x2a2   : > { %v2789_v4 = vpop.permute.xlu1 %2788  ;;  %v2271_v14 = vpop.permute.xlu0 %2270 }
 0x2a3   : > { %v2852_v0 = vmul.f32 %v23511_v11, %v2789_v4  ;;  %v1828_v4 = vadd.f32 %v1796_v25, %v23443_v7 }
 0x2a5   : > { %v2884_v40 = vadd.f32 %v2852_v0, %v2620_v36  ;;  %v1797_v36 = vmul.f32 %v23595_v55, %v23515_v50  ;;  %v2325_v0 = vmul.f32 %v23489_v16, %v2266_v24  ;;  %v2092_v52 = vadd.f32 %v2060_v5, %v1828_v4 }
 0x2a6   : > { %v2011_v17 = vpop.permute.xlu1 %2010  ;;  %v23579_v48 = vpop.permute.xlu0 %1492  ;;  %v2326_v50 = vmul.f32 %v23489_v16, %v2271_v14 }
 0x2a7   : > { %v2916_v59 = vmax.f32 %v2884_v40, 0.0  ;;  %v1829_v7 = vadd.f32 %v1797_v36, %v23468_v60  ;;  %v2357_v25 = vadd.f32 %v2325_v0, %v2092_v52  ;;  %v1798_v0 = vmul.f32 %v23595_v55, %v23560_v42 }
 0x2a8   : > { %v23581_v18 = vld [vmem:[#allocation2 + $0x138] sm:$0xff] }
 0x2a9   : > { %27652 = vst [vmem:[#allocation18_spill] sm:$0xff] %v23581_v18  ;;  %v23583_v47 = vld [vmem:[#allocation2 + $0x139] sm:$0xff]  ;;  %2949 = vst.msk [vmem:[#allocation2 + $0x141] sm:$0xff] %vm389_vm0, %v2916_v59  ;;  %18452 = vmatprep.mubr.msk.f32.mxu1 %vm389_vm0, %v23581_v18  ;;  %v2061_v59 = vmul.f32 %v23481_v46, %v2006_v54 }
 0x2aa   : > { %27653 = vst [vmem:[#allocation19_spill] sm:$0xff] %v23583_v47  ;;  %18673 = vmatprep.mubr.msk.f32.mxu0 %vm389_vm0, %v23583_v47  ;;  %v23590_v27 = vpop.permute.xlu1 %1497  ;;  %v2530_v12 = vpop.permute.xlu0 %2529 }
 0x2ab   : > { %v2589_v18 = vmul.f32 %v23501_v22, %v2530_v12  ;;  %v1534_v12 = vmul.f32 %v23428_v26, %v23524_v57 }
 0x2ad   : > { %v2621_v43 = vadd.f32 %v2589_v18, %v2357_v25 }
 0x2ae   : > { %v2535_v1 = vpop.permute.xlu1 %2534  ;;  %v2016_v21 = vpop.permute.xlu0 %2015 }
 0x2b0   : > { %v23600_v29 = vld [vmem:[#allocation2 + $0x140] sm:$0xff] }
 0x2b1   : > { %27654 = vst [vmem:[#allocation20_spill] sm:$0xff] %v23600_v29  ;;  %v23602_v35 = vld [vmem:[#allocation2 + $0x141] sm:$0xff]  ;;  %18453 = vmatmul.mubr.msk.f32.gmra.mrb[26].mxu1 %vm389_vm0, %v23600_v29  ;;  %v2093_v29 = vadd.f32 %v2061_v59, %v1829_v7 }
 0x2b2   : > { %27655 = vst [vmem:[#allocation21_spill] sm:$0xff] %v23602_v35  ;;  %18674 = vmatmul.mubr.msk.f32.gmra.mrb[24].mxu0 %vm389_vm0, %v23602_v35  ;;  %v2276_v51 = vpop.permute.xlu1 %2275  ;;  %v23612_v40 = vpop.permute.xlu0 %1756  ;;  %v2590_v35 = vmul.f32 %v23501_v22, %v2535_v1 }
 0x2b3   : > { %v2358_v3 = vadd.f32 %v2326_v50, %v2093_v29  ;;  %v744_v29 = vmul.f32 %v23414_v8, %v23504_v9  ;;  %v2327_v59 = vmul.f32 %v23489_v16, %v2276_v51  ;;  %v1271_v50 = vmul.f32 %v23403_v30, %v23562_v41 }
 0x2b4   : > { %v1536_v41 = vmul.f32 %v23428_v26, %v23579_v48 }
 0x2b5   : > { %v2622_v60 = vadd.f32 %v2590_v35, %v2358_v3  ;;  %v743_v3 = vmul.f32 %v23414_v8, %v23476_v34  ;;  %v1799_v35 = vmul.f32 %v23595_v55, %v23571_v45  ;;  %v2063_v8 = vmul.f32 %v23481_v46, %v2016_v21 }
 0x2b6   : > { %v23618_v24 = vpop.permute.xlu1 %1761  ;;  %v2794_v47 = vpop.permute.xlu0 %2793  ;;  %v776_v51 = vadd.f32 %v23422_v56, %v744_v29 }
 0x2b7   : > { %v2853_v6 = vmul.f32 %v23511_v11, %v2794_v47  ;;  %v1566_v47 = vadd.f32 %v1534_v12, %v23493_v61  ;;  %v1007_v61 = vmul.f32 %v23434_v15, %v23526_v33  ;;  %v775_v45 = vadd.f32 %v23422_v56, %v743_v3 }
 0x2b8   : > { %v1272_v33 = vmul.f32 %v23403_v30, %v23573_v63  ;;  %v1537_v30 = vmul.f32 %v23428_v26, %v23590_v27 }
 0x2b9   : > { %v2885_v5 = vadd.f32 %v2853_v6, %v2621_v43  ;;  %v1535_v6 = vmul.f32 %v23428_v26, %v23537_v10  ;;  %v2062_v43 = vmul.f32 %v23481_v46, %v2011_v17  ;;  %v1830_v42 = vadd.f32 %v1798_v0, %v1566_v47 }
 0x2ba   : > { %v2799_v4 = vpop.permute.xlu1 %2798  ;;  %v2281_v54 = vpop.permute.xlu0 %2280  ;;  %v1008_v10 = vmul.f32 %v23434_v15, %v23539_v37  ;;  %v1039_v56 = vadd.f32 %v1007_v61, %v775_v45  ;;  %v1801_v26 = vmul.f32 %v23595_v55, %v23618_v24 }
 0x2bb   : > { %v2917_v36 = vmax.f32 %v2885_v5, 0.0  ;;  %v2854_v14 = vmul.f32 %v23511_v11, %v2799_v4  ;;  %v1567_v34 = vadd.f32 %v1535_v6, %v23521_v38  ;;  %v2094_v25 = vadd.f32 %v2062_v43, %v1830_v42 }
 0x2bc   : > { %v2328_v21 = vmul.f32 %v23489_v16, %v2281_v54  ;;  %v1040_v4 = vadd.f32 %v1008_v10, %v776_v51  ;;  %v1303_v0 = vadd.f32 %v1271_v50, %v1039_v56 }
 0x2bd   : > { %2950 = vst.msk [vmem:[#allocation2 + $0x151] sm:$0xff] %vm389_vm0, %v2917_v36  ;;  %v2886_v18 = vadd.f32 %v2854_v14, %v2622_v60  ;;  %v1831_v38 = vadd.f32 %v1799_v35, %v1567_v34  ;;  %v2359_v5 = vadd.f32 %v2327_v59, %v2094_v25 }
 0x2be   : > { %v2540_v1 = vpop.permute.xlu1 %2539  ;;  %v2021_v52 = vpop.permute.xlu0 %2020  ;;  %v1568_v43 = vadd.f32 %v1536_v41, %v1303_v0  ;;  %v3354_v0 = vld [vmem:[#allocation2 + $0x9] sm:$0xff] }
 0x2bf   : > { %v2918_v57 = vmax.f32 %v2886_v18, 0.0  ;;  %v2591_v9 = vmul.f32 %v23501_v22, %v2540_v1  ;;  %v2095_v60 = vadd.f32 %v2063_v8, %v1831_v38  ;;  %v1304_v18 = vadd.f32 %v1272_v33, %v1040_v4 }
 0x2c0   : > { %v1800_v1 = vmul.f32 %v23595_v55, %v23612_v40  ;;  %v2064_v3 = vmul.f32 %v23481_v46, %v2021_v52 }
 0x2c1   : > { %2951 = vst.msk [vmem:[#allocation2 + $0x159] sm:$0xff] %vm389_vm0, %v2918_v57  ;;  %v2623_v36 = vadd.f32 %v2591_v9, %v2359_v5  ;;  %v2360_v48 = vadd.f32 %v2328_v21, %v2095_v60  ;;  %v1569_v57 = vadd.f32 %v1537_v30, %v1304_v18  ;;  %v3353_v60 = vld [vmem:[#allocation2 + $0x1] sm:$0xff] }
 0x2c2   : > { %v2545_v17 = vpop.permute.xlu1 %2544  ;;  %v2026_v7 = vpop.permute.xlu0 %2025  ;;  %v1832_v24 = vadd.f32 %v1800_v1, %v1568_v43 }
 0x2c3   : > { %v2592_v54 = vmul.f32 %v23501_v22, %v2545_v17  ;;  %v2065_v35 = vmul.f32 %v23481_v46, %v2026_v7  ;;  %v1833_v61 = vadd.f32 %v1801_v26, %v1569_v57  ;;  %v27656_v57 = vld [vmem:[#allocation6_spill] sm:$0xff] }
 0x2c4   : > { %v23653_v15 = vld [vmem:[#allocation2 + $0x150] sm:$0xff]  ;;  %v2096_v25 = vadd.f32 %v2064_v3, %v1832_v24  ;;  %v21775_v3 = vld [vmem:[#allocation2 + $0x39] sm:$0xff] }
 0x2c5   : > { %v23655_v37 = vld [vmem:[#allocation2 + $0x151] sm:$0xff]  ;;  %18455 = vmatprep.mubr.msk.f32.mxu1 %vm389_vm0, %v23653_v15  ;;  %v2624_v42 = vadd.f32 %v2592_v54, %v2360_v48  ;;  %v2097_v9 = vadd.f32 %v2065_v35, %v1833_v61  ;;  %v21774_v48 = vld [vmem:[#allocation2 + $0x21] sm:$0xff] }
 0x2c6   : > { %18676 = vmatprep.mubr.msk.f32.mxu0 %vm389_vm0, %v23655_v37  ;;  %v2804_v63 = vpop.permute.xlu1 %2803  ;;  %v2286_v12 = vpop.permute.xlu0 %2285  ;;  %v23754_v35 = vld [vmem:[#allocation2 + $0x32] sm:$0xff]  ;;  %v23762_v24 = vld [vmem:[#allocation2 + $0x3a] sm:$0xff] }
 0x2c7   : > { %v2855_v14 = vmul.f32 %v23511_v11, %v2804_v63  ;;  %v2329_v10 = vmul.f32 %v23489_v16, %v2286_v12  ;;  %v21778_v61 = vld [vmem:[#allocation2 + $0x61] sm:$0xff] }
 0x2c8   : > { %v23670_v47 = vld [vmem:[#allocation2 + $0x158] sm:$0xff] }
 0x2c9   : > { %v23672_v6 = vld [vmem:[#allocation2 + $0x159] sm:$0xff]  ;;  %v2887_v27 = vadd.f32 %v2855_v14, %v2623_v36  ;;  %18456 = vmatmul.mubr.msk.f32.gmra.mrb[28].mxu1 %vm389_vm0, %v23670_v47  ;;  %v2361_v7 = vadd.f32 %v2329_v10, %v2096_v25  ;;  %v16189_v36 = vld [vmem:[%s27450_s3 + $0x50] sm:$0xff] }
 0x2ca   : > { %18677 = vmatmul.mubr.msk.f32.gmra.mrb[26].mxu0 %vm389_vm0, %v23672_v6  ;;  %v2809_v40 = vpop.permute.xlu1 %2808  ;;  %v2291_v29 = vpop.permute.xlu0 %2290  ;;  %v16190_v14 = vld [vmem:[%s27450_s3 + $0x58] sm:$0xff]  ;;  %v23767_v10 = vld [vmem:[#allocation2 + $0x4a] sm:$0xff] }
 0x2cb   : > { %v2919_v59 = vmax.f32 %v2887_v27, 0.0  ;;  %v2856_v55 = vmul.f32 %v23511_v11, %v2809_v40  ;;  %v2330_v34 = vmul.f32 %v23489_v16, %v2291_v29  ;;  %v20261_v18 = vpack.c.bf16 %v16190_v14, %v16189_v36  ;;  %v16333_v27 = vld [vmem:[%s27450_s3 + $0xd0] sm:$0xff]  ;;  %v23743_v40 = vld [vmem:[#allocation2 + $0x22] sm:$0xff] }
 0x2cc   : > { %v16368_v29 = vld [vmem:[%s27450_s3 + $0xe8] sm:$0xff] }
 0x2cd   : > { %2952 = vst.msk [vmem:[#allocation2 + $0x169] sm:$0xff] %vm389_vm0, %v2919_v59  ;;  %v2888_v17 = vadd.f32 %v2856_v55, %v2624_v42  ;;  %v2362_v50 = vadd.f32 %v2330_v34, %v2097_v9  ;;  %v21776_v42 = vld [vmem:[#allocation2 + $0x49] sm:$0xff]  ;;  %v21777_v55 = vld [vmem:[#allocation2 + $0x51] sm:$0xff] }
 0x2ce   : > { %v2555_v8 = vpop.permute.xlu1 %2554  ;;  %v2550_v52 = vpop.permute.xlu0 %2549  ;;  %v23779_v34 = vld [vmem:[#allocation2 + $0x62] sm:$0xff]  ;;  %v23785_v25 = vld [vmem:[#allocation2 + $0x6a] sm:$0xff] }
 0x2cf   : > { %v2920_v45 = vmax.f32 %v2888_v17, 0.0  ;;  %v2594_v51 = vmul.f32 %v23501_v22, %v2555_v8  ;;  %v2593_v46 = vmul.f32 %v23501_v22, %v2550_v52  ;;  %v23773_v17 = vld [vmem:[#allocation2 + $0x52] sm:$0xff]  ;;  %v23797_v8 = vld [vmem:[#allocation2 + $0x82] sm:$0xff]  ;;  %v3744_v14 = vld [vmem:[#allocation2 + $0xa] sm:$0xff] }
 0x2d0   : > { %v27657_v52 = vld [vmem:[#allocation9_spill] sm:$0xff]  ;;  %v23845_v9 = vld [vmem:[#allocation2 + $0xe2] sm:$0xff] }
 0x2d1   : > { %2953 = vst.msk [vmem:[#allocation2 + $0x171] sm:$0xff] %vm389_vm0, %v2920_v45  ;;  %v2626_v5 = vadd.f32 %v2594_v51, %v2362_v50  ;;  %v2625_v21 = vadd.f32 %v2593_v46, %v2361_v7  ;;  %v27659_v45 = vld [vmem:[#allocation11_spill] sm:$0xff]  ;;  %v27660_v51 = vld [vmem:[#allocation13_spill] sm:$0xff] }
 0x2d2   : > { %v2819_v33 = vpop.permute.xlu1 %2818  ;;  %v2814_v38 = vpop.permute.xlu0 %2813  ;;  %v23857_v46 = vld [vmem:[#allocation2 + $0xfa] sm:$0xff]  ;;  %v27661_v7 = vld [vmem:[#allocation15_spill] sm:$0xff] }
 0x2d3   : > { %v2858_v56 = vmul.f32 %v23511_v11, %v2819_v33  ;;  %v2857_v16 = vmul.f32 %v23511_v11, %v2814_v38  ;;  %v23863_v50 = vld [vmem:[#allocation2 + $0x10a] sm:$0xff]  ;;  %v27662_v33 = vld [vmem:[#allocation17_spill] sm:$0xff] }
 0x2d4   : > { %v23691_v4 = vld [vmem:[#allocation2 + $0x168] sm:$0xff]  ;;  %v23869_v38 = vld [vmem:[#allocation2 + $0x112] sm:$0xff] }
 0x2d5   : > { %v23693_v41 = vld [vmem:[#allocation2 + $0x169] sm:$0xff]  ;;  %v2890_v30 = vadd.f32 %v2858_v56, %v2626_v5  ;;  %v2889_v63 = vadd.f32 %v2857_v16, %v2625_v21  ;;  %18458 = vmatprep.mubr.msk.f32.mxu1 %vm389_vm0, %v23691_v4  ;;  %v27664_v56 = vld [vmem:[#allocation21_spill] sm:$0xff] }
 0x2d6   : > { %18679 = vmatprep.mubr.msk.f32.mxu0 %vm389_vm0, %v23693_v41  ;;  %v27663_v5 = vld [vmem:[#allocation19_spill] sm:$0xff] }
 0x2d7   : > { %v2922_v22 = vmax.f32 %v2890_v30, 0.0  ;;  %v2921_v12 = vmax.f32 %v2889_v63, 0.0  ;;  %v23875_v21 = vld [vmem:[#allocation2 + $0x122] sm:$0xff]  ;;  %v23881_v16 = vld [vmem:[#allocation2 + $0x12a] sm:$0xff]  ;;  %v23887_v30 = vld [vmem:[#allocation2 + $0x13a] sm:$0xff] }
 0x2d8   : > { %v23702_v11 = vld [vmem:[#allocation2 + $0x170] sm:$0xff]  ;;  %v23893_v63 = vld [vmem:[#allocation2 + $0x142] sm:$0xff] }
 0x2d9   : > { %v23704_v54 = vld [vmem:[#allocation2 + $0x171] sm:$0xff]  ;;  %2955 = vst.msk [vmem:[#allocation2 + $0x189] sm:$0xff] %vm389_vm0, %v2922_v22  ;;  %2954 = vst.msk [vmem:[#allocation2 + $0x181] sm:$0xff] %vm389_vm0, %v2921_v12  ;;  %18459 = vmatmul.mubr.msk.f32.gmra.mrb[30].mxu1 %vm389_vm0, %v23702_v11  ;;  %v3743_v12 = vld [vmem:[#allocation2 + $0x2] sm:$0xff] }
 0x2da   : > { %18680 = vmatmul.mubr.msk.f32.gmra.mrb[28].mxu0 %vm389_vm0, %v23704_v54  ;;  %18469 = vmatprep.mubr.msk.f32.mxu1 %vm389_vm0, %v3353_v60  ;;  %v23899_v22 = vld [vmem:[#allocation2 + $0x152] sm:$0xff]  ;;  %v23905_v60 = vld [vmem:[#allocation2 + $0x15a] sm:$0xff]  ;;  %v23909_v36 = vld [vmem:[#allocation2 + $0x16a] sm:$0xff] }
 0x2dd   : > { %18470 = vmatmul.mubr.msk.f32.vlgmr.msra.gmra.mrb[0].mxu1 %vm389_vm0, %v3354_v0  ;;  %v23915_v0 = vld [vmem:[#allocation2 + $0x172] sm:$0xff] }
 0x2de   : > { %18472 = vmatprep.mubr.msk.f32.mxu1 %vm389_vm0, %v23163_v2  ;;  %20260 = vmatpush3.bf16.msra.mxu1 %v23557_v58  ;;  %v16334_v2 = vld [vmem:[%s27450_s3 + $0xd8] sm:$0xff] }
 0x2df   : > { %20262 = vmatprep.subr.bf16.mxu1 %v20261_v18  ;;  %v23737_v58 = vld [vmem:[#allocation2 + $0x1a] sm:$0xff]  ;;  %v20293_v43 = vpack.c.bf16 %v16334_v2, %v16333_v27  ;;  %v16369_v2 = vld [vmem:[%s27450_s3 + $0xf0] sm:$0xff] }
 0x2e0   : > { %v23720_v1 = vld [vmem:[#allocation2 + $0x181] sm:$0xff]  ;;  %v23722_v26 = vld [vmem:[#allocation2 + $0x189] sm:$0xff] }
 0x2e1   : > { %18473 = vmatmul.mubr.msk.f32.gmra.mrb[2].mxu1 %vm389_vm0, %v21774_v48  ;;  %18682 = vmatprep.mubr.msk.f32.mxu0 %vm389_vm0, %v23720_v1  ;;  %v27665_v48 = vld [vmem:[#allocation7_spill] sm:$0xff] }
 0x2e2   : > { %18475 = vmatprep.mubr.msk.f32.mxu1 %vm389_vm0, %v23175_v32  ;;  %18683 = vmatmul.mubr.msk.f32.gmra.mrb[30].mxu0 %vm389_vm0, %v23722_v26  ;;  %v16367_v32 = vld [vmem:[%s27450_s3 + $0xe0] sm:$0xff]  ;;  %v23929_v27 = vld [vmem:[#allocation2 + $0x18a] sm:$0xff] }
 0x2e3   : > { %18693 = vmatprep.mubr.msk.f32.mxu0 %vm389_vm0, %v23737_v58  ;;  %20264 = vmatpush3.bf16.msra.mxu1 %v20261_v18  ;;  %v23759_v59 = vpack.c.bf16 %v16368_v29, %v16367_v32  ;;  %v23921_v18 = vld [vmem:[#allocation2 + $0x182] sm:$0xff] }
 0x2e4   : > { %20673 = vmatprep.subr.bf16.mxu1 %v27656_v57  ;;  %v16404_v32 = vld [vmem:[%s27450_s3 + $0x108] sm:$0xff] }
 0x2e5   : > { %18476 = vmatmul.mubr.msk.f32.gmra.mrb[4].mxu1 %vm389_vm0, %v21775_v3  ;;  %v5305_v3 = vld [vmem:[#allocation2 + $0x38] sm:$0xff]  ;;  %v5306_v29 = vld [vmem:[#allocation2 + $0x48] sm:$0xff] }
 0x2e6   : > { %18478 = vmatprep.mubr.msk.f32.mxu1 %vm389_vm0, %v21776_v42  ;;  %18694 = vmatmul.mubr.msk.f32.vlgmr.msra.gmra.mrb[0].mxu0 %vm389_vm0, %v23743_v40 }
 0x2e7   : > { %20292 = vmatpush3.bf16.msra.mxu0 %v23457_v62  ;;  %18696 = vmatprep.mubr.msk.f32.mxu0 %vm389_vm0, %v23754_v35  ;;  %v21779_v62 = vld [vmem:[#allocation2 + $0x69] sm:$0xff] }
 0x2e8   : > { %20294 = vmatprep.subr.bf16.mxu0 %v20293_v43 }
 0x2e9   : > { %18479 = vmatmul.mubr.msk.f32.gmra.mrb[6].mxu1 %vm389_vm0, %v21777_v55  ;;  %v5307_v55 = vld [vmem:[#allocation2 + $0x50] sm:$0xff] }
 0x2ea   : > { %18481 = vmatprep.mubr.msk.f32.mxu1 %vm389_vm0, %v21778_v61  ;;  %18697 = vmatmul.mubr.msk.f32.gmra.mrb[2].mxu0 %vm389_vm0, %v23762_v24  ;;  %v5308_v61 = vld [vmem:[#allocation2 + $0x60] sm:$0xff] }
 0x2eb   : > { %18699 = vmatprep.mubr.msk.f32.mxu0 %vm389_vm0, %v23767_v10  ;;  %20296 = vmatpush3.bf16.msra.mxu0 %v20293_v43  ;;  %v5304_v43 = vld [vmem:[#allocation2 + $0x30] sm:$0xff] }
 0x2ec   : > { %20298 = vmatprep.subr.bf16.mxu0 %v23759_v59 }
 0x2ed   : > { %18482 = vmatmul.mubr.msk.f32.gmra.mrb[8].mxu1 %vm389_vm0, %v21779_v62  ;;  %v5310_v62 = vld [vmem:[#allocation2 + $0x78] sm:$0xff] }
 0x2ee   : > { %18484 = vmatprep.mubr.msk.f32.mxu1 %vm389_vm0, %v23200_v23  ;;  %18700 = vmatmul.mubr.msk.f32.gmra.mrb[4].mxu0 %vm389_vm0, %v23773_v17  ;;  %v23791_v23 = vld [vmem:[#allocation2 + $0x7a] sm:$0xff] }
 0x2ef   : > { %18702 = vmatprep.mubr.msk.f32.mxu0 %vm389_vm0, %v23779_v34 }
 0x2f1   : > { %18485 = vmatmul.mubr.msk.f32.gmra.mrb[10].mxu1 %vm389_vm0, %v23209_v13  ;;  %v23803_v13 = vld [vmem:[#allocation2 + $0x92] sm:$0xff] }
 0x2f2   : > { %18487 = vmatprep.mubr.msk.f32.mxu1 %vm389_vm0, %v23221_v49  ;;  %18703 = vmatmul.mubr.msk.f32.gmra.mrb[6].mxu0 %vm389_vm0, %v23785_v25  ;;  %v23809_v49 = vld [vmem:[#allocation2 + $0x9a] sm:$0xff] }
 0x2f3   : > { %18705 = vmatprep.mubr.msk.f32.mxu0 %vm389_vm0, %v23791_v23 }
 0x2f5   : > { %18488 = vmatmul.mubr.msk.f32.gmra.mrb[12].mxu1 %vm389_vm0, %v23225_v44  ;;  %v23815_v44 = vld [vmem:[#allocation2 + $0xaa] sm:$0xff] }
 0x2f6   : > { %18490 = vmatprep.mubr.msk.f32.mxu1 %vm389_vm0, %v23235_v28  ;;  %18706 = vmatmul.mubr.msk.f32.gmra.mrb[8].mxu0 %vm389_vm0, %v23797_v8  ;;  %v23821_v28 = vld [vmem:[#allocation2 + $0xb2] sm:$0xff] }
 0x2f7   : > { %18708 = vmatprep.mubr.msk.f32.mxu0 %vm389_vm0, %v23803_v13 }
 0x2f9   : > { %18491 = vmatmul.mubr.msk.f32.gmra.mrb[14].mxu1 %vm389_vm0, %v23240_v39  ;;  %v23827_v39 = vld [vmem:[#allocation2 + $0xc2] sm:$0xff] }
 0x2fa   : > { %18493 = vmatprep.mubr.msk.f32.mxu1 %vm389_vm0, %v23249_v31  ;;  %18709 = vmatmul.mubr.msk.f32.gmra.mrb[10].mxu0 %vm389_vm0, %v23809_v49  ;;  %v23833_v31 = vld [vmem:[#allocation2 + $0xca] sm:$0xff] }
 0x2fb   : > { %18711 = vmatprep.mubr.msk.f32.mxu0 %vm389_vm0, %v23815_v44 }
 0x2fd   : > { %18494 = vmatmul.mubr.msk.f32.gmra.mrb[16].mxu1 %vm389_vm0, %v23254_v19  ;;  %v23839_v19 = vld [vmem:[#allocation2 + $0xda] sm:$0xff] }
 0x2fe   : > { %18496 = vmatprep.mubr.msk.f32.mxu1 %vm389_vm0, %v23268_v20  ;;  %18712 = vmatmul.mubr.msk.f32.gmra.mrb[12].mxu0 %vm389_vm0, %v23821_v28  ;;  %v27658_v20 = vld [vmem:[#allocation10_spill] sm:$0xff] }
 0x2ff   : > { %18714 = vmatprep.mubr.msk.f32.mxu0 %vm389_vm0, %v23827_v39 }
 0x301   : > { %18497 = vmatmul.mubr.msk.f32.gmra.mrb[18].mxu1 %vm389_vm0, %v23272_v53  ;;  %v23851_v53 = vld [vmem:[#allocation2 + $0xf2] sm:$0xff] }
 0x302   : > { %18499 = vmatprep.mubr.msk.f32.mxu1 %vm389_vm0, %v27657_v52  ;;  %18715 = vmatmul.mubr.msk.f32.gmra.mrb[14].mxu0 %vm389_vm0, %v23833_v31  ;;  %v5311_v52 = vld [vmem:[#allocation2 + $0x80] sm:$0xff] }
 0x303   : > { %18717 = vmatprep.mubr.msk.f32.mxu0 %vm389_vm0, %v23839_v19 }
 0x305   : > { %18500 = vmatmul.mubr.msk.f32.gmra.mrb[20].mxu1 %vm389_vm0, %v27658_v20  ;;  %v5312_v20 = vld [vmem:[#allocation2 + $0x90] sm:$0xff] }
 0x306   : > { %18502 = vmatprep.mubr.msk.f32.mxu1 %vm389_vm0, %v27659_v45  ;;  %18718 = vmatmul.mubr.msk.f32.gmra.mrb[16].mxu0 %vm389_vm0, %v23845_v9  ;;  %v5313_v45 = vld [vmem:[#allocation2 + $0x98] sm:$0xff] }
 0x307   : > { %18720 = vmatprep.mubr.msk.f32.mxu0 %vm389_vm0, %v23851_v53 }
 0x309   : > { %18503 = vmatmul.mubr.msk.f32.gmra.mrb[22].mxu1 %vm389_vm0, %v27660_v51  ;;  %v5314_v51 = vld [vmem:[#allocation2 + $0xa8] sm:$0xff] }
 0x30a   : > { %18505 = vmatprep.mubr.msk.f32.mxu1 %vm389_vm0, %v27661_v7  ;;  %18721 = vmatmul.mubr.msk.f32.gmra.mrb[18].mxu0 %vm389_vm0, %v23857_v46  ;;  %v5315_v7 = vld [vmem:[#allocation2 + $0xb0] sm:$0xff] }
 0x30b   : > { %18723 = vmatprep.mubr.msk.f32.mxu0 %vm389_vm0, %v23863_v50 }
 0x30d   : > { %18506 = vmatmul.mubr.msk.f32.gmra.mrb[24].mxu1 %vm389_vm0, %v27662_v33  ;;  %v5316_v33 = vld [vmem:[#allocation2 + $0xc0] sm:$0xff] }
 0x30e   : > { %18508 = vmatprep.mubr.msk.f32.mxu1 %vm389_vm0, %v27663_v5  ;;  %18724 = vmatmul.mubr.msk.f32.gmra.mrb[20].mxu0 %vm389_vm0, %v23869_v38 }
 0x30f   : > { %18726 = vmatprep.mubr.msk.f32.mxu0 %vm389_vm0, %v23875_v21 }
 0x311   : > { %18509 = vmatmul.mubr.msk.f32.gmra.mrb[26].mxu1 %vm389_vm0, %v27664_v56 }
 0x312   : > { %18511 = vmatprep.mubr.msk.f32.mxu1 %vm389_vm0, %v23655_v37  ;;  %18727 = vmatmul.mubr.msk.f32.gmra.mrb[22].mxu0 %vm389_vm0, %v23881_v16 }
 0x313   : > { %18729 = vmatprep.mubr.msk.f32.mxu0 %vm389_vm0, %v23887_v30 }
 0x315   : > { %18512 = vmatmul.mubr.msk.f32.gmra.mrb[28].mxu1 %vm389_vm0, %v23672_v6 }
 0x316   : > { %18514 = vmatprep.mubr.msk.f32.mxu1 %vm389_vm0, %v23693_v41  ;;  %18730 = vmatmul.mubr.msk.f32.gmra.mrb[24].mxu0 %vm389_vm0, %v23893_v63 }
 0x317   : > { %18732 = vmatprep.mubr.msk.f32.mxu0 %vm389_vm0, %v23899_v22 }
 0x319   : > { %18515 = vmatmul.mubr.msk.f32.gmra.mrb[30].mxu1 %vm389_vm0, %v23704_v54 }
 0x31a   : > { %18733 = vmatmul.mubr.msk.f32.gmra.mrb[26].mxu0 %vm389_vm0, %v23905_v60  ;;  %18525 = vmatprep.mubr.msk.f32.mxu1 %vm389_vm0, %v3743_v12  ;;  %v5317_v12 = vld [vmem:[#allocation2 + $0xc8] sm:$0xff] }
 0x31b   : > { %18735 = vmatprep.mubr.msk.f32.mxu0 %vm389_vm0, %v23909_v36 }
 0x31d   : > { %18526 = vmatmul.mubr.msk.f32.vlgmr.msra.gmra.mrb[0].mxu1 %vm389_vm0, %v3744_v14  ;;  %v5318_v14 = vld [vmem:[#allocation2 + $0xd8] sm:$0xff] }
 0x31e   : > { %18528 = vmatprep.mubr.msk.f32.mxu1 %vm389_vm0, %v23737_v58  ;;  %18736 = vmatmul.mubr.msk.f32.gmra.mrb[28].mxu0 %vm389_vm0, %v23915_v0  ;;  %v16370_v58 = vld [vmem:[%s27450_s3 + $0xf8] sm:$0xff] }
 0x31f   : > { %18738 = vmatprep.mubr.msk.f32.mxu0 %vm389_vm0, %v23921_v18  ;;  %20675 = vmatpush3.bf16.msra.mxu1 %v27656_v57  ;;  %v20301_v57 = vpack.c.bf16 %v16370_v58, %v16369_v2  ;;  %v5320_v2 = vld [vmem:[#allocation2 + $0xf0] sm:$0xff]  ;;  %v5321_v58 = vld [vmem:[#allocation2 + $0xf8] sm:$0xff] }
 0x320   : > { %20674 = vmatprep.subr.bf16.mxu1 %v27665_v48 }
 0x321   : > { %18529 = vmatmul.mubr.msk.f32.gmra.mrb[2].mxu1 %vm389_vm0, %v23743_v40  ;;  %v16403_v40 = vld [vmem:[%s27450_s3 + $0x100] sm:$0xff] }
 0x322   : > { %18531 = vmatprep.mubr.msk.f32.mxu1 %vm389_vm0, %v23754_v35  ;;  %18739 = vmatmul.mubr.msk.f32.gmra.mrb[30].mxu0 %vm389_vm0, %v23929_v27  ;;  %v23956_v42 = vpack.c.bf16 %v16404_v32, %v16403_v40  ;;  %v27669_v40 = vld [vmem:[#allocation16_spill] sm:$0xff]  ;;  %v27670_v32 = vld [vmem:[#allocation18_spill] sm:$0xff] }
 0x323   : > { %18749 = vmatprep.mubr.msk.f32.mxu0 %vm389_vm0, %v5304_v43  ;;  %20676 = vmatpush3.bf16.msra.mxu1 %v27665_v48  ;;  %v5319_v48 = vld [vmem:[#allocation2 + $0xe0] sm:$0xff]  ;;  %v27666_v43 = vld [vmem:[#allocation12_spill] sm:$0xff] }
 0x325   : > { %18532 = vmatmul.mubr.msk.f32.gmra.mrb[4].mxu1 %vm389_vm0, %v23762_v24 }
 0x326   : > { %18534 = vmatprep.mubr.msk.f32.mxu1 %vm389_vm0, %v23767_v10  ;;  %18750 = vmatmul.mubr.msk.f32.vlgmr.msra.gmra.mrb[0].mxu0 %vm389_vm0, %v5305_v3  ;;  %v27668_v3 = vld [vmem:[#allocation14_spill] sm:$0xff] }
 0x327   : > { %20300 = vmatpush3.bf16.msra.mxu0 %v23759_v59  ;;  %18752 = vmatprep.mubr.msk.f32.mxu0 %vm389_vm0, %v5306_v29  ;;  %v5309_v59 = vld [vmem:[#allocation2 + $0x68] sm:$0xff]  ;;  %v27671_v29 = vld [vmem:[#allocation20_spill] sm:$0xff] }
 0x328   : > { %20302 = vmatprep.subr.bf16.mxu0 %v20301_v57 }
 0x329   : > { %18535 = vmatmul.mubr.msk.f32.gmra.mrb[6].mxu1 %vm389_vm0, %v23773_v17 }
 0x32a   : > { %18537 = vmatprep.mubr.msk.f32.mxu1 %vm389_vm0, %v23779_v34  ;;  %18753 = vmatmul.mubr.msk.f32.gmra.mrb[2].mxu0 %vm389_vm0, %v5307_v55  ;;  %v4153_v55 = vld [vmem:[#allocation2 + $0x108] sm:$0xff] }
 0x32b   : > { %18755 = vmatprep.mubr.msk.f32.mxu0 %vm389_vm0, %v5308_v61  ;;  %20304 = vmatpush3.bf16.msra.mxu0 %v20301_v57  ;;  %v27667_v57 = vld [vmem:[#allocation8_spill] sm:$0xff]  ;;  %v5332_v61 = vld [vmem:[#allocation2 + $0x180] sm:$0xff] }
 0x32c   : > { %20306 = vmatprep.subr.bf16.mxu0 %v23956_v42 }
 0x32d   : > { %18538 = vmatmul.mubr.msk.f32.gmra.mrb[8].mxu1 %vm389_vm0, %v23785_v25 }
 0x32e   : > { %18540 = vmatprep.mubr.msk.f32.mxu1 %vm389_vm0, %v23791_v23  ;;  %18756 = vmatmul.mubr.msk.f32.gmra.mrb[4].mxu0 %vm389_vm0, %v5309_v59  ;;  %v4154_v59 = vld [vmem:[#allocation2 + $0x110] sm:$0xff] }
 0x32f   : > { %18758 = vmatprep.mubr.msk.f32.mxu0 %vm389_vm0, %v5310_v62  ;;  %v5334_v62 = vld [vmem:[#allocation2 + $0x198] sm:$0xff] }
 0x331   : > { %18541 = vmatmul.mubr.msk.f32.gmra.mrb[10].mxu1 %vm389_vm0, %v23797_v8 }
 0x332   : > { %18543 = vmatprep.mubr.msk.f32.mxu1 %vm389_vm0, %v23803_v13  ;;  %18759 = vmatmul.mubr.msk.f32.gmra.mrb[6].mxu0 %vm389_vm0, %v5311_v52  ;;  %v5333_v52 = vld [vmem:[#allocation2 + $0x188] sm:$0xff] }
 0x333   : > { %18761 = vmatprep.mubr.msk.f32.mxu0 %vm389_vm0, %v5312_v20  ;;  %v5335_v20 = vld [vmem:[#allocation2 + $0x1a0] sm:$0xff] }
 0x335   : > { %18544 = vmatmul.mubr.msk.f32.gmra.mrb[12].mxu1 %vm389_vm0, %v23809_v49 }
 0x336   : > { %18546 = vmatprep.mubr.msk.f32.mxu1 %vm389_vm0, %v23815_v44  ;;  %18762 = vmatmul.mubr.msk.f32.gmra.mrb[8].mxu0 %vm389_vm0, %v5313_v45  ;;  %v16405_v45 = vld [vmem:[%s27450_s3 + $0x110] sm:$0xff] }
 0x337   : > { %18764 = vmatprep.mubr.msk.f32.mxu0 %vm389_vm0, %v5314_v51  ;;  %v16406_v51 = vld [vmem:[%s27450_s3 + $0x118] sm:$0xff] }
 0x339   : > { %18547 = vmatmul.mubr.msk.f32.gmra.mrb[14].mxu1 %vm389_vm0, %v23821_v28 }
 0x33a   : > { %18549 = vmatprep.mubr.msk.f32.mxu1 %vm389_vm0, %v23827_v39  ;;  %18765 = vmatmul.mubr.msk.f32.gmra.mrb[10].mxu0 %vm389_vm0, %v5315_v7  ;;  %v5694_v7 = vld [vmem:[#allocation2 + $0x31] sm:$0xff] }
 0x33b   : > { %18767 = vmatprep.mubr.msk.f32.mxu0 %vm389_vm0, %v5316_v33  ;;  %v20309_v33 = vpack.c.bf16 %v16406_v51, %v16405_v45 }
 0x33d   : > { %18550 = vmatmul.mubr.msk.f32.gmra.mrb[16].mxu1 %vm389_vm0, %v23833_v31 }
 0x33e   : > { %18552 = vmatprep.mubr.msk.f32.mxu1 %vm389_vm0, %v23839_v19  ;;  %18768 = vmatmul.mubr.msk.f32.gmra.mrb[12].mxu0 %vm389_vm0, %v5317_v12  ;;  %v5695_v12 = vld [vmem:[#allocation2 + $0x39] sm:$0xff] }
 0x33f   : > { %18770 = vmatprep.mubr.msk.f32.mxu0 %vm389_vm0, %v5318_v14  ;;  %v5696_v14 = vld [vmem:[#allocation2 + $0x49] sm:$0xff] }
 0x341   : > { %18553 = vmatmul.mubr.msk.f32.gmra.mrb[18].mxu1 %vm389_vm0, %v23845_v9 }
 0x342   : > { %18555 = vmatprep.mubr.msk.f32.mxu1 %vm389_vm0, %v23851_v53  ;;  %18771 = vmatmul.mubr.msk.f32.gmra.mrb[14].mxu0 %vm389_vm0, %v5319_v48  ;;  %v5697_v48 = vld [vmem:[#allocation2 + $0x51] sm:$0xff] }
 0x343   : > { %18773 = vmatprep.mubr.msk.f32.mxu0 %vm389_vm0, %v5320_v2  ;;  %v5698_v2 = vld [vmem:[#allocation2 + $0x61] sm:$0xff] }
 0x345   : > { %18556 = vmatmul.mubr.msk.f32.gmra.mrb[20].mxu1 %vm389_vm0, %v23857_v46 }
 0x346   : > { %18558 = vmatprep.mubr.msk.f32.mxu1 %vm389_vm0, %v23863_v50  ;;  %18774 = vmatmul.mubr.msk.f32.gmra.mrb[16].mxu0 %vm389_vm0, %v5321_v58  ;;  %v5703_v58 = vld [vmem:[#allocation2 + $0x99] sm:$0xff] }
 0x347   : > { %18776 = vmatprep.mubr.msk.f32.mxu0 %vm389_vm0, %v27666_v43  ;;  %v5705_v43 = vld [vmem:[#allocation2 + $0xb1] sm:$0xff] }
 0x349   : > { %18559 = vmatmul.mubr.msk.f32.gmra.mrb[22].mxu1 %vm389_vm0, %v23869_v38 }
 0x34a   : > { %18561 = vmatprep.mubr.msk.f32.mxu1 %vm389_vm0, %v23875_v21  ;;  %18777 = vmatmul.mubr.msk.f32.gmra.mrb[18].mxu0 %vm389_vm0, %v27667_v57  ;;  %v5706_v57 = vld [vmem:[#allocation2 + $0xc1] sm:$0xff] }
 0x34b   : > { %18779 = vmatprep.mubr.msk.f32.mxu0 %vm389_vm0, %v27668_v3 }
 0x34d   : > { %18562 = vmatmul.mubr.msk.f32.gmra.mrb[24].mxu1 %vm389_vm0, %v23881_v16 }
 0x34e   : > { %18564 = vmatprep.mubr.msk.f32.mxu1 %vm389_vm0, %v23887_v30  ;;  %18780 = vmatmul.mubr.msk.f32.gmra.mrb[20].mxu0 %vm389_vm0, %v27669_v40 }
 0x34f   : > { %18782 = vmatprep.mubr.msk.f32.mxu0 %vm389_vm0, %v27670_v32 }
 0x351   : > { %18565 = vmatmul.mubr.msk.f32.gmra.mrb[26].mxu1 %vm389_vm0, %v23893_v63 }
 0x352   : > { %18567 = vmatprep.mubr.msk.f32.mxu1 %vm389_vm0, %v23899_v22  ;;  %18783 = vmatmul.mubr.msk.f32.gmra.mrb[22].mxu0 %vm389_vm0, %v27671_v29 }
 0x353   : > { %18785 = vmatprep.mubr.msk.f32.mxu0 %vm389_vm0, %v23653_v15 }
 0x355   : > { %18568 = vmatmul.mubr.msk.f32.gmra.mrb[28].mxu1 %vm389_vm0, %v23905_v60 }
 0x356   : > { %18570 = vmatprep.mubr.msk.f32.mxu1 %vm389_vm0, %v23909_v36  ;;  %18786 = vmatmul.mubr.msk.f32.gmra.mrb[24].mxu0 %vm389_vm0, %v23670_v47 }
 0x357   : > { %18788 = vmatprep.mubr.msk.f32.mxu0 %vm389_vm0, %v23691_v4 }
 0x359   : > { %18571 = vmatmul.mubr.msk.f32.gmra.mrb[30].mxu1 %vm389_vm0, %v23915_v0 }
 0x35a   : > { %18611 = vmatprep.mubr.msk.f32.mxu1 %vm389_vm0, %v4153_v55  ;;  %18789 = vmatmul.mubr.msk.f32.gmra.mrb[26].mxu0 %vm389_vm0, %v23702_v11  ;;  %v5711_v55 = vld [vmem:[#allocation2 + $0xf9] sm:$0xff] }
 0x35b   : > { %18791 = vmatprep.mubr.msk.f32.mxu0 %vm389_vm0, %v5332_v61 }
 0x35d   : > { %18612 = vmatmul.mubr.msk.f32.vlgmr.msra.gmra.mrb[20].mxu1 %vm389_vm0, %v4154_v59  ;;  %v5713_v59 = vld [vmem:[#allocation2 + $0x111] sm:$0xff] }
 0x35e   : > { %18614 = vmatprep.mubr.msk.f32.mxu1 %vm389_vm0, %v27668_v3  ;;  %18792 = vmatmul.mubr.msk.f32.gmra.mrb[28].mxu0 %vm389_vm0, %v5333_v52  ;;  %v5707_v3 = vld [vmem:[#allocation2 + $0xc9] sm:$0xff] }
 0x35f   : > { %18794 = vmatprep.mubr.msk.f32.mxu0 %vm389_vm0, %v5334_v62  ;;  %v5714_v62 = vld [vmem:[#allocation2 + $0x121] sm:$0xff] }
 0x361   : > { %18615 = vmatmul.mubr.msk.f32.gmra.mrb[22].mxu1 %vm389_vm0, %v27669_v40  ;;  %v5708_v40 = vld [vmem:[#allocation2 + $0xd9] sm:$0xff] }
 0x362   : > { %18617 = vmatprep.mubr.msk.f32.mxu1 %vm389_vm0, %v27670_v32  ;;  %18795 = vmatmul.mubr.msk.f32.gmra.mrb[30].mxu0 %vm389_vm0, %v5335_v20  ;;  %v5709_v32 = vld [vmem:[#allocation2 + $0xe1] sm:$0xff]  ;;  %v5724_v20 = vld [vmem:[#allocation2 + $0x199] sm:$0xff] }
 0x363   : > { %18805 = vmatprep.mubr.msk.f32.mxu0 %vm389_vm0, %v5694_v7 }
 0x365   : > { %18618 = vmatmul.mubr.msk.f32.gmra.mrb[24].mxu1 %vm389_vm0, %v27671_v29  ;;  %v5710_v29 = vld [vmem:[#allocation2 + $0xf1] sm:$0xff] }
 0x366   : > { %18620 = vmatprep.mubr.msk.f32.mxu1 %vm389_vm0, %v23653_v15  ;;  %18806 = vmatmul.mubr.msk.f32.vlgmr.msra.gmra.mrb[0].mxu0 %vm389_vm0, %v5695_v12  ;;  %v5699_v15 = vld [vmem:[#allocation2 + $0x69] sm:$0xff] }
 0x367   : > { %20308 = vmatpush3.bf16.msra.mxu0 %v23956_v42  ;;  %18808 = vmatprep.mubr.msk.f32.mxu0 %vm389_vm0, %v5696_v14  ;;  %v5700_v42 = vld [vmem:[#allocation2 + $0x79] sm:$0xff] }
 0x368   : > { %20310 = vmatprep.subr.bf16.mxu0 %v20309_v33 }
 0x369   : > { %18621 = vmatmul.mubr.msk.f32.gmra.mrb[26].mxu1 %vm389_vm0, %v23670_v47  ;;  %v5701_v47 = vld [vmem:[#allocation2 + $0x81] sm:$0xff] }
 0x36a   : > { %18623 = vmatprep.mubr.msk.f32.mxu1 %vm389_vm0, %v23691_v4  ;;  %18809 = vmatmul.mubr.msk.f32.gmra.mrb[2].mxu0 %vm389_vm0, %v5697_v48  ;;  %v5702_v4 = vld [vmem:[#allocation2 + $0x91] sm:$0xff] }
 0x36b   : > { %18811 = vmatprep.mubr.msk.f32.mxu0 %vm389_vm0, %v5698_v2  ;;  %20312 = vmatpush3.bf16.msra.mxu0 %v20309_v33  ;;  %v16448_v2 = vld [vmem:[%s27452_s5 + $0x40] sm:$0xff] }
 0x36d   : > { %18624 = vmatmul.mubr.msk.f32.gmra.mrb[28].mxu1 %vm389_vm0, %v23702_v11  ;;  %v5704_v11 = vld [vmem:[#allocation2 + $0xa9] sm:$0xff] }
 0x36e   : > { %18626 = vmatprep.mubr.msk.f32.mxu1 %vm389_vm0, %v5332_v61  ;;  %18812 = vmatmul.mubr.msk.f32.gmra.mrb[4].mxu0 %vm389_vm0, %v5699_v15  ;;  %v5712_v61 = vld [vmem:[#allocation2 + $0x109] sm:$0xff] }
 0x36f   : > { %18814 = vmatprep.mubr.msk.f32.mxu0 %vm389_vm0, %v5700_v42  ;;  %v16449_v15 = vld [vmem:[%s27452_s5 + $0x48] sm:$0xff] }
 0x371   : > { %18627 = vmatmul.mubr.msk.f32.gmra.mrb[30].mxu1 %vm389_vm0, %v5333_v52  ;;  %v5715_v52 = vld [vmem:[#allocation2 + $0x129] sm:$0xff] }
 0x372   : > { %18815 = vmatmul.mubr.msk.f32.gmra.mrb[6].mxu0 %vm389_vm0, %v5701_v47  ;;  %v24382_v47 = vpack.c.bf16 %v16449_v15, %v16448_v2 }
 0x373   : > { %18817 = vmatprep.mubr.msk.f32.mxu0 %vm389_vm0, %v5702_v4 }
 0x376   : > { %18818 = vmatmul.mubr.msk.f32.gmra.mrb[8].mxu0 %vm389_vm0, %v5703_v58 }
 0x377   : > { %18820 = vmatprep.mubr.msk.f32.mxu0 %vm389_vm0, %v5704_v11 }
 0x37a   : > { %18821 = vmatmul.mubr.msk.f32.gmra.mrb[10].mxu0 %vm389_vm0, %v5705_v43  ;;  %v24406_v43 = vld [vmem:[%s27451_s4] ss:$0 sm:$0xff] }
 0x37b   : > { %18823 = vmatprep.mubr.msk.f32.mxu0 %vm389_vm0, %v5706_v57 }
 0x37e   : > { %18824 = vmatmul.mubr.msk.f32.gmra.mrb[12].mxu0 %vm389_vm0, %v5707_v3 }
 0x37f   : > { %18826 = vmatprep.mubr.msk.f32.mxu0 %vm389_vm0, %v5708_v40 }
 0x382   : > { %18827 = vmatmul.mubr.msk.f32.gmra.mrb[14].mxu0 %vm389_vm0, %v5709_v32 }
 0x383   : > { %18829 = vmatprep.mubr.msk.f32.mxu0 %vm389_vm0, %v5710_v29 }
 0x386   : > { %18830 = vmatmul.mubr.msk.f32.gmra.mrb[16].mxu0 %vm389_vm0, %v5711_v55 }
 0x387   : > { %18832 = vmatprep.mubr.msk.f32.mxu0 %vm389_vm0, %v5712_v61 }
 0x38a   : > { %18833 = vmatmul.mubr.msk.f32.gmra.mrb[18].mxu0 %vm389_vm0, %v5713_v59 }
 0x38b   : > { %18835 = vmatprep.mubr.msk.f32.mxu0 %vm389_vm0, %v5714_v62 }
 0x38e   : > { %18836 = vmatmul.mubr.msk.f32.gmra.mrb[20].mxu0 %vm389_vm0, %v5715_v52 }
 0x38f   : > { %18838 = vmatprep.mubr.msk.f32.mxu0 %vm389_vm0, %v27663_v5  ;;  %v5725_v5 = vld [vmem:[#allocation2 + $0x1a1] sm:$0xff] }
 0x392   : > { %18839 = vmatmul.mubr.msk.f32.gmra.mrb[22].mxu0 %vm389_vm0, %v27664_v56  ;;  %v6838_v56 = vld [vmem:[%s27452_s5 + $0x20] sm:$0xff] }
 0x393   : > { %18841 = vmatprep.mubr.msk.f32.mxu0 %vm389_vm0, %v23655_v37  ;;  %v27672_v37 = vmov 0.0  }
 0x394   : > { %436 = vst.msk [vmem:[#allocation3] sm:$0xff] %vm435_vm3, %v27672_v37  ;;  %440 = vst.msk [vmem:[#allocation3 + $0x90] sm:$0xff] %vm435_vm3, %v27672_v37 }
 0x395   : > { %463 = vst.msk [vmem:[#allocation4] sm:$0xff] %vm435_vm3, %v27672_v37  ;;  %464 = vst.msk [vmem:[#allocation4 + $0x8] sm:$0xff] %vm435_vm3, %v27672_v37 }
 0x396   : > { %18842 = vmatmul.mubr.msk.f32.gmra.mrb[24].mxu0 %vm389_vm0, %v23672_v6  ;;  %467 = vst.msk [vmem:[#allocation4 + $0x198] sm:$0xff] %vm435_vm3, %v27672_v37  ;;  %468 = vst.msk [vmem:[#allocation4 + $0x1a0] sm:$0xff] %vm435_vm3, %v27672_v37  ;;  %v6114_v6 = vld [vmem:[#allocation2 + $0x19a] sm:$0xff] }
 0x397   : > { %18844 = vmatprep.mubr.msk.f32.mxu0 %vm389_vm0, %v23693_v41  ;;  %v6115_v41 = vld [vmem:[#allocation2 + $0x1a2] sm:$0xff]  ;;  %443 = vst.msk [vmem:[#allocation3] sm:$0x1] %vm442_vm4, %v27672_v37  ;;  %444 = vst.msk [vmem:[#allocation3 + $0x10] sm:$0x1] %vm442_vm4, %v27672_v37 }
 0x398   : > { %445 = vst.msk [vmem:[#allocation3 + $0x20] sm:$0x1] %vm442_vm4, %v27672_v37  ;;  %446 = vst.msk [vmem:[#allocation3 + $0x30] sm:$0x1] %vm442_vm4, %v27672_v37 }
 0x399   : > { %447 = vst.msk [vmem:[#allocation3 + $0x40] sm:$0x1] %vm442_vm4, %v27672_v37  ;;  %448 = vst.msk [vmem:[#allocation3 + $0x50] sm:$0x1] %vm442_vm4, %v27672_v37 }
 0x39a   : > { %18845 = vmatmul.mubr.msk.f32.gmra.mrb[26].mxu0 %vm389_vm0, %v23704_v54  ;;  %449 = vst.msk [vmem:[#allocation3 + $0x60] sm:$0x1] %vm442_vm4, %v27672_v37  ;;  %450 = vst.msk [vmem:[#allocation3 + $0x70] sm:$0x1] %vm442_vm4, %v27672_v37 }
 0x39b   : > { %18847 = vmatprep.mubr.msk.f32.mxu0 %vm389_vm0, %v23720_v1  ;;  %451 = vst.msk [vmem:[#allocation3 + $0x80] sm:$0x1] %vm442_vm4, %v27672_v37  ;;  %452 = vst.msk [vmem:[#allocation3 + $0x90] sm:$0x1] %vm442_vm4, %v27672_v37 }
 0x39c   : > { %454 = vst.msk [vmem:[#allocation3 + $0x19] sm:$0x1] %vm442_vm4, %v27672_v37  ;;  %455 = vst.msk [vmem:[#allocation3 + $0x29] sm:$0x1] %vm442_vm4, %v27672_v37 }
 0x39d   : > { %456 = vst.msk [vmem:[#allocation3 + $0x39] sm:$0x1] %vm442_vm4, %v27672_v37  ;;  %457 = vst.msk [vmem:[#allocation3 + $0x49] sm:$0x1] %vm442_vm4, %v27672_v37 }
 0x39e   : > { %18848 = vmatmul.mubr.msk.f32.gmra.mrb[28].mxu0 %vm389_vm0, %v23722_v26  ;;  %458 = vst.msk [vmem:[#allocation3 + $0x59] sm:$0x1] %vm442_vm4, %v27672_v37  ;;  %459 = vst.msk [vmem:[#allocation3 + $0x69] sm:$0x1] %vm442_vm4, %v27672_v37 }
 0x39f   : > { %18850 = vmatprep.mubr.msk.f32.mxu0 %vm389_vm0, %v5724_v20  ;;  %460 = vst.msk [vmem:[#allocation3 + $0x79] sm:$0x1] %vm442_vm4, %v27672_v37  ;;  %461 = vst.msk [vmem:[#allocation3 + $0x89] sm:$0x1] %vm442_vm4, %v27672_v37 }
 0x3a0   : > { %470 = vst.msk [vmem:[#allocation4] sm:$0x1] %vm442_vm4, %v27672_v37  ;;  %471 = vst.msk [vmem:[#allocation4 + $0x18] sm:$0x1] %vm442_vm4, %v27672_v37 }
 0x3a1   : > { %472 = vst.msk [vmem:[#allocation4 + $0x30] sm:$0x1] %vm442_vm4, %v27672_v37  ;;  %473 = vst.msk [vmem:[#allocation4 + $0x48] sm:$0x1] %vm442_vm4, %v27672_v37 }
 0x3a2   : > { %18851 = vmatmul.mubr.msk.f32.gmra.mrb[30].mxu0 %vm389_vm0, %v5725_v5  ;;  %474 = vst.msk [vmem:[#allocation4 + $0x60] sm:$0x1] %vm442_vm4, %v27672_v37  ;;  %475 = vst.msk [vmem:[#allocation4 + $0x78] sm:$0x1] %vm442_vm4, %v27672_v37 }
 0x3a3   : > { %18861 = vmatprep.mubr.msk.f32.mxu0 %vm389_vm0, %v23754_v35  ;;  %476 = vst.msk [vmem:[#allocation4 + $0x90] sm:$0x1] %vm442_vm4, %v27672_v37  ;;  %477 = vst.msk [vmem:[#allocation4 + $0xa8] sm:$0x1] %vm442_vm4, %v27672_v37 }
 0x3a4   : > { %478 = vst.msk [vmem:[#allocation4 + $0xc0] sm:$0x1] %vm442_vm4, %v27672_v37  ;;  %479 = vst.msk [vmem:[#allocation4 + $0xd8] sm:$0x1] %vm442_vm4, %v27672_v37 }
 0x3a5   : > { %480 = vst.msk [vmem:[#allocation4 + $0xf0] sm:$0x1] %vm442_vm4, %v27672_v37  ;;  %481 = vst.msk [vmem:[#allocation4 + $0x108] sm:$0x1] %vm442_vm4, %v27672_v37 }
 0x3a6   : > { %18862 = vmatmul.mubr.msk.f32.vlgmr.msra.gmra.mrb[0].mxu0 %vm389_vm0, %v23762_v24  ;;  %482 = vst.msk [vmem:[#allocation4 + $0x120] sm:$0x1] %vm442_vm4, %v27672_v37  ;;  %483 = vst.msk [vmem:[#allocation4 + $0x138] sm:$0x1] %vm442_vm4, %v27672_v37 }
 0x3a7   : > { %18864 = vmatprep.mubr.msk.f32.mxu0 %vm389_vm0, %v23767_v10  ;;  %484 = vst.msk [vmem:[#allocation4 + $0x150] sm:$0x1] %vm442_vm4, %v27672_v37  ;;  %485 = vst.msk [vmem:[#allocation4 + $0x168] sm:$0x1] %vm442_vm4, %v27672_v37 }
 0x3a8   : > { %486 = vst.msk [vmem:[#allocation4 + $0x180] sm:$0x1] %vm442_vm4, %v27672_v37  ;;  %487 = vst.msk [vmem:[#allocation4 + $0x198] sm:$0x1] %vm442_vm4, %v27672_v37 }
 0x3a9   : > { %489 = vst.msk [vmem:[#allocation4 + $0x29] sm:$0x1] %vm442_vm4, %v27672_v37  ;;  %490 = vst.msk [vmem:[#allocation4 + $0x41] sm:$0x1] %vm442_vm4, %v27672_v37 }
 0x3aa   : > { %18865 = vmatmul.mubr.msk.f32.gmra.mrb[2].mxu0 %vm389_vm0, %v23773_v17  ;;  %491 = vst.msk [vmem:[#allocation4 + $0x59] sm:$0x1] %vm442_vm4, %v27672_v37  ;;  %492 = vst.msk [vmem:[#allocation4 + $0x71] sm:$0x1] %vm442_vm4, %v27672_v37 }
 0x3ab   : > { %18867 = vmatprep.mubr.msk.f32.mxu0 %vm389_vm0, %v23779_v34  ;;  %493 = vst.msk [vmem:[#allocation4 + $0x89] sm:$0x1] %vm442_vm4, %v27672_v37  ;;  %494 = vst.msk [vmem:[#allocation4 + $0xa1] sm:$0x1] %vm442_vm4, %v27672_v37 }
 0x3ac   : > { %495 = vst.msk [vmem:[#allocation4 + $0xb9] sm:$0x1] %vm442_vm4, %v27672_v37  ;;  %496 = vst.msk [vmem:[#allocation4 + $0xd1] sm:$0x1] %vm442_vm4, %v27672_v37 }
 0x3ad   : > { %497 = vst.msk [vmem:[#allocation4 + $0xe9] sm:$0x1] %vm442_vm4, %v27672_v37  ;;  %498 = vst.msk [vmem:[#allocation4 + $0x101] sm:$0x1] %vm442_vm4, %v27672_v37 }
 0x3ae   : > { %18868 = vmatmul.mubr.msk.f32.gmra.mrb[4].mxu0 %vm389_vm0, %v23785_v25  ;;  %499 = vst.msk [vmem:[#allocation4 + $0x119] sm:$0x1] %vm442_vm4, %v27672_v37  ;;  %500 = vst.msk [vmem:[#allocation4 + $0x131] sm:$0x1] %vm442_vm4, %v27672_v37 }
 0x3af   : > { %18870 = vmatprep.mubr.msk.f32.mxu0 %vm389_vm0, %v23791_v23  ;;  %501 = vst.msk [vmem:[#allocation4 + $0x149] sm:$0x1] %vm442_vm4, %v27672_v37  ;;  %502 = vst.msk [vmem:[#allocation4 + $0x161] sm:$0x1] %vm442_vm4, %v27672_v37 }
 0x3b0   : > { %503 = vst.msk [vmem:[#allocation4 + $0x179] sm:$0x1] %vm442_vm4, %v27672_v37  ;;  %504 = vst.msk [vmem:[#allocation4 + $0x191] sm:$0x1] %vm442_vm4, %v27672_v37 }
 0x3b1   : > { %438 = vst.msk [vmem:[#allocation3 + $0x8] sm:$0x3] %vm437_vm5, %v27672_v37  ;;  %441 = vst.msk [vmem:[#allocation3 + $0x98] sm:$0x3] %vm437_vm5, %v27672_v37 }
 0x3b2   : > { %18871 = vmatmul.mubr.msk.f32.gmra.mrb[6].mxu0 %vm389_vm0, %v23797_v8  ;;  %465 = vst.msk [vmem:[#allocation4 + $0x10] sm:$0x3] %vm437_vm5, %v27672_v37  ;;  %469 = vst.msk [vmem:[#allocation4 + $0x1a8] sm:$0x3] %vm437_vm5, %v27672_v37 }
 0x3b3   : > { %18873 = vmatprep.mubr.msk.f32.mxu0 %vm389_vm0, %v23803_v13  ;;  %453 = vst.msk [vmem:[#allocation3 + $0x9] sm:$0x1] %vm442_vm4, %v27672_v37  ;;  %462 = vst.msk [vmem:[#allocation3 + $0x99] sm:$0x1] %vm442_vm4, %v27672_v37 }
 0x3b4   : > { %488 = vst.msk [vmem:[#allocation4 + $0x11] sm:$0x1] %vm442_vm4, %v27672_v37  ;;  %505 = vst.msk [vmem:[#allocation4 + $0x1a9] sm:$0x1] %vm442_vm4, %v27672_v37 }
 0x3b6   : > { %18874 = vmatmul.mubr.msk.f32.gmra.mrb[8].mxu0 %vm389_vm0, %v23809_v49 }
 0x3b7   : > { %18876 = vmatprep.mubr.msk.f32.mxu0 %vm389_vm0, %v23815_v44 }
 0x3ba   : > { %18877 = vmatmul.mubr.msk.f32.gmra.mrb[10].mxu0 %vm389_vm0, %v23821_v28  ;;  %v6834_v28 = vld [vmem:[%s27452_s5] sm:$0xff] }
 0x3bb   : > { %18879 = vmatprep.mubr.msk.f32.mxu0 %vm389_vm0, %v23827_v39  ;;  %v6835_v39 = vld [vmem:[%s27452_s5 + $0x8] sm:$0xff] }
 0x3be   : > { %18880 = vmatmul.mubr.msk.f32.gmra.mrb[12].mxu0 %vm389_vm0, %v23833_v31 }
 0x3bf   : > { %18882 = vmatprep.mubr.msk.f32.mxu0 %vm389_vm0, %v23839_v19  ;;  %v20313_v19 = vpack.c.bf16 %v6835_v39, %v6834_v28 }
 0x3c1   : > { %20314 = vmatprep.subr.bf16.mxu1 %v20313_v19 }
 0x3c2   : > { %18883 = vmatmul.mubr.msk.f32.gmra.mrb[14].mxu0 %vm389_vm0, %v23845_v9  ;;  %20316 = vmatpush3.bf16.msra.mxu1 %v20313_v19 }
 0x3c3   : > { %18885 = vmatprep.mubr.msk.f32.mxu0 %vm389_vm0, %v23851_v53  ;;  %v6836_v53 = vld [vmem:[%s27452_s5 + $0x10] sm:$0xff] }
 0x3c6   : > { %18886 = vmatmul.mubr.msk.f32.gmra.mrb[16].mxu0 %vm389_vm0, %v23857_v46  ;;  %v6837_v46 = vld [vmem:[%s27452_s5 + $0x18] sm:$0xff] }
 0x3c7   : > { %18888 = vmatprep.mubr.msk.f32.mxu0 %vm389_vm0, %v23863_v50 }
 0x3ca   : > { %18889 = vmatmul.mubr.msk.f32.gmra.mrb[18].mxu0 %vm389_vm0, %v23869_v38  ;;  %v20317_v38 = vpack.c.bf16 %v6837_v46, %v6836_v53 }
 0x3cb   : > { %18891 = vmatprep.mubr.msk.f32.mxu0 %vm389_vm0, %v23875_v21 }
 0x3cc   : > { %20318 = vmatprep.subr.bf16.mxu1 %v20317_v38 }
 0x3cd   : > { %20320 = vmatpush3.bf16.msra.mxu1 %v20317_v38 }
 0x3ce   : > { %18892 = vmatmul.mubr.msk.f32.gmra.mrb[20].mxu0 %vm389_vm0, %v23881_v16  ;;  %v6839_v16 = vld [vmem:[%s27452_s5 + $0x28] sm:$0xff] }
 0x3cf   : > { %18894 = vmatprep.mubr.msk.f32.mxu0 %vm389_vm0, %v23887_v30 }
 0x3d2   : > { %18895 = vmatmul.mubr.msk.f32.gmra.mrb[22].mxu0 %vm389_vm0, %v23893_v63  ;;  %v20321_v63 = vpack.c.bf16 %v6839_v16, %v6838_v56 }
 0x3d3   : > { %18897 = vmatprep.mubr.msk.f32.mxu0 %vm389_vm0, %v23899_v22 }
 0x3d4   : > { %20322 = vmatprep.subr.bf16.mxu1 %v20321_v63 }
 0x3d5   : > { %20324 = vmatpush3.bf16.msra.mxu1 %v20321_v63 }
 0x3d6   : > { %18898 = vmatmul.mubr.msk.f32.gmra.mrb[24].mxu0 %vm389_vm0, %v23905_v60  ;;  %v6840_v60 = vld [vmem:[%s27452_s5 + $0x30] sm:$0xff] }
 0x3d7   : > { %18900 = vmatprep.mubr.msk.f32.mxu0 %vm389_vm0, %v23909_v36  ;;  %v6841_v36 = vld [vmem:[%s27452_s5 + $0x38] sm:$0xff] }
 0x3da   : > { %18901 = vmatmul.mubr.msk.f32.gmra.mrb[26].mxu0 %vm389_vm0, %v23915_v0  ;;  %v20325_v0 = vpack.c.bf16 %v6841_v36, %v6840_v60 }
 0x3db   : > { %18903 = vmatprep.mubr.msk.f32.mxu0 %vm389_vm0, %v23921_v18  ;;  %v6826_v18 = vld [vmem:[#allocation3] sm:$0xff] }
 0x3dc   : > { %20326 = vmatprep.subr.bf16.mxu1 %v20325_v0  ;;  %18925 = vmatprep.mubr.msk.f32.mxu1 %vm435_vm3, %v6826_v18 }
 0x3dd   : > { %20328 = vmatpush3.bf16.msra.mxu1 %v20325_v0 }
 0x3de   : > { %18904 = vmatmul.mubr.msk.f32.gmra.mrb[28].mxu0 %vm389_vm0, %v23929_v27  ;;  %20330 = vmatprep.subr.bf16.mxu1 %v24382_v47 }
 0x3df   : > { %18906 = vmatprep.mubr.msk.f32.mxu0 %vm389_vm0, %v6114_v6 }
 0x3e2   : > { %18907 = vmatmul.mubr.msk.f32.gmra.mrb[30].mxu0 %vm389_vm0, %v6115_v41 }
 0x3f0   : > { %v24189_v54 = vpop.f32.mrb[0].mxu1 }
 0x3f1   : > { %v24191_v1 = vpop.f32.mrb[1].mxu1  ;;  %v20677_v57 = vadd.f32 %v24189_v54, %v24406_v43 }
 0x3f2   : > { %v20679_v3 = vadd.f32 %v24406_v43, %v24191_v1 }
 0x3f4   : > { %v24193_v26 = vpop.f32.mrb[2].mxu1 }
 0x3f5   : > { %v24195_v35 = vpop.f32.mrb[3].mxu1  ;;  %v20681_v61 = vadd.f32 %v24193_v26, %v24406_v43 }
 0x3f6   : > { %v20683_v59 = vadd.f32 %v24406_v43, %v24195_v35 }
 0x3f8   : > { %v24197_v24 = vpop.f32.mrb[4].mxu1 }
 0x3f9   : > { %v24199_v10 = vpop.f32.mrb[5].mxu1  ;;  %v20685_v62 = vadd.f32 %v24197_v24, %v24406_v43 }
 0x3fa   : > { %v20687_v52 = vadd.f32 %v24406_v43, %v24199_v10 }
 0x3fc   : > { %v24201_v17 = vpop.f32.mrb[6].mxu1 }
 0x3fd   : > { %v24203_v34 = vpop.f32.mrb[7].mxu1  ;;  %v20689_v20 = vadd.f32 %v24201_v17, %v24406_v43 }
 0x3fe   : > { %v20691_v37 = vadd.f32 %v24406_v43, %v24203_v34 }
 0x400   : > { %v24205_v25 = vpop.f32.mrb[8].mxu1 }
 0x401   : > { %v24207_v23 = vpop.f32.mrb[9].mxu1  ;;  %v24426_v6 = vadd.f32 %v24205_v25, %v24406_v43 }
 0x402   : > { %v24430_v26 = vadd.f32 %v24406_v43, %v24207_v23 }
 0x404   : > { %v24209_v8 = vpop.f32.mrb[10].mxu1 }
 0x405   : > { %v24211_v13 = vpop.f32.mrb[11].mxu1  ;;  %v24434_v35 = vadd.f32 %v24209_v8, %v24406_v43 }
 0x406   : > { %v24438_v17 = vadd.f32 %v24406_v43, %v24211_v13 }
 0x408   : > { %v24213_v49 = vpop.f32.mrb[12].mxu1 }
 0x409   : > { %v24215_v44 = vpop.f32.mrb[13].mxu1  ;;  %v24442_v34 = vadd.f32 %v24213_v49, %v24406_v43 }
 0x40a   : > { %v24446_v25 = vadd.f32 %v24406_v43, %v24215_v44 }
 0x40c   : > { %v24223_v31 = vpop.f32.mrb[14].mxu1 }
 0x40d   : > { %v24225_v9 = vpop.f32.mrb[15].mxu1  ;;  %v24450_v28 = vadd.f32 %v24223_v31, %v24406_v43 }
 0x40e   : > { %v24454_v8 = vadd.f32 %v24406_v43, %v24225_v9 }
 0x410   : > { %v24233_v50 = vpop.f32.mrb[16].mxu1 }
 0x411   : > { %v24235_v21 = vpop.f32.mrb[17].mxu1  ;;  %v24458_v49 = vadd.f32 %v24233_v50, %v24406_v43 }
 0x412   : > { %v24466_v16 = vadd.f32 %v24406_v43, %v24235_v21 }
 0x414   : > { %v24243_v30 = vpop.f32.mrb[18].mxu1 }
 0x415   : > { %v24245_v22 = vpop.f32.mrb[19].mxu1  ;;  %v24470_v50 = vadd.f32 %v24243_v30, %v24406_v43 }
 0x416   : > { %v24474_v63 = vadd.f32 %v24406_v43, %v24245_v22 }
 0x430   : > { %v24358_v27 = vpop.f32.mrb[20].mxu1 }
 0x431   : > { %v24360_v45 = vpop.f32.mrb[21].mxu1  ;;  %v24478_v36 = vadd.f32 %v24358_v27, %v24406_v43 }
 0x432   : > { %v24482_v0 = vadd.f32 %v24406_v43, %v24360_v45  ;;  %v16450_v45 = vld [vmem:[%s27452_s5 + $0x50] sm:$0xff] }
 0x434   : > { %v24362_v51 = vpop.f32.mrb[22].mxu1 }
 0x435   : > { %v24364_v7 = vpop.f32.mrb[23].mxu1  ;;  %v24486_v21 = vadd.f32 %v24362_v51, %v24406_v43  ;;  %v16451_v51 = vld [vmem:[%s27452_s5 + $0x58] sm:$0xff] }
 0x436   : > { %v24490_v22 = vadd.f32 %v24406_v43, %v24364_v7 }
 0x438   : > { %v24366_v33 = vpop.f32.mrb[24].mxu1 }
 0x439   : > { %v24368_v12 = vpop.f32.mrb[25].mxu1 }
 0x43a   : > { %v24504_v7 = vadd.f32 %v24406_v43, %v24368_v12 }
 0x43c   : > { %v24370_v14 = vpop.f32.mrb[26].mxu1 }
 0x43d   : > { %v24372_v48 = vpop.f32.mrb[27].mxu1 }
 0x440   : > { %v24380_v42 = vpop.f32.mrb[28].mxu1 }
 0x441   : > { %v24384_v4 = vpop.f32.mrb[29].mxu1 }
 0x442   : > { %v24520_v12 = vadd.f32 %v24406_v43, %v24384_v4 }
 0x444   : > { %v24387_v58 = vpop.f32.mrb[30].mxu1 }
 0x445   : > { %v24389_v11 = vpop.f32.mrb[31].mxu1 }
 0x479   : > { %v18863_v40 = vpop.f32.mrb[0].mxu0 }
 0x47a   : > { %v20678_v32 = vadd.f32 %v20677_v57, %v18863_v40  ;;  %v6283_v29 = vpop.f32.mrb[1].mxu0  ;;  %v24508_v40 = vadd.f32 %v24370_v14, %v24406_v43 }
 0x47b   : > { %v20680_v55 = vadd.f32 %v20679_v3, %v6283_v29  ;;  %v24500_v3 = vadd.f32 %v24366_v33, %v24406_v43  ;;  %v24516_v33 = vadd.f32 %v24380_v42, %v24406_v43 }
 0x47c   : > { %v6475_v41 = vmax.f32 %v20678_v32, 0.0 }
 0x47d   : > { %v18866_v5 = vpop.f32.mrb[2].mxu0  ;;  %v6474_v24 = vmax.f32 %v20680_v55, 0.0 }
 0x47e   : > { %v20682_v54 = vadd.f32 %v20681_v61, %v18866_v5  ;;  %v6293_v1 = vpop.f32.mrb[3].mxu0  ;;  %v6509_v19 = vsel %vm435_vm3, %v6475_v41, -inf }
 0x47f   : > { %v20684_v10 = vadd.f32 %v20683_v59, %v6293_v1  ;;  %v6506_v31 = vsel %vm435_vm3, %v6474_v24, -inf }
 0x480   : > { %v6477_v23 = vmax.f32 %v20682_v54, 0.0 }
 0x481   : > { %v6476_v39 = vmax.f32 %v20684_v10, 0.0  ;;  %v18869_v13 = vpop.f32.mrb[4].mxu0 }
 0x482   : > { %v6510_v44 = vsel %vm435_vm3, %v6477_v23, -inf  ;;  %v20686_v53 = vadd.f32 %v20685_v62, %v18869_v13  ;;  %v6303_v46 = vpop.f32.mrb[5].mxu0  ;;  %v24512_v62 = vadd.f32 %v24406_v43, %v24372_v48 }
 0x483   : > { %v6511_v38 = vmax.f32 %v6509_v19, %v6510_v44  ;;  %v6507_v9 = vsel %vm435_vm3, %v6476_v39, -inf  ;;  %v20688_v56 = vadd.f32 %v20687_v52, %v6303_v46  ;;  %v24522_v52 = vpack.c.bf16 %v16451_v51, %v16450_v45  ;;  %v16454_v51 = vld [vmem:[%s27452_s5 + $0x70] sm:$0xff] }
 0x484   : > { %v6508_v60 = vmax.f32 %v6506_v31, %v6507_v9  ;;  %v6479_v15 = vmax.f32 %v20686_v53, 0.0 }
 0x485   : > { %v6594_v30 = vrot.slane %v6511_v38, 1  ;;  %v18872_v18 = vpop.f32.mrb[6].mxu0  ;;  %v6478_v61 = vmax.f32 %v20688_v56, 0.0  ;;  %v16452_v56 = vld [vmem:[%s27452_s5 + $0x60] sm:$0xff] }
 0x486   : > { %v6562_v2 = vrot.slane %v6508_v60, 1  ;;  %v20690_v27 = vadd.f32 %v20689_v20, %v18872_v18  ;;  %v6313_v57 = vpop.f32.mrb[7].mxu0 }
 0x487   : > { %v20692_v32 = vadd.f32 %v20691_v37, %v6313_v57  ;;  %v6610_v29 = vmax.f32 %v6511_v38, %v6594_v30  ;;  %v6515_v37 = vsel %vm435_vm3, %v6479_v15, -inf  ;;  %v6512_v39 = vsel %vm435_vm3, %v6478_v61, -inf }
 0x488   : > { %v6578_v55 = vmax.f32 %v6508_v60, %v6562_v2  ;;  %v6481_v59 = vmax.f32 %v20690_v27, 0.0  ;;  %v16453_v60 = vld [vmem:[%s27452_s5 + $0x68] sm:$0xff]  ;;  %v24542_v30 = vadd.f32 %v24387_v58, %v24406_v43 }
 0x489   : > { %v18875_v14 = vpop.f32.mrb[8].mxu0  ;;  %v6480_v1 = vmax.f32 %v20692_v32, 0.0  ;;  %v6682_v10 = vrot.slane %v6610_v29, 4  ;;  %v6698_v13 = vrot.slane %v6610_v29, 5  ;;  %v6714_v18 = vrot.slane %v6610_v29, 6 }
 0x48a   : > { %v6626_v20 = vrot.slane %v6578_v55, 1  ;;  %v6642_v5 = vrot.slane %v6578_v55, 2  ;;  %v6516_v41 = vsel %vm435_vm3, %v6481_v59, -inf  ;;  %v6323_v54 = vpop.f32.mrb[9].mxu0  ;;  %v20694_v24 = vadd.f32 %v24426_v6, %v18875_v14  ;;  %v16465_v14 = vld [vmem:[%s27452_s5 + $0x88] sm:$0xff] }
 0x48b   : > { %v6517_v48 = vmax.f32 %v6515_v37, %v6516_v41  ;;  %v20696_v42 = vadd.f32 %v24430_v26, %v6323_v54  ;;  %v6658_v23 = vrot.slane %v6578_v55, 3  ;;  %v6513_v53 = vsel %vm435_vm3, %v6480_v1, -inf }
 0x48c   : > { %v6747_v4 = vsel %vm6746_vm6, %v6578_v55, %v6626_v20  ;;  %v6514_v38 = vmax.f32 %v6512_v39, %v6513_v53  ;;  %v6483_v9 = vmax.f32 %v20694_v24, 0.0  ;;  %v6730_v27 = vrot.slane %v6610_v29, 7  ;;  %v16464_v29 = vld [vmem:[%s27452_s5 + $0x80] sm:$0xff] }
 0x48d   : > { %v6756_v19 = vsel %vm6755_vm7, %v6747_v4, %v6642_v5  ;;  %v6595_v44 = vrot.slane %v6517_v48, 1  ;;  %v18878_v46 = vpop.f32.mrb[10].mxu0  ;;  %v6482_v61 = vmax.f32 %v20696_v42, 0.0  ;;  %v24551_v59 = vpack.c.bf16 %v16453_v60, %v16452_v56 }
 0x48e   : > { %v6765_v31 = vsel %vm6764_vm8, %v6756_v19, %v6658_v23  ;;  %v20698_v6 = vadd.f32 %v24434_v35, %v18878_v46  ;;  %v6333_v26 = vpop.f32.mrb[11].mxu0  ;;  %v6563_v57 = vrot.slane %v6514_v38, 1  ;;  %v6521_v37 = vsel %vm435_vm3, %v6483_v9, -inf }
 0x48f   : > { %v6774_v2 = vsel %vm6773_vm9, %v6765_v31, %v6682_v10  ;;  %v20700_v15 = vadd.f32 %v24438_v17, %v6333_v26  ;;  %v6611_v55 = vmax.f32 %v6517_v48, %v6595_v44  ;;  %v16455_v17 = vld [vmem:[%s27452_s5 + $0x78] sm:$0xff]  ;;  %v24570_v39 = vpack.c.bf16 %v16465_v14, %v16464_v29 }
 0x490   : > { %v6783_v35 = vsel %vm6782_vm10, %v6774_v2, %v6698_v13  ;;  %v6485_v45 = vmax.f32 %v20698_v6, 0.0  ;;  %v6579_v5 = vmax.f32 %v6514_v38, %v6563_v57  ;;  %v24568_v4 = vpack.c.bf16 %v16455_v17, %v16454_v51 }
 0x491   : > { %v6792_v32 = vsel %vm6791_vm11, %v6783_v35, %v6714_v18  ;;  %v18881_v58 = vpop.f32.mrb[12].mxu0  ;;  %v6484_v1 = vmax.f32 %v20700_v15, 0.0  ;;  %v6518_v19 = vsel %vm435_vm3, %v6482_v61, -inf  ;;  %v6683_v6 = vrot.slane %v6611_v55, 4 }
 0x492   : > { %v6801_v20 = vsel %vm6800_vm12, %v6792_v32, %v6730_v27  ;;  %v6522_v41 = vsel %vm435_vm3, %v6485_v45, -inf  ;;  %v6343_v54 = vpop.f32.mrb[13].mxu0  ;;  %v20702_v24 = vadd.f32 %v24442_v34, %v18881_v58  ;;  %v6627_v10 = vrot.slane %v6579_v5, 1 }
 0x493   : > { %6810 = vst.msk [vmem:[#allocation3 + $0x11] sm:$0xff] %vm435_vm3, %v6801_v20  ;;  %v6523_v48 = vmax.f32 %v6521_v37, %v6522_v41  ;;  %v20704_v42 = vadd.f32 %v24446_v25, %v6343_v54  ;;  %v6643_v23 = vrot.slane %v6579_v5, 2  ;;  %v6659_v13 = vrot.slane %v6579_v5, 3 }
 0x494   : > { %v6519_v53 = vsel %vm435_vm3, %v6484_v1, -inf  ;;  %v6748_v31 = vsel %vm6746_vm6, %v6579_v5, %v6627_v10  ;;  %v6487_v9 = vmax.f32 %v20702_v24, 0.0  ;;  %v6699_v26 = vrot.slane %v6611_v55, 5 }
 0x495   : > { %v6596_v44 = vrot.slane %v6523_v48, 1  ;;  %v18884_v46 = vpop.f32.mrb[14].mxu0  ;;  %v6520_v38 = vmax.f32 %v6518_v19, %v6519_v53  ;;  %v6757_v56 = vsel %vm6755_vm7, %v6748_v31, %v6643_v23  ;;  %v6486_v60 = vmax.f32 %v20704_v42, 0.0 }
 0x496   : > { %v20706_v34 = vadd.f32 %v24450_v28, %v18884_v46  ;;  %v6353_v25 = vpop.f32.mrb[15].mxu0  ;;  %v6766_v18 = vsel %vm6764_vm8, %v6757_v56, %v6659_v13  ;;  %v6715_v35 = vrot.slane %v6611_v55, 6  ;;  %v6731_v57 = vrot.slane %v6611_v55, 7 }
 0x497   : > { %v6564_v2 = vrot.slane %v6520_v38, 1  ;;  %v20708_v27 = vadd.f32 %v24454_v8, %v6353_v25  ;;  %v6775_v45 = vsel %vm6773_vm9, %v6766_v18, %v6683_v6  ;;  %v6612_v51 = vmax.f32 %v6523_v48, %v6596_v44 }
 0x498   : > { %v6489_v15 = vmax.f32 %v20706_v34, 0.0  ;;  %v6784_v28 = vsel %vm6782_vm10, %v6775_v45, %v6699_v26  ;;  %v6527_v58 = vsel %vm435_vm3, %v6487_v9, -inf  ;;  %v6524_v48 = vsel %vm435_vm3, %v6486_v60, -inf }
 0x499   : > { %v18887_v32 = vpop.f32.mrb[16].mxu0  ;;  %v6580_v61 = vmax.f32 %v6520_v38, %v6564_v2  ;;  %v6793_v20 = vsel %vm6791_vm11, %v6784_v28, %v6715_v35  ;;  %v6488_v8 = vmax.f32 %v20708_v27, 0.0  ;;  %v6684_v46 = vrot.slane %v6612_v51, 4 }
 0x49a   : > { %v6528_v17 = vsel %vm435_vm3, %v6489_v15, -inf  ;;  %v6363_v29 = vpop.f32.mrb[17].mxu0  ;;  %v24583_v14 = vld [vmem:[#allocation3 + $0x10] sm:$0xff]  ;;  %v20710_v55 = vadd.f32 %v24458_v49, %v18887_v32  ;;  %v6802_v37 = vsel %vm6800_vm12, %v6793_v20, %v6731_v57  ;;  %v6716_v6 = vrot.slane %v6612_v51, 6 }
 0x49b   : > { %v6529_v5 = vmax.f32 %v6527_v58, %v6528_v17  ;;  %18926 = vmatmul.mubr.msk.f32.vlgmr.msra.gmra.mrb[32].mxu1 %vm435_vm3, %v24583_v14  ;;  %v6628_v41 = vrot.slane %v6580_v61, 1  ;;  %v6644_v54 = vrot.slane %v6580_v61, 2  ;;  %6811 = vst.msk [vmem:[#allocation3 + $0x21] sm:$0xff] %vm435_vm3, %v6802_v37  ;;  %v6660_v1 = vrot.slane %v6580_v61, 3 }
 0x49c   : > { %20332 = vmatpush3.bf16.msra.mxu1 %v24382_v47  ;;  %v6525_v42 = vsel %vm435_vm3, %v6488_v8, -inf  ;;  %v20712_v10 = vadd.f32 %v24466_v16, %v6363_v29  ;;  %v6491_v19 = vmax.f32 %v20710_v55, 0.0  ;;  %v6700_v47 = vrot.slane %v6612_v51, 5 }
 0x49d   : > { %v6597_v24 = vrot.slane %v6529_v5, 1  ;;  %v18890_v49 = vpop.f32.mrb[18].mxu0  ;;  %20334 = vmatprep.subr.bf16.mxu1 %v24522_v52  ;;  %v6749_v23 = vsel %vm6746_vm6, %v6580_v61, %v6628_v41  ;;  %v6526_v13 = vmax.f32 %v6524_v48, %v6525_v42  ;;  %v6732_v26 = vrot.slane %v6612_v51, 7 }
 0x49e   : > { %v20714_v44 = vadd.f32 %v24470_v50, %v18890_v49  ;;  %v6373_v53 = vpop.f32.mrb[19].mxu0  ;;  %v6758_v31 = vsel %vm6755_vm7, %v6749_v23, %v6644_v54  ;;  %v6490_v50 = vmax.f32 %v20712_v10, 0.0  ;;  %v6533_v27 = vsel %vm435_vm3, %v6491_v19, -inf }
 0x49f   : > { %v24599_v38 = vmax.f32 %v6529_v5, %v6597_v24  ;;  %v6767_v9 = vsel %vm6764_vm8, %v6758_v31, %v6660_v1  ;;  %v6565_v34 = vrot.slane %v6526_v13, 1  ;;  %v20716_v25 = vadd.f32 %v24474_v63, %v6373_v53 }
 0x4a0   : > { %v6493_v16 = vmax.f32 %v20714_v44, 0.0  ;;  %20336 = vmatpush3.bf16.msra.mxu1 %v24522_v52  ;;  %v6776_v56 = vsel %vm6773_vm9, %v6767_v9, %v6684_v46  ;;  %v6530_v17 = vsel %vm435_vm3, %v6490_v50, -inf }
 0x4a1   : > { %v18893_v60 = vpop.f32.mrb[20].mxu0  ;;  %20338 = vmatprep.subr.bf16.mxu1 %v24551_v59  ;;  %v6785_v18 = vsel %vm6782_vm10, %v6776_v56, %v6700_v47  ;;  %v6685_v2 = vrot.slane %v24599_v38, 4  ;;  %v6581_v15 = vmax.f32 %v6526_v13, %v6565_v34  ;;  %v6492_v57 = vmax.f32 %v20716_v25, 0.0 }
 0x4a2   : > { %v6383_v35 = vpop.f32.mrb[21].mxu0  ;;  %v6794_v63 = vsel %vm6791_vm11, %v6785_v18, %v6716_v6  ;;  %v6534_v52 = vsel %vm435_vm3, %v6493_v16, -inf  ;;  %v20718_v45 = vadd.f32 %v24478_v36, %v18893_v60  ;;  %v6701_v32 = vrot.slane %v24599_v38, 5  ;;  %v24614_v58 = vld [vmem:[#allocation3 + $0x20] sm:$0xff] }
 0x4a3   : > { %v6803_v51 = vsel %vm6800_vm12, %v6794_v63, %v6732_v26  ;;  %v6629_v28 = vrot.slane %v6581_v15, 1  ;;  %v6645_v61 = vrot.slane %v6581_v15, 2  ;;  %v6535_v29 = vmax.f32 %v6533_v27, %v6534_v52  ;;  %18928 = vmatprep.mubr.msk.f32.mxu1 %vm435_vm3, %v24614_v58 }
 0x4a4   : > { %20340 = vmatpush3.bf16.msra.mxu1 %v24551_v59  ;;  %6812 = vst.msk [vmem:[#allocation3 + $0x31] sm:$0xff] %vm435_vm3, %v6803_v51  ;;  %v6531_v20 = vsel %vm435_vm3, %v6492_v57, -inf  ;;  %v20720_v5 = vadd.f32 %v24482_v0, %v6383_v35  ;;  %v6661_v8 = vrot.slane %v6581_v15, 3  ;;  %v6495_v1 = vmax.f32 %v20718_v45, 0.0 }
 0x4a5   : > { %v18896_v36 = vpop.f32.mrb[22].mxu0  ;;  %20342 = vmatprep.subr.bf16.mxu1 %v24568_v4  ;;  %v6750_v55 = vsel %vm6746_vm6, %v6581_v15, %v6629_v28  ;;  %v6532_v37 = vmax.f32 %v6530_v17, %v6531_v20  ;;  %v6598_v48 = vrot.slane %v6535_v29, 1  ;;  %v6717_v23 = vrot.slane %v24599_v38, 6 }
 0x4a6   : > { %v20722_v59 = vadd.f32 %v24486_v21, %v18896_v36  ;;  %v6393_v41 = vpop.f32.mrb[23].mxu0  ;;  %v6759_v54 = vsel %vm6755_vm7, %v6750_v55, %v6645_v61  ;;  %v6494_v24 = vmax.f32 %v20720_v5, 0.0  ;;  %v6733_v13 = vrot.slane %v24599_v38, 7 }
 0x4a7   : > { %v6768_v0 = vsel %vm6764_vm8, %v6759_v54, %v6661_v8  ;;  %v6566_v42 = vrot.slane %v6532_v37, 1  ;;  %v20724_v49 = vadd.f32 %v24490_v22, %v6393_v41  ;;  %v6614_v19 = vmax.f32 %v6535_v29, %v6598_v48 }
 0x4a8   : > { %v6497_v10 = vmax.f32 %v20722_v59, 0.0  ;;  %20344 = vmatpush3.bf16.msra.mxu1 %v24568_v4  ;;  %v6777_v21 = vsel %vm6773_vm9, %v6768_v0, %v6685_v2  ;;  %v6539_v34 = vsel %vm435_vm3, %v6495_v1, -inf  ;;  %v6536_v38 = vsel %vm435_vm3, %v6494_v24, -inf }
 0x4a9   : > { %v18899_v44 = vpop.f32.mrb[24].mxu0  ;;  %20346 = vmatprep.subr.bf16.mxu1 %v24570_v39  ;;  %v6786_v53 = vsel %vm6782_vm10, %v6777_v21, %v6701_v32  ;;  %v6582_v46 = vmax.f32 %v6532_v37, %v6566_v42  ;;  %v6496_v31 = vmax.f32 %v20724_v49, 0.0  ;;  %v6686_v4 = vrot.slane %v6614_v19, 4 }
 0x4aa   : > { %v6540_v47 = vsel %vm435_vm3, %v6497_v10, -inf  ;;  %v6403_v9 = vpop.f32.mrb[25].mxu0  ;;  %v6795_v22 = vsel %vm6791_vm11, %v6786_v53, %v6717_v23  ;;  %v6702_v25 = vrot.slane %v6614_v19, 5  ;;  %v20726_v2 = vadd.f32 %v24500_v3, %v18899_v44 }
 0x4ab   : > { %v6804_v16 = vsel %vm6800_vm12, %v6795_v22, %v6733_v13  ;;  %v6630_v6 = vrot.slane %v6582_v46, 1  ;;  %v6646_v26 = vrot.slane %v6582_v46, 2  ;;  %v24640_v56 = vld [vmem:[#allocation3 + $0x30] sm:$0xff]  ;;  %v6662_v50 = vrot.slane %v6582_v46, 3 }
 0x4ac   : > { %6813 = vst.msk [vmem:[#allocation3 + $0x41] sm:$0xff] %vm435_vm3, %v6804_v16  ;;  %v6541_v60 = vmax.f32 %v6539_v34, %v6540_v47  ;;  %v6537_v18 = vsel %vm435_vm3, %v6496_v31, -inf  ;;  %18929 = vmatmul.mubr.msk.f32.gmra.mrb[34].mxu1 %vm435_vm3, %v24640_v56  ;;  %v20728_v63 = vadd.f32 %v24504_v7, %v6403_v9  ;;  %v6499_v32 = vmax.f32 %v20726_v2, 0.0 }
 0x4ad   : > { %v18902_v15 = vpop.f32.mrb[26].mxu0  ;;  %v6751_v27 = vsel %vm6746_vm6, %v6582_v46, %v6630_v6  ;;  %v6538_v35 = vmax.f32 %v6536_v38, %v6537_v18  ;;  %v6718_v20 = vrot.slane %v6614_v19, 6  ;;  %v6734_v55 = vrot.slane %v6614_v19, 7 }
 0x4ae   : > { %v20730_v52 = vadd.f32 %v24508_v40, %v18902_v15  ;;  %v6413_v57 = vpop.f32.mrb[27].mxu0  ;;  %v6760_v45 = vsel %vm6755_vm7, %v6751_v27, %v6646_v26  ;;  %v6599_v51 = vrot.slane %v6541_v60, 1  ;;  %v6498_v17 = vmax.f32 %v20728_v63, 0.0 }
 0x4af   : > { %v20732_v28 = vadd.f32 %v24512_v62, %v6413_v57  ;;  %v6769_v3 = vsel %vm6764_vm8, %v6760_v45, %v6662_v50  ;;  %v6567_v61 = vrot.slane %v6538_v35, 1  ;;  %v20739_v62 = vadd.f32 %v24406_v43, %v24389_v11 }
 0x4b0   : > { %v6501_v29 = vmax.f32 %v20730_v52, 0.0  ;;  %v6778_v5 = vsel %vm6773_vm9, %v6769_v3, %v6686_v4  ;;  %v6615_v36 = vmax.f32 %v6541_v60, %v6599_v51  ;;  %v6545_v48 = vsel %vm435_vm3, %v6499_v32, -inf }
 0x4b1   : > { %v6500_v8 = vmax.f32 %v20732_v28, 0.0  ;;  %v18905_v7 = vpop.f32.mrb[28].mxu0  ;;  %v6787_v40 = vsel %vm6782_vm10, %v6778_v5, %v6702_v25  ;;  %v6583_v37 = vmax.f32 %v6538_v35, %v6567_v61  ;;  %v6542_v1 = vsel %vm435_vm3, %v6498_v17, -inf }
 0x4b2   : > { %v6546_v59 = vsel %vm435_vm3, %v6501_v29, -inf  ;;  %v6423_v41 = vpop.f32.mrb[29].mxu0  ;;  %v6796_v54 = vsel %vm6791_vm11, %v6787_v40, %v6718_v20  ;;  %v6687_v0 = vrot.slane %v6615_v36, 4  ;;  %v20734_v11 = vadd.f32 %v24516_v33, %v18905_v7 }
 0x4b3   : > { %v6805_v24 = vsel %vm6800_vm12, %v6796_v54, %v6734_v55  ;;  %v6631_v42 = vrot.slane %v6583_v37, 1  ;;  %v6647_v10 = vrot.slane %v6583_v37, 2  ;;  %v24662_v49 = vld [vmem:[#allocation3 + $0x40] sm:$0xff]  ;;  %v6663_v23 = vrot.slane %v6583_v37, 3 }
 0x4b4   : > { %6814 = vst.msk [vmem:[#allocation3 + $0x51] sm:$0xff] %vm435_vm3, %v6805_v24  ;;  %v6547_v13 = vmax.f32 %v6545_v48, %v6546_v59  ;;  %v6543_v21 = vsel %vm435_vm3, %v6500_v8, -inf  ;;  %18931 = vmatprep.mubr.msk.f32.mxu1 %vm435_vm3, %v24662_v49  ;;  %v20736_v53 = vadd.f32 %v24520_v12, %v6423_v41  ;;  %v6703_v31 = vrot.slane %v6615_v36, 5 }
 0x4b5   : > { %v18908_v43 = vpop.f32.mrb[30].mxu0  ;;  %v6752_v19 = vsel %vm6746_vm6, %v6583_v37, %v6631_v42  ;;  %v6544_v44 = vmax.f32 %v6542_v1, %v6543_v21  ;;  %v6503_v38 = vmax.f32 %v20734_v11, 0.0  ;;  %v6719_v25 = vrot.slane %v6615_v36, 6 }
 0x4b6   : > { %v20738_v46 = vadd.f32 %v24542_v30, %v18908_v43  ;;  %v6433_v47 = vpop.f32.mrb[31].mxu0  ;;  %v6761_v9 = vsel %vm6755_vm7, %v6752_v19, %v6647_v10  ;;  %v6600_v22 = vrot.slane %v6547_v13, 1  ;;  %v6502_v26 = vmax.f32 %v20736_v53, 0.0 }
 0x4b7   : > { %v20740_v4 = vadd.f32 %v20739_v62, %v6433_v47  ;;  %v6770_v34 = vsel %vm6764_vm8, %v6761_v9, %v6663_v23  ;;  %v6568_v33 = vrot.slane %v6544_v44, 1  ;;  %v6735_v60 = vrot.slane %v6615_v36, 7  ;;  %v16466_v9 = vld [vmem:[%s27452_s5 + $0x90] sm:$0xff] }
 0x4b8   : > { %v6505_v16 = vmax.f32 %v20738_v46, 0.0  ;;  %v6779_v6 = vsel %vm6773_vm9, %v6770_v34, %v6687_v0  ;;  %v6616_v15 = vmax.f32 %v6547_v13, %v6600_v22  ;;  %v6551_v52 = vsel %vm435_vm3, %v6503_v38, -inf  ;;  %v6979_v46 = vld [vmem:[#allocation3 + $0x1] sm:$0xff]  ;;  %v24718_v34 = vld [vmem:[#allocation3 + $0x11] sm:$0xff] }
 0x4b9   : > { %v6504_v50 = vmax.f32 %v20740_v4, 0.0  ;;  %v6788_v12 = vsel %vm6782_vm10, %v6779_v6, %v6703_v31  ;;  %v6584_v30 = vmax.f32 %v6544_v44, %v6568_v33  ;;  %v6548_v45 = vsel %vm435_vm3, %v6502_v26, -inf  ;;  %v16467_v22 = vld [vmem:[%s27452_s5 + $0x98] sm:$0xff]  ;;  %v16468_v33 = vld [vmem:[%s27452_s5 + $0xa0] sm:$0xff]  ;;  %v16469_v38 = vld [vmem:[%s27452_s5 + $0xa8] sm:$0xff] }
 0x4ba   : > { %v6552_v18 = vsel %vm435_vm3, %v6505_v16, -inf  ;;  %v6797_v2 = vsel %vm6791_vm11, %v6788_v12, %v6719_v25  ;;  %v6688_v17 = vrot.slane %v6616_v15, 4  ;;  %v6704_v5 = vrot.slane %v6616_v15, 5  ;;  %v24728_v16 = vld [vmem:[#allocation3 + $0x21] sm:$0xff]  ;;  %v24733_v6 = vld [vmem:[#allocation3 + $0x31] sm:$0xff] }
 0x4bb   : > { %v6806_v27 = vsel %vm6800_vm12, %v6797_v2, %v6735_v60  ;;  %v6632_v35 = vrot.slane %v6584_v30, 1  ;;  %v6648_v63 = vrot.slane %v6584_v30, 2  ;;  %v24680_v57 = vld [vmem:[#allocation3 + $0x50] sm:$0xff]  ;;  %v6553_v51 = vmax.f32 %v6551_v52, %v6552_v18  ;;  %v16470_v26 = vld [vmem:[%s27452_s5 + $0xb0] sm:$0xff]  ;;  %v16481_v18 = vld [vmem:[%s27452_s5 + $0xc8] sm:$0xff] }
 0x4bc   : > { %6815 = vst.msk [vmem:[#allocation3 + $0x61] sm:$0xff] %vm435_vm3, %v6806_v27  ;;  %v6549_v32 = vsel %vm435_vm3, %v6504_v50, -inf  ;;  %18932 = vmatmul.mubr.msk.f32.gmra.mrb[36].mxu1 %vm435_vm3, %v24680_v57  ;;  %v6664_v28 = vrot.slane %v6584_v30, 3  ;;  %v6720_v7 = vrot.slane %v6616_v15, 6  ;;  %v6736_v40 = vrot.slane %v6616_v15, 7  ;;  %v16471_v50 = vld [vmem:[%s27452_s5 + $0xb8] sm:$0xff] }
 0x4bd   : > { %v6753_v3 = vsel %vm6746_vm6, %v6584_v30, %v6632_v35  ;;  %v6550_v61 = vmax.f32 %v6548_v45, %v6549_v32  ;;  %v6601_v20 = vrot.slane %v6553_v51, 1  ;;  %v20349_v4 = vpack.c.bf16 %v16467_v22, %v16466_v9  ;;  %v24743_v60 = vld [vmem:[#allocation3 + $0x41] sm:$0xff]  ;;  %v24747_v12 = vld [vmem:[#allocation3 + $0x51] sm:$0xff] }
 0x4be   : > { %v6762_v29 = vsel %vm6755_vm7, %v6753_v3, %v6648_v63  ;;  %v20353_v25 = vpack.c.bf16 %v16469_v38, %v16468_v33  ;;  %v16480_v30 = vld [vmem:[%s27452_s5 + $0xc0] sm:$0xff]  ;;  %v7133_v15 = vld [vmem:[#allocation3 + $0x2] sm:$0xff]  ;;  %v16529_v33 = vld [vmem:[%s27452_s5 + $0x188] sm:$0xff] }
 0x4bf   : > { %v6771_v36 = vsel %vm6764_vm8, %v6762_v29, %v6664_v28  ;;  %v6569_v8 = vrot.slane %v6550_v61, 1  ;;  %v6617_v62 = vmax.f32 %v6553_v51, %v6601_v20  ;;  %v20361_v27 = vpack.c.bf16 %v16481_v18, %v16480_v30  ;;  %v16482_v63 = vld [vmem:[%s27452_s5 + $0xd0] sm:$0xff]  ;;  %v16483_v52 = vld [vmem:[%s27452_s5 + $0xd8] sm:$0xff]  ;;  %v24772_v51 = vld [vmem:[#allocation3 + $0x12] sm:$0xff] }
 0x4c0   : > { %v6780_v55 = vsel %vm6773_vm9, %v6771_v36, %v6688_v17  ;;  %v20365_v45 = vpack.c.bf16 %v16483_v52, %v16482_v63  ;;  %v16484_v32 = vld [vmem:[%s27452_s5 + $0xe0] sm:$0xff]  ;;  %v16485_v28 = vld [vmem:[%s27452_s5 + $0xe8] sm:$0xff]  ;;  %v24782_v3 = vld [vmem:[#allocation3 + $0x22] sm:$0xff] }
 0x4c1   : > { %v6789_v37 = vsel %vm6782_vm10, %v6780_v55, %v6704_v5  ;;  %v6585_v59 = vmax.f32 %v6550_v61, %v6569_v8  ;;  %v6689_v10 = vrot.slane %v6617_v62, 4  ;;  %v6705_v13 = vrot.slane %v6617_v62, 5  ;;  %v24786_v17 = vld [vmem:[#allocation3 + $0x32] sm:$0xff]  ;;  %v16486_v29 = vld [vmem:[%s27452_s5 + $0xf0] sm:$0xff]  ;;  %v16487_v20 = vld [vmem:[%s27452_s5 + $0xf8] sm:$0xff] }
 0x4c2   : > { %v6798_v41 = vsel %vm6791_vm11, %v6789_v37, %v6720_v7  ;;  %v6721_v11 = vrot.slane %v6617_v62, 6  ;;  %v6737_v19 = vrot.slane %v6617_v62, 7  ;;  %v20369_v61 = vpack.c.bf16 %v16485_v28, %v16484_v32  ;;  %v24796_v5 = vld [vmem:[#allocation3 + $0x42] sm:$0xff]  ;;  %v24800_v8 = vld [vmem:[#allocation3 + $0x52] sm:$0xff] }
 0x4c3   : > { %v6807_v54 = vsel %vm6800_vm12, %v6798_v41, %v6736_v40  ;;  %v6633_v48 = vrot.slane %v6585_v59, 1  ;;  %v6649_v1 = vrot.slane %v6585_v59, 2  ;;  %v24694_v24 = vld [vmem:[#allocation3 + $0x60] sm:$0xff]  ;;  %v6665_v0 = vrot.slane %v6585_v59, 3  ;;  %v16496_v7 = vld [vmem:[%s27452_s5 + $0x100] sm:$0xff]  ;;  %v16497_v55 = vld [vmem:[%s27452_s5 + $0x108] sm:$0xff] }
 0x4c4   : > { %6816 = vst.msk [vmem:[#allocation3 + $0x71] sm:$0xff] %vm435_vm3, %v6807_v54  ;;  %18934 = vmatprep.mubr.msk.f32.mxu1 %vm435_vm3, %v24694_v24  ;;  %v24757_v2 = vld [vmem:[#allocation3 + $0x61] sm:$0xff]  ;;  %v20373_v36 = vpack.c.bf16 %v16487_v20, %v16486_v29  ;;  %v20377_v37 = vpack.c.bf16 %v16497_v55, %v16496_v7  ;;  %v16532_v30 = vld [vmem:[%s27452_s5 + $0x1a0] sm:$0xff]  ;;  %v16533_v18 = vld [vmem:[%s27452_s5 + $0x1a8] sm:$0xff] }
 0x4c5   : > { %v6754_v42 = vsel %vm6746_vm6, %v6585_v59, %v6633_v48  ;;  %v24810_v40 = vld [vmem:[#allocation3 + $0x62] sm:$0xff]  ;;  %v16500_v48 = vld [vmem:[%s27452_s5 + $0x120] sm:$0xff]  ;;  %v16549_v7 = vld [vmem:[%s27452_s5 + $0x1e8] sm:$0xff] }
 0x4c6   : > { %v6763_v23 = vsel %vm6755_vm7, %v6754_v42, %v6649_v1  ;;  %v16498_v41 = vld [vmem:[%s27452_s5 + $0x110] sm:$0xff]  ;;  %v16499_v62 = vld [vmem:[%s27452_s5 + $0x118] sm:$0xff]  ;;  %v16501_v1 = vld [vmem:[%s27452_s5 + $0x128] sm:$0xff] }
 0x4c7   : > { %v6772_v21 = vsel %vm6764_vm8, %v6763_v23, %v6665_v0  ;;  %v20381_v54 = vpack.c.bf16 %v16499_v62, %v16498_v41  ;;  %v20385_v0 = vpack.c.bf16 %v16501_v1, %v16500_v48  ;;  %v16503_v42 = vld [vmem:[%s27452_s5 + $0x138] sm:$0xff]  ;;  %v16512_v23 = vld [vmem:[%s27452_s5 + $0x140] sm:$0xff]  ;;  %v16518_v9 = vld [vmem:[%s27452_s5 + $0x170] sm:$0xff] }
 0x4c8   : > { %v6781_v43 = vsel %vm6773_vm9, %v6772_v21, %v6689_v10  ;;  %v16519_v22 = vld [vmem:[%s27452_s5 + $0x178] sm:$0xff]  ;;  %v16561_v41 = vld [vmem:[%s27452_s5 + $0x208] sm:$0xff]  ;;  %v16562_v62 = vld [vmem:[%s27452_s5 + $0x210] sm:$0xff] }
 0x4c9   : > { %v6790_v44 = vsel %vm6782_vm10, %v6781_v43, %v6705_v13  ;;  %v16513_v13 = vld [vmem:[%s27452_s5 + $0x148] sm:$0xff]  ;;  %v16514_v43 = vld [vmem:[%s27452_s5 + $0x150] sm:$0xff]  ;;  %v16535_v63 = vld [vmem:[%s27452_s5 + $0x1b8] sm:$0xff] }
 0x4ca   : > { %v6799_v53 = vsel %vm6791_vm11, %v6790_v44, %v6721_v11  ;;  %v20393_v21 = vpack.c.bf16 %v16513_v13, %v16512_v23  ;;  %v16547_v29 = vld [vmem:[%s27452_s5 + $0x1d8] sm:$0xff]  ;;  %v16564_v48 = vld [vmem:[%s27452_s5 + $0x220] sm:$0xff]  ;;  %v16565_v1 = vld [vmem:[%s27452_s5 + $0x228] sm:$0xff] }
 0x4cb   : > { %v6808_v47 = vsel %vm6800_vm12, %v6799_v53, %v6737_v19  ;;  %v24706_v31 = vld [vmem:[#allocation3 + $0x70] sm:$0xff]  ;;  %v16515_v19 = vld [vmem:[%s27452_s5 + $0x158] sm:$0xff] }
 0x4cc   : > { %6817 = vst.msk [vmem:[#allocation3 + $0x81] sm:$0xff] %vm435_vm3, %v6808_v47  ;;  %18935 = vmatmul.mubr.msk.f32.gmra.mrb[38].mxu1 %vm435_vm3, %v24706_v31  ;;  %v24761_v35 = vld [vmem:[#allocation3 + $0x71] sm:$0xff]  ;;  %v20397_v44 = vpack.c.bf16 %v16515_v19, %v16514_v43  ;;  %v8532_v23 = vld [vmem:[%s27454_s7 + $0x38] sm:$0xff] }
 0x4cd   : > { %18953 = vmatprep.mubr.msk.f32.mxu1 %vm435_vm3, %v6979_v46  ;;  %v24814_v59 = vld [vmem:[#allocation3 + $0x72] sm:$0xff]  ;;  %v8494_v19 = vld [vmem:[#allocation4 + $0x8] sm:$0xff] }
 0x4ce   : > { %v16516_v53 = vld [vmem:[%s27452_s5 + $0x160] sm:$0xff]  ;;  %v16517_v46 = vld [vmem:[%s27452_s5 + $0x168] sm:$0xff] }
 0x4cf   : > { %v20401_v47 = vpack.c.bf16 %v16517_v46, %v16516_v53  ;;  %v16610_v43 = vld [vmem:[%s27454_s7 + $0x48] sm:$0xff]  ;;  %v16611_v53 = vld [vmem:[%s27454_s7 + $0x50] sm:$0xff]  ;;  %v16612_v46 = vld [vmem:[%s27454_s7 + $0x58] sm:$0xff] }
 0x4d0   : > { %18954 = vmatmul.mubr.msk.f32.vlgmr.msra.gmra.mrb[32].mxu1 %vm435_vm3, %v24718_v34 }
 0x4d1   : > { %20348 = vmatpush3.bf16.msra.mxu1 %v24570_v39  ;;  %18956 = vmatprep.mubr.msk.f32.mxu1 %vm435_vm3, %v24728_v16  ;;  %v20357_v39 = vpack.c.bf16 %v16471_v50, %v16470_v26  ;;  %v16530_v26 = vld [vmem:[%s27452_s5 + $0x190] sm:$0xff]  ;;  %v16531_v50 = vld [vmem:[%s27452_s5 + $0x198] sm:$0xff] }
 0x4d2   : > { %20350 = vmatprep.subr.bf16.mxu1 %v20349_v4 }
 0x4d3   : > { %v24856_v11 = vld [vmem:[#allocation3 + $0x80] sm:$0xff] }
 0x4d4   : > { %18957 = vmatmul.mubr.msk.f32.gmra.mrb[34].mxu1 %vm435_vm3, %v24733_v6  ;;  %v24940_v28 = vld [vmem:[#allocation3 + $0x82] sm:$0xff] }
 0x4d5   : > { %20352 = vmatpush3.bf16.msra.mxu1 %v20349_v4  ;;  %18959 = vmatprep.mubr.msk.f32.mxu1 %vm435_vm3, %v24743_v60  ;;  %v20405_v4 = vpack.c.bf16 %v16519_v22, %v16518_v9  ;;  %v16613_v9 = vld [vmem:[%s27454_s7 + $0x60] sm:$0xff]  ;;  %v16614_v22 = vld [vmem:[%s27454_s7 + $0x68] sm:$0xff] }
 0x4d6   : > { %20354 = vmatprep.subr.bf16.mxu1 %v20353_v25 }
 0x4d8   : > { %18960 = vmatmul.mubr.msk.f32.gmra.mrb[36].mxu1 %vm435_vm3, %v24747_v12 }
 0x4d9   : > { %20356 = vmatpush3.bf16.msra.mxu1 %v20353_v25  ;;  %18962 = vmatprep.mubr.msk.f32.mxu1 %vm435_vm3, %v24757_v2  ;;  %v24898_v25 = vld [vmem:[#allocation3 + $0x81] sm:$0xff] }
 0x4da   : > { %20358 = vmatprep.subr.bf16.mxu1 %v20357_v39 }
 0x4dc   : > { %18963 = vmatmul.mubr.msk.f32.gmra.mrb[38].mxu1 %vm435_vm3, %v24761_v35 }
 0x4dd   : > { %20360 = vmatpush3.bf16.msra.mxu1 %v20357_v39  ;;  %18981 = vmatprep.mubr.msk.f32.mxu1 %vm435_vm3, %v7133_v15  ;;  %v20413_v39 = vpack.c.bf16 %v16531_v50, %v16530_v26  ;;  %v20417_v15 = vpack.c.bf16 %v16533_v18, %v16532_v30  ;;  %v16650_v26 = vld [vmem:[%s27454_s7 + $0x88] sm:$0xff] }
 0x4de   : > { %20362 = vmatprep.subr.bf16.mxu1 %v20361_v27 }
 0x4e0   : > { %18982 = vmatmul.mubr.msk.f32.vlgmr.msra.gmra.mrb[32].mxu1 %vm435_vm3, %v24772_v51 }
 0x4e1   : > { %20364 = vmatpush3.bf16.msra.mxu1 %v20361_v27  ;;  %18984 = vmatprep.mubr.msk.f32.mxu1 %vm435_vm3, %v24782_v3  ;;  %v16534_v27 = vld [vmem:[%s27452_s5 + $0x1b0] sm:$0xff] }
 0x4e2   : > { %20366 = vmatprep.subr.bf16.mxu1 %v20365_v45  ;;  %v20421_v52 = vpack.c.bf16 %v16535_v63, %v16534_v27 }
 0x4e4   : > { %18985 = vmatmul.mubr.msk.f32.gmra.mrb[34].mxu1 %vm435_vm3, %v24786_v17 }
 0x4e5   : > { %20368 = vmatpush3.bf16.msra.mxu1 %v20365_v45  ;;  %18987 = vmatprep.mubr.msk.f32.mxu1 %vm435_vm3, %v24796_v5  ;;  %v16544_v45 = vld [vmem:[%s27452_s5 + $0x1c0] sm:$0xff] }
 0x4e6   : > { %20370 = vmatprep.subr.bf16.mxu1 %v20369_v61 }
 0x4e8   : > { %18988 = vmatmul.mubr.msk.f32.gmra.mrb[36].mxu1 %vm435_vm3, %v24800_v8 }
 0x4e9   : > { %20372 = vmatpush3.bf16.msra.mxu1 %v20369_v61  ;;  %18990 = vmatprep.mubr.msk.f32.mxu1 %vm435_vm3, %v24810_v40  ;;  %v16546_v61 = vld [vmem:[%s27452_s5 + $0x1d0] sm:$0xff] }
 0x4ea   : > { %20374 = vmatprep.subr.bf16.mxu1 %v20373_v36  ;;  %v20429_v20 = vpack.c.bf16 %v16547_v29, %v16546_v61 }
 0x4ec   : > { %18991 = vmatmul.mubr.msk.f32.gmra.mrb[38].mxu1 %vm435_vm3, %v24814_v59 }
 0x4ed   : > { %20376 = vmatpush3.bf16.msra.mxu1 %v20373_v36  ;;  %19009 = vmatprep.mubr.msk.f32.mxu1 %vm435_vm3, %v24583_v14  ;;  %v16502_v14 = vld [vmem:[%s27452_s5 + $0x130] sm:$0xff]  ;;  %v16548_v36 = vld [vmem:[%s27452_s5 + $0x1e0] sm:$0xff] }
 0x4ee   : > { %20378 = vmatprep.subr.bf16.mxu1 %v20377_v37  ;;  %v20389_v10 = vpack.c.bf16 %v16503_v42, %v16502_v14  ;;  %v20433_v55 = vpack.c.bf16 %v16549_v7, %v16548_v36  ;;  %v16567_v14 = vld [vmem:[%s27452_s5 + $0x238] sm:$0xff] }
 0x4f0   : > { %19010 = vmatmul.mubr.msk.f32.vlgmr.msra.gmra.mrb[32].mxu1 %vm435_vm3, %v24614_v58 }
 0x4f1   : > { %20380 = vmatpush3.bf16.msra.mxu1 %v20377_v37  ;;  %19012 = vmatprep.mubr.msk.f32.mxu1 %vm435_vm3, %v24640_v56  ;;  %v16551_v37 = vld [vmem:[%s27452_s5 + $0x1f8] sm:$0xff] }
 0x4f2   : > { %20382 = vmatprep.subr.bf16.mxu1 %v20381_v54 }
 0x4f4   : > { %19013 = vmatmul.mubr.msk.f32.gmra.mrb[34].mxu1 %vm435_vm3, %v24662_v49 }
 0x4f5   : > { %20384 = vmatpush3.bf16.msra.mxu1 %v20381_v54  ;;  %19015 = vmatprep.mubr.msk.f32.mxu1 %vm435_vm3, %v24680_v57  ;;  %v16563_v54 = vld [vmem:[%s27452_s5 + $0x218] sm:$0xff] }
 0x4f6   : > { %20386 = vmatprep.subr.bf16.mxu1 %v20385_v0 }
 0x4f8   : > { %19016 = vmatmul.mubr.msk.f32.gmra.mrb[36].mxu1 %vm435_vm3, %v24694_v24 }
 0x4f9   : > { %20388 = vmatpush3.bf16.msra.mxu1 %v20385_v0  ;;  %19018 = vmatprep.mubr.msk.f32.mxu1 %vm435_vm3, %v24706_v31  ;;  %v20449_v0 = vpack.c.bf16 %v16565_v1, %v16564_v48 }
 0x4fa   : > { %20390 = vmatprep.subr.bf16.mxu1 %v20389_v10 }
 0x4fc   : > { %19019 = vmatmul.mubr.msk.f32.gmra.mrb[38].mxu1 %vm435_vm3, %v24856_v11 }
 0x4fd   : > { %20392 = vmatpush3.bf16.msra.mxu1 %v20389_v10  ;;  %19037 = vmatprep.mubr.msk.f32.mxu1 %vm435_vm3, %v24718_v34  ;;  %v16528_v34 = vld [vmem:[%s27452_s5 + $0x180] sm:$0xff]  ;;  %v8531_v10 = vld [vmem:[%s27454_s7 + $0x30] sm:$0xff] }
 0x4fe   : > { %20394 = vmatprep.subr.bf16.mxu1 %v20393_v21  ;;  %v20409_v38 = vpack.c.bf16 %v16529_v33, %v16528_v34  ;;  %v20469_v13 = vpack.c.bf16 %v8532_v23, %v8531_v10  ;;  %v16615_v34 = vld [vmem:[%s27454_s7 + $0x70] sm:$0xff]  ;;  %v16616_v33 = vld [vmem:[%s27454_s7 + $0x78] sm:$0xff] }
 0x500   : > { %19038 = vmatmul.mubr.msk.f32.vlgmr.msra.gmra.mrb[32].mxu1 %vm435_vm3, %v24728_v16 }
 0x501   : > { %20396 = vmatpush3.bf16.msra.mxu1 %v20393_v21  ;;  %19040 = vmatprep.mubr.msk.f32.mxu1 %vm435_vm3, %v24733_v6  ;;  %v8493_v21 = vld [vmem:[#allocation4] sm:$0xff] }
 0x502   : > { %20398 = vmatprep.subr.bf16.mxu1 %v20397_v44 }
 0x504   : > { %19041 = vmatmul.mubr.msk.f32.gmra.mrb[34].mxu1 %vm435_vm3, %v24743_v60 }
 0x505   : > { %20400 = vmatpush3.bf16.msra.mxu1 %v20397_v44  ;;  %19043 = vmatprep.mubr.msk.f32.mxu1 %vm435_vm3, %v24747_v12 }
 0x506   : > { %20402 = vmatprep.subr.bf16.mxu1 %v20401_v47 }
 0x508   : > { %19044 = vmatmul.mubr.msk.f32.gmra.mrb[36].mxu1 %vm435_vm3, %v24757_v2 }
 0x509   : > { %20404 = vmatpush3.bf16.msra.mxu1 %v20401_v47  ;;  %19046 = vmatprep.mubr.msk.f32.mxu1 %vm435_vm3, %v24761_v35  ;;  %v20477_v47 = vpack.c.bf16 %v16612_v46, %v16611_v53 }
 0x50a   : > { %20406 = vmatprep.subr.bf16.mxu1 %v20405_v4 }
 0x50c   : > { %19047 = vmatmul.mubr.msk.f32.gmra.mrb[38].mxu1 %vm435_vm3, %v24898_v25 }
 0x50d   : > { %20408 = vmatpush3.bf16.msra.mxu1 %v20405_v4  ;;  %19065 = vmatprep.mubr.msk.f32.mxu1 %vm435_vm3, %v24772_v51  ;;  %v16545_v51 = vld [vmem:[%s27452_s5 + $0x1c8] sm:$0xff]  ;;  %v20481_v4 = vpack.c.bf16 %v16614_v22, %v16613_v9 }
 0x50e   : > { %20410 = vmatprep.subr.bf16.mxu1 %v20409_v38  ;;  %v20425_v32 = vpack.c.bf16 %v16545_v51, %v16544_v45 }
 0x510   : > { %19066 = vmatmul.mubr.msk.f32.vlgmr.msra.gmra.mrb[32].mxu1 %vm435_vm3, %v24782_v3 }
 0x511   : > { %20412 = vmatpush3.bf16.msra.mxu1 %v20409_v38  ;;  %19068 = vmatprep.mubr.msk.f32.mxu1 %vm435_vm3, %v24786_v17  ;;  %v20485_v38 = vpack.c.bf16 %v16616_v33, %v16615_v34 }
 0x512   : > { %20414 = vmatprep.subr.bf16.mxu1 %v20413_v39 }
 0x514   : > { %19069 = vmatmul.mubr.msk.f32.gmra.mrb[34].mxu1 %vm435_vm3, %v24796_v5 }
 0x515   : > { %20416 = vmatpush3.bf16.msra.mxu1 %v20413_v39  ;;  %19071 = vmatprep.mubr.msk.f32.mxu1 %vm435_vm3, %v24800_v8  ;;  %v25093_v39 = vld [vmem:[%s27453_s6] ss:$0 sm:$0xff] }
 0x516   : > { %20418 = vmatprep.subr.bf16.mxu1 %v20417_v15 }
 0x518   : > { %19072 = vmatmul.mubr.msk.f32.gmra.mrb[36].mxu1 %vm435_vm3, %v24810_v40 }
 0x519   : > { %20420 = vmatpush3.bf16.msra.mxu1 %v20417_v15  ;;  %19074 = vmatprep.mubr.msk.f32.mxu1 %vm435_vm3, %v24814_v59 }
 0x51a   : > { %20422 = vmatprep.subr.bf16.mxu1 %v20421_v52 }
 0x51c   : > { %19075 = vmatmul.mubr.msk.f32.gmra.mrb[38].mxu1 %vm435_vm3, %v24940_v28 }
 0x51d   : > { %20424 = vmatpush3.bf16.msra.mxu1 %v20421_v52  ;;  %19093 = vmatprep.mubr.msk.f32.mxu1 %vm435_vm3, %v24614_v58  ;;  %v16550_v58 = vld [vmem:[%s27452_s5 + $0x1f0] sm:$0xff] }
 0x51e   : > { %20426 = vmatprep.subr.bf16.mxu1 %v20425_v32 }
 0x520   : > { %19094 = vmatmul.mubr.msk.f32.vlgmr.msra.gmra.mrb[32].mxu1 %vm435_vm3, %v24640_v56  ;;  %v20437_v56 = vpack.c.bf16 %v16551_v37, %v16550_v58 }
 0x521   : > { %20428 = vmatpush3.bf16.msra.mxu1 %v20425_v32  ;;  %19096 = vmatprep.mubr.msk.f32.mxu1 %vm435_vm3, %v24662_v49  ;;  %v16560_v49 = vld [vmem:[%s27452_s5 + $0x200] sm:$0xff] }
 0x522   : > { %20430 = vmatprep.subr.bf16.mxu1 %v20429_v20 }
 0x524   : > { %19097 = vmatmul.mubr.msk.f32.gmra.mrb[34].mxu1 %vm435_vm3, %v24680_v57  ;;  %v7757_v57 = vld [vmem:[#allocation3 + $0x90] sm:$0xff] }
 0x525   : > { %20432 = vmatpush3.bf16.msra.mxu1 %v20429_v20  ;;  %19099 = vmatprep.mubr.msk.f32.mxu1 %vm435_vm3, %v24694_v24  ;;  %v20441_v24 = vpack.c.bf16 %v16561_v41, %v16560_v49 }
 0x526   : > { %20434 = vmatprep.subr.bf16.mxu1 %v20433_v55 }
 0x528   : > { %19100 = vmatmul.mubr.msk.f32.gmra.mrb[36].mxu1 %vm435_vm3, %v24706_v31  ;;  %v20445_v31 = vpack.c.bf16 %v16563_v54, %v16562_v62 }
 0x529   : > { %20436 = vmatpush3.bf16.msra.mxu1 %v20433_v55  ;;  %19102 = vmatprep.mubr.msk.f32.mxu1 %vm435_vm3, %v24856_v11  ;;  %v16609_v11 = vld [vmem:[%s27454_s7 + $0x40] sm:$0xff] }
 0x52a   : > { %20438 = vmatprep.subr.bf16.mxu1 %v20437_v56  ;;  %v20473_v44 = vpack.c.bf16 %v16610_v43, %v16609_v11 }
 0x52c   : > { %19103 = vmatmul.mubr.msk.f32.gmra.mrb[38].mxu1 %vm435_vm3, %v7757_v57 }
 0x52d   : > { %20440 = vmatpush3.bf16.msra.mxu1 %v20437_v56  ;;  %19121 = vmatprep.mubr.msk.f32.mxu1 %vm435_vm3, %v24728_v16  ;;  %v16566_v16 = vld [vmem:[%s27452_s5 + $0x230] sm:$0xff] }
 0x52e   : > { %20442 = vmatprep.subr.bf16.mxu1 %v20441_v24 }
 0x530   : > { %19122 = vmatmul.mubr.msk.f32.vlgmr.msra.gmra.mrb[32].mxu1 %vm435_vm3, %v24733_v6  ;;  %v20453_v6 = vpack.c.bf16 %v16567_v14, %v16566_v16 }
 0x531   : > { %20444 = vmatpush3.bf16.msra.mxu1 %v20441_v24  ;;  %19124 = vmatprep.mubr.msk.f32.mxu1 %vm435_vm3, %v24743_v60  ;;  %v7911_v60 = vld [vmem:[#allocation3 + $0x91] sm:$0xff] }
 0x532   : > { %20446 = vmatprep.subr.bf16.mxu1 %v20445_v31 }
 0x534   : > { %19125 = vmatmul.mubr.msk.f32.gmra.mrb[34].mxu1 %vm435_vm3, %v24747_v12  ;;  %v8065_v12 = vld [vmem:[#allocation3 + $0x92] sm:$0xff] }
 0x535   : > { %20448 = vmatpush3.bf16.msra.mxu1 %v20445_v31  ;;  %19127 = vmatprep.mubr.msk.f32.mxu1 %vm435_vm3, %v24757_v2  ;;  %v8525_v2 = vld [vmem:[%s27454_s7] sm:$0xff] }
 0x536   : > { %20450 = vmatprep.subr.bf16.mxu1 %v20449_v0 }
 0x538   : > { %19128 = vmatmul.mubr.msk.f32.gmra.mrb[36].mxu1 %vm435_vm3, %v24761_v35  ;;  %v8526_v35 = vld [vmem:[%s27454_s7 + $0x8] sm:$0xff] }
 0x539   : > { %20452 = vmatpush3.bf16.msra.mxu1 %v20449_v0  ;;  %19130 = vmatprep.mubr.msk.f32.mxu1 %vm435_vm3, %v24898_v25  ;;  %v16649_v25 = vld [vmem:[%s27454_s7 + $0x80] sm:$0xff] }
 0x53a   : > { %20454 = vmatprep.subr.bf16.mxu1 %v20453_v6  ;;  %v25087_v50 = vpack.c.bf16 %v16650_v26, %v16649_v25 }
 0x53c   : > { %19131 = vmatmul.mubr.msk.f32.gmra.mrb[38].mxu1 %vm435_vm3, %v7911_v60 }
 0x53d   : > { %20456 = vmatpush3.bf16.msra.mxu1 %v20453_v6  ;;  %19149 = vmatprep.mubr.msk.f32.mxu1 %vm435_vm3, %v24782_v3  ;;  %v20457_v3 = vpack.c.bf16 %v8526_v35, %v8525_v2 }
 0x53f   : > { %20458 = vmatprep.subr.bf16.mxu1 %v20457_v3 }
 0x540   : > { %19150 = vmatmul.mubr.msk.f32.vlgmr.msra.gmra.mrb[32].mxu1 %vm435_vm3, %v24786_v17  ;;  %v8527_v17 = vld [vmem:[%s27454_s7 + $0x10] sm:$0xff] }
 0x541   : > { %19152 = vmatprep.mubr.msk.f32.mxu1 %vm435_vm3, %v24796_v5  ;;  %20460 = vmatpush3.bf16.msra.mxu1 %v20457_v3  ;;  %v8528_v5 = vld [vmem:[%s27454_s7 + $0x18] sm:$0xff] }
 0x544   : > { %19153 = vmatmul.mubr.msk.f32.gmra.mrb[34].mxu1 %vm435_vm3, %v24800_v8  ;;  %v20461_v8 = vpack.c.bf16 %v8528_v5, %v8527_v17 }
 0x545   : > { %19155 = vmatprep.mubr.msk.f32.mxu1 %vm435_vm3, %v24810_v40  ;;  %v8529_v40 = vld [vmem:[%s27454_s7 + $0x20] sm:$0xff] }
 0x546   : > { %20462 = vmatprep.subr.bf16.mxu1 %v20461_v8 }
 0x547   : > { %20464 = vmatpush3.bf16.msra.mxu1 %v20461_v8 }
 0x548   : > { %19156 = vmatmul.mubr.msk.f32.gmra.mrb[36].mxu1 %vm435_vm3, %v24814_v59  ;;  %v8530_v59 = vld [vmem:[%s27454_s7 + $0x28] sm:$0xff] }
 0x549   : > { %19158 = vmatprep.mubr.msk.f32.mxu1 %vm435_vm3, %v24940_v28  ;;  %v20465_v42 = vpack.c.bf16 %v8530_v59, %v8529_v40 }
 0x54b   : > { %20466 = vmatprep.subr.bf16.mxu1 %v20465_v42 }
 0x54c   : > { %19159 = vmatmul.mubr.msk.f32.gmra.mrb[38].mxu1 %vm435_vm3, %v8065_v12 }
 0x54d   : > { %20468 = vmatpush3.bf16.msra.mxu1 %v20465_v42  ;;  %19177 = vmatprep.mubr.msk.f32.mxu1 %vm435_vm3, %v8493_v21 }
 0x54e   : > { %20470 = vmatprep.subr.bf16.mxu1 %v20469_v13 }
 0x551   : > { %20472 = vmatpush3.bf16.msra.mxu1 %v20469_v13 }
 0x552   : > { %20474 = vmatprep.subr.bf16.mxu1 %v20473_v44 }
 0x554   : > { %19178 = vmatmul.mubr.msk.f32.vlgmr.msra.gmra.mrb[40].mxu1 %vm435_vm3, %v8494_v19 }
 0x555   : > { %20476 = vmatpush3.bf16.msra.mxu1 %v20473_v44 }
 0x556   : > { %20478 = vmatprep.subr.bf16.mxu1 %v20477_v47 }
 0x559   : > { %20480 = vmatpush3.bf16.msra.mxu1 %v20477_v47 }
 0x55a   : > { %20482 = vmatprep.subr.bf16.mxu1 %v20481_v4 }
 0x55d   : > { %20484 = vmatpush3.bf16.msra.mxu1 %v20481_v4 }
 0x55e   : > { %20486 = vmatprep.subr.bf16.mxu1 %v20485_v38 }
 0x561   : > { %20488 = vmatpush3.bf16.msra.mxu1 %v20485_v38 }
 0x562   : > { %20490 = vmatprep.subr.bf16.mxu1 %v25087_v50 }
 0x613   : > { %v19151_v30 = vpop.f32.mrb[32].mxu1 }
 0x614   : > { %v20741_v18 = vadd.f32 %v19151_v30, %v25093_v39  ;;  %v8165_v15 = vpop.f32.mrb[33].mxu1 }
 0x615   : > { %v20742_v27 = vadd.f32 %v25093_v39, %v8165_v15 }
 0x616   : > { %v25097_v63 = vmax.f32 %v20741_v18, 0.0 }
 0x617   : > { %v25099_v52 = vmax.f32 %v20742_v27, 0.0  ;;  %v19154_v45 = vpop.f32.mrb[34].mxu1 }
 0x618   : > { %v8229_v51 = vrot.slane %v25097_v63, 7  ;;  %v8245_v32 = vrot.slane %v25097_v63, 6  ;;  %v8261_v28 = vrot.slane %v25097_v63, 5  ;;  %v8175_v61 = vpop.f32.mrb[35].mxu1  ;;  %v8293_v29 = vrot.slane %v25097_v63, 3 }
 0x619   : > { %v8309_v20 = vrot.slane %v25097_v63, 2  ;;  %v8325_v36 = vrot.slane %v25097_v63, 1  ;;  %v8228_v7 = vrot.slane %v25099_v52, 7  ;;  %v8244_v58 = vrot.slane %v25099_v52, 6 }
 0x61a   : > { %v8341_v55 = vsel %vm6746_vm6, %v25097_v63, %v8229_v51  ;;  %v8260_v37 = vrot.slane %v25099_v52, 5  ;;  %v8292_v56 = vrot.slane %v25099_v52, 3  ;;  %v8308_v41 = vrot.slane %v25099_v52, 2 }
 0x61b   : > { %v25114_v49 = vsel %vm6755_vm7, %v8341_v55, %v8229_v51  ;;  %v8340_v57 = vsel %vm6746_vm6, %v25099_v52, %v8228_v7  ;;  %v20743_v24 = vadd.f32 %v19154_v45, %v25093_v39  ;;  %v19157_v62 = vpop.f32.mrb[36].mxu1  ;;  %v20744_v31 = vadd.f32 %v25093_v39, %v8175_v61 }
 0x61c   : > { %v8348_v54 = vsel %vm6755_vm7, %v8340_v57, %v8228_v7  ;;  %v20745_v48 = vadd.f32 %v19157_v62, %v25093_v39  ;;  %v8185_v1 = vpop.f32.mrb[37].mxu1  ;;  %v8276_v0 = vrot.slane %v25099_v52, 4  ;;  %v8324_v16 = vrot.slane %v25099_v52, 1 }
 0x61d   : > { %v25125_v14 = vmax.f32 %v20743_v24, 0.0  ;;  %v20746_v6 = vadd.f32 %v25093_v39, %v8185_v1  ;;  %v8356_v60 = vsel %vm6764_vm8, %v8348_v54, %v8244_v58  ;;  %v25129_v12 = vmax.f32 %v20744_v31, 0.0 }
 0x61e   : > { %v25131_v2 = vmax.f32 %v20745_v48, 0.0  ;;  %v8364_v35 = vsel %vm6773_vm9, %v8356_v60, %v8244_v58  ;;  %v8277_v3 = vrot.slane %v25097_v63, 4  ;;  %v8396_v59 = vsel %vm6746_vm6, %v8276_v0, %v8292_v56 }
 0x61f   : > { %v8231_v17 = vrot.slane %v25125_v14, 7  ;;  %v8247_v5 = vrot.slane %v25125_v14, 6  ;;  %v8263_v8 = vrot.slane %v25125_v14, 5  ;;  %v19160_v40 = vpop.f32.mrb[38].mxu1  ;;  %v8295_v42 = vrot.slane %v25125_v14, 3 }
 0x620   : > { %v8311_v10 = vrot.slane %v25125_v14, 2  ;;  %v8327_v23 = vrot.slane %v25125_v14, 1  ;;  %v8230_v13 = vrot.slane %v25129_v12, 7  ;;  %v8195_v21 = vpop.f32.mrb[39].mxu1  ;;  %v8246_v43 = vrot.slane %v25129_v12, 6 }
 0x621   : > { %v8343_v11 = vsel %vm6746_vm6, %v25125_v14, %v8231_v17  ;;  %v8262_v19 = vrot.slane %v25129_v12, 5  ;;  %v8294_v44 = vrot.slane %v25129_v12, 3  ;;  %v8310_v46 = vrot.slane %v25129_v12, 2 }
 0x622   : > { %v25151_v53 = vsel %vm6755_vm7, %v8343_v11, %v8231_v17  ;;  %v8342_v47 = vsel %vm6746_vm6, %v25129_v12, %v8230_v13  ;;  %v8233_v9 = vrot.slane %v25131_v2, 7  ;;  %v8326_v22 = vrot.slane %v25129_v12, 1 }
 0x623   : > { %v8350_v4 = vsel %vm6755_vm7, %v8342_v47, %v8230_v13  ;;  %v8249_v34 = vrot.slane %v25131_v2, 6  ;;  %v8265_v33 = vrot.slane %v25131_v2, 5  ;;  %v8297_v38 = vrot.slane %v25131_v2, 3 }
 0x624   : > { %v8313_v25 = vrot.slane %v25131_v2, 2  ;;  %v8345_v26 = vsel %vm6746_vm6, %v25131_v2, %v8233_v9  ;;  %v25165_v30 = vmax.f32 %v20746_v6, 0.0  ;;  %v8329_v18 = vrot.slane %v25131_v2, 1 }
 0x625   : > { %v20747_v15 = vadd.f32 %v19160_v40, %v25093_v39  ;;  %v20748_v27 = vadd.f32 %v25093_v39, %v8195_v21  ;;  %v8372_v45 = vsel %vm6782_vm10, %v8364_v35, %v8260_v37  ;;  %v25172_v51 = vsel %vm6755_vm7, %v8345_v26, %v8233_v9 }
 0x626   : > { %v8232_v61 = vrot.slane %v25165_v30, 7  ;;  %v8248_v7 = vrot.slane %v25165_v30, 6  ;;  %v8264_v55 = vrot.slane %v25165_v30, 5  ;;  %v8296_v58 = vrot.slane %v25165_v30, 3 }
 0x627   : > { %v8312_v57 = vrot.slane %v25165_v30, 2  ;;  %v25179_v24 = vmax.f32 %v20747_v15, 0.0  ;;  %v25181_v62 = vmax.f32 %v20748_v27, 0.0  ;;  %v8328_v39 = vrot.slane %v25165_v30, 1 }
 0x628   : > { %v8344_v54 = vsel %vm6746_vm6, %v25165_v30, %v8232_v61  ;;  %v8380_v31 = vsel %vm6791_vm11, %v8372_v45, %v8260_v37  ;;  %v8404_v48 = vsel %vm6755_vm7, %v8396_v59, %v8292_v56  ;;  %v8357_v35 = vsel %vm6764_vm8, %v25114_v49, %v8245_v32 }
 0x629   : > { %v25189_v1 = vsel %vm6755_vm7, %v8344_v54, %v8232_v61  ;;  %v8235_v6 = vrot.slane %v25179_v24, 7  ;;  %v8251_v60 = vrot.slane %v25179_v24, 6  ;;  %v8267_v17 = vrot.slane %v25179_v24, 5 }
 0x62a   : > { %v8299_v40 = vrot.slane %v25179_v24, 3  ;;  %v8315_v37 = vrot.slane %v25179_v24, 2  ;;  %v8234_v56 = vrot.slane %v25181_v62, 7  ;;  %v8250_v13 = vrot.slane %v25181_v62, 6 }
 0x62b   : > { %v8347_v59 = vsel %vm6746_vm6, %v25179_v24, %v8235_v6  ;;  %v8266_v21 = vrot.slane %v25181_v62, 5  ;;  %v8298_v11 = vrot.slane %v25181_v62, 3  ;;  %v8314_v49 = vrot.slane %v25181_v62, 2 }
 0x62c   : > { %v25207_v47 = vsel %vm6755_vm7, %v8347_v59, %v8235_v6  ;;  %v8330_v9 = vrot.slane %v25181_v62, 1  ;;  %v8346_v26 = vsel %vm6746_vm6, %v25181_v62, %v8234_v56  ;;  %v8388_v27 = vsel %vm6800_vm12, %v8380_v31, %v8276_v0 }
 0x62d   : > { %v25214_v15 = vsel %vm6755_vm7, %v8346_v26, %v8234_v56  ;;  %v8412_v45 = vsel %vm6764_vm8, %v8404_v48, %v8308_v41  ;;  %v8365_v61 = vsel %vm6773_vm9, %v8357_v35, %v8245_v32  ;;  %8453 = vst.msk [vmem:[#allocation4 + $0x19] sm:$0xff] %vm435_vm3, %v8388_v27  ;;  %8455 = vst.msk [vmem:[#allocation4 + $0x31] sm:$0xff] %vm435_vm3, %v8388_v27  ;;  %v8278_v32 = vrot.slane %v25129_v12, 4 }
 0x62e   : > { %v8420_v54 = vsel %vm6773_vm9, %v8412_v45, %v8308_v41  ;;  %v8373_v0 = vsel %vm6782_vm10, %v8365_v61, %v8261_v28  ;;  %v8397_v31 = vsel %vm6746_vm6, %v8277_v3, %v8293_v29  ;;  %v8358_v35 = vsel %vm6764_vm8, %v8350_v4, %v8246_v43 }
 0x62f   : > { %v8428_v48 = vsel %vm6782_vm10, %v8420_v54, %v8324_v16  ;;  %v8381_v41 = vsel %vm6791_vm11, %v8373_v0, %v8261_v28  ;;  %v8405_v6 = vsel %vm6755_vm7, %v8397_v31, %v8293_v29  ;;  %v8366_v29 = vsel %vm6773_vm9, %v8358_v35, %v8246_v43 }
 0x630   : > { %v8436_v56 = vsel %vm6791_vm11, %v8428_v48, %v8324_v16  ;;  %v8389_v59 = vsel %vm6800_vm12, %v8381_v41, %v8277_v3  ;;  %v8413_v28 = vsel %vm6764_vm8, %v8405_v6, %v8309_v20  ;;  %v8374_v3 = vsel %vm6782_vm10, %v8366_v29, %v8262_v19 }
 0x631   : > { %v8444_v26 = vsel %vm6800_vm12, %v8436_v56, %v25099_v52  ;;  %8457 = vst.msk [vmem:[#allocation4 + $0x49] sm:$0xff] %vm435_vm3, %v8389_v59  ;;  %8459 = vst.msk [vmem:[#allocation4 + $0x61] sm:$0xff] %vm435_vm3, %v8389_v59  ;;  %v8421_v16 = vsel %vm6773_vm9, %v8413_v28, %v8309_v20  ;;  %v8398_v4 = vsel %vm6746_vm6, %v8278_v32, %v8294_v44  ;;  %v8279_v27 = vrot.slane %v25125_v14, 4 }
 0x632   : > { %8454 = vst.msk [vmem:[#allocation4 + $0x21] sm:$0xff] %vm435_vm3, %v8444_v26  ;;  %8456 = vst.msk [vmem:[#allocation4 + $0x39] sm:$0xff] %vm435_vm3, %v8444_v26  ;;  %v8429_v52 = vsel %vm6782_vm10, %v8421_v16, %v8325_v36  ;;  %v8382_v20 = vsel %vm6791_vm11, %v8374_v3, %v8262_v19  ;;  %v8406_v43 = vsel %vm6755_vm7, %v8398_v4, %v8294_v44 }
 0x633   : > { %v8437_v45 = vsel %vm6791_vm11, %v8429_v52, %v8325_v36  ;;  %v8390_v61 = vsel %vm6800_vm12, %v8382_v20, %v8278_v32  ;;  %v8414_v54 = vsel %vm6764_vm8, %v8406_v43, %v8310_v46  ;;  %v8359_v19 = vsel %vm6764_vm8, %v25151_v53, %v8247_v5 }
 0x634   : > { %v8445_v44 = vsel %vm6800_vm12, %v8437_v45, %v25097_v63  ;;  %8461 = vst.msk [vmem:[#allocation4 + $0x79] sm:$0xff] %vm435_vm3, %v8390_v61  ;;  %8463 = vst.msk [vmem:[#allocation4 + $0x91] sm:$0xff] %vm435_vm3, %v8390_v61  ;;  %v8422_v36 = vsel %vm6773_vm9, %v8414_v54, %v8310_v46  ;;  %v8367_v0 = vsel %vm6773_vm9, %v8359_v19, %v8247_v5  ;;  %v25312_v53 = vld [vmem:[#allocation4 + $0x18] sm:$0xff]  ;;  %v8280_v32 = vrot.slane %v25165_v30, 4  ;;  %v25381_v3 = vld [vmem:[#allocation4 + $0x30] sm:$0xff] }
 0x635   : > { %v8399_v31 = vsel %vm6746_vm6, %v8279_v27, %v8295_v42  ;;  %8458 = vst.msk [vmem:[#allocation4 + $0x51] sm:$0xff] %vm435_vm3, %v8445_v44  ;;  %8460 = vst.msk [vmem:[#allocation4 + $0x69] sm:$0xff] %vm435_vm3, %v8445_v44  ;;  %v8430_v63 = vsel %vm6782_vm10, %v8422_v36, %v8326_v22  ;;  %v8375_v46 = vsel %vm6782_vm10, %v8367_v0, %v8263_v8  ;;  %19180 = vmatprep.mubr.msk.f32.mxu1 %vm435_vm3, %v25312_v53 }
 0x636   : > { %v8407_v5 = vsel %vm6755_vm7, %v8399_v31, %v8295_v42  ;;  %v8438_v48 = vsel %vm6791_vm11, %v8430_v63, %v8326_v22  ;;  %v8383_v41 = vsel %vm6791_vm11, %v8375_v46, %v8263_v8  ;;  %v8360_v42 = vsel %vm6764_vm8, %v25189_v1, %v8248_v7 }
 0x637   : > { %v8415_v6 = vsel %vm6764_vm8, %v8407_v5, %v8311_v10  ;;  %v8446_v35 = vsel %vm6800_vm12, %v8438_v48, %v25129_v12  ;;  %v8391_v56 = vsel %vm6800_vm12, %v8383_v41, %v8279_v27  ;;  %v8368_v8 = vsel %vm6773_vm9, %v8360_v42, %v8248_v7 }
 0x638   : > { %v8423_v22 = vsel %vm6773_vm9, %v8415_v6, %v8311_v10  ;;  %8462 = vst.msk [vmem:[#allocation4 + $0x81] sm:$0xff] %vm435_vm3, %v8446_v35  ;;  %8464 = vst.msk [vmem:[#allocation4 + $0x99] sm:$0xff] %vm435_vm3, %v8446_v35  ;;  %v8376_v10 = vsel %vm6782_vm10, %v8368_v8, %v8264_v55  ;;  %v8400_v7 = vsel %vm6746_vm6, %v8280_v32, %v8296_v58  ;;  %v8281_v1 = vrot.slane %v25131_v2, 4 }
 0x639   : > { %8465 = vst.msk [vmem:[#allocation4 + $0xa9] sm:$0xff] %vm435_vm3, %v8391_v56  ;;  %8467 = vst.msk [vmem:[#allocation4 + $0xc1] sm:$0xff] %vm435_vm3, %v8391_v56  ;;  %v8431_v12 = vsel %vm6782_vm10, %v8423_v22, %v8327_v23  ;;  %v25364_v59 = vld [vmem:[#allocation4 + $0x20] sm:$0xff]  ;;  %v8384_v29 = vsel %vm6791_vm11, %v8376_v10, %v8264_v55  ;;  %v8408_v26 = vsel %vm6755_vm7, %v8400_v7, %v8296_v58  ;;  %v8282_v52 = vrot.slane %v25181_v62, 4  ;;  %v25421_v45 = vld [vmem:[#allocation4 + $0x38] sm:$0xff] }
 0x63a   : > { %v8439_v28 = vsel %vm6791_vm11, %v8431_v12, %v8327_v23  ;;  %v8361_v16 = vsel %vm6764_vm8, %v25172_v51, %v8249_v34  ;;  %19181 = vmatmul.mubr.msk.f32.gmra.mrb[42].mxu1 %vm435_vm3, %v25364_v59  ;;  %v8392_v4 = vsel %vm6800_vm12, %v8384_v29, %v8280_v32  ;;  %v8416_v55 = vsel %vm6764_vm8, %v8408_v26, %v8312_v57 }
 0x63b   : > { %v8447_v23 = vsel %vm6800_vm12, %v8439_v28, %v25125_v14  ;;  %v8369_v58 = vsel %vm6773_vm9, %v8361_v16, %v8249_v34  ;;  %19183 = vmatprep.mubr.msk.f32.mxu1 %vm435_vm3, %v25381_v3  ;;  %8469 = vst.msk [vmem:[#allocation4 + $0xd9] sm:$0xff] %vm435_vm3, %v8392_v4  ;;  %8471 = vst.msk [vmem:[#allocation4 + $0xf1] sm:$0xff] %vm435_vm3, %v8392_v4  ;;  %v8424_v14 = vsel %vm6773_vm9, %v8416_v55, %v8312_v57  ;;  %v25545_v10 = vld [vmem:[#allocation4 + $0x90] sm:$0xff] }
 0x63c   : > { %8466 = vst.msk [vmem:[#allocation4 + $0xb1] sm:$0xff] %vm435_vm3, %v8447_v23  ;;  %8468 = vst.msk [vmem:[#allocation4 + $0xc9] sm:$0xff] %vm435_vm3, %v8447_v23  ;;  %v8377_v51 = vsel %vm6782_vm10, %v8369_v58, %v8265_v33  ;;  %v8401_v34 = vsel %vm6746_vm6, %v8281_v1, %v8297_v38  ;;  %v8432_v20 = vsel %vm6782_vm10, %v8424_v14, %v8328_v39  ;;  %v8283_v0 = vrot.slane %v25179_v24, 4  ;;  %v25475_v5 = vld [vmem:[#allocation4 + $0x50] sm:$0xff]  ;;  %v25523_v8 = vld [vmem:[#allocation4 + $0x68] sm:$0xff] }
 0x63d   : > { %v8385_v43 = vsel %vm6791_vm11, %v8377_v51, %v8265_v33  ;;  %v8409_v57 = vsel %vm6755_vm7, %v8401_v34, %v8297_v38  ;;  %v8362_v27 = vsel %vm6764_vm8, %v25214_v15, %v8250_v13  ;;  %v8440_v61 = vsel %vm6791_vm11, %v8432_v20, %v8328_v39  ;;  %v25435_v15 = vld [vmem:[#allocation4 + $0x48] sm:$0xff] }
 0x63e   : > { %v8393_v54 = vsel %vm6800_vm12, %v8385_v43, %v8281_v1  ;;  %v8417_v33 = vsel %vm6764_vm8, %v8409_v57, %v8313_v25  ;;  %v8370_v38 = vsel %vm6773_vm9, %v8362_v27, %v8250_v13  ;;  %19184 = vmatmul.mubr.msk.f32.gmra.mrb[44].mxu1 %vm435_vm3, %v25421_v45  ;;  %v8448_v19 = vsel %vm6800_vm12, %v8440_v61, %v25165_v30  ;;  %v8886_v27 = vld [vmem:[#allocation4 + $0x1] sm:$0xff] }
 0x63f   : > { %8473 = vst.msk [vmem:[#allocation4 + $0x109] sm:$0xff] %vm435_vm3, %v8393_v54  ;;  %8475 = vst.msk [vmem:[#allocation4 + $0x121] sm:$0xff] %vm435_vm3, %v8393_v54  ;;  %v8425_v39 = vsel %vm6773_vm9, %v8417_v33, %v8313_v25  ;;  %v8378_v13 = vsel %vm6782_vm10, %v8370_v38, %v8266_v21  ;;  %v8402_v44 = vsel %vm6746_vm6, %v8282_v52, %v8298_v11  ;;  %19186 = vmatprep.mubr.msk.f32.mxu1 %vm435_vm3, %v25435_v15  ;;  %v25541_v12 = vld [vmem:[#allocation4 + $0x80] sm:$0xff]  ;;  %v25549_v7 = vld [vmem:[#allocation4 + $0x98] sm:$0xff] }
 0x640   : > { %8470 = vst.msk [vmem:[#allocation4 + $0xe1] sm:$0xff] %vm435_vm3, %v8448_v19  ;;  %8472 = vst.msk [vmem:[#allocation4 + $0xf9] sm:$0xff] %vm435_vm3, %v8448_v19  ;;  %v8433_v30 = vsel %vm6782_vm10, %v8425_v39, %v8329_v18  ;;  %v8386_v25 = vsel %vm6791_vm11, %v8378_v13, %v8266_v21  ;;  %v8410_v36 = vsel %vm6755_vm7, %v8402_v44, %v8298_v11  ;;  %v8331_v41 = vrot.slane %v25179_v24, 1  ;;  %v25561_v28 = vld [vmem:[#allocation4 + $0xc0] sm:$0xff]  ;;  %v16652_v33 = vld [vmem:[%s27454_s7 + $0x98] sm:$0xff] }
 0x641   : > { %v8441_v31 = vsel %vm6791_vm11, %v8433_v30, %v8329_v18  ;;  %v8394_v63 = vsel %vm6800_vm12, %v8386_v25, %v8282_v52  ;;  %v8418_v46 = vsel %vm6764_vm8, %v8410_v36, %v8314_v49  ;;  %v8363_v21 = vsel %vm6764_vm8, %v25207_v47, %v8251_v60  ;;  %v16651_v54 = vld [vmem:[%s27454_s7 + $0x90] sm:$0xff]  ;;  %v8887_v38 = vld [vmem:[#allocation4 + $0x9] sm:$0xff]  ;;  %v16654_v13 = vld [vmem:[%s27454_s7 + $0xa8] sm:$0xff] }
 0x642   : > { %v8449_v11 = vsel %vm6800_vm12, %v8441_v31, %v25131_v2  ;;  %8477 = vst.msk [vmem:[#allocation4 + $0x139] sm:$0xff] %vm435_vm3, %v8394_v63  ;;  %8479 = vst.msk [vmem:[#allocation4 + $0x151] sm:$0xff] %vm435_vm3, %v8394_v63  ;;  %v8426_v18 = vsel %vm6773_vm9, %v8418_v46, %v8314_v49  ;;  %v8371_v32 = vsel %vm6773_vm9, %v8363_v21, %v8251_v60  ;;  %19187 = vmatmul.mubr.msk.f32.gmra.mrb[46].mxu1 %vm435_vm3, %v25475_v5  ;;  %v25492_v2 = vld [vmem:[#allocation4 + $0x60] sm:$0xff]  ;;  %v25569_v26 = vld [vmem:[#allocation4 + $0xd8] sm:$0xff] }
 0x643   : > { %v8403_v47 = vsel %vm6746_vm6, %v8283_v0, %v8299_v40  ;;  %8474 = vst.msk [vmem:[#allocation4 + $0x111] sm:$0xff] %vm435_vm3, %v8449_v11  ;;  %8476 = vst.msk [vmem:[#allocation4 + $0x129] sm:$0xff] %vm435_vm3, %v8449_v11  ;;  %v8434_v49 = vsel %vm6782_vm10, %v8426_v18, %v8330_v9  ;;  %v8379_v60 = vsel %vm6782_vm10, %v8371_v32, %v8267_v17  ;;  %19189 = vmatprep.mubr.msk.f32.mxu1 %vm435_vm3, %v25492_v2  ;;  %v25557_v1 = vld [vmem:[#allocation4 + $0xb0] sm:$0xff]  ;;  %v25565_v29 = vld [vmem:[#allocation4 + $0xc8] sm:$0xff] }
 0x644   : > { %v8411_v48 = vsel %vm6755_vm7, %v8403_v47, %v8299_v40  ;;  %v8442_v6 = vsel %vm6791_vm11, %v8434_v49, %v8330_v9  ;;  %v8387_v42 = vsel %vm6791_vm11, %v8379_v60, %v8267_v17  ;;  %v25577_v23 = vld [vmem:[#allocation4 + $0xf0] sm:$0xff]  ;;  %v20493_v19 = vpack.c.bf16 %v16652_v33, %v16651_v54  ;;  %v25639_v44 = vld [vmem:[#allocation4 + $0x19] sm:$0xff]  ;;  %v25644_v25 = vld [vmem:[#allocation4 + $0x21] sm:$0xff] }
 0x645   : > { %v8419_v35 = vsel %vm6764_vm8, %v8411_v48, %v8315_v37  ;;  %v8450_v40 = vsel %vm6800_vm12, %v8442_v6, %v25181_v62  ;;  %v8395_v56 = vsel %vm6800_vm12, %v8387_v42, %v8283_v0  ;;  %v25532_v62 = vld [vmem:[#allocation4 + $0x78] sm:$0xff]  ;;  %v16653_v39 = vld [vmem:[%s27454_s7 + $0xa0] sm:$0xff]  ;;  %v16655_v36 = vld [vmem:[%s27454_s7 + $0xb0] sm:$0xff] }
 0x646   : > { %v8427_v22 = vsel %vm6773_vm9, %v8419_v35, %v8315_v37  ;;  %8478 = vst.msk [vmem:[#allocation4 + $0x141] sm:$0xff] %vm435_vm3, %v8450_v40  ;;  %8480 = vst.msk [vmem:[#allocation4 + $0x159] sm:$0xff] %vm435_vm3, %v8450_v40  ;;  %19190 = vmatmul.mubr.msk.f32.gmra.mrb[48].mxu1 %vm435_vm3, %v25523_v8  ;;  %v25585_v55 = vld [vmem:[#allocation4 + $0x108] sm:$0xff]  ;;  %v25593_v14 = vld [vmem:[#allocation4 + $0x120] sm:$0xff]  ;;  %v20497_v30 = vpack.c.bf16 %v16654_v13, %v16653_v39 }
 0x647   : > { %8481 = vst.msk [vmem:[#allocation4 + $0x169] sm:$0xff] %vm435_vm3, %v8395_v56  ;;  %8483 = vst.msk [vmem:[#allocation4 + $0x181] sm:$0xff] %vm435_vm3, %v8395_v56  ;;  %v8435_v17 = vsel %vm6782_vm10, %v8427_v22, %v8331_v41  ;;  %19192 = vmatprep.mubr.msk.f32.mxu1 %vm435_vm3, %v25532_v62  ;;  %v25573_v16 = vld [vmem:[#allocation4 + $0xe0] sm:$0xff]  ;;  %v25581_v4 = vld [vmem:[#allocation4 + $0xf8] sm:$0xff] }
 0x648   : > { %v8443_v9 = vsel %vm6791_vm11, %v8435_v17, %v8331_v41  ;;  %v16656_v0 = vld [vmem:[%s27454_s7 + $0xb8] sm:$0xff]  ;;  %v25654_v31 = vld [vmem:[#allocation4 + $0x31] sm:$0xff]  ;;  %v25658_v63 = vld [vmem:[#allocation4 + $0x39] sm:$0xff] }
 0x649   : > { %v8451_v37 = vsel %vm6800_vm12, %v8443_v9, %v25179_v24  ;;  %v25553_v24 = vld [vmem:[#allocation4 + $0xa8] sm:$0xff]  ;;  %v25601_v34 = vld [vmem:[#allocation4 + $0x138] sm:$0xff]  ;;  %v25609_v20 = vld [vmem:[#allocation4 + $0x150] sm:$0xff] }
 0x64a   : > { %8482 = vst.msk [vmem:[#allocation4 + $0x171] sm:$0xff] %vm435_vm3, %v8451_v37  ;;  %8484 = vst.msk [vmem:[#allocation4 + $0x189] sm:$0xff] %vm435_vm3, %v8451_v37  ;;  %19193 = vmatmul.mubr.msk.f32.gmra.mrb[50].mxu1 %vm435_vm3, %v25541_v12  ;;  %v25589_v58 = vld [vmem:[#allocation4 + $0x110] sm:$0xff]  ;;  %v25597_v51 = vld [vmem:[#allocation4 + $0x128] sm:$0xff] }
 0x64b   : > { %19195 = vmatprep.mubr.msk.f32.mxu1 %vm435_vm3, %v25545_v10  ;;  %v16689_v46 = vld [vmem:[%s27454_s7 + $0xc0] sm:$0xff]  ;;  %v16690_v21 = vld [vmem:[%s27454_s7 + $0xc8] sm:$0xff]  ;;  %v25676_v47 = vld [vmem:[#allocation4 + $0x61] sm:$0xff] }
 0x64c   : > { %v25668_v11 = vld [vmem:[#allocation4 + $0x49] sm:$0xff]  ;;  %v20505_v18 = vpack.c.bf16 %v16690_v21, %v16689_v46  ;;  %v25672_v32 = vld [vmem:[#allocation4 + $0x51] sm:$0xff]  ;;  %v25684_v60 = vld [vmem:[#allocation4 + $0x79] sm:$0xff] }
 0x64d   : > { %v25605_v52 = vld [vmem:[#allocation4 + $0x140] sm:$0xff]  ;;  %v25613_v43 = vld [vmem:[#allocation4 + $0x158] sm:$0xff]  ;;  %v25680_v49 = vld [vmem:[#allocation4 + $0x69] sm:$0xff] }
 0x64e   : > { %19196 = vmatmul.mubr.msk.f32.gmra.mrb[52].mxu1 %vm435_vm3, %v25549_v7  ;;  %v25617_v57 = vld [vmem:[#allocation4 + $0x168] sm:$0xff]  ;;  %v25692_v41 = vld [vmem:[#allocation4 + $0x91] sm:$0xff]  ;;  %v25696_v6 = vld [vmem:[#allocation4 + $0x99] sm:$0xff] }
 0x64f   : > { %19198 = vmatprep.mubr.msk.f32.mxu1 %vm435_vm3, %v25553_v24  ;;  %v25688_v48 = vld [vmem:[#allocation4 + $0x81] sm:$0xff]  ;;  %v25700_v42 = vld [vmem:[#allocation4 + $0xa9] sm:$0xff]  ;;  %v25704_v35 = vld [vmem:[#allocation4 + $0xb1] sm:$0xff] }
 0x650   : > { %v25708_v40 = vld [vmem:[#allocation4 + $0xc1] sm:$0xff]  ;;  %v25712_v56 = vld [vmem:[#allocation4 + $0xc9] sm:$0xff]  ;;  %v25716_v22 = vld [vmem:[#allocation4 + $0xd9] sm:$0xff] }
 0x651   : > { %v25621_v61 = vld [vmem:[#allocation4 + $0x170] sm:$0xff]  ;;  %v25720_v17 = vld [vmem:[#allocation4 + $0xe1] sm:$0xff]  ;;  %v25728_v37 = vld [vmem:[#allocation4 + $0xf9] sm:$0xff] }
 0x652   : > { %19199 = vmatmul.mubr.msk.f32.gmra.mrb[54].mxu1 %vm435_vm3, %v25557_v1  ;;  %v25724_v9 = vld [vmem:[#allocation4 + $0xf1] sm:$0xff]  ;;  %v25740_v33 = vld [vmem:[#allocation4 + $0x121] sm:$0xff] }
 0x653   : > { %19201 = vmatprep.mubr.msk.f32.mxu1 %vm435_vm3, %v25561_v28  ;;  %v25736_v54 = vld [vmem:[#allocation4 + $0x111] sm:$0xff]  ;;  %v25752_v39 = vld [vmem:[#allocation4 + $0x141] sm:$0xff] }
 0x654   : > { %27674 = vst [vmem:[#allocation9_spill] sm:$0xff] %v25752_v39  ;;  %v25756_v13 = vld [vmem:[#allocation4 + $0x151] sm:$0xff]  ;;  %v16691_v46 = vld [vmem:[%s27454_s7 + $0xd0] sm:$0xff]  ;;  %v16692_v21 = vld [vmem:[%s27454_s7 + $0xd8] sm:$0xff] }
 0x655   : > { %27675 = vst [vmem:[#allocation10_spill] sm:$0xff] %v25756_v13 }
 0x656   : > { %19202 = vmatmul.mubr.msk.f32.gmra.mrb[56].mxu1 %vm435_vm3, %v25565_v29 }
 0x657   : > { %19204 = vmatprep.mubr.msk.f32.mxu1 %vm435_vm3, %v25569_v26 }
 0x65a   : > { %19205 = vmatmul.mubr.msk.f32.gmra.mrb[58].mxu1 %vm435_vm3, %v25573_v16 }
 0x65b   : > { %19207 = vmatprep.mubr.msk.f32.mxu1 %vm435_vm3, %v25577_v23 }
 0x65e   : > { %19208 = vmatmul.mubr.msk.f32.gmra.mrb[60].mxu1 %vm435_vm3, %v25581_v4 }
 0x65f   : > { %19210 = vmatprep.mubr.msk.f32.mxu1 %vm435_vm3, %v25585_v55 }
 0x662   : > { %19211 = vmatmul.mubr.msk.f32.gmra.mrb[62].mxu1 %vm435_vm3, %v25589_v58 }
 0x663   : > { %19213 = vmatprep.mubr.msk.f32.mxu1 %vm435_vm3, %v25593_v14 }
 0x666   : > { %19214 = vmatmul.mubr.msk.f32.gmra.mrb[64].mxu1 %vm435_vm3, %v25597_v51 }
 0x667   : > { %19216 = vmatprep.mubr.msk.f32.mxu1 %vm435_vm3, %v25601_v34 }
 0x66a   : > { %19217 = vmatmul.mubr.msk.f32.gmra.mrb[66].mxu1 %vm435_vm3, %v25605_v52 }
 0x66b   : > { %19219 = vmatprep.mubr.msk.f32.mxu1 %vm435_vm3, %v25609_v20 }
 0x66e   : > { %19220 = vmatmul.mubr.msk.f32.gmra.mrb[68].mxu1 %vm435_vm3, %v25613_v43 }
 0x66f   : > { %19222 = vmatprep.mubr.msk.f32.mxu1 %vm435_vm3, %v25617_v57 }
 0x672   : > { %19223 = vmatmul.mubr.msk.f32.gmra.mrb[70].mxu1 %vm435_vm3, %v25621_v61 }
 0x673   : > { %19241 = vmatprep.mubr.msk.f32.mxu1 %vm435_vm3, %v8886_v27  ;;  %v25732_v27 = vld [vmem:[#allocation4 + $0x109] sm:$0xff] }
 0x676   : > { %19242 = vmatmul.mubr.msk.f32.vlgmr.msra.gmra.mrb[40].mxu1 %vm435_vm3, %v8887_v38  ;;  %v25744_v38 = vld [vmem:[#allocation4 + $0x129] sm:$0xff] }
 0x677   : > { %20492 = vmatpush3.bf16.msra.mxu1 %v25087_v50  ;;  %19244 = vmatprep.mubr.msk.f32.mxu1 %vm435_vm3, %v25639_v44  ;;  %v20501_v50 = vpack.c.bf16 %v16656_v0, %v16655_v36  ;;  %v25764_v36 = vld [vmem:[#allocation4 + $0x169] sm:$0xff] }
 0x678   : > { %20494 = vmatprep.subr.bf16.mxu1 %v20493_v19  ;;  %27677 = vst [vmem:[#allocation13_spill] sm:$0xff] %v25764_v36  ;;  %v9280_v0 = vld [vmem:[#allocation4 + $0x2] sm:$0xff] }
 0x67a   : > { %19245 = vmatmul.mubr.msk.f32.gmra.mrb[42].mxu1 %vm435_vm3, %v25644_v25 }
 0x67b   : > { %19247 = vmatprep.mubr.msk.f32.mxu1 %vm435_vm3, %v25654_v31  ;;  %20496 = vmatpush3.bf16.msra.mxu1 %v20493_v19  ;;  %v25748_v19 = vld [vmem:[#allocation4 + $0x139] sm:$0xff] }
 0x67c   : > { %20498 = vmatprep.subr.bf16.mxu1 %v20497_v30  ;;  %27673 = vst [vmem:[#allocation6_spill] sm:$0xff] %v25748_v19 }
 0x67e   : > { %19248 = vmatmul.mubr.msk.f32.gmra.mrb[44].mxu1 %vm435_vm3, %v25658_v63 }
 0x67f   : > { %19250 = vmatprep.mubr.msk.f32.mxu1 %vm435_vm3, %v25668_v11  ;;  %20500 = vmatpush3.bf16.msra.mxu1 %v20497_v30  ;;  %v25760_v30 = vld [vmem:[#allocation4 + $0x159] sm:$0xff] }
 0x680   : > { %20502 = vmatprep.subr.bf16.mxu1 %v20501_v50  ;;  %27676 = vst [vmem:[#allocation11_spill] sm:$0xff] %v25760_v30 }
 0x682   : > { %19251 = vmatmul.mubr.msk.f32.gmra.mrb[46].mxu1 %vm435_vm3, %v25672_v32 }
 0x683   : > { %19253 = vmatprep.mubr.msk.f32.mxu1 %vm435_vm3, %v25676_v47  ;;  %20504 = vmatpush3.bf16.msra.mxu1 %v20501_v50  ;;  %v25768_v50 = vld [vmem:[#allocation4 + $0x171] sm:$0xff] }
 0x684   : > { %20506 = vmatprep.subr.bf16.mxu1 %v20505_v18  ;;  %27678 = vst [vmem:[#allocation15_spill] sm:$0xff] %v25768_v50 }
 0x686   : > { %19254 = vmatmul.mubr.msk.f32.gmra.mrb[48].mxu1 %vm435_vm3, %v25680_v49 }
 0x687   : > { %19256 = vmatprep.mubr.msk.f32.mxu1 %vm435_vm3, %v25684_v60 }
 0x68a   : > { %19257 = vmatmul.mubr.msk.f32.gmra.mrb[50].mxu1 %vm435_vm3, %v25688_v48 }
 0x68b   : > { %19259 = vmatprep.mubr.msk.f32.mxu1 %vm435_vm3, %v25692_v41 }
 0x68e   : > { %19260 = vmatmul.mubr.msk.f32.gmra.mrb[52].mxu1 %vm435_vm3, %v25696_v6 }
 0x68f   : > { %19262 = vmatprep.mubr.msk.f32.mxu1 %vm435_vm3, %v25700_v42 }
 0x692   : > { %19263 = vmatmul.mubr.msk.f32.gmra.mrb[54].mxu1 %vm435_vm3, %v25704_v35 }
 0x693   : > { %19265 = vmatprep.mubr.msk.f32.mxu1 %vm435_vm3, %v25708_v40 }
 0x696   : > { %19266 = vmatmul.mubr.msk.f32.gmra.mrb[56].mxu1 %vm435_vm3, %v25712_v56 }
 0x697   : > { %19268 = vmatprep.mubr.msk.f32.mxu1 %vm435_vm3, %v25716_v22 }
 0x69a   : > { %19269 = vmatmul.mubr.msk.f32.gmra.mrb[58].mxu1 %vm435_vm3, %v25720_v17 }
 0x69b   : > { %19271 = vmatprep.mubr.msk.f32.mxu1 %vm435_vm3, %v25724_v9 }
 0x69e   : > { %19272 = vmatmul.mubr.msk.f32.gmra.mrb[60].mxu1 %vm435_vm3, %v25728_v37 }
 0x69f   : > { %19274 = vmatprep.mubr.msk.f32.mxu1 %vm435_vm3, %v25732_v27 }
 0x6a2   : > { %19275 = vmatmul.mubr.msk.f32.gmra.mrb[62].mxu1 %vm435_vm3, %v25736_v54 }
 0x6a3   : > { %19277 = vmatprep.mubr.msk.f32.mxu1 %vm435_vm3, %v25740_v33 }
 0x6a6   : > { %19278 = vmatmul.mubr.msk.f32.gmra.mrb[64].mxu1 %vm435_vm3, %v25744_v38 }
 0x6a7   : > { %19280 = vmatprep.mubr.msk.f32.mxu1 %vm435_vm3, %v25748_v19  ;;  %v25786_v19 = vld [vmem:[#allocation4 + $0x1a] sm:$0xff] }
 0x6a8   : > { %27679 = vst [vmem:[#allocation17_spill] sm:$0xff] %v25786_v19 }
 0x6aa   : > { %19281 = vmatmul.mubr.msk.f32.gmra.mrb[66].mxu1 %vm435_vm3, %v25752_v39  ;;  %v16694_v39 = vld [vmem:[%s27454_s7 + $0xe8] sm:$0xff] }
 0x6ab   : > { %19283 = vmatprep.mubr.msk.f32.mxu1 %vm435_vm3, %v25756_v13  ;;  %v20509_v13 = vpack.c.bf16 %v16692_v21, %v16691_v46  ;;  %v16695_v46 = vld [vmem:[%s27454_s7 + $0xf0] sm:$0xff]  ;;  %v16696_v21 = vld [vmem:[%s27454_s7 + $0xf8] sm:$0xff] }
 0x6ae   : > { %19284 = vmatmul.mubr.msk.f32.gmra.mrb[68].mxu1 %vm435_vm3, %v25760_v30  ;;  %v9281_v30 = vld [vmem:[#allocation4 + $0xa] sm:$0xff] }
 0x6af   : > { %19286 = vmatprep.mubr.msk.f32.mxu1 %vm435_vm3, %v25764_v36  ;;  %v16693_v36 = vld [vmem:[%s27454_s7 + $0xe0] sm:$0xff] }
 0x6b2   : > { %19287 = vmatmul.mubr.msk.f32.gmra.mrb[70].mxu1 %vm435_vm3, %v25768_v50  ;;  %v25790_v50 = vld [vmem:[#allocation4 + $0x22] sm:$0xff] }
 0x6b3   : > { %19305 = vmatprep.mubr.msk.f32.mxu1 %vm435_vm3, %v9280_v0  ;;  %v20513_v0 = vpack.c.bf16 %v16694_v39, %v16693_v36  ;;  %27680 = vst [vmem:[#allocation19_spill] sm:$0xff] %v25790_v50  ;;  %v25804_v39 = vld [vmem:[#allocation4 + $0x3a] sm:$0xff]  ;;  %v16729_v36 = vld [vmem:[%s27454_s7 + $0x100] sm:$0xff] }
 0x6b4   : > { %27681 = vst [vmem:[#allocation21_spill] sm:$0xff] %v25804_v39 }
 0x6b6   : > { %19306 = vmatmul.mubr.msk.f32.vlgmr.msra.gmra.mrb[40].mxu1 %vm435_vm3, %v9281_v30  ;;  %v25800_v30 = vld [vmem:[#allocation4 + $0x32] sm:$0xff] }
 0x6b7   : > { %20508 = vmatpush3.bf16.msra.mxu1 %v20505_v18  ;;  %19308 = vmatprep.mubr.msk.f32.mxu1 %vm435_vm3, %v25786_v19  ;;  %v20517_v18 = vpack.c.bf16 %v16696_v21, %v16695_v46  ;;  %v16730_v19 = vld [vmem:[%s27454_s7 + $0x108] sm:$0xff]  ;;  %v25822_v21 = vld [vmem:[#allocation4 + $0x62] sm:$0xff] }
 0x6b8   : > { %20510 = vmatprep.subr.bf16.mxu1 %v20509_v13  ;;  %v25818_v46 = vld [vmem:[#allocation4 + $0x52] sm:$0xff]  ;;  %27682 = vst [vmem:[#allocation7_spill] sm:$0xff] %v25822_v21 }
 0x6ba   : > { %19309 = vmatmul.mubr.msk.f32.gmra.mrb[42].mxu1 %vm435_vm3, %v25790_v50  ;;  %v25814_v50 = vld [vmem:[#allocation4 + $0x4a] sm:$0xff] }
 0x6bb   : > { %19311 = vmatprep.mubr.msk.f32.mxu1 %vm435_vm3, %v25800_v30  ;;  %20512 = vmatpush3.bf16.msra.mxu1 %v20509_v13  ;;  %v20521_v13 = vpack.c.bf16 %v16730_v19, %v16729_v36  ;;  %v25834_v19 = vld [vmem:[#allocation4 + $0x82] sm:$0xff]  ;;  %v25838_v36 = vld [vmem:[#allocation4 + $0x92] sm:$0xff] }
 0x6bc   : > { %20514 = vmatprep.subr.bf16.mxu1 %v20513_v0  ;;  %27685 = vst [vmem:[#allocation14_spill] sm:$0xff] %v25834_v19  ;;  %27686 = vst [vmem:[#allocation16_spill] sm:$0xff] %v25838_v36 }
 0x6be   : > { %19312 = vmatmul.mubr.msk.f32.gmra.mrb[44].mxu1 %vm435_vm3, %v25804_v39  ;;  %v25826_v39 = vld [vmem:[#allocation4 + $0x6a] sm:$0xff] }
 0x6bf   : > { %19314 = vmatprep.mubr.msk.f32.mxu1 %vm435_vm3, %v25814_v50  ;;  %20516 = vmatpush3.bf16.msra.mxu1 %v20513_v0  ;;  %27683 = vst [vmem:[#allocation12_spill] sm:$0xff] %v25826_v39  ;;  %v25830_v0 = vld [vmem:[#allocation4 + $0x7a] sm:$0xff] }
 0x6c0   : > { %20518 = vmatprep.subr.bf16.mxu1 %v20517_v18  ;;  %27684 = vst [vmem:[#allocation8_spill] sm:$0xff] %v25830_v0 }
 0x6c2   : > { %19315 = vmatmul.mubr.msk.f32.gmra.mrb[46].mxu1 %vm435_vm3, %v25818_v46 }
 0x6c3   : > { %19317 = vmatprep.mubr.msk.f32.mxu1 %vm435_vm3, %v25822_v21  ;;  %20520 = vmatpush3.bf16.msra.mxu1 %v20517_v18  ;;  %v25842_v18 = vld [vmem:[#allocation4 + $0x9a] sm:$0xff] }
 0x6c4   : > { %20522 = vmatprep.subr.bf16.mxu1 %v20521_v13  ;;  %27687 = vst [vmem:[#allocation18_spill] sm:$0xff] %v25842_v18  ;;  %v16734_v21 = vld [vmem:[%s27454_s7 + $0x128] sm:$0xff] }
 0x6c6   : > { %19318 = vmatmul.mubr.msk.f32.gmra.mrb[48].mxu1 %vm435_vm3, %v25826_v39  ;;  %v25846_v39 = vld [vmem:[#allocation4 + $0xaa] sm:$0xff] }
 0x6c7   : > { %19320 = vmatprep.mubr.msk.f32.mxu1 %vm435_vm3, %v25830_v0  ;;  %27688 = vst [vmem:[#allocation20_spill] sm:$0xff] %v25846_v39  ;;  %v25850_v0 = vld [vmem:[#allocation4 + $0xb2] sm:$0xff] }
 0x6c8   : > { %27689 = vst [vmem:[#allocation22_spill] sm:$0xff] %v25850_v0 }
 0x6ca   : > { %19321 = vmatmul.mubr.msk.f32.gmra.mrb[50].mxu1 %vm435_vm3, %v25834_v19  ;;  %v25854_v19 = vld [vmem:[#allocation4 + $0xc2] sm:$0xff] }
 0x6cb   : > { %19323 = vmatprep.mubr.msk.f32.mxu1 %vm435_vm3, %v25838_v36  ;;  %27690 = vst [vmem:[#allocation23_spill] sm:$0xff] %v25854_v19  ;;  %v25858_v36 = vld [vmem:[#allocation4 + $0xca] sm:$0xff] }
 0x6cc   : > { %27691 = vst [vmem:[#allocation24_spill] sm:$0xff] %v25858_v36 }
 0x6ce   : > { %19324 = vmatmul.mubr.msk.f32.gmra.mrb[52].mxu1 %vm435_vm3, %v25842_v18  ;;  %v25862_v18 = vld [vmem:[#allocation4 + $0xda] sm:$0xff] }
 0x6cf   : > { %19326 = vmatprep.mubr.msk.f32.mxu1 %vm435_vm3, %v25846_v39  ;;  %27692 = vst [vmem:[#allocation25_spill] sm:$0xff] %v25862_v18  ;;  %v25866_v39 = vld [vmem:[#allocation4 + $0xe2] sm:$0xff] }
 0x6d0   : > { %27693 = vst [vmem:[#allocation26_spill] sm:$0xff] %v25866_v39 }
 0x6d2   : > { %19327 = vmatmul.mubr.msk.f32.gmra.mrb[54].mxu1 %vm435_vm3, %v25850_v0  ;;  %v25870_v0 = vld [vmem:[#allocation4 + $0xf2] sm:$0xff] }
 0x6d3   : > { %19329 = vmatprep.mubr.msk.f32.mxu1 %vm435_vm3, %v25854_v19  ;;  %27694 = vst [vmem:[#allocation27_spill] sm:$0xff] %v25870_v0  ;;  %v25874_v19 = vld [vmem:[#allocation4 + $0xfa] sm:$0xff] }
 0x6d4   : > { %27695 = vst [vmem:[#allocation28_spill] sm:$0xff] %v25874_v19 }
 0x6d6   : > { %19330 = vmatmul.mubr.msk.f32.gmra.mrb[56].mxu1 %vm435_vm3, %v25858_v36  ;;  %v25878_v36 = vld [vmem:[#allocation4 + $0x10a] sm:$0xff] }
 0x6d7   : > { %19332 = vmatprep.mubr.msk.f32.mxu1 %vm435_vm3, %v25862_v18  ;;  %27696 = vst [vmem:[#allocation29_spill] sm:$0xff] %v25878_v36  ;;  %v25882_v18 = vld [vmem:[#allocation4 + $0x112] sm:$0xff] }
 0x6d8   : > { %27697 = vst [vmem:[#allocation30_spill] sm:$0xff] %v25882_v18 }
 0x6da   : > { %19333 = vmatmul.mubr.msk.f32.gmra.mrb[58].mxu1 %vm435_vm3, %v25866_v39  ;;  %v25886_v39 = vld [vmem:[#allocation4 + $0x122] sm:$0xff] }
 0x6db   : > { %19335 = vmatprep.mubr.msk.f32.mxu1 %vm435_vm3, %v25870_v0  ;;  %27698 = vst [vmem:[#allocation31_spill] sm:$0xff] %v25886_v39  ;;  %v25890_v0 = vld [vmem:[#allocation4 + $0x12a] sm:$0xff] }
 0x6dc   : > { %27699 = vst [vmem:[#allocation32_spill] sm:$0xff] %v25890_v0 }
 0x6de   : > { %19336 = vmatmul.mubr.msk.f32.gmra.mrb[60].mxu1 %vm435_vm3, %v25874_v19  ;;  %v25894_v19 = vld [vmem:[#allocation4 + $0x13a] sm:$0xff] }
 0x6df   : > { %19338 = vmatprep.mubr.msk.f32.mxu1 %vm435_vm3, %v25878_v36  ;;  %27700 = vst [vmem:[#allocation33_spill] sm:$0xff] %v25894_v19  ;;  %v25898_v36 = vld [vmem:[#allocation4 + $0x142] sm:$0xff] }
 0x6e0   : > { %27701 = vst [vmem:[#allocation34_spill] sm:$0xff] %v25898_v36 }
 0x6e2   : > { %19339 = vmatmul.mubr.msk.f32.gmra.mrb[62].mxu1 %vm435_vm3, %v25882_v18  ;;  %v25902_v18 = vld [vmem:[#allocation4 + $0x152] sm:$0xff] }
 0x6e3   : > { %19341 = vmatprep.mubr.msk.f32.mxu1 %vm435_vm3, %v25886_v39  ;;  %27702 = vst [vmem:[#allocation35_spill] sm:$0xff] %v25902_v18  ;;  %v25906_v39 = vld [vmem:[#allocation4 + $0x15a] sm:$0xff] }
 0x6e4   : > { %27703 = vst [vmem:[#allocation36_spill] sm:$0xff] %v25906_v39 }
 0x6e6   : > { %19342 = vmatmul.mubr.msk.f32.gmra.mrb[64].mxu1 %vm435_vm3, %v25890_v0  ;;  %v25910_v0 = vld [vmem:[#allocation4 + $0x16a] sm:$0xff] }
 0x6e7   : > { %19344 = vmatprep.mubr.msk.f32.mxu1 %vm435_vm3, %v25894_v19  ;;  %27704 = vst [vmem:[#allocation37_spill] sm:$0xff] %v25910_v0  ;;  %v25914_v19 = vld [vmem:[#allocation4 + $0x172] sm:$0xff] }
 0x6e8   : > { %27705 = vst [vmem:[#allocation38_spill] sm:$0xff] %v25914_v19 }
 0x6ea   : > { %19345 = vmatmul.mubr.msk.f32.gmra.mrb[66].mxu1 %vm435_vm3, %v25898_v36  ;;  %v16731_v36 = vld [vmem:[%s27454_s7 + $0x110] sm:$0xff] }
 0x6eb   : > { %19347 = vmatprep.mubr.msk.f32.mxu1 %vm435_vm3, %v25902_v18  ;;  %v16732_v18 = vld [vmem:[%s27454_s7 + $0x118] sm:$0xff] }
 0x6ee   : > { %19348 = vmatmul.mubr.msk.f32.gmra.mrb[68].mxu1 %vm435_vm3, %v25906_v39  ;;  %v20525_v39 = vpack.c.bf16 %v16732_v18, %v16731_v36  ;;  %v16736_v36 = vld [vmem:[%s27454_s7 + $0x138] sm:$0xff]  ;;  %v16814_v18 = vld [vmem:[%s27454_s7 + $0x1a8] sm:$0xff] }
 0x6ef   : > { %19350 = vmatprep.mubr.msk.f32.mxu1 %vm435_vm3, %v25910_v0  ;;  %v16733_v0 = vld [vmem:[%s27454_s7 + $0x120] sm:$0xff] }
 0x6f2   : > { %19351 = vmatmul.mubr.msk.f32.gmra.mrb[70].mxu1 %vm435_vm3, %v25914_v19  ;;  %v20529_v19 = vpack.c.bf16 %v16734_v21, %v16733_v0  ;;  %v27712_v21 = vld [vmem:[#allocation17_spill] sm:$0xff] }
 0x6f3   : > { %19369 = vmatprep.mubr.msk.f32.mxu1 %vm435_vm3, %v25312_v53  ;;  %v16735_v53 = vld [vmem:[%s27454_s7 + $0x130] sm:$0xff] }
 0x6f6   : > { %19370 = vmatmul.mubr.msk.f32.vlgmr.msra.gmra.mrb[40].mxu1 %vm435_vm3, %v25364_v59  ;;  %v20533_v59 = vpack.c.bf16 %v16736_v36, %v16735_v53  ;;  %v27713_v53 = vld [vmem:[#allocation19_spill] sm:$0xff] }
 0x6f7   : > { %20524 = vmatpush3.bf16.msra.mxu1 %v20521_v13  ;;  %19372 = vmatprep.mubr.msk.f32.mxu1 %vm435_vm3, %v25381_v3  ;;  %v16769_v3 = vld [vmem:[%s27454_s7 + $0x140] sm:$0xff]  ;;  %v16770_v13 = vld [vmem:[%s27454_s7 + $0x148] sm:$0xff] }
 0x6f8   : > { %20526 = vmatprep.subr.bf16.mxu1 %v20525_v39 }
 0x6fa   : > { %19373 = vmatmul.mubr.msk.f32.gmra.mrb[42].mxu1 %vm435_vm3, %v25421_v45  ;;  %v20537_v45 = vpack.c.bf16 %v16770_v13, %v16769_v3  ;;  %v16816_v3 = vld [vmem:[%s27454_s7 + $0x1b8] sm:$0xff] }
 0x6fb   : > { %19375 = vmatprep.mubr.msk.f32.mxu1 %vm435_vm3, %v25435_v15  ;;  %20528 = vmatpush3.bf16.msra.mxu1 %v20525_v39  ;;  %v26002_v15 = vld [vmem:[#allocation4 + $0x180] sm:$0xff]  ;;  %v16812_v39 = vld [vmem:[%s27454_s7 + $0x198] sm:$0xff] }
 0x6fc   : > { %20530 = vmatprep.subr.bf16.mxu1 %v20529_v19  ;;  %v27714_v13 = vld [vmem:[#allocation21_spill] sm:$0xff] }
 0x6fe   : > { %19376 = vmatmul.mubr.msk.f32.gmra.mrb[44].mxu1 %vm435_vm3, %v25475_v5  ;;  %v26006_v5 = vld [vmem:[#allocation4 + $0x188] sm:$0xff] }
 0x6ff   : > { %19378 = vmatprep.mubr.msk.f32.mxu1 %vm435_vm3, %v25492_v2  ;;  %20532 = vmatpush3.bf16.msra.mxu1 %v20529_v19  ;;  %v16771_v2 = vld [vmem:[%s27454_s7 + $0x150] sm:$0xff]  ;;  %v16813_v19 = vld [vmem:[%s27454_s7 + $0x1a0] sm:$0xff] }
 0x700   : > { %20534 = vmatprep.subr.bf16.mxu1 %v20533_v59  ;;  %v20561_v36 = vpack.c.bf16 %v16814_v18, %v16813_v19  ;;  %v27728_v19 = vld [vmem:[#allocation28_spill] sm:$0xff]  ;;  %v27729_v18 = vld [vmem:[#allocation29_spill] sm:$0xff] }
 0x702   : > { %19379 = vmatmul.mubr.msk.f32.gmra.mrb[46].mxu1 %vm435_vm3, %v25523_v8  ;;  %v16772_v8 = vld [vmem:[%s27454_s7 + $0x158] sm:$0xff] }
 0x703   : > { %19381 = vmatprep.mubr.msk.f32.mxu1 %vm435_vm3, %v25532_v62  ;;  %20536 = vmatpush3.bf16.msra.mxu1 %v20533_v59  ;;  %v20541_v62 = vpack.c.bf16 %v16772_v8, %v16771_v2  ;;  %v16815_v59 = vld [vmem:[%s27454_s7 + $0x1b0] sm:$0xff]  ;;  %v16849_v2 = vld [vmem:[%s27454_s7 + $0x1c0] sm:$0xff]  ;;  %v16850_v8 = vld [vmem:[%s27454_s7 + $0x1c8] sm:$0xff] }
 0x704   : > { %20538 = vmatprep.subr.bf16.mxu1 %v20537_v45 }
 0x706   : > { %19382 = vmatmul.mubr.msk.f32.gmra.mrb[48].mxu1 %vm435_vm3, %v25541_v12  ;;  %v16773_v12 = vld [vmem:[%s27454_s7 + $0x160] sm:$0xff] }
 0x707   : > { %19384 = vmatprep.mubr.msk.f32.mxu1 %vm435_vm3, %v25545_v10  ;;  %v16774_v10 = vld [vmem:[%s27454_s7 + $0x168] sm:$0xff] }
 0x70a   : > { %19385 = vmatmul.mubr.msk.f32.gmra.mrb[50].mxu1 %vm435_vm3, %v25549_v7  ;;  %v20545_v7 = vpack.c.bf16 %v16774_v10, %v16773_v12  ;;  %v20569_v12 = vpack.c.bf16 %v16850_v8, %v16849_v2  ;;  %v27716_v10 = vld [vmem:[#allocation12_spill] sm:$0xff]  ;;  %v27735_v2 = vld [vmem:[#allocation35_spill] sm:$0xff] }
 0x70b   : > { %19387 = vmatprep.mubr.msk.f32.mxu1 %vm435_vm3, %v25553_v24  ;;  %v16775_v24 = vld [vmem:[%s27454_s7 + $0x170] sm:$0xff] }
 0x70c   : > { %v27736_v8 = vld [vmem:[#allocation36_spill] sm:$0xff] }
 0x70e   : > { %19388 = vmatmul.mubr.msk.f32.gmra.mrb[52].mxu1 %vm435_vm3, %v25557_v1  ;;  %v16776_v1 = vld [vmem:[%s27454_s7 + $0x178] sm:$0xff] }
 0x70f   : > { %19390 = vmatprep.mubr.msk.f32.mxu1 %vm435_vm3, %v25561_v28  ;;  %v20549_v28 = vpack.c.bf16 %v16776_v1, %v16775_v24  ;;  %v27718_v24 = vld [vmem:[#allocation14_spill] sm:$0xff]  ;;  %v27719_v1 = vld [vmem:[#allocation16_spill] sm:$0xff] }
 0x712   : > { %19391 = vmatmul.mubr.msk.f32.gmra.mrb[54].mxu1 %vm435_vm3, %v25565_v29  ;;  %v16809_v29 = vld [vmem:[%s27454_s7 + $0x180] sm:$0xff] }
 0x713   : > { %19393 = vmatprep.mubr.msk.f32.mxu1 %vm435_vm3, %v25569_v26  ;;  %v16810_v26 = vld [vmem:[%s27454_s7 + $0x188] sm:$0xff] }
 0x716   : > { %19394 = vmatmul.mubr.msk.f32.gmra.mrb[56].mxu1 %vm435_vm3, %v25573_v16  ;;  %v20553_v16 = vpack.c.bf16 %v16810_v26, %v16809_v29  ;;  %v27721_v29 = vld [vmem:[#allocation20_spill] sm:$0xff]  ;;  %v27722_v26 = vld [vmem:[#allocation22_spill] sm:$0xff] }
 0x717   : > { %19396 = vmatprep.mubr.msk.f32.mxu1 %vm435_vm3, %v25577_v23  ;;  %v27706_v23 = vld [vmem:[#allocation6_spill] sm:$0xff] }
 0x71a   : > { %19397 = vmatmul.mubr.msk.f32.gmra.mrb[58].mxu1 %vm435_vm3, %v25581_v4  ;;  %v27707_v4 = vld [vmem:[#allocation9_spill] sm:$0xff] }
 0x71b   : > { %19399 = vmatprep.mubr.msk.f32.mxu1 %vm435_vm3, %v25585_v55  ;;  %v27708_v55 = vld [vmem:[#allocation10_spill] sm:$0xff] }
 0x71e   : > { %19400 = vmatmul.mubr.msk.f32.gmra.mrb[60].mxu1 %vm435_vm3, %v25589_v58  ;;  %v27709_v58 = vld [vmem:[#allocation11_spill] sm:$0xff] }
 0x71f   : > { %19402 = vmatprep.mubr.msk.f32.mxu1 %vm435_vm3, %v25593_v14  ;;  %v27710_v14 = vld [vmem:[#allocation13_spill] sm:$0xff] }
 0x722   : > { %19403 = vmatmul.mubr.msk.f32.gmra.mrb[62].mxu1 %vm435_vm3, %v25597_v51  ;;  %v27711_v51 = vld [vmem:[#allocation15_spill] sm:$0xff] }
 0x723   : > { %19405 = vmatprep.mubr.msk.f32.mxu1 %vm435_vm3, %v25601_v34  ;;  %v26094_v34 = vld [vmem:[#allocation4 + $0x181] sm:$0xff] }
 0x726   : > { %19406 = vmatmul.mubr.msk.f32.gmra.mrb[64].mxu1 %vm435_vm3, %v25605_v52 }
 0x727   : > { %19408 = vmatprep.mubr.msk.f32.mxu1 %vm435_vm3, %v25609_v20 }
 0x72a   : > { %19409 = vmatmul.mubr.msk.f32.gmra.mrb[66].mxu1 %vm435_vm3, %v25613_v43 }
 0x72b   : > { %19411 = vmatprep.mubr.msk.f32.mxu1 %vm435_vm3, %v25617_v57 }
 0x72e   : > { %19412 = vmatmul.mubr.msk.f32.gmra.mrb[68].mxu1 %vm435_vm3, %v25621_v61 }
 0x72f   : > { %19414 = vmatprep.mubr.msk.f32.mxu1 %vm435_vm3, %v26002_v15 }
 0x732   : > { %19415 = vmatmul.mubr.msk.f32.gmra.mrb[70].mxu1 %vm435_vm3, %v26006_v5 }
 0x733   : > { %19433 = vmatprep.mubr.msk.f32.mxu1 %vm435_vm3, %v25639_v44  ;;  %v26098_v44 = vld [vmem:[#allocation4 + $0x189] sm:$0xff] }
 0x736   : > { %19434 = vmatmul.mubr.msk.f32.vlgmr.msra.gmra.mrb[40].mxu1 %vm435_vm3, %v25644_v25  ;;  %v16811_v25 = vld [vmem:[%s27454_s7 + $0x190] sm:$0xff] }
 0x737   : > { %20540 = vmatpush3.bf16.msra.mxu1 %v20537_v45  ;;  %19436 = vmatprep.mubr.msk.f32.mxu1 %vm435_vm3, %v25654_v31  ;;  %v20557_v0 = vpack.c.bf16 %v16812_v39, %v16811_v25  ;;  %v20565_v45 = vpack.c.bf16 %v16816_v3, %v16815_v59  ;;  %v27724_v25 = vld [vmem:[#allocation24_spill] sm:$0xff]  ;;  %v27725_v39 = vld [vmem:[#allocation25_spill] sm:$0xff] }
 0x738   : > { %20542 = vmatprep.subr.bf16.mxu1 %v20541_v62  ;;  %v27732_v59 = vld [vmem:[#allocation32_spill] sm:$0xff]  ;;  %v27733_v3 = vld [vmem:[#allocation33_spill] sm:$0xff] }
 0x73a   : > { %19437 = vmatmul.mubr.msk.f32.gmra.mrb[42].mxu1 %vm435_vm3, %v25658_v63 }
 0x73b   : > { %19439 = vmatprep.mubr.msk.f32.mxu1 %vm435_vm3, %v25668_v11  ;;  %20544 = vmatpush3.bf16.msra.mxu1 %v20541_v62  ;;  %v27715_v62 = vld [vmem:[#allocation7_spill] sm:$0xff] }
 0x73c   : > { %20546 = vmatprep.subr.bf16.mxu1 %v20545_v7 }
 0x73e   : > { %19440 = vmatmul.mubr.msk.f32.gmra.mrb[44].mxu1 %vm435_vm3, %v25672_v32 }
 0x73f   : > { %19442 = vmatprep.mubr.msk.f32.mxu1 %vm435_vm3, %v25676_v47  ;;  %20548 = vmatpush3.bf16.msra.mxu1 %v20545_v7  ;;  %v27717_v7 = vld [vmem:[#allocation8_spill] sm:$0xff] }
 0x740   : > { %20550 = vmatprep.subr.bf16.mxu1 %v20549_v28 }
 0x742   : > { %19443 = vmatmul.mubr.msk.f32.gmra.mrb[46].mxu1 %vm435_vm3, %v25680_v49 }
 0x743   : > { %19445 = vmatprep.mubr.msk.f32.mxu1 %vm435_vm3, %v25684_v60  ;;  %20552 = vmatpush3.bf16.msra.mxu1 %v20549_v28  ;;  %v27720_v28 = vld [vmem:[#allocation18_spill] sm:$0xff] }
 0x744   : > { %20554 = vmatprep.subr.bf16.mxu1 %v20553_v16 }
 0x746   : > { %19446 = vmatmul.mubr.msk.f32.gmra.mrb[48].mxu1 %vm435_vm3, %v25688_v48 }
 0x747   : > { %19448 = vmatprep.mubr.msk.f32.mxu1 %vm435_vm3, %v25692_v41 }
 0x74a   : > { %19449 = vmatmul.mubr.msk.f32.gmra.mrb[50].mxu1 %vm435_vm3, %v25696_v6 }
 0x74b   : > { %19451 = vmatprep.mubr.msk.f32.mxu1 %vm435_vm3, %v25700_v42 }
 0x74e   : > { %19452 = vmatmul.mubr.msk.f32.gmra.mrb[52].mxu1 %vm435_vm3, %v25704_v35 }
 0x74f   : > { %19454 = vmatprep.mubr.msk.f32.mxu1 %vm435_vm3, %v25708_v40 }
 0x752   : > { %19455 = vmatmul.mubr.msk.f32.gmra.mrb[54].mxu1 %vm435_vm3, %v25712_v56 }
 0x753   : > { %19457 = vmatprep.mubr.msk.f32.mxu1 %vm435_vm3, %v25716_v22 }
 0x756   : > { %19458 = vmatmul.mubr.msk.f32.gmra.mrb[56].mxu1 %vm435_vm3, %v25720_v17 }
 0x757   : > { %19460 = vmatprep.mubr.msk.f32.mxu1 %vm435_vm3, %v25724_v9 }
 0x75a   : > { %19461 = vmatmul.mubr.msk.f32.gmra.mrb[58].mxu1 %vm435_vm3, %v25728_v37 }
 0x75b   : > { %19463 = vmatprep.mubr.msk.f32.mxu1 %vm435_vm3, %v25732_v27 }
 0x75e   : > { %19464 = vmatmul.mubr.msk.f32.gmra.mrb[60].mxu1 %vm435_vm3, %v25736_v54 }
 0x75f   : > { %19466 = vmatprep.mubr.msk.f32.mxu1 %vm435_vm3, %v25740_v33 }
 0x762   : > { %19467 = vmatmul.mubr.msk.f32.gmra.mrb[62].mxu1 %vm435_vm3, %v25744_v38 }
 0x763   : > { %19469 = vmatprep.mubr.msk.f32.mxu1 %vm435_vm3, %v27706_v23 }
 0x766   : > { %19470 = vmatmul.mubr.msk.f32.gmra.mrb[64].mxu1 %vm435_vm3, %v27707_v4 }
 0x767   : > { %19472 = vmatprep.mubr.msk.f32.mxu1 %vm435_vm3, %v27708_v55 }
 0x76a   : > { %19473 = vmatmul.mubr.msk.f32.gmra.mrb[66].mxu1 %vm435_vm3, %v27709_v58 }
 0x76b   : > { %19475 = vmatprep.mubr.msk.f32.mxu1 %vm435_vm3, %v27710_v14 }
 0x76e   : > { %19476 = vmatmul.mubr.msk.f32.gmra.mrb[68].mxu1 %vm435_vm3, %v27711_v51 }
 0x76f   : > { %19478 = vmatprep.mubr.msk.f32.mxu1 %vm435_vm3, %v26094_v34 }
 0x772   : > { %19479 = vmatmul.mubr.msk.f32.gmra.mrb[70].mxu1 %vm435_vm3, %v26098_v44 }
 0x773   : > { %19497 = vmatprep.mubr.msk.f32.mxu1 %vm435_vm3, %v27712_v21  ;;  %v27726_v21 = vld [vmem:[#allocation26_spill] sm:$0xff] }
 0x776   : > { %19498 = vmatmul.mubr.msk.f32.vlgmr.msra.gmra.mrb[40].mxu1 %vm435_vm3, %v27713_v53  ;;  %v27730_v53 = vld [vmem:[#allocation30_spill] sm:$0xff] }
 0x777   : > { %20556 = vmatpush3.bf16.msra.mxu1 %v20553_v16  ;;  %19500 = vmatprep.mubr.msk.f32.mxu1 %vm435_vm3, %v25800_v30  ;;  %v27723_v16 = vld [vmem:[#allocation23_spill] sm:$0xff] }
 0x778   : > { %20558 = vmatprep.subr.bf16.mxu1 %v20557_v0 }
 0x77a   : > { %19501 = vmatmul.mubr.msk.f32.gmra.mrb[42].mxu1 %vm435_vm3, %v27714_v13 }
 0x77b   : > { %19503 = vmatprep.mubr.msk.f32.mxu1 %vm435_vm3, %v25814_v50  ;;  %20560 = vmatpush3.bf16.msra.mxu1 %v20557_v0  ;;  %v27727_v0 = vld [vmem:[#allocation27_spill] sm:$0xff] }
 0x77c   : > { %20562 = vmatprep.subr.bf16.mxu1 %v20561_v36 }
 0x77e   : > { %19504 = vmatmul.mubr.msk.f32.gmra.mrb[44].mxu1 %vm435_vm3, %v25818_v46 }
 0x77f   : > { %19506 = vmatprep.mubr.msk.f32.mxu1 %vm435_vm3, %v27715_v62  ;;  %20564 = vmatpush3.bf16.msra.mxu1 %v20561_v36  ;;  %v27731_v36 = vld [vmem:[#allocation31_spill] sm:$0xff] }
 0x780   : > { %20566 = vmatprep.subr.bf16.mxu1 %v20565_v45 }
 0x782   : > { %19507 = vmatmul.mubr.msk.f32.gmra.mrb[46].mxu1 %vm435_vm3, %v27716_v10 }
 0x783   : > { %19509 = vmatprep.mubr.msk.f32.mxu1 %vm435_vm3, %v27717_v7  ;;  %20568 = vmatpush3.bf16.msra.mxu1 %v20565_v45  ;;  %v27734_v45 = vld [vmem:[#allocation34_spill] sm:$0xff] }
 0x784   : > { %20570 = vmatprep.subr.bf16.mxu1 %v20569_v12 }
 0x786   : > { %19510 = vmatmul.mubr.msk.f32.gmra.mrb[48].mxu1 %vm435_vm3, %v27718_v24 }
 0x787   : > { %19512 = vmatprep.mubr.msk.f32.mxu1 %vm435_vm3, %v27719_v1 }
 0x78a   : > { %19513 = vmatmul.mubr.msk.f32.gmra.mrb[50].mxu1 %vm435_vm3, %v27720_v28 }
 0x78b   : > { %19515 = vmatprep.mubr.msk.f32.mxu1 %vm435_vm3, %v27721_v29 }
 0x78e   : > { %19516 = vmatmul.mubr.msk.f32.gmra.mrb[52].mxu1 %vm435_vm3, %v27722_v26 }
 0x78f   : > { %19518 = vmatprep.mubr.msk.f32.mxu1 %vm435_vm3, %v27723_v16 }
 0x792   : > { %19519 = vmatmul.mubr.msk.f32.gmra.mrb[54].mxu1 %vm435_vm3, %v27724_v25 }
 0x793   : > { %19521 = vmatprep.mubr.msk.f32.mxu1 %vm435_vm3, %v27725_v39 }
 0x796   : > { %19522 = vmatmul.mubr.msk.f32.gmra.mrb[56].mxu1 %vm435_vm3, %v27726_v21 }
 0x797   : > { %19524 = vmatprep.mubr.msk.f32.mxu1 %vm435_vm3, %v27727_v0  ;;  %v10860_v0 = vld [vmem:[#allocation4 + $0x50] sm:$0xff] }
 0x79a   : > { %19525 = vmatmul.mubr.msk.f32.gmra.mrb[58].mxu1 %vm435_vm3, %v27728_v19  ;;  %v10859_v19 = vld [vmem:[#allocation4 + $0x48] sm:$0xff] }
 0x79b   : > { %19527 = vmatprep.mubr.msk.f32.mxu1 %vm435_vm3, %v27729_v18  ;;  %v27737_v18 = vld [vmem:[#allocation37_spill] sm:$0xff] }
 0x79e   : > { %19528 = vmatmul.mubr.msk.f32.gmra.mrb[60].mxu1 %vm435_vm3, %v27730_v53  ;;  %v27738_v53 = vld [vmem:[#allocation38_spill] sm:$0xff] }
 0x79f   : > { %19530 = vmatprep.mubr.msk.f32.mxu1 %vm435_vm3, %v27731_v36  ;;  %v26186_v36 = vld [vmem:[#allocation4 + $0x182] sm:$0xff] }
 0x7a0   : > { %27739 = vst [vmem:[#allocation6_spill] sm:$0xff] %v26186_v36 }
 0x7a2   : > { %19531 = vmatmul.mubr.msk.f32.gmra.mrb[62].mxu1 %vm435_vm3, %v27732_v59  ;;  %v16854_v59 = vld [vmem:[%s27454_s7 + $0x1e8] sm:$0xff] }
 0x7a3   : > { %19533 = vmatprep.mubr.msk.f32.mxu1 %vm435_vm3, %v27733_v3  ;;  %v26190_v3 = vld [vmem:[#allocation4 + $0x18a] sm:$0xff] }
 0x7a4   : > { %27740 = vst [vmem:[#allocation9_spill] sm:$0xff] %v26190_v3 }
 0x7a6   : > { %19534 = vmatmul.mubr.msk.f32.gmra.mrb[64].mxu1 %vm435_vm3, %v27734_v45  ;;  %v10858_v45 = vld [vmem:[#allocation4 + $0x38] sm:$0xff] }
 0x7a7   : > { %19536 = vmatprep.mubr.msk.f32.mxu1 %vm435_vm3, %v27735_v2  ;;  %v16851_v2 = vld [vmem:[%s27454_s7 + $0x1d0] sm:$0xff] }
 0x7aa   : > { %19537 = vmatmul.mubr.msk.f32.gmra.mrb[66].mxu1 %vm435_vm3, %v27736_v8  ;;  %v16852_v8 = vld [vmem:[%s27454_s7 + $0x1d8] sm:$0xff] }
 0x7ab   : > { %19539 = vmatprep.mubr.msk.f32.mxu1 %vm435_vm3, %v27737_v18  ;;  %v10857_v18 = vld [vmem:[#allocation4 + $0x30] sm:$0xff] }
 0x7ae   : > { %19540 = vmatmul.mubr.msk.f32.gmra.mrb[68].mxu1 %vm435_vm3, %v27738_v53  ;;  %v20573_v53 = vpack.c.bf16 %v16852_v8, %v16851_v2  ;;  %v16856_v2 = vld [vmem:[%s27454_s7 + $0x1f8] sm:$0xff]  ;;  %v10861_v8 = vld [vmem:[#allocation4 + $0x60] sm:$0xff] }
 0x7af   : > { %19542 = vmatprep.mubr.msk.f32.mxu1 %vm435_vm3, %v26186_v36  ;;  %v16853_v36 = vld [vmem:[%s27454_s7 + $0x1e0] sm:$0xff] }
 0x7b2   : > { %19543 = vmatmul.mubr.msk.f32.gmra.mrb[70].mxu1 %vm435_vm3, %v26190_v3  ;;  %v20577_v3 = vpack.c.bf16 %v16854_v59, %v16853_v36  ;;  %v16889_v36 = vld [vmem:[%s27454_s7 + $0x200] sm:$0xff]  ;;  %v16890_v59 = vld [vmem:[%s27454_s7 + $0x208] sm:$0xff] }
 0x7b3   : > { %19561 = vmatprep.mubr.msk.f32.mxu1 %vm435_vm3, %v10857_v18  ;;  %v16855_v18 = vld [vmem:[%s27454_s7 + $0x1f0] sm:$0xff] }
 0x7b6   : > { %19562 = vmatmul.mubr.msk.f32.vlgmr.msra.gmra.mrb[40].mxu1 %vm435_vm3, %v10858_v45  ;;  %v10863_v45 = vld [vmem:[#allocation4 + $0x78] sm:$0xff] }
 0x7b7   : > { %20572 = vmatpush3.bf16.msra.mxu1 %v20569_v12  ;;  %19564 = vmatprep.mubr.msk.f32.mxu1 %vm435_vm3, %v10859_v19  ;;  %v20581_v12 = vpack.c.bf16 %v16856_v2, %v16855_v18  ;;  %v10862_v19 = vld [vmem:[#allocation4 + $0x68] sm:$0xff]  ;;  %v10865_v18 = vld [vmem:[#allocation4 + $0x90] sm:$0xff]  ;;  %v10866_v2 = vld [vmem:[#allocation4 + $0x98] sm:$0xff] }
 0x7b8   : > { %20574 = vmatprep.subr.bf16.mxu1 %v20573_v53 }
 0x7ba   : > { %19565 = vmatmul.mubr.msk.f32.gmra.mrb[42].mxu1 %vm435_vm3, %v10860_v0  ;;  %v20585_v0 = vpack.c.bf16 %v16890_v59, %v16889_v36  ;;  %v10870_v36 = vld [vmem:[#allocation4 + $0xc8] sm:$0xff]  ;;  %v10871_v59 = vld [vmem:[#allocation4 + $0xd8] sm:$0xff] }
 0x7bb   : > { %19567 = vmatprep.mubr.msk.f32.mxu1 %vm435_vm3, %v10861_v8  ;;  %20576 = vmatpush3.bf16.msra.mxu1 %v20573_v53  ;;  %v10864_v53 = vld [vmem:[#allocation4 + $0x80] sm:$0xff]  ;;  %v10867_v8 = vld [vmem:[#allocation4 + $0xa8] sm:$0xff] }
 0x7bc   : > { %20578 = vmatprep.subr.bf16.mxu1 %v20577_v3 }
 0x7be   : > { %19568 = vmatmul.mubr.msk.f32.gmra.mrb[44].mxu1 %vm435_vm3, %v10862_v19  ;;  %v10868_v19 = vld [vmem:[#allocation4 + $0xb0] sm:$0xff] }
 0x7bf   : > { %19570 = vmatprep.mubr.msk.f32.mxu1 %vm435_vm3, %v10863_v45  ;;  %20580 = vmatpush3.bf16.msra.mxu1 %v20577_v3  ;;  %v10869_v3 = vld [vmem:[#allocation4 + $0xc0] sm:$0xff]  ;;  %v10873_v45 = vld [vmem:[#allocation4 + $0xf0] sm:$0xff] }
 0x7c0   : > { %20582 = vmatprep.subr.bf16.mxu1 %v20581_v12 }
 0x7c2   : > { %19571 = vmatmul.mubr.msk.f32.gmra.mrb[46].mxu1 %vm435_vm3, %v10864_v53  ;;  %v10874_v53 = vld [vmem:[#allocation4 + $0xf8] sm:$0xff] }
 0x7c3   : > { %19573 = vmatprep.mubr.msk.f32.mxu1 %vm435_vm3, %v10865_v18  ;;  %20584 = vmatpush3.bf16.msra.mxu1 %v20581_v12  ;;  %v10872_v12 = vld [vmem:[#allocation4 + $0xe0] sm:$0xff]  ;;  %v10875_v18 = vld [vmem:[#allocation4 + $0x108] sm:$0xff] }
 0x7c4   : > { %20586 = vmatprep.subr.bf16.mxu1 %v20585_v0 }
 0x7c6   : > { %19574 = vmatmul.mubr.msk.f32.gmra.mrb[48].mxu1 %vm435_vm3, %v10866_v2  ;;  %v10876_v2 = vld [vmem:[#allocation4 + $0x110] sm:$0xff] }
 0x7c7   : > { %19576 = vmatprep.mubr.msk.f32.mxu1 %vm435_vm3, %v10867_v8  ;;  %v10877_v8 = vld [vmem:[#allocation4 + $0x120] sm:$0xff] }
 0x7ca   : > { %19577 = vmatmul.mubr.msk.f32.gmra.mrb[50].mxu1 %vm435_vm3, %v10868_v19  ;;  %v10878_v19 = vld [vmem:[#allocation4 + $0x128] sm:$0xff] }
 0x7cb   : > { %19579 = vmatprep.mubr.msk.f32.mxu1 %vm435_vm3, %v10869_v3  ;;  %v10879_v3 = vld [vmem:[#allocation4 + $0x138] sm:$0xff] }
 0x7ce   : > { %19580 = vmatmul.mubr.msk.f32.gmra.mrb[52].mxu1 %vm435_vm3, %v10870_v36  ;;  %v10887_v36 = vld [vmem:[#allocation4 + $0x198] sm:$0xff] }
 0x7cf   : > { %19582 = vmatprep.mubr.msk.f32.mxu1 %vm435_vm3, %v10871_v59  ;;  %v12146_v59 = vld [vmem:[%s27456_s9 + $0x18] sm:$0xff] }
 0x7d2   : > { %19583 = vmatmul.mubr.msk.f32.gmra.mrb[54].mxu1 %vm435_vm3, %v10872_v12 }
 0x7d3   : > { %19585 = vmatprep.mubr.msk.f32.mxu1 %vm435_vm3, %v10873_v45 }
 0x7d6   : > { %19586 = vmatmul.mubr.msk.f32.gmra.mrb[56].mxu1 %vm435_vm3, %v10874_v53  ;;  %v16893_v53 = vld [vmem:[%s27454_s7 + $0x220] sm:$0xff] }
 0x7d7   : > { %19588 = vmatprep.mubr.msk.f32.mxu1 %vm435_vm3, %v10875_v18  ;;  %v16894_v18 = vld [vmem:[%s27454_s7 + $0x228] sm:$0xff] }
 0x7da   : > { %19589 = vmatmul.mubr.msk.f32.gmra.mrb[58].mxu1 %vm435_vm3, %v10876_v2  ;;  %v16895_v2 = vld [vmem:[%s27454_s7 + $0x230] sm:$0xff] }
 0x7db   : > { %19591 = vmatprep.mubr.msk.f32.mxu1 %vm435_vm3, %v10877_v8  ;;  %v16896_v8 = vld [vmem:[%s27454_s7 + $0x238] sm:$0xff] }
 0x7de   : > { %19592 = vmatmul.mubr.msk.f32.gmra.mrb[60].mxu1 %vm435_vm3, %v10878_v19 }
 0x7df   : > { %19594 = vmatprep.mubr.msk.f32.mxu1 %vm435_vm3, %v10879_v3 }
 0x7e2   : > { %19595 = vmatmul.mubr.msk.f32.gmra.mrb[62].mxu1 %vm435_vm3, %v25605_v52  ;;  %v10888_v52 = vld [vmem:[#allocation4 + $0x1a0] sm:$0xff] }
 0x7e3   : > { %19597 = vmatprep.mubr.msk.f32.mxu1 %vm435_vm3, %v25609_v20  ;;  %v16891_v20 = vld [vmem:[%s27454_s7 + $0x210] sm:$0xff] }
 0x7e6   : > { %19598 = vmatmul.mubr.msk.f32.gmra.mrb[64].mxu1 %vm435_vm3, %v25613_v43  ;;  %v16892_v43 = vld [vmem:[%s27454_s7 + $0x218] sm:$0xff] }
 0x7e7   : > { %19600 = vmatprep.mubr.msk.f32.mxu1 %vm435_vm3, %v25617_v57  ;;  %v12143_v57 = vld [vmem:[%s27456_s9] sm:$0xff]  ;;  %v20589_v12 = vpack.c.bf16 %v16892_v43, %v16891_v20 }
 0x7ea   : > { %19601 = vmatmul.mubr.msk.f32.gmra.mrb[66].mxu1 %vm435_vm3, %v25621_v61  ;;  %v12144_v61 = vld [vmem:[%s27456_s9 + $0x8] sm:$0xff] }
 0x7eb   : > { %19603 = vmatprep.mubr.msk.f32.mxu1 %vm435_vm3, %v26002_v15  ;;  %v12145_v15 = vld [vmem:[%s27456_s9 + $0x10] sm:$0xff] }
 0x7ec   : > { %v20605_v45 = vpack.c.bf16 %v12146_v59, %v12145_v15 }
 0x7ee   : > { %19604 = vmatmul.mubr.msk.f32.gmra.mrb[68].mxu1 %vm435_vm3, %v26006_v5  ;;  %v20601_v5 = vpack.c.bf16 %v12144_v61, %v12143_v57 }
 0x7ef   : > { %19606 = vmatprep.mubr.msk.f32.mxu1 %vm435_vm3, %v10887_v36 }
 0x7f0   : > { %20602 = vmatprep.subr.bf16.mxu0 %v20601_v5 }
 0x7f1   : > { %20604 = vmatpush3.bf16.msra.mxu0 %v20601_v5 }
 0x7f2   : > { %19607 = vmatmul.mubr.msk.f32.gmra.mrb[70].mxu1 %vm435_vm3, %v10888_v52  ;;  %20606 = vmatprep.subr.bf16.mxu0 %v20605_v45 }
 0x7f3   : > { %19625 = vmatprep.mubr.msk.f32.mxu1 %vm435_vm3, %v25654_v31  ;;  %v20593_v31 = vpack.c.bf16 %v16894_v18, %v16893_v53 }
 0x7f5   : > { %20608 = vmatpush3.bf16.msra.mxu0 %v20605_v45 }
 0x7f6   : > { %19626 = vmatmul.mubr.msk.f32.vlgmr.msra.gmra.mrb[40].mxu1 %vm435_vm3, %v25658_v63  ;;  %v20597_v63 = vpack.c.bf16 %v16896_v8, %v16895_v2 }
 0x7f7   : > { %20588 = vmatpush3.bf16.msra.mxu1 %v20585_v0  ;;  %19628 = vmatprep.mubr.msk.f32.mxu1 %vm435_vm3, %v25668_v11  ;;  %v11281_v11 = vld [vmem:[#allocation4 + $0x199] sm:$0xff] }
 0x7f8   : > { %20590 = vmatprep.subr.bf16.mxu1 %v20589_v12 }
 0x7fa   : > { %19629 = vmatmul.mubr.msk.f32.gmra.mrb[42].mxu1 %vm435_vm3, %v25672_v32  ;;  %v11282_v32 = vld [vmem:[#allocation4 + $0x1a1] sm:$0xff] }
 0x7fb   : > { %19631 = vmatprep.mubr.msk.f32.mxu1 %vm435_vm3, %v25676_v47  ;;  %20592 = vmatpush3.bf16.msra.mxu1 %v20589_v12  ;;  %v27741_v47 = vld [vmem:[#allocation27_spill] sm:$0xff] }
 0x7fc   : > { %20594 = vmatprep.subr.bf16.mxu1 %v20593_v31 }
 0x7fe   : > { %19632 = vmatmul.mubr.msk.f32.gmra.mrb[44].mxu1 %vm435_vm3, %v25680_v49  ;;  %v27742_v49 = vld [vmem:[#allocation28_spill] sm:$0xff] }
 0x7ff   : > { %19634 = vmatprep.mubr.msk.f32.mxu1 %vm435_vm3, %v25684_v60  ;;  %20596 = vmatpush3.bf16.msra.mxu1 %v20593_v31  ;;  %v27743_v60 = vld [vmem:[#allocation29_spill] sm:$0xff] }
 0x800   : > { %20598 = vmatprep.subr.bf16.mxu1 %v20597_v63 }
 0x802   : > { %19635 = vmatmul.mubr.msk.f32.gmra.mrb[46].mxu1 %vm435_vm3, %v25688_v48  ;;  %v27744_v48 = vld [vmem:[#allocation30_spill] sm:$0xff] }
 0x803   : > { %19637 = vmatprep.mubr.msk.f32.mxu1 %vm435_vm3, %v25692_v41  ;;  %20600 = vmatpush3.bf16.msra.mxu1 %v20597_v63  ;;  %v27745_v41 = vld [vmem:[#allocation31_spill] sm:$0xff] }
 0x806   : > { %19638 = vmatmul.mubr.msk.f32.gmra.mrb[48].mxu1 %vm435_vm3, %v25696_v6  ;;  %v27746_v6 = vld [vmem:[#allocation32_spill] sm:$0xff] }
 0x807   : > { %19640 = vmatprep.mubr.msk.f32.mxu1 %vm435_vm3, %v25700_v42  ;;  %v27747_v42 = vld [vmem:[#allocation33_spill] sm:$0xff] }
 0x80a   : > { %19641 = vmatmul.mubr.msk.f32.gmra.mrb[50].mxu1 %vm435_vm3, %v25704_v35  ;;  %v27748_v35 = vld [vmem:[#allocation34_spill] sm:$0xff] }
 0x80b   : > { %19643 = vmatprep.mubr.msk.f32.mxu1 %vm435_vm3, %v25708_v40  ;;  %v27749_v40 = vld [vmem:[#allocation35_spill] sm:$0xff] }
 0x80e   : > { %19644 = vmatmul.mubr.msk.f32.gmra.mrb[52].mxu1 %vm435_vm3, %v25712_v56  ;;  %v27750_v56 = vld [vmem:[#allocation36_spill] sm:$0xff] }
 0x80f   : > { %19646 = vmatprep.mubr.msk.f32.mxu1 %vm435_vm3, %v25716_v22  ;;  %v27751_v22 = vld [vmem:[#allocation37_spill] sm:$0xff] }
 0x812   : > { %19647 = vmatmul.mubr.msk.f32.gmra.mrb[54].mxu1 %vm435_vm3, %v25720_v17  ;;  %v27752_v17 = vld [vmem:[#allocation38_spill] sm:$0xff] }
 0x813   : > { %19649 = vmatprep.mubr.msk.f32.mxu1 %vm435_vm3, %v25724_v9  ;;  %v27753_v9 = vld [vmem:[#allocation6_spill] sm:$0xff] }
 0x816   : > { %19650 = vmatmul.mubr.msk.f32.gmra.mrb[56].mxu1 %vm435_vm3, %v25728_v37  ;;  %v11675_v37 = vld [vmem:[#allocation4 + $0x19a] sm:$0xff] }
 0x817   : > { %19652 = vmatprep.mubr.msk.f32.mxu1 %vm435_vm3, %v25732_v27  ;;  %v27754_v27 = vld [vmem:[#allocation9_spill] sm:$0xff] }
 0x81a   : > { %19653 = vmatmul.mubr.msk.f32.gmra.mrb[58].mxu1 %vm435_vm3, %v25736_v54  ;;  %v11676_v54 = vld [vmem:[#allocation4 + $0x1a2] sm:$0xff] }
 0x81b   : > { %19655 = vmatprep.mubr.msk.f32.mxu1 %vm435_vm3, %v25740_v33  ;;  %v12111_v33 = vld [vmem:[#allocation2] sm:$0xff] }
 0x81c   : > { %19745 = vmatprep.mubr.msk.f32.mxu0 %vm389_vm0, %v12111_v33 }
 0x81e   : > { %19656 = vmatmul.mubr.msk.f32.gmra.mrb[60].mxu1 %vm435_vm3, %v25744_v38  ;;  %v16962_v38 = vld [vmem:[%s27456_s9 + $0x20] sm:$0xff] }
 0x81f   : > { %19658 = vmatprep.mubr.msk.f32.mxu1 %vm435_vm3, %v27706_v23  ;;  %v16964_v23 = vld [vmem:[%s27456_s9 + $0x30] sm:$0xff] }
 0x822   : > { %19659 = vmatmul.mubr.msk.f32.gmra.mrb[62].mxu1 %vm435_vm3, %v27707_v4  ;;  %v16965_v4 = vld [vmem:[%s27456_s9 + $0x38] sm:$0xff] }
 0x823   : > { %19661 = vmatprep.mubr.msk.f32.mxu1 %vm435_vm3, %v27708_v55  ;;  %v20613_v55 = vpack.c.bf16 %v16965_v4, %v16964_v23 }
 0x826   : > { %19662 = vmatmul.mubr.msk.f32.gmra.mrb[64].mxu1 %vm435_vm3, %v27709_v58  ;;  %v16998_v58 = vld [vmem:[%s27456_s9 + $0x40] sm:$0xff] }
 0x827   : > { %19664 = vmatprep.mubr.msk.f32.mxu1 %vm435_vm3, %v27710_v14  ;;  %v16999_v14 = vld [vmem:[%s27456_s9 + $0x48] sm:$0xff] }
 0x82a   : > { %19665 = vmatmul.mubr.msk.f32.gmra.mrb[66].mxu1 %vm435_vm3, %v27711_v51  ;;  %v26431_v51 = vpack.c.bf16 %v16999_v14, %v16998_v58 }
 0x82b   : > { %19667 = vmatprep.mubr.msk.f32.mxu1 %vm435_vm3, %v26094_v34  ;;  %v26437_v34 = vld [vmem:[%s27455_s8] ss:$0 sm:$0xff] }
 0x82e   : > { %19668 = vmatmul.mubr.msk.f32.gmra.mrb[68].mxu1 %vm435_vm3, %v26098_v44 }
 0x82f   : > { %19670 = vmatprep.mubr.msk.f32.mxu1 %vm435_vm3, %v11281_v11 }
 0x832   : > { %19671 = vmatmul.mubr.msk.f32.gmra.mrb[70].mxu1 %vm435_vm3, %v11282_v32 }
 0x833   : > { %19689 = vmatprep.mubr.msk.f32.mxu1 %vm435_vm3, %v25800_v30 }
 0x836   : > { %19690 = vmatmul.mubr.msk.f32.vlgmr.msra.gmra.mrb[40].mxu1 %vm435_vm3, %v27714_v13 }
 0x837   : > { %19692 = vmatprep.mubr.msk.f32.mxu1 %vm435_vm3, %v25814_v50  ;;  %v16963_v50 = vld [vmem:[%s27456_s9 + $0x28] sm:$0xff] }
 0x838   : > { %v20609_v30 = vpack.c.bf16 %v16963_v50, %v16962_v38 }
 0x83a   : > { %19693 = vmatmul.mubr.msk.f32.gmra.mrb[42].mxu1 %vm435_vm3, %v25818_v46  ;;  %v12112_v46 = vld [vmem:[#allocation2 + $0x8] sm:$0xff]  ;;  %20610 = vmatprep.subr.bf16.mxu0 %v20609_v30 }
 0x83b   : > { %19695 = vmatprep.mubr.msk.f32.mxu1 %vm435_vm3, %v27715_v62  ;;  %19746 = vmatmul.mubr.msk.f32.vlgmr.msra.gmra.mrb[32].mxu0 %vm389_vm0, %v12112_v46 }
 0x83c   : > { %20612 = vmatpush3.bf16.msra.mxu0 %v20609_v30 }
 0x83d   : > { %20614 = vmatprep.subr.bf16.mxu0 %v20613_v55 }
 0x83e   : > { %19696 = vmatmul.mubr.msk.f32.gmra.mrb[44].mxu1 %vm435_vm3, %v27716_v10 }
 0x83f   : > { %19698 = vmatprep.mubr.msk.f32.mxu1 %vm435_vm3, %v27717_v7 }
 0x840   : > { %20616 = vmatpush3.bf16.msra.mxu0 %v20613_v55 }
 0x841   : > { %20618 = vmatprep.subr.bf16.mxu0 %v26431_v51 }
 0x842   : > { %19699 = vmatmul.mubr.msk.f32.gmra.mrb[46].mxu1 %vm435_vm3, %v27718_v24 }
 0x843   : > { %19701 = vmatprep.mubr.msk.f32.mxu1 %vm435_vm3, %v27719_v1 }
 0x846   : > { %19702 = vmatmul.mubr.msk.f32.gmra.mrb[48].mxu1 %vm435_vm3, %v27720_v28 }
 0x847   : > { %19704 = vmatprep.mubr.msk.f32.mxu1 %vm435_vm3, %v27721_v29 }
 0x84a   : > { %19705 = vmatmul.mubr.msk.f32.gmra.mrb[50].mxu1 %vm435_vm3, %v27722_v26 }
 0x84b   : > { %19707 = vmatprep.mubr.msk.f32.mxu1 %vm435_vm3, %v27723_v16 }
 0x84e   : > { %19708 = vmatmul.mubr.msk.f32.gmra.mrb[52].mxu1 %vm435_vm3, %v27724_v25 }
 0x84f   : > { %19710 = vmatprep.mubr.msk.f32.mxu1 %vm435_vm3, %v27725_v39 }
 0x852   : > { %19711 = vmatmul.mubr.msk.f32.gmra.mrb[54].mxu1 %vm435_vm3, %v27726_v21 }
 0x853   : > { %19713 = vmatprep.mubr.msk.f32.mxu1 %vm435_vm3, %v27741_v47 }
 0x856   : > { %19714 = vmatmul.mubr.msk.f32.gmra.mrb[56].mxu1 %vm435_vm3, %v27742_v49 }
 0x857   : > { %19716 = vmatprep.mubr.msk.f32.mxu1 %vm435_vm3, %v27743_v60 }
 0x85a   : > { %19717 = vmatmul.mubr.msk.f32.gmra.mrb[58].mxu1 %vm435_vm3, %v27744_v48 }
 0x85b   : > { %19719 = vmatprep.mubr.msk.f32.mxu1 %vm435_vm3, %v27745_v41 }
 0x85e   : > { %19720 = vmatmul.mubr.msk.f32.gmra.mrb[60].mxu1 %vm435_vm3, %v27746_v6 }
 0x85f   : > { %19722 = vmatprep.mubr.msk.f32.mxu1 %vm435_vm3, %v27747_v42 }
 0x862   : > { %19723 = vmatmul.mubr.msk.f32.gmra.mrb[62].mxu1 %vm435_vm3, %v27748_v35 }
 0x863   : > { %19725 = vmatprep.mubr.msk.f32.mxu1 %vm435_vm3, %v27749_v40 }
 0x866   : > { %19726 = vmatmul.mubr.msk.f32.gmra.mrb[64].mxu1 %vm435_vm3, %v27750_v56 }
 0x867   : > { %19728 = vmatprep.mubr.msk.f32.mxu1 %vm435_vm3, %v27751_v22 }
 0x86a   : > { %19729 = vmatmul.mubr.msk.f32.gmra.mrb[66].mxu1 %vm435_vm3, %v27752_v17 }
 0x86b   : > { %19731 = vmatprep.mubr.msk.f32.mxu1 %vm435_vm3, %v27753_v9 }
 0x86e   : > { %19732 = vmatmul.mubr.msk.f32.gmra.mrb[68].mxu1 %vm435_vm3, %v27754_v27 }
 0x86f   : > { %19734 = vmatprep.mubr.msk.f32.mxu1 %vm435_vm3, %v11675_v37 }
 0x872   : > { %19735 = vmatmul.mubr.msk.f32.gmra.mrb[70].mxu1 %vm435_vm3, %v11676_v54 }
 0x909   : > { %v19691_v44 = vpop.f32.mrb[40].mxu1 }
 0x90a   : > { %v20749_v13 = vadd.f32 %v19691_v44, %v26437_v34  ;;  %v11848_v62 = vpop.f32.mrb[41].mxu1 }
 0x90b   : > { %v20750_v10 = vadd.f32 %v26437_v34, %v11848_v62 }
 0x90c   : > { %v12040_v7 = vmax.f32 %v20749_v13, 0.0 }
 0x90d   : > { %v12039_v24 = vmax.f32 %v20750_v10, 0.0  ;;  %v19694_v1 = vpop.f32.mrb[42].mxu1 }
 0x90e   : > { %12072 = vst.msk [vmem:[#allocation2 + $0x21] sm:$0xff] %vm389_vm0, %v12040_v7  ;;  %v20751_v28 = vadd.f32 %v19694_v1, %v26437_v34  ;;  %v11858_v29 = vpop.f32.mrb[43].mxu1 }
 0x90f   : > { %12071 = vst.msk [vmem:[#allocation2 + $0x19] sm:$0xff] %vm389_vm0, %v12039_v24  ;;  %v20752_v26 = vadd.f32 %v26437_v34, %v11858_v29 }
 0x910   : > { %v12042_v16 = vmax.f32 %v20751_v28, 0.0 }
 0x911   : > { %v12041_v25 = vmax.f32 %v20752_v26, 0.0  ;;  %v19697_v39 = vpop.f32.mrb[44].mxu1 }
 0x912   : > { %12074 = vst.msk [vmem:[#allocation2 + $0x39] sm:$0xff] %vm389_vm0, %v12042_v16  ;;  %v20753_v21 = vadd.f32 %v19697_v39, %v26437_v34  ;;  %v11868_v0 = vpop.f32.mrb[45].mxu1 }
 0x913   : > { %12073 = vst.msk [vmem:[#allocation2 + $0x31] sm:$0xff] %vm389_vm0, %v12041_v25  ;;  %v20754_v19 = vadd.f32 %v26437_v34, %v11868_v0 }
 0x914   : > { %v12044_v3 = vmax.f32 %v20753_v21, 0.0 }
 0x915   : > { %v12043_v36 = vmax.f32 %v20754_v19, 0.0  ;;  %v19700_v52 = vpop.f32.mrb[46].mxu1 }
 0x916   : > { %12076 = vst.msk [vmem:[#allocation2 + $0x51] sm:$0xff] %vm389_vm0, %v12044_v3  ;;  %v20755_v20 = vadd.f32 %v19700_v52, %v26437_v34  ;;  %v11878_v43 = vpop.f32.mrb[47].mxu1  ;;  %v26451_v57 = vld [vmem:[#allocation2 + $0x18] sm:$0xff]  ;;  %v26453_v61 = vld [vmem:[#allocation2 + $0x20] sm:$0xff] }
 0x917   : > { %12075 = vst.msk [vmem:[#allocation2 + $0x49] sm:$0xff] %vm389_vm0, %v12043_v36  ;;  %v20756_v15 = vadd.f32 %v26437_v34, %v11878_v43  ;;  %19748 = vmatprep.mubr.msk.f32.mxu0 %vm389_vm0, %v26451_v57 }
 0x918   : > { %v12046_v5 = vmax.f32 %v20755_v20, 0.0  ;;  %19749 = vmatmul.mubr.msk.f32.gmra.mrb[34].mxu0 %vm389_vm0, %v26453_v61 }
 0x919   : > { %v12045_v59 = vmax.f32 %v20756_v15, 0.0  ;;  %v19703_v12 = vpop.f32.mrb[48].mxu1 }
 0x91a   : > { %12078 = vst.msk [vmem:[#allocation2 + $0x69] sm:$0xff] %vm389_vm0, %v12046_v5  ;;  %v20757_v45 = vadd.f32 %v19703_v12, %v26437_v34  ;;  %v11888_v53 = vpop.f32.mrb[49].mxu1  ;;  %v26463_v18 = vld [vmem:[#allocation2 + $0x30] sm:$0xff]  ;;  %v26465_v31 = vld [vmem:[#allocation2 + $0x38] sm:$0xff] }
 0x91b   : > { %12077 = vst.msk [vmem:[#allocation2 + $0x61] sm:$0xff] %vm389_vm0, %v12045_v59  ;;  %v20758_v2 = vadd.f32 %v26437_v34, %v11888_v53  ;;  %19751 = vmatprep.mubr.msk.f32.mxu0 %vm389_vm0, %v26463_v18 }
 0x91c   : > { %v12048_v8 = vmax.f32 %v20757_v45, 0.0  ;;  %19752 = vmatmul.mubr.msk.f32.gmra.mrb[36].mxu0 %vm389_vm0, %v26465_v31 }
 0x91d   : > { %v12047_v63 = vmax.f32 %v20758_v2, 0.0  ;;  %v19706_v11 = vpop.f32.mrb[50].mxu1 }
 0x91e   : > { %12080 = vst.msk [vmem:[#allocation2 + $0x81] sm:$0xff] %vm389_vm0, %v12048_v8  ;;  %v20759_v32 = vadd.f32 %v19706_v11, %v26437_v34  ;;  %v11898_v47 = vpop.f32.mrb[51].mxu1  ;;  %v26475_v49 = vld [vmem:[#allocation2 + $0x48] sm:$0xff]  ;;  %v26477_v60 = vld [vmem:[#allocation2 + $0x50] sm:$0xff] }
 0x91f   : > { %12079 = vst.msk [vmem:[#allocation2 + $0x79] sm:$0xff] %vm389_vm0, %v12047_v63  ;;  %v20760_v48 = vadd.f32 %v26437_v34, %v11898_v47  ;;  %19754 = vmatprep.mubr.msk.f32.mxu0 %vm389_vm0, %v26475_v49 }
 0x920   : > { %v12050_v41 = vmax.f32 %v20759_v32, 0.0  ;;  %19755 = vmatmul.mubr.msk.f32.gmra.mrb[38].mxu0 %vm389_vm0, %v26477_v60 }
 0x921   : > { %v12049_v6 = vmax.f32 %v20760_v48, 0.0  ;;  %v19709_v42 = vpop.f32.mrb[52].mxu1 }
 0x922   : > { %12082 = vst.msk [vmem:[#allocation2 + $0x99] sm:$0xff] %vm389_vm0, %v12050_v41  ;;  %v20761_v35 = vadd.f32 %v19709_v42, %v26437_v34  ;;  %v11908_v40 = vpop.f32.mrb[53].mxu1  ;;  %v26487_v56 = vld [vmem:[#allocation2 + $0x60] sm:$0xff]  ;;  %v26489_v22 = vld [vmem:[#allocation2 + $0x68] sm:$0xff] }
 0x923   : > { %12081 = vst.msk [vmem:[#allocation2 + $0x91] sm:$0xff] %vm389_vm0, %v12049_v6  ;;  %v20762_v17 = vadd.f32 %v26437_v34, %v11908_v40  ;;  %19757 = vmatprep.mubr.msk.f32.mxu0 %vm389_vm0, %v26487_v56 }
 0x924   : > { %v12052_v9 = vmax.f32 %v20761_v35, 0.0  ;;  %19758 = vmatmul.mubr.msk.f32.gmra.mrb[40].mxu0 %vm389_vm0, %v26489_v22 }
 0x925   : > { %v12051_v37 = vmax.f32 %v20762_v17, 0.0  ;;  %v19712_v27 = vpop.f32.mrb[54].mxu1 }
 0x926   : > { %12084 = vst.msk [vmem:[#allocation2 + $0xb1] sm:$0xff] %vm389_vm0, %v12052_v9  ;;  %v20763_v54 = vadd.f32 %v19712_v27, %v26437_v34  ;;  %v11918_v33 = vpop.f32.mrb[55].mxu1  ;;  %v26499_v38 = vld [vmem:[#allocation2 + $0x78] sm:$0xff]  ;;  %v26501_v50 = vld [vmem:[#allocation2 + $0x80] sm:$0xff] }
 0x927   : > { %12083 = vst.msk [vmem:[#allocation2 + $0xa9] sm:$0xff] %vm389_vm0, %v12051_v37  ;;  %v20764_v30 = vadd.f32 %v26437_v34, %v11918_v33  ;;  %19760 = vmatprep.mubr.msk.f32.mxu0 %vm389_vm0, %v26499_v38 }
 0x928   : > { %v12054_v46 = vmax.f32 %v20763_v54, 0.0  ;;  %19761 = vmatmul.mubr.msk.f32.gmra.mrb[42].mxu0 %vm389_vm0, %v26501_v50 }
 0x929   : > { %v12053_v23 = vmax.f32 %v20764_v30, 0.0  ;;  %v19715_v4 = vpop.f32.mrb[56].mxu1 }
 0x92a   : > { %12086 = vst.msk [vmem:[#allocation2 + $0xc9] sm:$0xff] %vm389_vm0, %v12054_v46  ;;  %v20765_v55 = vadd.f32 %v19715_v4, %v26437_v34  ;;  %v11928_v58 = vpop.f32.mrb[57].mxu1  ;;  %v26511_v14 = vld [vmem:[#allocation2 + $0x90] sm:$0xff]  ;;  %v26513_v44 = vld [vmem:[#allocation2 + $0x98] sm:$0xff] }
 0x92b   : > { %12085 = vst.msk [vmem:[#allocation2 + $0xc1] sm:$0xff] %vm389_vm0, %v12053_v23  ;;  %v20766_v13 = vadd.f32 %v26437_v34, %v11928_v58  ;;  %19763 = vmatprep.mubr.msk.f32.mxu0 %vm389_vm0, %v26511_v14 }
 0x92c   : > { %v12056_v62 = vmax.f32 %v20765_v55, 0.0  ;;  %19764 = vmatmul.mubr.msk.f32.gmra.mrb[44].mxu0 %vm389_vm0, %v26513_v44 }
 0x92d   : > { %v12055_v10 = vmax.f32 %v20766_v13, 0.0  ;;  %v19718_v7 = vpop.f32.mrb[58].mxu1 }
 0x92e   : > { %12088 = vst.msk [vmem:[#allocation2 + $0xe1] sm:$0xff] %vm389_vm0, %v12056_v62  ;;  %v20767_v24 = vadd.f32 %v19718_v7, %v26437_v34  ;;  %v11938_v1 = vpop.f32.mrb[59].mxu1  ;;  %v26523_v28 = vld [vmem:[#allocation2 + $0xa8] sm:$0xff]  ;;  %v26525_v29 = vld [vmem:[#allocation2 + $0xb0] sm:$0xff] }
 0x92f   : > { %12087 = vst.msk [vmem:[#allocation2 + $0xd9] sm:$0xff] %vm389_vm0, %v12055_v10  ;;  %v20768_v26 = vadd.f32 %v26437_v34, %v11938_v1  ;;  %19766 = vmatprep.mubr.msk.f32.mxu0 %vm389_vm0, %v26523_v28 }
 0x930   : > { %v12058_v16 = vmax.f32 %v20767_v24, 0.0  ;;  %19767 = vmatmul.mubr.msk.f32.gmra.mrb[46].mxu0 %vm389_vm0, %v26525_v29 }
 0x931   : > { %v12057_v25 = vmax.f32 %v20768_v26, 0.0  ;;  %v19721_v39 = vpop.f32.mrb[60].mxu1 }
 0x932   : > { %12090 = vst.msk [vmem:[#allocation2 + $0xf9] sm:$0xff] %vm389_vm0, %v12058_v16  ;;  %v20769_v21 = vadd.f32 %v19721_v39, %v26437_v34  ;;  %v11948_v0 = vpop.f32.mrb[61].mxu1  ;;  %v26535_v19 = vld [vmem:[#allocation2 + $0xc0] sm:$0xff]  ;;  %v26537_v3 = vld [vmem:[#allocation2 + $0xc8] sm:$0xff] }
 0x933   : > { %12089 = vst.msk [vmem:[#allocation2 + $0xf1] sm:$0xff] %vm389_vm0, %v12057_v25  ;;  %v20770_v36 = vadd.f32 %v26437_v34, %v11948_v0  ;;  %19769 = vmatprep.mubr.msk.f32.mxu0 %vm389_vm0, %v26535_v19 }
 0x934   : > { %v12060_v52 = vmax.f32 %v20769_v21, 0.0  ;;  %19770 = vmatmul.mubr.msk.f32.gmra.mrb[48].mxu0 %vm389_vm0, %v26537_v3 }
 0x935   : > { %v12059_v20 = vmax.f32 %v20770_v36, 0.0  ;;  %v19724_v43 = vpop.f32.mrb[62].mxu1  ;;  %v12500_v36 = vld [vmem:[#allocation2 + $0x1] sm:$0xff] }
 0x936   : > { %12092 = vst.msk [vmem:[#allocation2 + $0x111] sm:$0xff] %vm389_vm0, %v12060_v52  ;;  %v20771_v15 = vadd.f32 %v19724_v43, %v26437_v34  ;;  %v11958_v5 = vpop.f32.mrb[63].mxu1  ;;  %v26547_v59 = vld [vmem:[#allocation2 + $0xd8] sm:$0xff]  ;;  %v26549_v12 = vld [vmem:[#allocation2 + $0xe0] sm:$0xff]  ;;  %v17000_v52 = vld [vmem:[%s27456_s9 + $0x50] sm:$0xff] }
 0x937   : > { %12091 = vst.msk [vmem:[#allocation2 + $0x109] sm:$0xff] %vm389_vm0, %v12059_v20  ;;  %v20772_v45 = vadd.f32 %v26437_v34, %v11958_v5  ;;  %19772 = vmatprep.mubr.msk.f32.mxu0 %vm389_vm0, %v26547_v59  ;;  %v17001_v20 = vld [vmem:[%s27456_s9 + $0x58] sm:$0xff]  ;;  %v12501_v43 = vld [vmem:[#allocation2 + $0x9] sm:$0xff]  ;;  %v17034_v5 = vld [vmem:[%s27456_s9 + $0x60] sm:$0xff] }
 0x938   : > { %v12062_v53 = vmax.f32 %v20771_v15, 0.0  ;;  %19773 = vmatmul.mubr.msk.f32.gmra.mrb[50].mxu0 %vm389_vm0, %v26549_v12  ;;  %v20621_v15 = vpack.c.bf16 %v17001_v20, %v17000_v52 }
 0x939   : > { %v12061_v2 = vmax.f32 %v20772_v45, 0.0  ;;  %v19727_v8 = vpop.f32.mrb[64].mxu1  ;;  %v17035_v45 = vld [vmem:[%s27456_s9 + $0x68] sm:$0xff] }
 0x93a   : > { %12094 = vst.msk [vmem:[#allocation2 + $0x129] sm:$0xff] %vm389_vm0, %v12062_v53  ;;  %v20773_v63 = vadd.f32 %v19727_v8, %v26437_v34  ;;  %v11968_v11 = vpop.f32.mrb[65].mxu1  ;;  %v26559_v32 = vld [vmem:[#allocation2 + $0xf0] sm:$0xff]  ;;  %v26561_v47 = vld [vmem:[#allocation2 + $0xf8] sm:$0xff]  ;;  %v26644_v8 = vld [vmem:[#allocation2 + $0x21] sm:$0xff] }
 0x93b   : > { %12093 = vst.msk [vmem:[#allocation2 + $0x121] sm:$0xff] %vm389_vm0, %v12061_v2  ;;  %v20774_v48 = vadd.f32 %v26437_v34, %v11968_v11  ;;  %19775 = vmatprep.mubr.msk.f32.mxu0 %vm389_vm0, %v26559_v32  ;;  %v26637_v53 = vld [vmem:[#allocation2 + $0x19] sm:$0xff]  ;;  %v26642_v2 = vpack.c.bf16 %v17035_v45, %v17034_v5  ;;  %v26657_v11 = vld [vmem:[#allocation2 + $0x49] sm:$0xff] }
 0x93c   : > { %v12064_v41 = vmax.f32 %v20773_v63, 0.0  ;;  %19776 = vmatmul.mubr.msk.f32.gmra.mrb[52].mxu0 %vm389_vm0, %v26561_v47  ;;  %v26648_v63 = vld [vmem:[#allocation2 + $0x31] sm:$0xff] }
 0x93d   : > { %v12063_v6 = vmax.f32 %v20774_v48, 0.0  ;;  %v19730_v42 = vpop.f32.mrb[66].mxu1  ;;  %v26661_v48 = vld [vmem:[#allocation2 + $0x51] sm:$0xff] }
 0x93e   : > { %12096 = vst.msk [vmem:[#allocation2 + $0x141] sm:$0xff] %vm389_vm0, %v12064_v41  ;;  %v20775_v35 = vadd.f32 %v19730_v42, %v26437_v34  ;;  %v11978_v40 = vpop.f32.mrb[67].mxu1  ;;  %v26571_v17 = vld [vmem:[#allocation2 + $0x108] sm:$0xff]  ;;  %v26573_v9 = vld [vmem:[#allocation2 + $0x110] sm:$0xff]  ;;  %v26673_v42 = vld [vmem:[#allocation2 + $0x79] sm:$0xff] }
 0x93f   : > { %12095 = vst.msk [vmem:[#allocation2 + $0x139] sm:$0xff] %vm389_vm0, %v12063_v6  ;;  %v20776_v37 = vadd.f32 %v26437_v34, %v11978_v40  ;;  %19778 = vmatprep.mubr.msk.f32.mxu0 %vm389_vm0, %v26571_v17  ;;  %v26665_v41 = vld [vmem:[#allocation2 + $0x61] sm:$0xff]  ;;  %v26669_v6 = vld [vmem:[#allocation2 + $0x69] sm:$0xff]  ;;  %v26681_v40 = vld [vmem:[#allocation2 + $0x91] sm:$0xff] }
 0x940   : > { %v12066_v27 = vmax.f32 %v20775_v35, 0.0  ;;  %19779 = vmatmul.mubr.msk.f32.gmra.mrb[54].mxu0 %vm389_vm0, %v26573_v9  ;;  %v26677_v35 = vld [vmem:[#allocation2 + $0x81] sm:$0xff]  ;;  %v17036_v5 = vld [vmem:[%s27456_s9 + $0x70] sm:$0xff]  ;;  %v17037_v45 = vld [vmem:[%s27456_s9 + $0x78] sm:$0xff] }
 0x941   : > { %v12065_v54 = vmax.f32 %v20776_v37, 0.0  ;;  %v19733_v33 = vpop.f32.mrb[68].mxu1  ;;  %v26685_v37 = vld [vmem:[#allocation2 + $0x99] sm:$0xff] }
 0x942   : > { %12098 = vst.msk [vmem:[#allocation2 + $0x159] sm:$0xff] %vm389_vm0, %v12066_v27  ;;  %v20777_v30 = vadd.f32 %v19733_v33, %v26437_v34  ;;  %v11988_v46 = vpop.f32.mrb[69].mxu1  ;;  %v26583_v23 = vld [vmem:[#allocation2 + $0x120] sm:$0xff]  ;;  %v26585_v4 = vld [vmem:[#allocation2 + $0x128] sm:$0xff] }
 0x943   : > { %12097 = vst.msk [vmem:[#allocation2 + $0x151] sm:$0xff] %vm389_vm0, %v12065_v54  ;;  %v20778_v55 = vadd.f32 %v26437_v34, %v11988_v46  ;;  %19781 = vmatprep.mubr.msk.f32.mxu0 %vm389_vm0, %v26583_v23  ;;  %v26689_v27 = vld [vmem:[#allocation2 + $0xa9] sm:$0xff]  ;;  %v26693_v54 = vld [vmem:[#allocation2 + $0xb1] sm:$0xff]  ;;  %v26697_v33 = vld [vmem:[#allocation2 + $0xc1] sm:$0xff] }
 0x944   : > { %v12068_v58 = vmax.f32 %v20777_v30, 0.0  ;;  %19782 = vmatmul.mubr.msk.f32.gmra.mrb[56].mxu0 %vm389_vm0, %v26585_v4  ;;  %v26701_v30 = vld [vmem:[#allocation2 + $0xc9] sm:$0xff]  ;;  %v26705_v46 = vld [vmem:[#allocation2 + $0xd9] sm:$0xff] }
 0x945   : > { %v12067_v13 = vmax.f32 %v20778_v55, 0.0  ;;  %v19736_v62 = vpop.f32.mrb[70].mxu1  ;;  %v26709_v55 = vld [vmem:[#allocation2 + $0xe1] sm:$0xff] }
 0x946   : > { %12100 = vst.msk [vmem:[#allocation2 + $0x171] sm:$0xff] %vm389_vm0, %v12068_v58  ;;  %v20779_v10 = vadd.f32 %v19736_v62, %v26437_v34  ;;  %v11998_v7 = vpop.f32.mrb[71].mxu1  ;;  %v26595_v24 = vld [vmem:[#allocation2 + $0x138] sm:$0xff]  ;;  %v26597_v1 = vld [vmem:[#allocation2 + $0x140] sm:$0xff]  ;;  %v26721_v62 = vld [vmem:[#allocation2 + $0x109] sm:$0xff] }
 0x947   : > { %12099 = vst.msk [vmem:[#allocation2 + $0x169] sm:$0xff] %vm389_vm0, %v12067_v13  ;;  %v20780_v26 = vadd.f32 %v26437_v34, %v11998_v7  ;;  %19784 = vmatprep.mubr.msk.f32.mxu0 %vm389_vm0, %v26595_v24  ;;  %v26713_v58 = vld [vmem:[#allocation2 + $0xf1] sm:$0xff]  ;;  %v26717_v13 = vld [vmem:[#allocation2 + $0xf9] sm:$0xff]  ;;  %v26729_v7 = vld [vmem:[#allocation2 + $0x121] sm:$0xff] }
 0x948   : > { %v12070_v16 = vmax.f32 %v20779_v10, 0.0  ;;  %19785 = vmatmul.mubr.msk.f32.gmra.mrb[58].mxu0 %vm389_vm0, %v26597_v1  ;;  %v26725_v10 = vld [vmem:[#allocation2 + $0x111] sm:$0xff] }
 0x949   : > { %v12069_v25 = vmax.f32 %v20780_v26, 0.0  ;;  %v26733_v26 = vld [vmem:[#allocation2 + $0x129] sm:$0xff]  ;;  %v26749_v52 = vld [vmem:[#allocation2 + $0x159] sm:$0xff] }
 0x94a   : > { %12102 = vst.msk [vmem:[#allocation2 + $0x189] sm:$0xff] %vm389_vm0, %v12070_v16  ;;  %v26606_v39 = vld [vmem:[#allocation2 + $0x150] sm:$0xff]  ;;  %v26608_v21 = vld [vmem:[#allocation2 + $0x158] sm:$0xff]  ;;  %27758 = vst [vmem:[#allocation15_spill] sm:$0xff] %v26749_v52 }
 0x94b   : > { %12101 = vst.msk [vmem:[#allocation2 + $0x181] sm:$0xff] %vm389_vm0, %v12069_v25  ;;  %19787 = vmatprep.mubr.msk.f32.mxu0 %vm389_vm0, %v26606_v39  ;;  %v26737_v16 = vld [vmem:[#allocation2 + $0x139] sm:$0xff]  ;;  %v26741_v25 = vld [vmem:[#allocation2 + $0x141] sm:$0xff] }
 0x94c   : > { %19788 = vmatmul.mubr.msk.f32.gmra.mrb[60].mxu0 %vm389_vm0, %v26608_v21  ;;  %27755 = vst [vmem:[#allocation10_spill] sm:$0xff] %v26737_v16  ;;  %27756 = vst [vmem:[#allocation11_spill] sm:$0xff] %v26741_v25 }
 0x94e   : > { %v26615_v34 = vld [vmem:[#allocation2 + $0x168] sm:$0xff]  ;;  %v26617_v0 = vld [vmem:[#allocation2 + $0x170] sm:$0xff] }
 0x94f   : > { %19790 = vmatprep.mubr.msk.f32.mxu0 %vm389_vm0, %v26615_v34  ;;  %v26753_v20 = vld [vmem:[#allocation2 + $0x169] sm:$0xff] }
 0x950   : > { %19791 = vmatmul.mubr.msk.f32.gmra.mrb[62].mxu0 %vm389_vm0, %v26617_v0  ;;  %27759 = vst [vmem:[#allocation17_spill] sm:$0xff] %v26753_v20 }
 0x951   : > { %19801 = vmatprep.mubr.msk.f32.mxu0 %vm389_vm0, %v12500_v36  ;;  %v26745_v36 = vld [vmem:[#allocation2 + $0x151] sm:$0xff] }
 0x952   : > { %27757 = vst [vmem:[#allocation13_spill] sm:$0xff] %v26745_v36 }
 0x954   : > { %19802 = vmatmul.mubr.msk.f32.vlgmr.msra.gmra.mrb[32].mxu0 %vm389_vm0, %v12501_v43  ;;  %v12890_v43 = vld [vmem:[#allocation2 + $0x2] sm:$0xff] }
 0x955   : > { %20620 = vmatpush3.bf16.msra.mxu0 %v26431_v51  ;;  %19804 = vmatprep.mubr.msk.f32.mxu0 %vm389_vm0, %v26637_v53  ;;  %v26653_v51 = vld [vmem:[#allocation2 + $0x39] sm:$0xff] }
 0x956   : > { %20622 = vmatprep.subr.bf16.mxu0 %v20621_v15 }
 0x958   : > { %19805 = vmatmul.mubr.msk.f32.gmra.mrb[34].mxu0 %vm389_vm0, %v26644_v8 }
 0x959   : > { %19807 = vmatprep.mubr.msk.f32.mxu0 %vm389_vm0, %v26648_v63  ;;  %20624 = vmatpush3.bf16.msra.mxu0 %v20621_v15  ;;  %v26757_v15 = vld [vmem:[#allocation2 + $0x171] sm:$0xff] }
 0x95a   : > { %20626 = vmatprep.subr.bf16.mxu0 %v26642_v2  ;;  %27760 = vst [vmem:[#allocation19_spill] sm:$0xff] %v26757_v15 }
 0x95c   : > { %19808 = vmatmul.mubr.msk.f32.gmra.mrb[36].mxu0 %vm389_vm0, %v26653_v51 }
 0x95d   : > { %19810 = vmatprep.mubr.msk.f32.mxu0 %vm389_vm0, %v26657_v11 }
 0x960   : > { %19811 = vmatmul.mubr.msk.f32.gmra.mrb[38].mxu0 %vm389_vm0, %v26661_v48 }
 0x961   : > { %19813 = vmatprep.mubr.msk.f32.mxu0 %vm389_vm0, %v26665_v41 }
 0x964   : > { %19814 = vmatmul.mubr.msk.f32.gmra.mrb[40].mxu0 %vm389_vm0, %v26669_v6 }
 0x965   : > { %19816 = vmatprep.mubr.msk.f32.mxu0 %vm389_vm0, %v26673_v42 }
 0x968   : > { %19817 = vmatmul.mubr.msk.f32.gmra.mrb[42].mxu0 %vm389_vm0, %v26677_v35 }
 0x969   : > { %19819 = vmatprep.mubr.msk.f32.mxu0 %vm389_vm0, %v26681_v40 }
 0x96c   : > { %19820 = vmatmul.mubr.msk.f32.gmra.mrb[44].mxu0 %vm389_vm0, %v26685_v37 }
 0x96d   : > { %19822 = vmatprep.mubr.msk.f32.mxu0 %vm389_vm0, %v26689_v27 }
 0x970   : > { %19823 = vmatmul.mubr.msk.f32.gmra.mrb[46].mxu0 %vm389_vm0, %v26693_v54 }
 0x971   : > { %19825 = vmatprep.mubr.msk.f32.mxu0 %vm389_vm0, %v26697_v33 }
 0x974   : > { %19826 = vmatmul.mubr.msk.f32.gmra.mrb[48].mxu0 %vm389_vm0, %v26701_v30 }
 0x975   : > { %19828 = vmatprep.mubr.msk.f32.mxu0 %vm389_vm0, %v26705_v46 }
 0x978   : > { %19829 = vmatmul.mubr.msk.f32.gmra.mrb[50].mxu0 %vm389_vm0, %v26709_v55 }
 0x979   : > { %19831 = vmatprep.mubr.msk.f32.mxu0 %vm389_vm0, %v26713_v58 }
 0x97c   : > { %19832 = vmatmul.mubr.msk.f32.gmra.mrb[52].mxu0 %vm389_vm0, %v26717_v13 }
 0x97d   : > { %19834 = vmatprep.mubr.msk.f32.mxu0 %vm389_vm0, %v26721_v62 }
 0x980   : > { %19835 = vmatmul.mubr.msk.f32.gmra.mrb[54].mxu0 %vm389_vm0, %v26725_v10 }
 0x981   : > { %19837 = vmatprep.mubr.msk.f32.mxu0 %vm389_vm0, %v26729_v7 }
 0x984   : > { %19838 = vmatmul.mubr.msk.f32.gmra.mrb[56].mxu0 %vm389_vm0, %v26733_v26 }
 0x985   : > { %19840 = vmatprep.mubr.msk.f32.mxu0 %vm389_vm0, %v26737_v16  ;;  %v26775_v16 = vld [vmem:[#allocation2 + $0x1a] sm:$0xff] }
 0x988   : > { %19841 = vmatmul.mubr.msk.f32.gmra.mrb[58].mxu0 %vm389_vm0, %v26741_v25  ;;  %v17071_v25 = vld [vmem:[%s27456_s9 + $0x88] sm:$0xff] }
 0x989   : > { %19843 = vmatprep.mubr.msk.f32.mxu0 %vm389_vm0, %v26745_v36  ;;  %v20629_v36 = vpack.c.bf16 %v17037_v45, %v17036_v5  ;;  %v26782_v5 = vld [vmem:[#allocation2 + $0x22] sm:$0xff]  ;;  %v26786_v45 = vld [vmem:[#allocation2 + $0x32] sm:$0xff] }
 0x98a   : > { %27761 = vst [vmem:[#allocation21_spill] sm:$0xff] %v26786_v45 }
 0x98c   : > { %19844 = vmatmul.mubr.msk.f32.gmra.mrb[60].mxu0 %vm389_vm0, %v26749_v52  ;;  %v12891_v52 = vld [vmem:[#allocation2 + $0xa] sm:$0xff] }
 0x98d   : > { %19846 = vmatprep.mubr.msk.f32.mxu0 %vm389_vm0, %v26753_v20  ;;  %v17070_v20 = vld [vmem:[%s27456_s9 + $0x80] sm:$0xff] }
 0x990   : > { %19847 = vmatmul.mubr.msk.f32.gmra.mrb[62].mxu0 %vm389_vm0, %v26757_v15 }
 0x991   : > { %19857 = vmatprep.mubr.msk.f32.mxu0 %vm389_vm0, %v12890_v43  ;;  %v26780_v43 = vpack.c.bf16 %v17071_v25, %v17070_v20  ;;  %v26795_v25 = vld [vmem:[#allocation2 + $0x4a] sm:$0xff]  ;;  %v26803_v20 = vld [vmem:[#allocation2 + $0x62] sm:$0xff] }
 0x992   : > { %27763 = vst [vmem:[#allocation12_spill] sm:$0xff] %v26795_v25  ;;  %27765 = vst [vmem:[#allocation14_spill] sm:$0xff] %v26803_v20 }
 0x994   : > { %19858 = vmatmul.mubr.msk.f32.vlgmr.msra.gmra.mrb[32].mxu0 %vm389_vm0, %v12891_v52  ;;  %v26799_v52 = vld [vmem:[#allocation2 + $0x52] sm:$0xff] }
 0x995   : > { %20628 = vmatpush3.bf16.msra.mxu0 %v26642_v2  ;;  %19860 = vmatprep.mubr.msk.f32.mxu0 %vm389_vm0, %v26775_v16  ;;  %v26791_v2 = vld [vmem:[#allocation2 + $0x3a] sm:$0xff]  ;;  %27764 = vst [vmem:[#allocation8_spill] sm:$0xff] %v26799_v52 }
 0x996   : > { %20630 = vmatprep.subr.bf16.mxu0 %v20629_v36  ;;  %27762 = vst [vmem:[#allocation7_spill] sm:$0xff] %v26791_v2 }
 0x998   : > { %19861 = vmatmul.mubr.msk.f32.gmra.mrb[34].mxu0 %vm389_vm0, %v26782_v5 }
 0x999   : > { %19863 = vmatprep.mubr.msk.f32.mxu0 %vm389_vm0, %v26786_v45  ;;  %20632 = vmatpush3.bf16.msra.mxu0 %v20629_v36  ;;  %v26807_v36 = vld [vmem:[#allocation2 + $0x6a] sm:$0xff] }
 0x99a   : > { %20634 = vmatprep.subr.bf16.mxu0 %v26780_v43  ;;  %27766 = vst [vmem:[#allocation16_spill] sm:$0xff] %v26807_v36  ;;  %v17107_v45 = vld [vmem:[%s27456_s9 + $0xa8] sm:$0xff] }
 0x99c   : > { %19864 = vmatmul.mubr.msk.f32.gmra.mrb[36].mxu0 %vm389_vm0, %v26791_v2  ;;  %v26811_v2 = vld [vmem:[#allocation2 + $0x7a] sm:$0xff] }
 0x99d   : > { %19866 = vmatprep.mubr.msk.f32.mxu0 %vm389_vm0, %v26795_v25  ;;  %27767 = vst [vmem:[#allocation18_spill] sm:$0xff] %v26811_v2  ;;  %v26815_v25 = vld [vmem:[#allocation2 + $0x82] sm:$0xff] }
 0x99e   : > { %27768 = vst [vmem:[#allocation20_spill] sm:$0xff] %v26815_v25 }
 0x9a0   : > { %19867 = vmatmul.mubr.msk.f32.gmra.mrb[38].mxu0 %vm389_vm0, %v26799_v52  ;;  %v26819_v52 = vld [vmem:[#allocation2 + $0x92] sm:$0xff] }
 0x9a1   : > { %19869 = vmatprep.mubr.msk.f32.mxu0 %vm389_vm0, %v26803_v20  ;;  %27769 = vst [vmem:[#allocation22_spill] sm:$0xff] %v26819_v52  ;;  %v26823_v20 = vld [vmem:[#allocation2 + $0x9a] sm:$0xff] }
 0x9a2   : > { %27770 = vst [vmem:[#allocation23_spill] sm:$0xff] %v26823_v20 }
 0x9a4   : > { %19870 = vmatmul.mubr.msk.f32.gmra.mrb[40].mxu0 %vm389_vm0, %v26807_v36  ;;  %v26827_v36 = vld [vmem:[#allocation2 + $0xaa] sm:$0xff] }
 0x9a5   : > { %19872 = vmatprep.mubr.msk.f32.mxu0 %vm389_vm0, %v26811_v2  ;;  %27771 = vst [vmem:[#allocation24_spill] sm:$0xff] %v26827_v36  ;;  %v26831_v2 = vld [vmem:[#allocation2 + $0xb2] sm:$0xff] }
 0x9a6   : > { %27772 = vst [vmem:[#allocation25_spill] sm:$0xff] %v26831_v2 }
 0x9a8   : > { %19873 = vmatmul.mubr.msk.f32.gmra.mrb[42].mxu0 %vm389_vm0, %v26815_v25  ;;  %v26835_v25 = vld [vmem:[#allocation2 + $0xc2] sm:$0xff] }
 0x9a9   : > { %19875 = vmatprep.mubr.msk.f32.mxu0 %vm389_vm0, %v26819_v52  ;;  %27773 = vst [vmem:[#allocation26_spill] sm:$0xff] %v26835_v25  ;;  %v26839_v52 = vld [vmem:[#allocation2 + $0xca] sm:$0xff] }
 0x9aa   : > { %27774 = vst [vmem:[#allocation27_spill] sm:$0xff] %v26839_v52 }
 0x9ac   : > { %19876 = vmatmul.mubr.msk.f32.gmra.mrb[44].mxu0 %vm389_vm0, %v26823_v20  ;;  %v26843_v20 = vld [vmem:[#allocation2 + $0xda] sm:$0xff] }
 0x9ad   : > { %19878 = vmatprep.mubr.msk.f32.mxu0 %vm389_vm0, %v26827_v36  ;;  %27775 = vst [vmem:[#allocation28_spill] sm:$0xff] %v26843_v20  ;;  %v26847_v36 = vld [vmem:[#allocation2 + $0xe2] sm:$0xff] }
 0x9ae   : > { %27776 = vst [vmem:[#allocation29_spill] sm:$0xff] %v26847_v36 }
 0x9b0   : > { %19879 = vmatmul.mubr.msk.f32.gmra.mrb[46].mxu0 %vm389_vm0, %v26831_v2  ;;  %v26851_v2 = vld [vmem:[#allocation2 + $0xf2] sm:$0xff] }
 0x9b1   : > { %19881 = vmatprep.mubr.msk.f32.mxu0 %vm389_vm0, %v26835_v25  ;;  %27777 = vst [vmem:[#allocation30_spill] sm:$0xff] %v26851_v2  ;;  %v26855_v25 = vld [vmem:[#allocation2 + $0xfa] sm:$0xff] }
 0x9b2   : > { %27778 = vst [vmem:[#allocation31_spill] sm:$0xff] %v26855_v25 }
 0x9b4   : > { %19882 = vmatmul.mubr.msk.f32.gmra.mrb[48].mxu0 %vm389_vm0, %v26839_v52  ;;  %v26859_v52 = vld [vmem:[#allocation2 + $0x10a] sm:$0xff] }
 0x9b5   : > { %19884 = vmatprep.mubr.msk.f32.mxu0 %vm389_vm0, %v26843_v20  ;;  %27779 = vst [vmem:[#allocation32_spill] sm:$0xff] %v26859_v52  ;;  %v26863_v20 = vld [vmem:[#allocation2 + $0x112] sm:$0xff] }
 0x9b6   : > { %27780 = vst [vmem:[#allocation33_spill] sm:$0xff] %v26863_v20 }
 0x9b8   : > { %19885 = vmatmul.mubr.msk.f32.gmra.mrb[50].mxu0 %vm389_vm0, %v26847_v36  ;;  %v26867_v36 = vld [vmem:[#allocation2 + $0x122] sm:$0xff] }
 0x9b9   : > { %19887 = vmatprep.mubr.msk.f32.mxu0 %vm389_vm0, %v26851_v2  ;;  %27781 = vst [vmem:[#allocation34_spill] sm:$0xff] %v26867_v36  ;;  %v26871_v2 = vld [vmem:[#allocation2 + $0x12a] sm:$0xff] }
 0x9ba   : > { %27782 = vst [vmem:[#allocation35_spill] sm:$0xff] %v26871_v2 }
 0x9bc   : > { %19888 = vmatmul.mubr.msk.f32.gmra.mrb[52].mxu0 %vm389_vm0, %v26855_v25  ;;  %v26875_v25 = vld [vmem:[#allocation2 + $0x13a] sm:$0xff] }
 0x9bd   : > { %19890 = vmatprep.mubr.msk.f32.mxu0 %vm389_vm0, %v26859_v52  ;;  %27783 = vst [vmem:[#allocation36_spill] sm:$0xff] %v26875_v25  ;;  %v26879_v52 = vld [vmem:[#allocation2 + $0x142] sm:$0xff] }
 0x9be   : > { %27784 = vst [vmem:[#allocation37_spill] sm:$0xff] %v26879_v52 }
 0x9c0   : > { %19891 = vmatmul.mubr.msk.f32.gmra.mrb[54].mxu0 %vm389_vm0, %v26863_v20  ;;  %v26883_v20 = vld [vmem:[#allocation2 + $0x152] sm:$0xff] }
 0x9c1   : > { %19893 = vmatprep.mubr.msk.f32.mxu0 %vm389_vm0, %v26867_v36  ;;  %27785 = vst [vmem:[#allocation38_spill] sm:$0xff] %v26883_v20  ;;  %v26887_v36 = vld [vmem:[#allocation2 + $0x15a] sm:$0xff] }
 0x9c2   : > { %27786 = vst [vmem:[#allocation6_spill] sm:$0xff] %v26887_v36 }
 0x9c4   : > { %19894 = vmatmul.mubr.msk.f32.gmra.mrb[56].mxu0 %vm389_vm0, %v26871_v2  ;;  %v26891_v2 = vld [vmem:[#allocation2 + $0x16a] sm:$0xff] }
 0x9c5   : > { %19896 = vmatprep.mubr.msk.f32.mxu0 %vm389_vm0, %v26875_v25  ;;  %27787 = vst [vmem:[#allocation9_spill] sm:$0xff] %v26891_v2  ;;  %v26895_v25 = vld [vmem:[#allocation2 + $0x172] sm:$0xff] }
 0x9c6   : > { %27788 = vst [vmem:[#allocation39_spill] sm:$0xff] %v26895_v25 }
 0x9c8   : > { %19897 = vmatmul.mubr.msk.f32.gmra.mrb[58].mxu0 %vm389_vm0, %v26879_v52  ;;  %v17072_v52 = vld [vmem:[%s27456_s9 + $0x90] sm:$0xff] }
 0x9c9   : > { %19899 = vmatprep.mubr.msk.f32.mxu0 %vm389_vm0, %v26883_v20  ;;  %v17073_v20 = vld [vmem:[%s27456_s9 + $0x98] sm:$0xff] }
 0x9cc   : > { %19900 = vmatmul.mubr.msk.f32.gmra.mrb[60].mxu0 %vm389_vm0, %v26887_v36  ;;  %v20637_v36 = vpack.c.bf16 %v17073_v20, %v17072_v52  ;;  %v27793_v52 = vld [vmem:[#allocation17_spill] sm:$0xff]  ;;  %v27052_v20 = vld [vmem:[#allocation2 + $0x181] sm:$0xff] }
 0x9cd   : > { %19902 = vmatprep.mubr.msk.f32.mxu0 %vm389_vm0, %v26891_v2  ;;  %v17106_v2 = vld [vmem:[%s27456_s9 + $0xa0] sm:$0xff] }
 0x9d0   : > { %19903 = vmatmul.mubr.msk.f32.gmra.mrb[62].mxu0 %vm389_vm0, %v26895_v25  ;;  %v20641_v25 = vpack.c.bf16 %v17107_v45, %v17106_v2  ;;  %v27791_v2 = vld [vmem:[#allocation13_spill] sm:$0xff] }
 0x9d1   : > { %19913 = vmatprep.mubr.msk.f32.mxu0 %vm389_vm0, %v26451_v57  ;;  %v26972_v57 = vld [vmem:[#allocation2 + $0x180] sm:$0xff] }
 0x9d4   : > { %19914 = vmatmul.mubr.msk.f32.vlgmr.msra.gmra.mrb[32].mxu0 %vm389_vm0, %v26453_v61  ;;  %v26976_v61 = vld [vmem:[#allocation2 + $0x188] sm:$0xff] }
 0x9d5   : > { %20636 = vmatpush3.bf16.msra.mxu0 %v26780_v43  ;;  %19916 = vmatprep.mubr.msk.f32.mxu0 %vm389_vm0, %v26463_v18  ;;  %v17108_v18 = vld [vmem:[%s27456_s9 + $0xb0] sm:$0xff]  ;;  %v17143_v43 = vld [vmem:[%s27456_s9 + $0xc8] sm:$0xff] }
 0x9d6   : > { %20638 = vmatprep.subr.bf16.mxu0 %v20637_v36 }
 0x9d8   : > { %19917 = vmatmul.mubr.msk.f32.gmra.mrb[34].mxu0 %vm389_vm0, %v26465_v31  ;;  %v17109_v31 = vld [vmem:[%s27456_s9 + $0xb8] sm:$0xff] }
 0x9d9   : > { %19919 = vmatprep.mubr.msk.f32.mxu0 %vm389_vm0, %v26475_v49  ;;  %20640 = vmatpush3.bf16.msra.mxu0 %v20637_v36  ;;  %v20645_v49 = vpack.c.bf16 %v17109_v31, %v17108_v18  ;;  %v27056_v36 = vld [vmem:[#allocation2 + $0x189] sm:$0xff]  ;;  %v17145_v31 = vld [vmem:[%s27456_s9 + $0xd8] sm:$0xff] }
 0x9da   : > { %20642 = vmatprep.subr.bf16.mxu0 %v20641_v25  ;;  %v17144_v18 = vld [vmem:[%s27456_s9 + $0xd0] sm:$0xff] }
 0x9dc   : > { %19920 = vmatmul.mubr.msk.f32.gmra.mrb[36].mxu0 %vm389_vm0, %v26477_v60  ;;  %v17142_v60 = vld [vmem:[%s27456_s9 + $0xc0] sm:$0xff] }
 0x9dd   : > { %19922 = vmatprep.mubr.msk.f32.mxu0 %vm389_vm0, %v26487_v56  ;;  %v20649_v45 = vpack.c.bf16 %v17143_v43, %v17142_v60  ;;  %v17178_v60 = vld [vmem:[%s27456_s9 + $0xe0] sm:$0xff]  ;;  %v17179_v43 = vld [vmem:[%s27456_s9 + $0xe8] sm:$0xff] }
 0x9e0   : > { %19923 = vmatmul.mubr.msk.f32.gmra.mrb[38].mxu0 %vm389_vm0, %v26489_v22 }
 0x9e1   : > { %19925 = vmatprep.mubr.msk.f32.mxu0 %vm389_vm0, %v26499_v38 }
 0x9e4   : > { %19926 = vmatmul.mubr.msk.f32.gmra.mrb[40].mxu0 %vm389_vm0, %v26501_v50 }
 0x9e5   : > { %19928 = vmatprep.mubr.msk.f32.mxu0 %vm389_vm0, %v26511_v14 }
 0x9e8   : > { %19929 = vmatmul.mubr.msk.f32.gmra.mrb[42].mxu0 %vm389_vm0, %v26513_v44 }
 0x9e9   : > { %19931 = vmatprep.mubr.msk.f32.mxu0 %vm389_vm0, %v26523_v28 }
 0x9ec   : > { %19932 = vmatmul.mubr.msk.f32.gmra.mrb[44].mxu0 %vm389_vm0, %v26525_v29 }
 0x9ed   : > { %19934 = vmatprep.mubr.msk.f32.mxu0 %vm389_vm0, %v26535_v19 }
 0x9f0   : > { %19935 = vmatmul.mubr.msk.f32.gmra.mrb[46].mxu0 %vm389_vm0, %v26537_v3 }
 0x9f1   : > { %19937 = vmatprep.mubr.msk.f32.mxu0 %vm389_vm0, %v26547_v59 }
 0x9f4   : > { %19938 = vmatmul.mubr.msk.f32.gmra.mrb[48].mxu0 %vm389_vm0, %v26549_v12 }
 0x9f5   : > { %19940 = vmatprep.mubr.msk.f32.mxu0 %vm389_vm0, %v26559_v32 }
 0x9f8   : > { %19941 = vmatmul.mubr.msk.f32.gmra.mrb[50].mxu0 %vm389_vm0, %v26561_v47 }
 0x9f9   : > { %19943 = vmatprep.mubr.msk.f32.mxu0 %vm389_vm0, %v26571_v17 }
 0x9fc   : > { %19944 = vmatmul.mubr.msk.f32.gmra.mrb[52].mxu0 %vm389_vm0, %v26573_v9 }
 0x9fd   : > { %19946 = vmatprep.mubr.msk.f32.mxu0 %vm389_vm0, %v26583_v23 }
 0xa00   : > { %19947 = vmatmul.mubr.msk.f32.gmra.mrb[54].mxu0 %vm389_vm0, %v26585_v4 }
 0xa01   : > { %19949 = vmatprep.mubr.msk.f32.mxu0 %vm389_vm0, %v26595_v24 }
 0xa04   : > { %19950 = vmatmul.mubr.msk.f32.gmra.mrb[56].mxu0 %vm389_vm0, %v26597_v1 }
 0xa05   : > { %19952 = vmatprep.mubr.msk.f32.mxu0 %vm389_vm0, %v26606_v39 }
 0xa08   : > { %19953 = vmatmul.mubr.msk.f32.gmra.mrb[58].mxu0 %vm389_vm0, %v26608_v21 }
 0xa09   : > { %19955 = vmatprep.mubr.msk.f32.mxu0 %vm389_vm0, %v26615_v34 }
 0xa0c   : > { %19956 = vmatmul.mubr.msk.f32.gmra.mrb[60].mxu0 %vm389_vm0, %v26617_v0 }
 0xa0d   : > { %19958 = vmatprep.mubr.msk.f32.mxu0 %vm389_vm0, %v26972_v57 }
 0xa10   : > { %19959 = vmatmul.mubr.msk.f32.gmra.mrb[62].mxu0 %vm389_vm0, %v26976_v61 }
 0xa11   : > { %19969 = vmatprep.mubr.msk.f32.mxu0 %vm389_vm0, %v26637_v53  ;;  %v27789_v53 = vld [vmem:[#allocation10_spill] sm:$0xff] }
 0xa12   : > { %27794 = vst [vmem:[#allocation10_spill] sm:$0xff] %v27052_v20 }
 0xa14   : > { %19970 = vmatmul.mubr.msk.f32.vlgmr.msra.gmra.mrb[32].mxu0 %vm389_vm0, %v26644_v8  ;;  %v27790_v8 = vld [vmem:[#allocation11_spill] sm:$0xff] }
 0xa15   : > { %20644 = vmatpush3.bf16.msra.mxu0 %v20641_v25  ;;  %19972 = vmatprep.mubr.msk.f32.mxu0 %vm389_vm0, %v26648_v63  ;;  %v27792_v25 = vld [vmem:[#allocation15_spill] sm:$0xff]  ;;  %27795 = vst [vmem:[#allocation11_spill] sm:$0xff] %v27056_v36 }
 0xa16   : > { %20646 = vmatprep.subr.bf16.mxu0 %v20645_v49 }
 0xa18   : > { %19973 = vmatmul.mubr.msk.f32.gmra.mrb[34].mxu0 %vm389_vm0, %v26653_v51 }
 0xa19   : > { %19975 = vmatprep.mubr.msk.f32.mxu0 %vm389_vm0, %v26657_v11  ;;  %20648 = vmatpush3.bf16.msra.mxu0 %v20645_v49  ;;  %v20653_v49 = vpack.c.bf16 %v17145_v31, %v17144_v18  ;;  %v27799_v18 = vld [vmem:[#allocation8_spill] sm:$0xff]  ;;  %v27800_v31 = vld [vmem:[#allocation14_spill] sm:$0xff] }
 0xa1a   : > { %20650 = vmatprep.subr.bf16.mxu0 %v20649_v45 }
 0xa1c   : > { %19976 = vmatmul.mubr.msk.f32.gmra.mrb[36].mxu0 %vm389_vm0, %v26661_v48 }
 0xa1d   : > { %19978 = vmatprep.mubr.msk.f32.mxu0 %vm389_vm0, %v26665_v41 }
 0xa20   : > { %19979 = vmatmul.mubr.msk.f32.gmra.mrb[38].mxu0 %vm389_vm0, %v26669_v6 }
 0xa21   : > { %19981 = vmatprep.mubr.msk.f32.mxu0 %vm389_vm0, %v26673_v42 }
 0xa24   : > { %19982 = vmatmul.mubr.msk.f32.gmra.mrb[40].mxu0 %vm389_vm0, %v26677_v35 }
 0xa25   : > { %19984 = vmatprep.mubr.msk.f32.mxu0 %vm389_vm0, %v26681_v40 }
 0xa28   : > { %19985 = vmatmul.mubr.msk.f32.gmra.mrb[42].mxu0 %vm389_vm0, %v26685_v37 }
 0xa29   : > { %19987 = vmatprep.mubr.msk.f32.mxu0 %vm389_vm0, %v26689_v27 }
 0xa2c   : > { %19988 = vmatmul.mubr.msk.f32.gmra.mrb[44].mxu0 %vm389_vm0, %v26693_v54 }
 0xa2d   : > { %19990 = vmatprep.mubr.msk.f32.mxu0 %vm389_vm0, %v26697_v33 }
 0xa30   : > { %19991 = vmatmul.mubr.msk.f32.gmra.mrb[46].mxu0 %vm389_vm0, %v26701_v30 }
 0xa31   : > { %19993 = vmatprep.mubr.msk.f32.mxu0 %vm389_vm0, %v26705_v46 }
 0xa34   : > { %19994 = vmatmul.mubr.msk.f32.gmra.mrb[48].mxu0 %vm389_vm0, %v26709_v55 }
 0xa35   : > { %19996 = vmatprep.mubr.msk.f32.mxu0 %vm389_vm0, %v26713_v58 }
 0xa38   : > { %19997 = vmatmul.mubr.msk.f32.gmra.mrb[50].mxu0 %vm389_vm0, %v26717_v13 }
 0xa39   : > { %19999 = vmatprep.mubr.msk.f32.mxu0 %vm389_vm0, %v26721_v62 }
 0xa3c   : > { %20000 = vmatmul.mubr.msk.f32.gmra.mrb[52].mxu0 %vm389_vm0, %v26725_v10 }
 0xa3d   : > { %20002 = vmatprep.mubr.msk.f32.mxu0 %vm389_vm0, %v26729_v7 }
 0xa40   : > { %20003 = vmatmul.mubr.msk.f32.gmra.mrb[54].mxu0 %vm389_vm0, %v26733_v26 }
 0xa41   : > { %20005 = vmatprep.mubr.msk.f32.mxu0 %vm389_vm0, %v27789_v53 }
 0xa44   : > { %20006 = vmatmul.mubr.msk.f32.gmra.mrb[56].mxu0 %vm389_vm0, %v27790_v8 }
 0xa45   : > { %20008 = vmatprep.mubr.msk.f32.mxu0 %vm389_vm0, %v27791_v2 }
 0xa48   : > { %20009 = vmatmul.mubr.msk.f32.gmra.mrb[58].mxu0 %vm389_vm0, %v27792_v25 }
 0xa49   : > { %20011 = vmatprep.mubr.msk.f32.mxu0 %vm389_vm0, %v27793_v52 }
 0xa4c   : > { %20012 = vmatmul.mubr.msk.f32.gmra.mrb[60].mxu0 %vm389_vm0, %v26757_v15  ;;  %v27797_v15 = vld [vmem:[#allocation7_spill] sm:$0xff] }
 0xa4d   : > { %20014 = vmatprep.mubr.msk.f32.mxu0 %vm389_vm0, %v27052_v20  ;;  %v27796_v20 = vld [vmem:[#allocation21_spill] sm:$0xff] }
 0xa50   : > { %20015 = vmatmul.mubr.msk.f32.gmra.mrb[62].mxu0 %vm389_vm0, %v27056_v36  ;;  %v20657_v36 = vpack.c.bf16 %v17179_v43, %v17178_v60  ;;  %v27803_v60 = vld [vmem:[#allocation20_spill] sm:$0xff]  ;;  %v27804_v43 = vld [vmem:[#allocation22_spill] sm:$0xff] }
 0xa51   : > { %20025 = vmatprep.mubr.msk.f32.mxu0 %vm389_vm0, %v26775_v16  ;;  %v27798_v16 = vld [vmem:[#allocation12_spill] sm:$0xff] }
 0xa54   : > { %20026 = vmatmul.mubr.msk.f32.vlgmr.msra.gmra.mrb[32].mxu0 %vm389_vm0, %v26782_v5  ;;  %v27801_v5 = vld [vmem:[#allocation16_spill] sm:$0xff] }
 0xa55   : > { %20652 = vmatpush3.bf16.msra.mxu0 %v20649_v45  ;;  %20028 = vmatprep.mubr.msk.f32.mxu0 %vm389_vm0, %v27796_v20  ;;  %v27802_v45 = vld [vmem:[#allocation18_spill] sm:$0xff]  ;;  %v14453_v20 = vld [vmem:[#allocation2 + $0x50] sm:$0xff] }
 0xa56   : > { %20654 = vmatprep.subr.bf16.mxu0 %v20653_v49 }
 0xa58   : > { %20029 = vmatmul.mubr.msk.f32.gmra.mrb[34].mxu0 %vm389_vm0, %v27797_v15  ;;  %v14452_v15 = vld [vmem:[#allocation2 + $0x48] sm:$0xff] }
 0xa59   : > { %20031 = vmatprep.mubr.msk.f32.mxu0 %vm389_vm0, %v27798_v16  ;;  %20656 = vmatpush3.bf16.msra.mxu0 %v20653_v49  ;;  %v27805_v49 = vld [vmem:[#allocation23_spill] sm:$0xff]  ;;  %v27806_v16 = vld [vmem:[#allocation24_spill] sm:$0xff] }
 0xa5a   : > { %20658 = vmatprep.subr.bf16.mxu0 %v20657_v36 }
 0xa5c   : > { %20032 = vmatmul.mubr.msk.f32.gmra.mrb[36].mxu0 %vm389_vm0, %v27799_v18  ;;  %v27807_v18 = vld [vmem:[#allocation25_spill] sm:$0xff] }
 0xa5d   : > { %20034 = vmatprep.mubr.msk.f32.mxu0 %vm389_vm0, %v27800_v31  ;;  %v27808_v31 = vld [vmem:[#allocation26_spill] sm:$0xff] }
 0xa60   : > { %20035 = vmatmul.mubr.msk.f32.gmra.mrb[38].mxu0 %vm389_vm0, %v27801_v5  ;;  %v27809_v5 = vld [vmem:[#allocation27_spill] sm:$0xff] }
 0xa61   : > { %20037 = vmatprep.mubr.msk.f32.mxu0 %vm389_vm0, %v27802_v45  ;;  %v27810_v45 = vld [vmem:[#allocation28_spill] sm:$0xff] }
 0xa64   : > { %20038 = vmatmul.mubr.msk.f32.gmra.mrb[40].mxu0 %vm389_vm0, %v27803_v60  ;;  %v27811_v60 = vld [vmem:[#allocation29_spill] sm:$0xff] }
 0xa65   : > { %20040 = vmatprep.mubr.msk.f32.mxu0 %vm389_vm0, %v27804_v43  ;;  %v27812_v43 = vld [vmem:[#allocation30_spill] sm:$0xff] }
 0xa68   : > { %20041 = vmatmul.mubr.msk.f32.gmra.mrb[42].mxu0 %vm389_vm0, %v27805_v49  ;;  %v27813_v49 = vld [vmem:[#allocation31_spill] sm:$0xff] }
 0xa69   : > { %20043 = vmatprep.mubr.msk.f32.mxu0 %vm389_vm0, %v27806_v16  ;;  %v27814_v16 = vld [vmem:[#allocation32_spill] sm:$0xff] }
 0xa6c   : > { %20044 = vmatmul.mubr.msk.f32.gmra.mrb[44].mxu0 %vm389_vm0, %v27807_v18  ;;  %v27815_v18 = vld [vmem:[#allocation33_spill] sm:$0xff] }
 0xa6d   : > { %20046 = vmatprep.mubr.msk.f32.mxu0 %vm389_vm0, %v27808_v31  ;;  %v27816_v31 = vld [vmem:[#allocation34_spill] sm:$0xff] }
 0xa70   : > { %20047 = vmatmul.mubr.msk.f32.gmra.mrb[46].mxu0 %vm389_vm0, %v27809_v5  ;;  %v27817_v5 = vld [vmem:[#allocation35_spill] sm:$0xff] }
 0xa71   : > { %20049 = vmatprep.mubr.msk.f32.mxu0 %vm389_vm0, %v27810_v45  ;;  %v27818_v45 = vld [vmem:[#allocation36_spill] sm:$0xff] }
 0xa74   : > { %20050 = vmatmul.mubr.msk.f32.gmra.mrb[48].mxu0 %vm389_vm0, %v27811_v60  ;;  %v27819_v60 = vld [vmem:[#allocation37_spill] sm:$0xff] }
 0xa75   : > { %20052 = vmatprep.mubr.msk.f32.mxu0 %vm389_vm0, %v27812_v43  ;;  %v27820_v43 = vld [vmem:[#allocation38_spill] sm:$0xff] }
 0xa78   : > { %20053 = vmatmul.mubr.msk.f32.gmra.mrb[50].mxu0 %vm389_vm0, %v27813_v49  ;;  %v27821_v49 = vld [vmem:[#allocation6_spill] sm:$0xff] }
 0xa79   : > { %20055 = vmatprep.mubr.msk.f32.mxu0 %vm389_vm0, %v27814_v16  ;;  %v27822_v16 = vld [vmem:[#allocation9_spill] sm:$0xff] }
 0xa7c   : > { %20056 = vmatmul.mubr.msk.f32.gmra.mrb[52].mxu0 %vm389_vm0, %v27815_v18  ;;  %v27823_v18 = vld [vmem:[#allocation39_spill] sm:$0xff] }
 0xa7d   : > { %20058 = vmatprep.mubr.msk.f32.mxu0 %vm389_vm0, %v27816_v31  ;;  %v27132_v31 = vld [vmem:[#allocation2 + $0x182] sm:$0xff] }
 0xa7e   : > { %27824 = vst [vmem:[#allocation13_spill] sm:$0xff] %v27132_v31 }
 0xa80   : > { %20059 = vmatmul.mubr.msk.f32.gmra.mrb[54].mxu0 %vm389_vm0, %v27817_v5  ;;  %v17215_v5 = vld [vmem:[%s27456_s9 + $0x108] sm:$0xff] }
 0xa81   : > { %20061 = vmatprep.mubr.msk.f32.mxu0 %vm389_vm0, %v27818_v45  ;;  %v27136_v45 = vld [vmem:[#allocation2 + $0x18a] sm:$0xff] }
 0xa82   : > { %27825 = vst [vmem:[#allocation15_spill] sm:$0xff] %v27136_v45 }
 0xa84   : > { %20062 = vmatmul.mubr.msk.f32.gmra.mrb[56].mxu0 %vm389_vm0, %v27819_v60  ;;  %v14451_v60 = vld [vmem:[#allocation2 + $0x38] sm:$0xff] }
 0xa85   : > { %20064 = vmatprep.mubr.msk.f32.mxu0 %vm389_vm0, %v27820_v43  ;;  %v17180_v43 = vld [vmem:[%s27456_s9 + $0xf0] sm:$0xff] }
 0xa88   : > { %20065 = vmatmul.mubr.msk.f32.gmra.mrb[58].mxu0 %vm389_vm0, %v27821_v49  ;;  %v17181_v49 = vld [vmem:[%s27456_s9 + $0xf8] sm:$0xff] }
 0xa89   : > { %20067 = vmatprep.mubr.msk.f32.mxu0 %vm389_vm0, %v27822_v16  ;;  %v14450_v16 = vld [vmem:[#allocation2 + $0x30] sm:$0xff] }
 0xa8c   : > { %20068 = vmatmul.mubr.msk.f32.gmra.mrb[60].mxu0 %vm389_vm0, %v27823_v18  ;;  %v20661_v18 = vpack.c.bf16 %v17181_v49, %v17180_v43 }
 0xa8d   : > { %20070 = vmatprep.mubr.msk.f32.mxu0 %vm389_vm0, %v27132_v31  ;;  %v17214_v31 = vld [vmem:[%s27456_s9 + $0x100] sm:$0xff] }
 0xa90   : > { %20071 = vmatmul.mubr.msk.f32.gmra.mrb[62].mxu0 %vm389_vm0, %v27136_v45  ;;  %v20665_v45 = vpack.c.bf16 %v17215_v5, %v17214_v31 }
 0xa91   : > { %20081 = vmatprep.mubr.msk.f32.mxu0 %vm389_vm0, %v14450_v16 }
 0xa94   : > { %20082 = vmatmul.mubr.msk.f32.vlgmr.msra.gmra.mrb[32].mxu0 %vm389_vm0, %v14451_v60 }
 0xa95   : > { %20660 = vmatpush3.bf16.msra.mxu0 %v20657_v36  ;;  %20084 = vmatprep.mubr.msk.f32.mxu0 %vm389_vm0, %v14452_v15 }
 0xa96   : > { %20662 = vmatprep.subr.bf16.mxu0 %v20661_v18 }
 0xa98   : > { %20085 = vmatmul.mubr.msk.f32.gmra.mrb[34].mxu0 %vm389_vm0, %v14453_v20 }
 0xa99   : > { %20087 = vmatprep.mubr.msk.f32.mxu0 %vm389_vm0, %v26487_v56  ;;  %20664 = vmatpush3.bf16.msra.mxu0 %v20661_v18  ;;  %v14480_v56 = vld [vmem:[#allocation2 + $0x198] sm:$0xff] }
 0xa9a   : > { %20666 = vmatprep.subr.bf16.mxu0 %v20665_v45 }
 0xa9c   : > { %20088 = vmatmul.mubr.msk.f32.gmra.mrb[36].mxu0 %vm389_vm0, %v26489_v22  ;;  %v14481_v22 = vld [vmem:[#allocation2 + $0x1a0] sm:$0xff] }
 0xa9d   : > { %20090 = vmatprep.mubr.msk.f32.mxu0 %vm389_vm0, %v26499_v38  ;;  %v17216_v38 = vld [vmem:[%s27456_s9 + $0x110] sm:$0xff] }
 0xaa0   : > { %20091 = vmatmul.mubr.msk.f32.gmra.mrb[38].mxu0 %vm389_vm0, %v26501_v50  ;;  %v17217_v50 = vld [vmem:[%s27456_s9 + $0x118] sm:$0xff] }
 0xaa1   : > { %20093 = vmatprep.mubr.msk.f32.mxu0 %vm389_vm0, %v26511_v14  ;;  %v20669_v14 = vpack.c.bf16 %v17217_v50, %v17216_v38 }
 0xaa4   : > { %20094 = vmatmul.mubr.msk.f32.gmra.mrb[40].mxu0 %vm389_vm0, %v26513_v44  ;;  %v27826_v44 = vld [vmem:[#allocation19_spill] sm:$0xff] }
 0xaa5   : > { %20096 = vmatprep.mubr.msk.f32.mxu0 %vm389_vm0, %v26523_v28  ;;  %v27827_v28 = vld [vmem:[#allocation10_spill] sm:$0xff] }
 0xaa8   : > { %20097 = vmatmul.mubr.msk.f32.gmra.mrb[42].mxu0 %vm389_vm0, %v26525_v29  ;;  %v14870_v29 = vld [vmem:[#allocation2 + $0x199] sm:$0xff] }
 0xaa9   : > { %20099 = vmatprep.mubr.msk.f32.mxu0 %vm389_vm0, %v26535_v19  ;;  %v27828_v19 = vld [vmem:[#allocation11_spill] sm:$0xff] }
 0xaac   : > { %20100 = vmatmul.mubr.msk.f32.gmra.mrb[44].mxu0 %vm389_vm0, %v26537_v3  ;;  %v14871_v3 = vld [vmem:[#allocation2 + $0x1a1] sm:$0xff] }
 0xaad   : > { %20102 = vmatprep.mubr.msk.f32.mxu0 %vm389_vm0, %v26547_v59  ;;  %v27829_v59 = vld [vmem:[#allocation21_spill] sm:$0xff] }
 0xab0   : > { %20103 = vmatmul.mubr.msk.f32.gmra.mrb[46].mxu0 %vm389_vm0, %v26549_v12  ;;  %v27830_v12 = vld [vmem:[#allocation7_spill] sm:$0xff] }
 0xab1   : > { %20105 = vmatprep.mubr.msk.f32.mxu0 %vm389_vm0, %v26559_v32  ;;  %v27831_v32 = vld [vmem:[#allocation12_spill] sm:$0xff] }
 0xab4   : > { %20106 = vmatmul.mubr.msk.f32.gmra.mrb[48].mxu0 %vm389_vm0, %v26561_v47  ;;  %v27832_v47 = vld [vmem:[#allocation8_spill] sm:$0xff] }
 0xab5   : > { %20108 = vmatprep.mubr.msk.f32.mxu0 %vm389_vm0, %v26571_v17  ;;  %v27833_v17 = vld [vmem:[#allocation14_spill] sm:$0xff] }
 0xab8   : > { %20109 = vmatmul.mubr.msk.f32.gmra.mrb[50].mxu0 %vm389_vm0, %v26573_v9  ;;  %v27834_v9 = vld [vmem:[#allocation16_spill] sm:$0xff] }
 0xab9   : > { %20111 = vmatprep.mubr.msk.f32.mxu0 %vm389_vm0, %v26583_v23  ;;  %v27835_v23 = vld [vmem:[#allocation18_spill] sm:$0xff] }
 0xabc   : > { %20112 = vmatmul.mubr.msk.f32.gmra.mrb[52].mxu0 %vm389_vm0, %v26585_v4  ;;  %v27836_v4 = vld [vmem:[#allocation20_spill] sm:$0xff] }
 0xabd   : > { %20114 = vmatprep.mubr.msk.f32.mxu0 %vm389_vm0, %v26595_v24  ;;  %v27837_v24 = vld [vmem:[#allocation22_spill] sm:$0xff] }
 0xac0   : > { %20115 = vmatmul.mubr.msk.f32.gmra.mrb[54].mxu0 %vm389_vm0, %v26597_v1  ;;  %v27838_v1 = vld [vmem:[#allocation23_spill] sm:$0xff] }
 0xac1   : > { %20117 = vmatprep.mubr.msk.f32.mxu0 %vm389_vm0, %v26606_v39  ;;  %v27839_v39 = vld [vmem:[#allocation24_spill] sm:$0xff] }
 0xac4   : > { %20118 = vmatmul.mubr.msk.f32.gmra.mrb[56].mxu0 %vm389_vm0, %v26608_v21  ;;  %v27840_v21 = vld [vmem:[#allocation25_spill] sm:$0xff] }
 0xac5   : > { %20120 = vmatprep.mubr.msk.f32.mxu0 %vm389_vm0, %v26615_v34  ;;  %v27841_v34 = vld [vmem:[#allocation26_spill] sm:$0xff] }
 0xac8   : > { %20121 = vmatmul.mubr.msk.f32.gmra.mrb[58].mxu0 %vm389_vm0, %v26617_v0  ;;  %v27842_v0 = vld [vmem:[#allocation27_spill] sm:$0xff] }
 0xac9   : > { %20123 = vmatprep.mubr.msk.f32.mxu0 %vm389_vm0, %v26972_v57 }
 0xacc   : > { %20124 = vmatmul.mubr.msk.f32.gmra.mrb[60].mxu0 %vm389_vm0, %v26976_v61 }
 0xacd   : > { %20126 = vmatprep.mubr.msk.f32.mxu0 %vm389_vm0, %v14480_v56 }
 0xad0   : > { %20127 = vmatmul.mubr.msk.f32.gmra.mrb[62].mxu0 %vm389_vm0, %v14481_v22 }
 0xad1   : > { %20137 = vmatprep.mubr.msk.f32.mxu0 %vm389_vm0, %v26648_v63  ;;  %v27843_v63 = vld [vmem:[#allocation28_spill] sm:$0xff] }
 0xad4   : > { %20138 = vmatmul.mubr.msk.f32.vlgmr.msra.gmra.mrb[32].mxu0 %vm389_vm0, %v26653_v51  ;;  %v27844_v51 = vld [vmem:[#allocation29_spill] sm:$0xff] }
 0xad5   : > { %20668 = vmatpush3.bf16.msra.mxu0 %v20665_v45  ;;  %20140 = vmatprep.mubr.msk.f32.mxu0 %vm389_vm0, %v26657_v11  ;;  %v27845_v11 = vld [vmem:[#allocation30_spill] sm:$0xff] }
 0xad6   : > { %20670 = vmatprep.subr.bf16.mxu0 %v20669_v14 }
 0xad8   : > { %20141 = vmatmul.mubr.msk.f32.gmra.mrb[34].mxu0 %vm389_vm0, %v26661_v48  ;;  %v27846_v48 = vld [vmem:[#allocation31_spill] sm:$0xff] }
 0xad9   : > { %20143 = vmatprep.mubr.msk.f32.mxu0 %vm389_vm0, %v26665_v41  ;;  %20672 = vmatpush3.bf16.msra.mxu0 %v20669_v14  ;;  %v27847_v41 = vld [vmem:[#allocation32_spill] sm:$0xff] }
 0xadc   : > { %20144 = vmatmul.mubr.msk.f32.gmra.mrb[36].mxu0 %vm389_vm0, %v26669_v6  ;;  %v27848_v6 = vld [vmem:[#allocation33_spill] sm:$0xff] }
 0xadd   : > { %20146 = vmatprep.mubr.msk.f32.mxu0 %vm389_vm0, %v26673_v42  ;;  %v27849_v42 = vld [vmem:[#allocation34_spill] sm:$0xff] }
 0xae0   : > { %20147 = vmatmul.mubr.msk.f32.gmra.mrb[38].mxu0 %vm389_vm0, %v26677_v35  ;;  %v27850_v35 = vld [vmem:[#allocation35_spill] sm:$0xff] }
 0xae1   : > { %20149 = vmatprep.mubr.msk.f32.mxu0 %vm389_vm0, %v26681_v40  ;;  %v27851_v40 = vld [vmem:[#allocation36_spill] sm:$0xff] }
 0xae4   : > { %20150 = vmatmul.mubr.msk.f32.gmra.mrb[40].mxu0 %vm389_vm0, %v26685_v37  ;;  %v27852_v37 = vld [vmem:[#allocation37_spill] sm:$0xff] }
 0xae5   : > { %20152 = vmatprep.mubr.msk.f32.mxu0 %vm389_vm0, %v26689_v27  ;;  %v27853_v27 = vld [vmem:[#allocation38_spill] sm:$0xff] }
 0xae8   : > { %20153 = vmatmul.mubr.msk.f32.gmra.mrb[42].mxu0 %vm389_vm0, %v26693_v54  ;;  %v27854_v54 = vld [vmem:[#allocation6_spill] sm:$0xff] }
 0xae9   : > { %20155 = vmatprep.mubr.msk.f32.mxu0 %vm389_vm0, %v26697_v33  ;;  %v27855_v33 = vld [vmem:[#allocation9_spill] sm:$0xff] }
 0xaec   : > { %20156 = vmatmul.mubr.msk.f32.gmra.mrb[44].mxu0 %vm389_vm0, %v26701_v30  ;;  %v27856_v30 = vld [vmem:[#allocation39_spill] sm:$0xff] }
 0xaed   : > { %20158 = vmatprep.mubr.msk.f32.mxu0 %vm389_vm0, %v26705_v46  ;;  %v27857_v46 = vld [vmem:[#allocation13_spill] sm:$0xff] }
 0xaf0   : > { %20159 = vmatmul.mubr.msk.f32.gmra.mrb[46].mxu0 %vm389_vm0, %v26709_v55  ;;  %v15260_v55 = vld [vmem:[#allocation2 + $0x19a] sm:$0xff] }
 0xaf1   : > { %20161 = vmatprep.mubr.msk.f32.mxu0 %vm389_vm0, %v26713_v58  ;;  %v27858_v58 = vld [vmem:[#allocation15_spill] sm:$0xff] }
 0xaf4   : > { %20162 = vmatmul.mubr.msk.f32.gmra.mrb[48].mxu0 %vm389_vm0, %v26717_v13  ;;  %v15261_v13 = vld [vmem:[#allocation2 + $0x1a2] sm:$0xff] }
 0xaf5   : > { %20164 = vmatprep.mubr.msk.f32.mxu0 %vm389_vm0, %v26721_v62  ;;  %v27340_v62 = vld [vmem:[#allocation5] ss:$0 sm:$0xff] }
 0xaf8   : > { %20165 = vmatmul.mubr.msk.f32.gmra.mrb[50].mxu0 %vm389_vm0, %v26725_v10 }
 0xaf9   : > { %20167 = vmatprep.mubr.msk.f32.mxu0 %vm389_vm0, %v26729_v7 }
 0xafc   : > { %20168 = vmatmul.mubr.msk.f32.gmra.mrb[52].mxu0 %vm389_vm0, %v26733_v26 }
 0xafd   : > { %20170 = vmatprep.mubr.msk.f32.mxu0 %vm389_vm0, %v27789_v53 }
 0xb00   : > { %20171 = vmatmul.mubr.msk.f32.gmra.mrb[54].mxu0 %vm389_vm0, %v27790_v8 }
 0xb01   : > { %20173 = vmatprep.mubr.msk.f32.mxu0 %vm389_vm0, %v27791_v2 }
 0xb04   : > { %20174 = vmatmul.mubr.msk.f32.gmra.mrb[56].mxu0 %vm389_vm0, %v27792_v25 }
 0xb05   : > { %20176 = vmatprep.mubr.msk.f32.mxu0 %vm389_vm0, %v27793_v52 }
 0xb08   : > { %20177 = vmatmul.mubr.msk.f32.gmra.mrb[58].mxu0 %vm389_vm0, %v27826_v44 }
 0xb09   : > { %20179 = vmatprep.mubr.msk.f32.mxu0 %vm389_vm0, %v27827_v28 }
 0xb0c   : > { %20180 = vmatmul.mubr.msk.f32.gmra.mrb[60].mxu0 %vm389_vm0, %v27828_v19 }
 0xb0d   : > { %20182 = vmatprep.mubr.msk.f32.mxu0 %vm389_vm0, %v14870_v29 }
 0xb10   : > { %20183 = vmatmul.mubr.msk.f32.gmra.mrb[62].mxu0 %vm389_vm0, %v14871_v3 }
 0xb11   : > { %20193 = vmatprep.mubr.msk.f32.mxu0 %vm389_vm0, %v27829_v59 }
 0xb14   : > { %20194 = vmatmul.mubr.msk.f32.vlgmr.msra.gmra.mrb[32].mxu0 %vm389_vm0, %v27830_v12 }
 0xb15   : > { %20196 = vmatprep.mubr.msk.f32.mxu0 %vm389_vm0, %v27831_v32 }
 0xb18   : > { %20197 = vmatmul.mubr.msk.f32.gmra.mrb[34].mxu0 %vm389_vm0, %v27832_v47 }
 0xb19   : > { %20199 = vmatprep.mubr.msk.f32.mxu0 %vm389_vm0, %v27833_v17 }
 0xb1c   : > { %20200 = vmatmul.mubr.msk.f32.gmra.mrb[36].mxu0 %vm389_vm0, %v27834_v9 }
 0xb1d   : > { %20202 = vmatprep.mubr.msk.f32.mxu0 %vm389_vm0, %v27835_v23 }
 0xb20   : > { %20203 = vmatmul.mubr.msk.f32.gmra.mrb[38].mxu0 %vm389_vm0, %v27836_v4 }
 0xb21   : > { %20205 = vmatprep.mubr.msk.f32.mxu0 %vm389_vm0, %v27837_v24 }
 0xb24   : > { %20206 = vmatmul.mubr.msk.f32.gmra.mrb[40].mxu0 %vm389_vm0, %v27838_v1 }
 0xb25   : > { %20208 = vmatprep.mubr.msk.f32.mxu0 %vm389_vm0, %v27839_v39 }
 0xb28   : > { %20209 = vmatmul.mubr.msk.f32.gmra.mrb[42].mxu0 %vm389_vm0, %v27840_v21 }
 0xb29   : > { %20211 = vmatprep.mubr.msk.f32.mxu0 %vm389_vm0, %v27841_v34 }
 0xb2c   : > { %20212 = vmatmul.mubr.msk.f32.gmra.mrb[44].mxu0 %vm389_vm0, %v27842_v0 }
 0xb2d   : > { %20214 = vmatprep.mubr.msk.f32.mxu0 %vm389_vm0, %v27843_v63 }
 0xb30   : > { %20215 = vmatmul.mubr.msk.f32.gmra.mrb[46].mxu0 %vm389_vm0, %v27844_v51 }
 0xb31   : > { %20217 = vmatprep.mubr.msk.f32.mxu0 %vm389_vm0, %v27845_v11 }
 0xb34   : > { %20218 = vmatmul.mubr.msk.f32.gmra.mrb[48].mxu0 %vm389_vm0, %v27846_v48 }
 0xb35   : > { %20220 = vmatprep.mubr.msk.f32.mxu0 %vm389_vm0, %v27847_v41 }
 0xb38   : > { %20221 = vmatmul.mubr.msk.f32.gmra.mrb[50].mxu0 %vm389_vm0, %v27848_v6 }
 0xb39   : > { %20223 = vmatprep.mubr.msk.f32.mxu0 %vm389_vm0, %v27849_v42 }
 0xb3c   : > { %20224 = vmatmul.mubr.msk.f32.gmra.mrb[52].mxu0 %vm389_vm0, %v27850_v35 }
 0xb3d   : > { %20226 = vmatprep.mubr.msk.f32.mxu0 %vm389_vm0, %v27851_v40 }
 0xb40   : > { %20227 = vmatmul.mubr.msk.f32.gmra.mrb[54].mxu0 %vm389_vm0, %v27852_v37 }
 0xb41   : > { %20229 = vmatprep.mubr.msk.f32.mxu0 %vm389_vm0, %v27853_v27 }
 0xb44   : > { %20230 = vmatmul.mubr.msk.f32.gmra.mrb[56].mxu0 %vm389_vm0, %v27854_v54 }
 0xb45   : > { %20232 = vmatprep.mubr.msk.f32.mxu0 %vm389_vm0, %v27855_v33 }
 0xb48   : > { %20233 = vmatmul.mubr.msk.f32.gmra.mrb[58].mxu0 %vm389_vm0, %v27856_v30 }
 0xb49   : > { %20235 = vmatprep.mubr.msk.f32.mxu0 %vm389_vm0, %v27857_v46 }
 0xb4c   : > { %20236 = vmatmul.mubr.msk.f32.gmra.mrb[60].mxu0 %vm389_vm0, %v27858_v58 }
 0xb4d   : > { %20238 = vmatprep.mubr.msk.f32.mxu0 %vm389_vm0, %v15260_v55 }
 0xb50   : > { %20239 = vmatmul.mubr.msk.f32.gmra.mrb[62].mxu0 %vm389_vm0, %v15261_v13 }
 0xbe7   : > { %v20195_v10 = vpop.f32.mrb[32].mxu0 }
 0xbe8   : > { %v20781_v7 = vadd.f32 %v20195_v10, %v27340_v62  ;;  %v15429_v26 = vpop.f32.mrb[33].mxu0 }
 0xbe9   : > { %v20782_v15 = vadd.f32 %v27340_v62, %v15429_v26 }
 0xbea   : > { %v15621_v57 = vsub.f32 0.0, %v20781_v7 }
 0xbeb   : > { %v15620_v61 = vsub.f32 0.0, %v20782_v15  ;;  %v20198_v53 = vpop.f32.mrb[34].mxu0 }
 0xbec   : > { %v15654_v8 = vmul.f32 1.442695, %v15621_v57  ;;  %v20783_v2 = vadd.f32 %v20198_v53, %v27340_v62  ;;  %v15439_v25 = vpop.f32.mrb[35].mxu0 }
 0xbed   : > { %v15652_v52 = vmul.f32 1.442695, %v15620_v61  ;;  %v20784_v20 = vadd.f32 %v27340_v62, %v15439_v25 }
 0xbee   : > { %21626 = vpow2.f32 %v15654_v8  ;;  %v15623_v36 = vsub.f32 0.0, %v20783_v2 }
 0xbef   : > { %21628 = vpow2.f32 %v15652_v52  ;;  %v15622_v16 = vsub.f32 0.0, %v20784_v20  ;;  %v20201_v18 = vpop.f32.mrb[36].mxu0 }
 0xbf0   : > { %v15658_v31 = vmul.f32 1.442695, %v15623_v36  ;;  %v20785_v5 = vadd.f32 %v20201_v18, %v27340_v62  ;;  %v15449_v45 = vpop.f32.mrb[37].mxu0 }
 0xbf1   : > { %v15656_v60 = vmul.f32 1.442695, %v15622_v16  ;;  %v20786_v43 = vadd.f32 %v27340_v62, %v15449_v45 }
 0xbf2   : > { %21630 = vpow2.f32 %v15658_v31  ;;  %v15625_v49 = vsub.f32 0.0, %v20785_v5 }
 0xbf3   : > { %21632 = vpow2.f32 %v15656_v60  ;;  %v15624_v56 = vsub.f32 0.0, %v20786_v43  ;;  %v20204_v22 = vpop.f32.mrb[38].mxu0 }
 0xbf4   : > { %v15662_v38 = vmul.f32 1.442695, %v15625_v49  ;;  %v20787_v50 = vadd.f32 %v20204_v22, %v27340_v62  ;;  %v15459_v14 = vpop.f32.mrb[39].mxu0 }
 0xbf5   : > { %v15660_v44 = vmul.f32 1.442695, %v15624_v56  ;;  %v20788_v28 = vadd.f32 %v27340_v62, %v15459_v14 }
 0xbf6   : > { %21634 = vpow2.f32 %v15662_v38  ;;  %v15627_v29 = vsub.f32 0.0, %v20787_v50 }
 0xbf7   : > { %21636 = vpow2.f32 %v15660_v44  ;;  %v15626_v19 = vsub.f32 0.0, %v20788_v28  ;;  %v20207_v3 = vpop.f32.mrb[40].mxu0 }
 0xbf8   : > { %v21627_v59 = vpop.eup %21626  ;;  %v15666_v12 = vmul.f32 1.442695, %v15627_v29  ;;  %v20789_v32 = vadd.f32 %v20207_v3, %v27340_v62  ;;  %v15469_v47 = vpop.f32.mrb[41].mxu0 }
 0xbf9   : > { %v21629_v17 = vpop.eup %21628  ;;  %v15717_v9 = vadd.f32 1.0, %v21627_v59  ;;  %v15664_v23 = vmul.f32 1.442695, %v15626_v19  ;;  %v20790_v4 = vadd.f32 %v27340_v62, %v15469_v47 }
 0xbfa   : > { %v15716_v24 = vadd.f32 1.0, %v21629_v17  ;;  %21638 = vpow2.f32 %v15666_v12  ;;  %v15629_v1 = vsub.f32 0.0, %v20789_v32 }
 0xbfb   : > { %21640 = vrcp.f32 %v15717_v9  ;;  %v15628_v39 = vsub.f32 0.0, %v20790_v4  ;;  %v20210_v21 = vpop.f32.mrb[42].mxu0 }
 0xbfc   : > { %v21631_v34 = vpop.eup %21630  ;;  %21642 = vrcp.f32 %v15716_v24  ;;  %v15670_v0 = vmul.f32 1.442695, %v15629_v1  ;;  %v20791_v63 = vadd.f32 %v20210_v21, %v27340_v62  ;;  %v15479_v51 = vpop.f32.mrb[43].mxu0 }
 0xbfd   : > { %v21633_v11 = vpop.eup %21632  ;;  %v15719_v48 = vadd.f32 1.0, %v21631_v34  ;;  %21644 = vpow2.f32 %v15664_v23  ;;  %v15668_v41 = vmul.f32 1.442695, %v15628_v39  ;;  %v20792_v6 = vadd.f32 %v27340_v62, %v15479_v51 }
 0xbfe   : > { %v15718_v42 = vadd.f32 1.0, %v21633_v11  ;;  %21646 = vpow2.f32 %v15670_v0  ;;  %v15631_v35 = vsub.f32 0.0, %v20791_v63 }
 0xbff   : > { %21648 = vrcp.f32 %v15719_v48  ;;  %v15630_v40 = vsub.f32 0.0, %v20792_v6  ;;  %v20213_v37 = vpop.f32.mrb[44].mxu0 }
 0xc00   : > { %v21635_v27 = vpop.eup %21634  ;;  %21650 = vrcp.f32 %v15718_v42  ;;  %v15674_v54 = vmul.f32 1.442695, %v15631_v35  ;;  %v20793_v33 = vadd.f32 %v20213_v37, %v27340_v62  ;;  %v15489_v30 = vpop.f32.mrb[45].mxu0 }
 0xc01   : > { %v21637_v46 = vpop.eup %21636  ;;  %v15721_v55 = vadd.f32 1.0, %v21635_v27  ;;  %21652 = vpow2.f32 %v15668_v41  ;;  %v15672_v58 = vmul.f32 1.442695, %v15630_v40  ;;  %v20794_v13 = vadd.f32 %v27340_v62, %v15489_v30 }
 0xc02   : > { %v15720_v10 = vadd.f32 1.0, %v21637_v46  ;;  %21654 = vpow2.f32 %v15674_v54  ;;  %v15633_v7 = vsub.f32 0.0, %v20793_v33 }
 0xc03   : > { %21656 = vrcp.f32 %v15721_v55  ;;  %v15632_v26 = vsub.f32 0.0, %v20794_v13  ;;  %v20216_v15 = vpop.f32.mrb[46].mxu0 }
 0xc04   : > { %v21639_v57 = vpop.eup %21638  ;;  %21658 = vrcp.f32 %v15720_v10  ;;  %v15678_v61 = vmul.f32 1.442695, %v15633_v7  ;;  %v20795_v53 = vadd.f32 %v20216_v15, %v27340_v62  ;;  %v15499_v8 = vpop.f32.mrb[47].mxu0 }
 0xc05   : > { %v21641_v2 = vpop.eup %21640  ;;  %v15723_v25 = vadd.f32 1.0, %v21639_v57  ;;  %21660 = vpow2.f32 %v15672_v58  ;;  %v15676_v52 = vmul.f32 1.442695, %v15632_v26  ;;  %v20796_v20 = vadd.f32 %v27340_v62, %v15499_v8 }
 0xc06   : > { %v21643_v36 = vpop.eup %21642  ;;  %15814 = vst.msk [vmem:[%s27360_s25 + $0x8] sm:$0xff] %vm15812_vm13, %v21641_v2  ;;  %21662 = vpow2.f32 %v15678_v61  ;;  %v15635_v16 = vsub.f32 0.0, %v20795_v53 }
 0xc07   : > { %v21645_v18 = vpop.eup %21644  ;;  %15813 = vst.msk [vmem:[%s27360_s25] sm:$0xff] %vm15812_vm13, %v21643_v36  ;;  %21664 = vrcp.f32 %v15723_v25  ;;  %v15634_v31 = vsub.f32 0.0, %v20796_v20  ;;  %v20219_v5 = vpop.f32.mrb[48].mxu0 }
 0xc08   : > { %v21647_v45 = vpop.eup %21646  ;;  %v15722_v60 = vadd.f32 1.0, %v21645_v18  ;;  %21666 = vpow2.f32 %v15676_v52  ;;  %v15682_v43 = vmul.f32 1.442695, %v15635_v16  ;;  %v20797_v49 = vadd.f32 %v20219_v5, %v27340_v62  ;;  %v15509_v56 = vpop.f32.mrb[49].mxu0 }
 0xc09   : > { %v21649_v22 = vpop.eup %21648  ;;  %v15725_v38 = vadd.f32 1.0, %v21647_v45  ;;  %v15680_v50 = vmul.f32 1.442695, %v15634_v31  ;;  %v20798_v14 = vadd.f32 %v27340_v62, %v15509_v56 }
 0xc0a   : > { %v21651_v44 = vpop.eup %21650  ;;  %15816 = vst.msk [vmem:[%s27360_s25 + $0x18] sm:$0xff] %vm15812_vm13, %v21649_v22  ;;  %21668 = vrcp.f32 %v15722_v60  ;;  %v15637_v28 = vsub.f32 0.0, %v20797_v49 }
 0xc0b   : > { %v21653_v29 = vpop.eup %21652  ;;  %15815 = vst.msk [vmem:[%s27360_s25 + $0x10] sm:$0xff] %vm15812_vm13, %v21651_v44  ;;  %21670 = vrcp.f32 %v15725_v38  ;;  %v15636_v19 = vsub.f32 0.0, %v20798_v14  ;;  %v20222_v3 = vpop.f32.mrb[50].mxu0 }
 0xc0c   : > { %v21655_v59 = vpop.eup %21654  ;;  %v15724_v12 = vadd.f32 1.0, %v21653_v29  ;;  %21672 = vpow2.f32 %v15682_v43  ;;  %v15686_v32 = vmul.f32 1.442695, %v15637_v28  ;;  %v20799_v47 = vadd.f32 %v20222_v3, %v27340_v62  ;;  %v15519_v17 = vpop.f32.mrb[51].mxu0 }
 0xc0d   : > { %v21657_v9 = vpop.eup %21656  ;;  %v15727_v23 = vadd.f32 1.0, %v21655_v59  ;;  %21674 = vpow2.f32 %v15680_v50  ;;  %v15684_v4 = vmul.f32 1.442695, %v15636_v19  ;;  %v20800_v24 = vadd.f32 %v27340_v62, %v15519_v17 }
 0xc0e   : > { %v21659_v1 = vpop.eup %21658  ;;  %15818 = vst.msk [vmem:[%s27360_s25 + $0x28] sm:$0xff] %vm15812_vm13, %v21657_v9  ;;  %21676 = vrcp.f32 %v15724_v12  ;;  %v15639_v39 = vsub.f32 0.0, %v20799_v47 }
 0xc0f   : > { %v21661_v21 = vpop.eup %21660  ;;  %15817 = vst.msk [vmem:[%s27360_s25 + $0x20] sm:$0xff] %vm15812_vm13, %v21659_v1  ;;  %21678 = vrcp.f32 %v15727_v23  ;;  %v15638_v34 = vsub.f32 0.0, %v20800_v24  ;;  %v20225_v0 = vpop.f32.mrb[52].mxu0 }
 0xc10   : > { %v21663_v63 = vpop.eup %21662  ;;  %v15726_v51 = vadd.f32 1.0, %v21661_v21  ;;  %21680 = vpow2.f32 %v15686_v32  ;;  %v15690_v11 = vmul.f32 1.442695, %v15639_v39  ;;  %v20801_v48 = vadd.f32 %v20225_v0, %v27340_v62  ;;  %v15529_v41 = vpop.f32.mrb[53].mxu0 }
 0xc11   : > { %v21665_v6 = vpop.eup %21664  ;;  %v15729_v42 = vadd.f32 1.0, %v21663_v63  ;;  %21682 = vpow2.f32 %v15684_v4  ;;  %v20802_v35 = vadd.f32 %v27340_v62, %v15529_v41  ;;  %v15688_v37 = vmul.f32 1.442695, %v15638_v34 }
 0xc12   : > { %v21667_v40 = vpop.eup %21666  ;;  %15820 = vst.msk [vmem:[%s27360_s25 + $0x38] sm:$0xff] %vm15812_vm13, %v21665_v6  ;;  %21684 = vrcp.f32 %v15726_v51  ;;  %v15641_v27 = vsub.f32 0.0, %v20801_v48 }
 0xc13   : > { %21686 = vrcp.f32 %v15729_v42  ;;  %v15728_v54 = vadd.f32 1.0, %v21667_v40  ;;  %v15640_v33 = vsub.f32 0.0, %v20802_v35  ;;  %v20228_v30 = vpop.f32.mrb[54].mxu0 }
 0xc14   : > { %v21669_v46 = vpop.eup %21668  ;;  %21688 = vpow2.f32 %v15690_v11  ;;  %v15694_v55 = vmul.f32 1.442695, %v15641_v27  ;;  %v20803_v58 = vadd.f32 %v20228_v30, %v27340_v62  ;;  %v15539_v13 = vpop.f32.mrb[55].mxu0 }
 0xc15   : > { %v21671_v10 = vpop.eup %21670  ;;  %15819 = vst.msk [vmem:[%s27360_s25 + $0x30] sm:$0xff] %vm15812_vm13, %v21669_v46  ;;  %21690 = vrcp.f32 %v15728_v54  ;;  %v15692_v7 = vmul.f32 1.442695, %v15640_v33  ;;  %v20804_v26 = vadd.f32 %v27340_v62, %v15539_v13 }
 0xc16   : > { %v21673_v15 = vpop.eup %21672  ;;  %15822 = vst.msk [vmem:[%s27360_s25 + $0x48] sm:$0xff] %vm15812_vm13, %v21671_v10  ;;  %21692 = vpow2.f32 %v15688_v37  ;;  %v15643_v57 = vsub.f32 0.0, %v20803_v58 }
 0xc17   : > { %v21675_v61 = vpop.eup %21674  ;;  %v15731_v53 = vadd.f32 1.0, %v21673_v15  ;;  %21694 = vpow2.f32 %v15694_v55  ;;  %v15642_v8 = vsub.f32 0.0, %v20804_v26  ;;  %v20231_v2 = vpop.f32.mrb[56].mxu0 }
 0xc18   : > { %v21677_v25 = vpop.eup %21676  ;;  %v15730_v52 = vadd.f32 1.0, %v21675_v61  ;;  %21696 = vpow2.f32 %v15692_v7  ;;  %v15698_v20 = vmul.f32 1.442695, %v15643_v57  ;;  %v20805_v36 = vadd.f32 %v20231_v2, %v27340_v62  ;;  %v15549_v16 = vpop.f32.mrb[57].mxu0 }
 0xc19   : > { %v21679_v18 = vpop.eup %21678  ;;  %15821 = vst.msk [vmem:[%s27360_s25 + $0x40] sm:$0xff] %vm15812_vm13, %v21677_v25  ;;  %21698 = vrcp.f32 %v15731_v53  ;;  %v15696_v31 = vmul.f32 1.442695, %v15642_v8  ;;  %v20806_v5 = vadd.f32 %v27340_v62, %v15549_v16 }
 0xc1a   : > { %v21681_v45 = vpop.eup %21680  ;;  %15824 = vst.msk [vmem:[%s27360_s25 + $0x58] sm:$0xff] %vm15812_vm13, %v21679_v18  ;;  %21700 = vrcp.f32 %v15730_v52  ;;  %v15645_v60 = vsub.f32 0.0, %v20805_v36 }
 0xc1b   : > { %v21683_v43 = vpop.eup %21682  ;;  %v15733_v49 = vadd.f32 1.0, %v21681_v45  ;;  %21702 = vpow2.f32 %v15698_v20  ;;  %v15644_v56 = vsub.f32 0.0, %v20806_v5  ;;  %v20234_v22 = vpop.f32.mrb[58].mxu0 }
 0xc1c   : > { %v21685_v38 = vpop.eup %21684  ;;  %v15732_v50 = vadd.f32 1.0, %v21683_v43  ;;  %21704 = vpow2.f32 %v15696_v31  ;;  %v15702_v14 = vmul.f32 1.442695, %v15645_v60  ;;  %v20807_v44 = vadd.f32 %v20234_v22, %v27340_v62  ;;  %v15559_v28 = vpop.f32.mrb[59].mxu0 }
 0xc1d   : > { %v21687_v29 = vpop.eup %21686  ;;  %15823 = vst.msk [vmem:[%s27360_s25 + $0x50] sm:$0xff] %vm15812_vm13, %v21685_v38  ;;  %21706 = vrcp.f32 %v15733_v49  ;;  %v15700_v19 = vmul.f32 1.442695, %v15644_v56  ;;  %v20808_v3 = vadd.f32 %v27340_v62, %v15559_v28 }
 0xc1e   : > { %v21689_v59 = vpop.eup %21688  ;;  %15826 = vst.msk [vmem:[%s27360_s25 + $0x68] sm:$0xff] %vm15812_vm13, %v21687_v29  ;;  %21708 = vrcp.f32 %v15732_v50  ;;  %v15647_v12 = vsub.f32 0.0, %v20807_v44 }
 0xc1f   : > { %v21691_v32 = vpop.eup %21690  ;;  %v15735_v47 = vadd.f32 1.0, %v21689_v59  ;;  %21710 = vpow2.f32 %v15702_v14  ;;  %v15646_v17 = vsub.f32 0.0, %v20808_v3  ;;  %v20237_v9 = vpop.f32.mrb[60].mxu0 }
 0xc20   : > { %v21693_v23 = vpop.eup %21692  ;;  %15825 = vst.msk [vmem:[%s27360_s25 + $0x60] sm:$0xff] %vm15812_vm13, %v21691_v32  ;;  %21712 = vpow2.f32 %v15700_v19  ;;  %v15706_v4 = vmul.f32 1.442695, %v15647_v12  ;;  %v20809_v24 = vadd.f32 %v20237_v9, %v27340_v62  ;;  %v15569_v1 = vpop.f32.mrb[61].mxu0 }
 0xc21   : > { %v21695_v39 = vpop.eup %21694  ;;  %21714 = vrcp.f32 %v15735_v47  ;;  %v15734_v21 = vadd.f32 1.0, %v21693_v23  ;;  %v20810_v34 = vadd.f32 %v27340_v62, %v15569_v1  ;;  %v15704_v51 = vmul.f32 1.442695, %v15646_v17 }
 0xc22   : > { %v21697_v0 = vpop.eup %21696  ;;  %v15737_v63 = vadd.f32 1.0, %v21695_v39  ;;  %21716 = vpow2.f32 %v15706_v4  ;;  %v15649_v11 = vsub.f32 0.0, %v20809_v24 }
 0xc23   : > { %v21699_v48 = vpop.eup %21698  ;;  %21718 = vrcp.f32 %v15734_v21  ;;  %v15736_v41 = vadd.f32 1.0, %v21697_v0  ;;  %v15648_v6 = vsub.f32 0.0, %v20810_v34  ;;  %v20240_v42 = vpop.f32.mrb[62].mxu0 }
 0xc24   : > { %v21701_v35 = vpop.eup %21700  ;;  %15828 = vst.msk [vmem:[%s27360_s25 + $0x78] sm:$0xff] %vm15812_vm13, %v21699_v48  ;;  %21720 = vrcp.f32 %v15737_v63  ;;  %v15710_v40 = vmul.f32 1.442695, %v15649_v11  ;;  %v20811_v37 = vadd.f32 %v20240_v42, %v27340_v62  ;;  %v15579_v27 = vpop.f32.mrb[63].mxu0 }
 0xc25   : > { %v21703_v54 = vpop.eup %21702  ;;  %15827 = vst.msk [vmem:[%s27360_s25 + $0x70] sm:$0xff] %vm15812_vm13, %v21701_v35  ;;  %21722 = vrcp.f32 %v15736_v41  ;;  %v20812_v33 = vadd.f32 %v27340_v62, %v15579_v27  ;;  %v15708_v55 = vmul.f32 1.442695, %v15648_v6 }
 0xc26   : > { %v21705_v30 = vpop.eup %21704  ;;  %v15739_v46 = vadd.f32 1.0, %v21703_v54  ;;  %21724 = vpow2.f32 %v15704_v51  ;;  %v15651_v58 = vsub.f32 0.0, %v20811_v37 }
 0xc27   : > { %v21707_v13 = vpop.eup %21706  ;;  %v15738_v10 = vadd.f32 1.0, %v21705_v30  ;;  %21726 = vpow2.f32 %v15710_v40  ;;  %v15650_v7 = vsub.f32 0.0, %v20812_v33 }
 0xc28   : > { %v21709_v26 = vpop.eup %21708  ;;  %15830 = vst.msk [vmem:[%s27360_s25 + $0x88] sm:$0xff] %vm15812_vm13, %v21707_v13  ;;  %21728 = vrcp.f32 %v15739_v46  ;;  %v15714_v15 = vmul.f32 1.442695, %v15651_v58 }
 0xc29   : > { %v21711_v57 = vpop.eup %21710  ;;  %15829 = vst.msk [vmem:[%s27360_s25 + $0x80] sm:$0xff] %vm15812_vm13, %v21709_v26  ;;  %21730 = vrcp.f32 %v15738_v10  ;;  %v15712_v53 = vmul.f32 1.442695, %v15650_v7 }
 0xc2a   : > { %v21713_v62 = vpop.eup %21712  ;;  %v15741_v61 = vadd.f32 1.0, %v21711_v57  ;;  %21732 = vpow2.f32 %v15708_v55 }
 0xc2b   : > { %v21715_v8 = vpop.eup %21714  ;;  %v15740_v2 = vadd.f32 1.0, %v21713_v62  ;;  %21734 = vpow2.f32 %v15714_v15 }
 0xc2c   : > { %v21717_v25 = vpop.eup %21716  ;;  %15832 = vst.msk [vmem:[%s27360_s25 + $0x98] sm:$0xff] %vm15812_vm13, %v21715_v8  ;;  %21736 = vrcp.f32 %v15741_v61 }
 0xc2d   : > { %v21719_v52 = vpop.eup %21718  ;;  %21738 = vrcp.f32 %v15740_v2  ;;  %v15743_v20 = vadd.f32 1.0, %v21717_v25 }
 0xc2e   : > { %v21721_v36 = vpop.eup %21720  ;;  %15831 = vst.msk [vmem:[%s27360_s25 + $0x90] sm:$0xff] %vm15812_vm13, %v21719_v52  ;;  %21740 = vpow2.f32 %v15712_v53 }
 0xc2f   : > { %v21723_v16 = vpop.eup %21722  ;;  %15834 = vst.msk [vmem:[%s27360_s25 + $0xa8] sm:$0xff] %vm15812_vm13, %v21721_v36  ;;  %21742 = vrcp.f32 %v15743_v20 }
 0xc30   : > { %v21725_v18 = vpop.eup %21724  ;;  %15833 = vst.msk [vmem:[%s27360_s25 + $0xa0] sm:$0xff] %vm15812_vm13, %v21723_v16 }
 0xc31   : > { %v21727_v31 = vpop.eup %21726  ;;  %v15742_v5 = vadd.f32 1.0, %v21725_v18 }
 0xc32   : > { %v21729_v45 = vpop.eup %21728  ;;  %v15745_v60 = vadd.f32 1.0, %v21727_v31 }
 0xc33   : > { %v21731_v43 = vpop.eup %21730  ;;  %15836 = vst.msk [vmem:[%s27360_s25 + $0xb8] sm:$0xff] %vm15812_vm13, %v21729_v45  ;;  %21744 = vrcp.f32 %v15742_v5 }
 0xc34   : > { %v21733_v49 = vpop.eup %21732  ;;  %15835 = vst.msk [vmem:[%s27360_s25 + $0xb0] sm:$0xff] %vm15812_vm13, %v21731_v43  ;;  %21746 = vrcp.f32 %v15745_v60 }
 0xc35   : > { %v21735_v56 = vpop.eup %21734  ;;  %v15744_v22 = vadd.f32 1.0, %v21733_v49 }
 0xc36   : > { %v21737_v38 = vpop.eup %21736  ;;  %v15747_v50 = vadd.f32 1.0, %v21735_v56 }
 0xc37   : > { %v21739_v14 = vpop.eup %21738  ;;  %15838 = vst.msk [vmem:[%s27360_s25 + $0xc8] sm:$0xff] %vm15812_vm13, %v21737_v38  ;;  %21748 = vrcp.f32 %v15744_v22 }
 0xc38   : > { %v21741_v44 = vpop.eup %21740  ;;  %15837 = vst.msk [vmem:[%s27360_s25 + $0xc0] sm:$0xff] %vm15812_vm13, %v21739_v14  ;;  %21750 = vrcp.f32 %v15747_v50 }
 0xc39   : > { %v21743_v28 = vpop.eup %21742  ;;  %v15746_v29 = vadd.f32 1.0, %v21741_v44 }
 0xc3a   : > { %15840 = vst.msk [vmem:[%s27360_s25 + $0xd8] sm:$0xff] %vm15812_vm13, %v21743_v28 }
 0xc3b   : > { %21752 = vrcp.f32 %v15746_v29 }
 0xc3d   : > { %v21745_v19 = vpop.eup %21744 }
 0xc3e   : > { %v21747_v3 = vpop.eup %21746  ;;  %15839 = vst.msk [vmem:[%s27360_s25 + $0xd0] sm:$0xff] %vm15812_vm13, %v21745_v19 }
 0xc3f   : > { %15842 = vst.msk [vmem:[%s27360_s25 + $0xe8] sm:$0xff] %vm15812_vm13, %v21747_v3 }
 0xc41   : > { %v21749_v59 = vpop.eup %21748 }
 0xc42   : > { %v21751_v12 = vpop.eup %21750  ;;  %15841 = vst.msk [vmem:[%s27360_s25 + $0xe0] sm:$0xff] %vm15812_vm13, %v21749_v59 }
 0xc43   : > { %15844 = vst.msk [vmem:[%s27360_s25 + $0xf8] sm:$0xff] %vm15812_vm13, %v21751_v12 }
 0xc45   : > { %v21753_v32 = vpop.eup %21752 }
 0xc46   : > { %15843 = vst.msk [vmem:[%s27360_s25 + $0xf0] sm:$0xff] %vm15812_vm13, %v21753_v32 }
 0xc47 PF: > { %s23_s19 = sadd.s32 1, %s21786_s19  }
 0xc48   : > { %p20_p4 = scmp.ge.s32.totalorder %s23_s19, 4  }
 0xc4a   :  { %22 = sbr.rel (!%p20_p4) target bundleno = 3 (0x3), region = 145 }

</bundles_post_ra>
